<compile_context>
chip_gen: v7x
topology: tpu7x:2x2x1
jax: 0.10.0
libtpu: 0.0.40
codegen_flags: <defaults>
</compile_context>

<pallas_src>
import jax
import jax.numpy as jnp
from jax.experimental import pallas as pl
from jax.experimental.pallas import tpu as pltpu


# ----------------------------- host-side weight prep -----------------------------

def _conv_toeplitz(w, w_in, w_out):
    """Block-Toeplitz-over-width matrices for a 5x5 'valid' conv.

    w: (Cout, Cin, KH, KW) PyTorch layout.
    Returns T of shape (KH, w_in*Cin, w_out*Cout) with
        T[i, wj*Cin + ci, x*Cout + co] = w[co, ci, i, wj - x]  if 0 <= wj - x < KW
                                         else 0
    so that   conv_out_row(h)[x*Cout+co] = sum_i x_row(h+i) @ T[i].
    """
    cout, cin, kh, kw = w.shape
    wt = jnp.transpose(w, (2, 3, 1, 0))                       # (KH, KW, Cin, Cout)
    wj = jnp.arange(w_in)[:, None]
    xo = jnp.arange(w_out)[None, :]
    j = wj - xo                                                # (w_in, w_out)
    valid = ((j >= 0) & (j < kw)).astype(w.dtype)
    jc = jnp.clip(j, 0, kw - 1)
    gathered = wt[:, jc, :, :]                                 # (KH, w_in, w_out, Cin, Cout)
    gathered = gathered * valid[None, :, :, None, None]
    out = jnp.transpose(gathered, (0, 1, 3, 2, 4))             # (KH, wj, ci, x, co)
    return out.reshape(kh, w_in * cin, w_out * cout)


def _wpool_selectors(w_in, w_out, c):
    """Exact 0/1 lane selectors for stride-2 column pooling.

    sel[0][wi*c+ci, x*c+cj] = 1 iff wi == 2x   and ci == cj
    sel[1][wi*c+ci, x*c+cj] = 1 iff wi == 2x+1 and ci == cj
    """
    wi = jnp.arange(w_in)[:, None, None, None]
    ci = jnp.arange(c)[None, :, None, None]
    x = jnp.arange(w_out)[None, None, :, None]
    cj = jnp.arange(c)[None, None, None, :]
    even = ((wi == 2 * x) & (ci == cj)).astype(jnp.float32)
    odd = ((wi == 2 * x + 1) & (ci == cj)).astype(jnp.float32)
    shape = (w_in * c, w_out * c)
    return jnp.stack([even.reshape(shape), odd.reshape(shape)])


def _hpool_selectors(bt, h_in, h_out):
    """Exact 0/1 block-diagonal row selectors for stride-2 row pooling.

    sel[0][b*h_out+y, b*h_in+2y]   = 1
    sel[1][b*h_out+y, b*h_in+2y+1] = 1
    """
    r = jnp.arange(bt * h_out)
    col = jnp.arange(bt * h_in)
    rb, ry = r // h_out, r % h_out
    cb, ch = col // h_in, col % h_in
    same = rb[:, None] == cb[None, :]
    even = (same & (ch[None, :] == 2 * ry[:, None])).astype(jnp.float32)
    odd = (same & (ch[None, :] == 2 * ry[:, None] + 1)).astype(jnp.float32)
    return jnp.stack([even, odd])


# ------------------------------- fused kernel --------------------------------

def _lenet_kernel(x_ref,                       # (BT, 32, 96)   per-image rows, lanes = w*3+c
                  w1t_ref, b1_ref,             # (5, 96, 168) bf16, (1, 168) f32
                  s1_ref, c1sel_ref,           # (2, BT*14, BT*28), (2, 168, 84)  f32
                  w2t_ref, b2_ref,             # (5, 84, 160) bf16, (1, 160) f32
                  s2_ref, c2sel_ref,           # (2, BT*5, BT*10), (2, 160, 80)   f32
                  wf1_ref, bf1_ref,            # (400, 120) bf16, (1, 120) f32
                  wf2_ref, bf2_ref,            # (120, 84)  bf16, (1, 84)  f32
                  wf3_ref, bf3_ref,            # (84, n_class) bf16, (1, n_class) f32
                  out_ref,                     # (BT, n_class) f32
                  slab1_ref,                   # VMEM (BT*28, 96)  f32  shifted-row slab
                  acc1_ref,                    # VMEM (BT*28, 168) f32  conv1 accumulator
                  p1_ref,                      # VMEM (BT*14, 84)  f32  pooled-1 activation
                  slab2_ref,                   # VMEM (BT*10, 84)  f32  shifted-row slab
                  acc2_ref,                    # VMEM (BT*10, 160) f32  conv2 accumulator
                  feat_ref):                   # VMEM (BT, 400)    f32  flattened features
    f32 = jnp.float32
    bf16 = jnp.bfloat16
    bt = x_ref.shape[0]

    # ---- conv1: implicit GEMM over the 5 kernel-row offsets ------------------
    # acc1 rows are (image, conv-row) flattened: row b*28 + h; lanes = w*6 + cout.
    acc1_ref[...] = jnp.zeros(acc1_ref.shape, f32) + b1_ref[...]
    for i in range(5):
        for b in range(bt):
            # full-lane-width row-window copy (no lane shifts)
            slab1_ref[pl.ds(b * 28, 28), :] = x_ref[b, pl.ds(i, 28), :]
        acc1_ref[...] += jnp.dot(slab1_ref[...].astype(bf16), w1t_ref[i],
                                 preferred_element_type=f32)

    # ---- pool1 (2x2 max) + ReLU ----------------------------------------------
    hm = jnp.maximum(
        jnp.dot(s1_ref[0], acc1_ref[...], preferred_element_type=f32),
        jnp.dot(s1_ref[1], acc1_ref[...], preferred_element_type=f32))     # (BT*14, 168)
    p1 = jnp.maximum(
        jnp.dot(hm, c1sel_ref[0], preferred_element_type=f32),
        jnp.dot(hm, c1sel_ref[1], preferred_element_type=f32))             # (BT*14, 84)
    p1_ref[...] = jnp.maximum(p1, 0.0)

    # ---- conv2 ----------------------------------------------------------------
    acc2_ref[...] = jnp.zeros(acc2_ref.shape, f32) + b2_ref[...]
    for i in range(5):
        for b in range(bt):
            slab2_ref[pl.ds(b * 10, 10), :] = p1_ref[pl.ds(b * 14 + i, 10), :]
        acc2_ref[...] += jnp.dot(slab2_ref[...].astype(bf16), w2t_ref[i],
                                 preferred_element_type=f32)

    # ---- pool2 (2x2 max) + ReLU -----------------------------------------------
    hm2 = jnp.maximum(
        jnp.dot(s2_ref[0], acc2_ref[...], preferred_element_type=f32),
        jnp.dot(s2_ref[1], acc2_ref[...], preferred_element_type=f32))     # (BT*5, 160)
    p2 = jnp.maximum(
        jnp.dot(hm2, c2sel_ref[0], preferred_element_type=f32),
        jnp.dot(hm2, c2sel_ref[1], preferred_element_type=f32))            # (BT*5, 80)
    p2 = jnp.maximum(p2, 0.0)

    # ---- flatten to (BT, 400) in (row, col, channel) order --------------------
    # (fc1 weights are pre-permuted on the host to match this ordering)
    for b in range(bt):
        for y in range(5):
            feat_ref[pl.ds(b, 1), pl.ds(y * 80, 80)] = p2[b * 5 + y:b * 5 + y + 1, :]

    # ---- fc1 -> fc2 -> fc3 (bf16 operands, f32 accumulation) -------------------
    z = jnp.dot(feat_ref[...].astype(bf16), wf1_ref[...],
                preferred_element_type=f32) + bf1_ref[...]
    z = jnp.maximum(z, 0.0).astype(bf16)
    z = jnp.dot(z, wf2_ref[...], preferred_element_type=f32) + bf2_ref[...]
    z = jnp.maximum(z, 0.0).astype(bf16)
    z = jnp.dot(z, wf3_ref[...], preferred_element_type=f32) + bf3_ref[...]
    out_ref[...] = z


# --------------------------------- wrapper -----------------------------------

def lenet_forward(params, x_nchw, *, block_batch=8):
    """LeNet forward (PyTorch semantics) as one fused, batch-tiled Pallas kernel."""
    B, C, H, W = x_nchw.shape
    assert (C, H, W) == (3, 32, 32), "LeNet geometry requires (3, 32, 32) inputs"
    n_class = params["fc3_b"].shape[0]

    bt = min(block_batch, B)
    assert B % bt == 0 and (bt % 8 == 0 or bt == B), (
        "batch must be divisible by the batch tile, and the tile a multiple of 8")

    # NCHW -> NHWC -> merge (W, C) into lanes (index w*3 + c).
    x = jnp.transpose(x_nchw, (0, 2, 3, 1)).reshape(B, 32, 96).astype(jnp.float32)

    # Conv weights as block-Toeplitz-over-width matrices (bf16 MXU operands).
    w1t = _conv_toeplitz(params["conv1_w"], 32, 28).astype(jnp.bfloat16)   # (5, 96, 168)
    w2t = _conv_toeplitz(params["conv2_w"], 14, 10).astype(jnp.bfloat16)   # (5, 84, 160)
    b1 = jnp.tile(params["conv1_b"], 28).reshape(1, 168).astype(jnp.float32)
    b2 = jnp.tile(params["conv2_b"], 10).reshape(1, 160).astype(jnp.float32)

    # Exact 0/1 pooling selectors.
    s1 = _hpool_selectors(bt, 28, 14)       # (2, bt*14, bt*28)
    s2 = _hpool_selectors(bt, 10, 5)        # (2, bt*5,  bt*10)
    c1sel = _wpool_selectors(28, 14, 6)     # (2, 168, 84)
    c2sel = _wpool_selectors(10, 5, 16)     # (2, 160, 80)

    # fc weights are stored (in, out).  A real PyTorch checkpoint stores nn.Linear
    # weights as (out, in) -- transpose them before building `params`.
    # fc1 rows reordered from PyTorch's (c, y, x) flatten to the kernel's (y, x, c).
    wf1 = jnp.transpose(params["fc1_w"].reshape(16, 5, 5, 120),
                        (1, 2, 0, 3)).reshape(400, 120).astype(jnp.bfloat16)
    bf1 = params["fc1_b"].reshape(1, 120).astype(jnp.float32)
    wf2 = params["fc2_w"].astype(jnp.bfloat16)
    bf2 = params["fc2_b"].reshape(1, 84).astype(jnp.float32)
    wf3 = params["fc3_w"].astype(jnp.bfloat16)
    bf3 = params["fc3_b"].reshape(1, n_class).astype(jnp.float32)

    def const(n):
        return lambda g: (0,) * n

    out = pl.pallas_call(
        _lenet_kernel,
        out_shape=jax.ShapeDtypeStruct((B, n_class), jnp.float32),
        grid=(B // bt,),
        in_specs=[
            pl.BlockSpec((bt, 32, 96), lambda g: (g, 0, 0)),   # images (per batch tile)
            pl.BlockSpec(w1t.shape, const(3)),                 # conv1 Toeplitz weights
            pl.BlockSpec(b1.shape, const(2)),                  # conv1 bias (lane layout)
            pl.BlockSpec(s1.shape, const(3)),                  # pool1 row selectors
            pl.BlockSpec(c1sel.shape, const(3)),               # pool1 column selectors
            pl.BlockSpec(w2t.shape, const(3)),                 # conv2 Toeplitz weights
            pl.BlockSpec(b2.shape, const(2)),                  # conv2 bias
            pl.BlockSpec(s2.shape, const(3)),                  # pool2 row selectors
            pl.BlockSpec(c2sel.shape, const(3)),               # pool2 column selectors
            pl.BlockSpec(wf1.shape, const(2)),                 # fc1 w
            pl.BlockSpec(bf1.shape, const(2)),                 # fc1 b
            pl.BlockSpec(wf2.shape, const(2)),                 # fc2 w
            pl.BlockSpec(bf2.shape, const(2)),                 # fc2 b
            pl.BlockSpec(wf3.shape, const(2)),                 # fc3 w
            pl.BlockSpec(bf3.shape, const(2)),                 # fc3 b
        ],
        out_specs=pl.BlockSpec((bt, n_class), lambda g: (g, 0)),
        scratch_shapes=[
            pltpu.VMEM((bt * 28, 96), jnp.float32),    # conv1 shifted-row slab
            pltpu.VMEM((bt * 28, 168), jnp.float32),   # conv1 f32 accumulator
            pltpu.VMEM((bt * 14, 84), jnp.float32),    # pooled-1 activation
            pltpu.VMEM((bt * 10, 84), jnp.float32),    # conv2 shifted-row slab
            pltpu.VMEM((bt * 10, 160), jnp.float32),   # conv2 f32 accumulator
            pltpu.VMEM((bt, 400), jnp.float32),        # flattened fc1 features
        ],
        compiler_params=pltpu.CompilerParams(
            dimension_semantics=("parallel",)),        # shard batch tiles across TCs
    )(x, w1t, b1, s1, c1sel, w2t, b2, s2, c2sel, wf1, bf1, wf2, bf2, wf3, bf3)

    return out


# ------------------------------ pure-JAX reference ----------------------------

def lenet_reference(params, x):
    """f32 XLA reference with exactly the PyTorch module's semantics."""
    dn = ("NCHW", "OIHW", "NCHW")
    y = jax.lax.conv_general_dilated(x, params["conv1_w"], (1, 1), "VALID",
                                     dimension_numbers=dn)
    y = jax.nn.relu(y + params["conv1_b"][None, :, None, None])
    y = jax.lax.reduce_window(y, -jnp.inf, jax.lax.max,
                              (1, 1, 2, 2), (1, 1, 2, 2), "VALID")
    y = jax.lax.conv_general_dilated(y, params["conv2_w"], (1, 1), "VALID",
                                     dimension_numbers=dn)
    y = jax.nn.relu(y + params["conv2_b"][None, :, None, None])
    y = jax.lax.reduce_window(y, -jnp.inf, jax.lax.max,
                              (1, 1, 2, 2), (1, 1, 2, 2), "VALID")
    y = y.reshape(y.shape[0], -1)                      # PyTorch x.view(-1, 16*5*5)
    y = jax.nn.relu(y @ params["fc1_w"] + params["fc1_b"])
    y = jax.nn.relu(y @ params["fc2_w"] + params["fc2_b"])
    return y @ params["fc3_w"] + params["fc3_b"]


# ------------------------------ parameter setup ------------------------------

def init_params(key, n_class):
    """Deterministic synthetic params, PyTorch-default-style uniform(-1/sqrt(fan_in)).

    Conventions: conv weights (Cout, Cin, KH, KW); fc weights stored as (in, out)
    (a PyTorch nn.Linear checkpoint would need a transpose).
    """
    ks = jax.random.split(key, 10)

    def u(k, shape, fan_in):
        bound = 1.0 / (fan_in ** 0.5)
        return jax.random.uniform(k, shape, jnp.float32, -bound, bound)

    return {
        "conv1_w": u(ks[0], (6, 3, 5, 5), 3 * 5 * 5),
        "conv1_b": u(ks[1], (6,), 3 * 5 * 5),
        "conv2_w": u(ks[2], (16, 6, 5, 5), 6 * 5 * 5),
        "conv2_b": u(ks[3], (16,), 6 * 5 * 5),
        "fc1_w": u(ks[4], (400, 120), 400),
        "fc1_b": u(ks[5], (120,), 400),
        "fc2_w": u(ks[6], (120, 84), 120),
        "fc2_b": u(ks[7], (84,), 120),
        "fc3_w": u(ks[8], (84, n_class), 84),
        "fc3_b": u(ks[9], (n_class,), 84),
    }


if __name__ == "__main__":
    n_class = 4
    key = jax.random.PRNGKey(0)
    pkey, xkey = jax.random.split(key)
    params = init_params(pkey, n_class)
    # LeNet geometry requires 32x32 spatial input (NCHW, like PyTorch).
    # B=16 with the default batch tile of 8 -> 2 grid steps (one per v7x TensorCore).
    x = jax.random.normal(xkey, (16, 3, 32, 32), jnp.float32)

    out = jax.jit(lenet_forward)(params, x)
    out = jax.block_until_ready(out)
    assert out.shape == (16, n_class), out.shape
    assert out.dtype == jnp.float32

    # Cross-check against the f32 XLA reference (bf16 matmul operands => loose tol).
    ref = lenet_reference(params, x)
    assert bool(jnp.allclose(out, ref, rtol=7e-2, atol=7e-2)), (
        float(jnp.max(jnp.abs(out - ref))))
    print("KERNEL_OK")
</pallas_src>

<mosaic_0001>
module attributes {stable_mosaic.version = 11 : i64} {
  func.func @_lenet_kernel(%arg0: i32, %arg1: memref<8x32x96xf32, #tpu.memory_space<vmem>>, %arg2: memref<5x96x168xbf16, #tpu.memory_space<vmem>>, %arg3: memref<1x168xf32, #tpu.memory_space<vmem>>, %arg4: memref<2x112x224xf32, #tpu.memory_space<vmem>>, %arg5: memref<2x168x84xf32, #tpu.memory_space<vmem>>, %arg6: memref<5x84x160xbf16, #tpu.memory_space<vmem>>, %arg7: memref<1x160xf32, #tpu.memory_space<vmem>>, %arg8: memref<2x40x80xf32, #tpu.memory_space<vmem>>, %arg9: memref<2x160x80xf32, #tpu.memory_space<vmem>>, %arg10: memref<400x120xbf16, #tpu.memory_space<vmem>>, %arg11: memref<1x120xf32, #tpu.memory_space<vmem>>, %arg12: memref<120x84xbf16, #tpu.memory_space<vmem>>, %arg13: memref<1x84xf32, #tpu.memory_space<vmem>>, %arg14: memref<84x4xbf16, #tpu.memory_space<vmem>>, %arg15: memref<1x4xf32, #tpu.memory_space<vmem>>, %arg16: memref<8x4xf32, #tpu.memory_space<vmem>>, %arg17: memref<224x96xf32, #tpu.memory_space<vmem>>, %arg18: memref<224x168xf32, #tpu.memory_space<vmem>>, %arg19: memref<112x84xf32, #tpu.memory_space<vmem>>, %arg20: memref<80x84xf32, #tpu.memory_space<vmem>>, %arg21: memref<80x160xf32, #tpu.memory_space<vmem>>, %arg22: memref<8x400xf32, #tpu.memory_space<vmem>>) attributes {dimension_semantics = [#tpu.dimension_semantics<parallel>], iteration_bounds = array<i64: 2>, scalar_prefetch = 0 : i64, scratch_operands = 6 : i64, tpu.core_type = #tpu.core_type<tc>, window_params = [{transform_indices = @transform_0, window_bounds = array<i64: 8, 32, 96>}, {pipeline_mode = #tpu.pipeline_mode<synchronous>, transform_indices = @transform_1, window_bounds = array<i64: 5, 96, 168>}, {pipeline_mode = #tpu.pipeline_mode<synchronous>, transform_indices = @transform_2, window_bounds = array<i64: 1, 168>}, {pipeline_mode = #tpu.pipeline_mode<synchronous>, transform_indices = @transform_3, window_bounds = array<i64: 2, 112, 224>}, {pipeline_mode = #tpu.pipeline_mode<synchronous>, transform_indices = @transform_4, window_bounds = array<i64: 2, 168, 84>}, {pipeline_mode = #tpu.pipeline_mode<synchronous>, transform_indices = @transform_5, window_bounds = array<i64: 5, 84, 160>}, {pipeline_mode = #tpu.pipeline_mode<synchronous>, transform_indices = @transform_6, window_bounds = array<i64: 1, 160>}, {pipeline_mode = #tpu.pipeline_mode<synchronous>, transform_indices = @transform_7, window_bounds = array<i64: 2, 40, 80>}, {pipeline_mode = #tpu.pipeline_mode<synchronous>, transform_indices = @transform_8, window_bounds = array<i64: 2, 160, 80>}, {pipeline_mode = #tpu.pipeline_mode<synchronous>, transform_indices = @transform_9, window_bounds = array<i64: 400, 120>}, {pipeline_mode = #tpu.pipeline_mode<synchronous>, transform_indices = @transform_10, window_bounds = array<i64: 1, 120>}, {pipeline_mode = #tpu.pipeline_mode<synchronous>, transform_indices = @transform_11, window_bounds = array<i64: 120, 84>}, {pipeline_mode = #tpu.pipeline_mode<synchronous>, transform_indices = @transform_12, window_bounds = array<i64: 1, 84>}, {pipeline_mode = #tpu.pipeline_mode<synchronous>, transform_indices = @transform_13, window_bounds = array<i64: 84, 4>}, {pipeline_mode = #tpu.pipeline_mode<synchronous>, transform_indices = @transform_14, window_bounds = array<i64: 1, 4>}, {transform_indices = @transform_15, window_bounds = array<i64: 8, 4>}]} {
    %cst = arith.constant 0.000000e+00 : f32
    %0 = vector.broadcast %cst : f32 to vector<224x168xf32>
    %c0 = arith.constant 0 : index
    %c0_0 = arith.constant 0 : index
    %1 = vector.load %arg3[%c0, %c0_0] : memref<1x168xf32, #tpu.memory_space<vmem>>, vector<1x168xf32>
    %2 = vector.broadcast %1 : vector<1x168xf32> to vector<224x168xf32>
    %3 = arith.addf %0, %2 : vector<224x168xf32>
    %c0_1 = arith.constant 0 : index
    %c0_2 = arith.constant 0 : index
    %4 = vector.load %arg18[%c0_1, %c0_2] : memref<224x168xf32, #tpu.memory_space<vmem>>, vector<224x168xf32>
    tpu.vector_store %arg18[%c0_1, %c0_2], %3 {strides = array<i32>} : memref<224x168xf32, #tpu.memory_space<vmem>>, vector<224x168xf32>,
    %c0_3 = arith.constant 0 : index
    %c0_4 = arith.constant 0 : index
    %c0_5 = arith.constant 0 : index
    %5 = vector.load %arg1[%c0_3, %c0_4, %c0_5] : memref<8x32x96xf32, #tpu.memory_space<vmem>>, vector<1x28x96xf32>
    %6 = vector.shape_cast %5 : vector<1x28x96xf32> to vector<28x96xf32>
    %c0_6 = arith.constant 0 : index
    %c0_7 = arith.constant 0 : index
    %7 = vector.load %arg17[%c0_6, %c0_7] : memref<224x96xf32, #tpu.memory_space<vmem>>, vector<28x96xf32>
    tpu.vector_store %arg17[%c0_6, %c0_7], %6 {strides = array<i32>} : memref<224x96xf32, #tpu.memory_space<vmem>>, vector<28x96xf32>,
    %c1 = arith.constant 1 : index
    %c0_8 = arith.constant 0 : index
    %c0_9 = arith.constant 0 : index
    %8 = vector.load %arg1[%c1, %c0_8, %c0_9] : memref<8x32x96xf32, #tpu.memory_space<vmem>>, vector<1x28x96xf32>
    %9 = vector.shape_cast %8 : vector<1x28x96xf32> to vector<28x96xf32>
    %c28 = arith.constant 28 : index
    %c0_10 = arith.constant 0 : index
    %10 = vector.load %arg17[%c28, %c0_10] : memref<224x96xf32, #tpu.memory_space<vmem>>, vector<28x96xf32>
    tpu.vector_store %arg17[%c28, %c0_10], %9 {strides = array<i32>} : memref<224x96xf32, #tpu.memory_space<vmem>>, vector<28x96xf32>,
    %c2 = arith.constant 2 : index
    %c0_11 = arith.constant 0 : index
    %c0_12 = arith.constant 0 : index
    %11 = vector.load %arg1[%c2, %c0_11, %c0_12] : memref<8x32x96xf32, #tpu.memory_space<vmem>>, vector<1x28x96xf32>
    %12 = vector.shape_cast %11 : vector<1x28x96xf32> to vector<28x96xf32>
    %c56 = arith.constant 56 : index
    %c0_13 = arith.constant 0 : index
    %13 = vector.load %arg17[%c56, %c0_13] : memref<224x96xf32, #tpu.memory_space<vmem>>, vector<28x96xf32>
    tpu.vector_store %arg17[%c56, %c0_13], %12 {strides = array<i32>} : memref<224x96xf32, #tpu.memory_space<vmem>>, vector<28x96xf32>,
    %c3 = arith.constant 3 : index
    %c0_14 = arith.constant 0 : index
    %c0_15 = arith.constant 0 : index
    %14 = vector.load %arg1[%c3, %c0_14, %c0_15] : memref<8x32x96xf32, #tpu.memory_space<vmem>>, vector<1x28x96xf32>
    %15 = vector.shape_cast %14 : vector<1x28x96xf32> to vector<28x96xf32>
    %c84 = arith.constant 84 : index
    %c0_16 = arith.constant 0 : index
    %16 = vector.load %arg17[%c84, %c0_16] : memref<224x96xf32, #tpu.memory_space<vmem>>, vector<28x96xf32>
    tpu.vector_store %arg17[%c84, %c0_16], %15 {strides = array<i32>} : memref<224x96xf32, #tpu.memory_space<vmem>>, vector<28x96xf32>,
    %c4 = arith.constant 4 : index
    %c0_17 = arith.constant 0 : index
    %c0_18 = arith.constant 0 : index
    %17 = vector.load %arg1[%c4, %c0_17, %c0_18] : memref<8x32x96xf32, #tpu.memory_space<vmem>>, vector<1x28x96xf32>
    %18 = vector.shape_cast %17 : vector<1x28x96xf32> to vector<28x96xf32>
    %c112 = arith.constant 112 : index
    %c0_19 = arith.constant 0 : index
    %19 = vector.load %arg17[%c112, %c0_19] : memref<224x96xf32, #tpu.memory_space<vmem>>, vector<28x96xf32>
    tpu.vector_store %arg17[%c112, %c0_19], %18 {strides = array<i32>} : memref<224x96xf32, #tpu.memory_space<vmem>>, vector<28x96xf32>,
    %c5 = arith.constant 5 : index
    %c0_20 = arith.constant 0 : index
    %c0_21 = arith.constant 0 : index
    %20 = vector.load %arg1[%c5, %c0_20, %c0_21] : memref<8x32x96xf32, #tpu.memory_space<vmem>>, vector<1x28x96xf32>
    %21 = vector.shape_cast %20 : vector<1x28x96xf32> to vector<28x96xf32>
    %c140 = arith.constant 140 : index
    %c0_22 = arith.constant 0 : index
    %22 = vector.load %arg17[%c140, %c0_22] : memref<224x96xf32, #tpu.memory_space<vmem>>, vector<28x96xf32>
    tpu.vector_store %arg17[%c140, %c0_22], %21 {strides = array<i32>} : memref<224x96xf32, #tpu.memory_space<vmem>>, vector<28x96xf32>,
    %c6 = arith.constant 6 : index
    %c0_23 = arith.constant 0 : index
    %c0_24 = arith.constant 0 : index
    %23 = vector.load %arg1[%c6, %c0_23, %c0_24] : memref<8x32x96xf32, #tpu.memory_space<vmem>>, vector<1x28x96xf32>
    %24 = vector.shape_cast %23 : vector<1x28x96xf32> to vector<28x96xf32>
    %c168 = arith.constant 168 : index
    %c0_25 = arith.constant 0 : index
    %25 = vector.load %arg17[%c168, %c0_25] : memref<224x96xf32, #tpu.memory_space<vmem>>, vector<28x96xf32>
    tpu.vector_store %arg17[%c168, %c0_25], %24 {strides = array<i32>} : memref<224x96xf32, #tpu.memory_space<vmem>>, vector<28x96xf32>,
    %c7 = arith.constant 7 : index
    %c0_26 = arith.constant 0 : index
    %c0_27 = arith.constant 0 : index
    %26 = vector.load %arg1[%c7, %c0_26, %c0_27] : memref<8x32x96xf32, #tpu.memory_space<vmem>>, vector<1x28x96xf32>
    %27 = vector.shape_cast %26 : vector<1x28x96xf32> to vector<28x96xf32>
    %c196 = arith.constant 196 : index
    %c0_28 = arith.constant 0 : index
    %28 = vector.load %arg17[%c196, %c0_28] : memref<224x96xf32, #tpu.memory_space<vmem>>, vector<28x96xf32>
    tpu.vector_store %arg17[%c196, %c0_28], %27 {strides = array<i32>} : memref<224x96xf32, #tpu.memory_space<vmem>>, vector<28x96xf32>,
    %c0_29 = arith.constant 0 : index
    %c0_30 = arith.constant 0 : index
    %29 = vector.load %arg18[%c0_29, %c0_30] : memref<224x168xf32, #tpu.memory_space<vmem>>, vector<224x168xf32>
    %c0_31 = arith.constant 0 : index
    %c0_32 = arith.constant 0 : index
    %30 = vector.load %arg17[%c0_31, %c0_32] : memref<224x96xf32, #tpu.memory_space<vmem>>, vector<224x96xf32>
    %31 = arith.truncf %30 : vector<224x96xf32> to vector<224x96xbf16>
    %c0_33 = arith.constant 0 : index
    %c0_34 = arith.constant 0 : index
    %c0_35 = arith.constant 0 : index
    %32 = vector.load %arg2[%c0_33, %c0_34, %c0_35] : memref<5x96x168xbf16, #tpu.memory_space<vmem>>, vector<1x96x168xbf16>
    %33 = vector.shape_cast %32 : vector<1x96x168xbf16> to vector<96x168xbf16>
    %cst_36 = arith.constant dense<0.000000e+00> : vector<224x168xf32>
    %34 = tpu.matmul %31, %33, %cst_36 {dimension_numbers = #tpu.dot_dimension_numbers<[1], [0], [0], [1], [0, 0, 1, 1], [], []>} : vector<224x96xbf16>, vector<96x168xbf16>, vector<224x168xf32> -> vector<224x168xf32>
    %35 = arith.addf %29, %34 : vector<224x168xf32>
    %c0_37 = arith.constant 0 : index
    %c0_38 = arith.constant 0 : index
    %36 = vector.load %arg18[%c0_37, %c0_38] : memref<224x168xf32, #tpu.memory_space<vmem>>, vector<224x168xf32>
    tpu.vector_store %arg18[%c0_37, %c0_38], %35 {strides = array<i32>} : memref<224x168xf32, #tpu.memory_space<vmem>>, vector<224x168xf32>,
    %c0_39 = arith.constant 0 : index
    %c1_40 = arith.constant 1 : index
    %c0_41 = arith.constant 0 : index
    %37 = vector.load %arg1[%c0_39, %c1_40, %c0_41] : memref<8x32x96xf32, #tpu.memory_space<vmem>>, vector<1x28x96xf32>
    %38 = vector.shape_cast %37 : vector<1x28x96xf32> to vector<28x96xf32>
    %c0_42 = arith.constant 0 : index
    %c0_43 = arith.constant 0 : index
    %39 = vector.load %arg17[%c0_42, %c0_43] : memref<224x96xf32, #tpu.memory_space<vmem>>, vector<28x96xf32>
    tpu.vector_store %arg17[%c0_42, %c0_43], %38 {strides = array<i32>} : memref<224x96xf32, #tpu.memory_space<vmem>>, vector<28x96xf32>,
    %c1_44 = arith.constant 1 : index
    %c1_45 = arith.constant 1 : index
    %c0_46 = arith.constant 0 : index
    %40 = vector.load %arg1[%c1_44, %c1_45, %c0_46] : memref<8x32x96xf32, #tpu.memory_space<vmem>>, vector<1x28x96xf32>
    %41 = vector.shape_cast %40 : vector<1x28x96xf32> to vector<28x96xf32>
    %c28_47 = arith.constant 28 : index
    %c0_48 = arith.constant 0 : index
    %42 = vector.load %arg17[%c28_47, %c0_48] : memref<224x96xf32, #tpu.memory_space<vmem>>, vector<28x96xf32>
    tpu.vector_store %arg17[%c28_47, %c0_48], %41 {strides = array<i32>} : memref<224x96xf32, #tpu.memory_space<vmem>>, vector<28x96xf32>,
    %c2_49 = arith.constant 2 : index
    %c1_50 = arith.constant 1 : index
    %c0_51 = arith.constant 0 : index
    %43 = vector.load %arg1[%c2_49, %c1_50, %c0_51] : memref<8x32x96xf32, #tpu.memory_space<vmem>>, vector<1x28x96xf32>
    %44 = vector.shape_cast %43 : vector<1x28x96xf32> to vector<28x96xf32>
    %c56_52 = arith.constant 56 : index
    %c0_53 = arith.constant 0 : index
    %45 = vector.load %arg17[%c56_52, %c0_53] : memref<224x96xf32, #tpu.memory_space<vmem>>, vector<28x96xf32>
    tpu.vector_store %arg17[%c56_52, %c0_53], %44 {strides = array<i32>} : memref<224x96xf32, #tpu.memory_space<vmem>>, vector<28x96xf32>,
    %c3_54 = arith.constant 3 : index
    %c1_55 = arith.constant 1 : index
    %c0_56 = arith.constant 0 : index
    %46 = vector.load %arg1[%c3_54, %c1_55, %c0_56] : memref<8x32x96xf32, #tpu.memory_space<vmem>>, vector<1x28x96xf32>
    %47 = vector.shape_cast %46 : vector<1x28x96xf32> to vector<28x96xf32>
    %c84_57 = arith.constant 84 : index
    %c0_58 = arith.constant 0 : index
    %48 = vector.load %arg17[%c84_57, %c0_58] : memref<224x96xf32, #tpu.memory_space<vmem>>, vector<28x96xf32>
    tpu.vector_store %arg17[%c84_57, %c0_58], %47 {strides = array<i32>} : memref<224x96xf32, #tpu.memory_space<vmem>>, vector<28x96xf32>,
    %c4_59 = arith.constant 4 : index
    %c1_60 = arith.constant 1 : index
    %c0_61 = arith.constant 0 : index
    %49 = vector.load %arg1[%c4_59, %c1_60, %c0_61] : memref<8x32x96xf32, #tpu.memory_space<vmem>>, vector<1x28x96xf32>
    %50 = vector.shape_cast %49 : vector<1x28x96xf32> to vector<28x96xf32>
    %c112_62 = arith.constant 112 : index
    %c0_63 = arith.constant 0 : index
    %51 = vector.load %arg17[%c112_62, %c0_63] : memref<224x96xf32, #tpu.memory_space<vmem>>, vector<28x96xf32>
    tpu.vector_store %arg17[%c112_62, %c0_63], %50 {strides = array<i32>} : memref<224x96xf32, #tpu.memory_space<vmem>>, vector<28x96xf32>,
    %c5_64 = arith.constant 5 : index
    %c1_65 = arith.constant 1 : index
    %c0_66 = arith.constant 0 : index
    %52 = vector.load %arg1[%c5_64, %c1_65, %c0_66] : memref<8x32x96xf32, #tpu.memory_space<vmem>>, vector<1x28x96xf32>
    %53 = vector.shape_cast %52 : vector<1x28x96xf32> to vector<28x96xf32>
    %c140_67 = arith.constant 140 : index
    %c0_68 = arith.constant 0 : index
    %54 = vector.load %arg17[%c140_67, %c0_68] : memref<224x96xf32, #tpu.memory_space<vmem>>, vector<28x96xf32>
    tpu.vector_store %arg17[%c140_67, %c0_68], %53 {strides = array<i32>} : memref<224x96xf32, #tpu.memory_space<vmem>>, vector<28x96xf32>,
    %c6_69 = arith.constant 6 : index
    %c1_70 = arith.constant 1 : index
    %c0_71 = arith.constant 0 : index
    %55 = vector.load %arg1[%c6_69, %c1_70, %c0_71] : memref<8x32x96xf32, #tpu.memory_space<vmem>>, vector<1x28x96xf32>
    %56 = vector.shape_cast %55 : vector<1x28x96xf32> to vector<28x96xf32>
    %c168_72 = arith.constant 168 : index
    %c0_73 = arith.constant 0 : index
    %57 = vector.load %arg17[%c168_72, %c0_73] : memref<224x96xf32, #tpu.memory_space<vmem>>, vector<28x96xf32>
    tpu.vector_store %arg17[%c168_72, %c0_73], %56 {strides = array<i32>} : memref<224x96xf32, #tpu.memory_space<vmem>>, vector<28x96xf32>,
    %c7_74 = arith.constant 7 : index
    %c1_75 = arith.constant 1 : index
    %c0_76 = arith.constant 0 : index
    %58 = vector.load %arg1[%c7_74, %c1_75, %c0_76] : memref<8x32x96xf32, #tpu.memory_space<vmem>>, vector<1x28x96xf32>
    %59 = vector.shape_cast %58 : vector<1x28x96xf32> to vector<28x96xf32>
    %c196_77 = arith.constant 196 : index
    %c0_78 = arith.constant 0 : index
    %60 = vector.load %arg17[%c196_77, %c0_78] : memref<224x96xf32, #tpu.memory_space<vmem>>, vector<28x96xf32>
    tpu.vector_store %arg17[%c196_77, %c0_78], %59 {strides = array<i32>} : memref<224x96xf32, #tpu.memory_space<vmem>>, vector<28x96xf32>,
    %c0_79 = arith.constant 0 : index
    %c0_80 = arith.constant 0 : index
    %61 = vector.load %arg18[%c0_79, %c0_80] : memref<224x168xf32, #tpu.memory_space<vmem>>, vector<224x168xf32>
    %c0_81 = arith.constant 0 : index
    %c0_82 = arith.constant 0 : index
    %62 = vector.load %arg17[%c0_81, %c0_82] : memref<224x96xf32, #tpu.memory_space<vmem>>, vector<224x96xf32>
    %63 = arith.truncf %62 : vector<224x96xf32> to vector<224x96xbf16>
    %c1_83 = arith.constant 1 : index
    %c0_84 = arith.constant 0 : index
    %c0_85 = arith.constant 0 : index
    %64 = vector.load %arg2[%c1_83, %c0_84, %c0_85] : memref<5x96x168xbf16, #tpu.memory_space<vmem>>, vector<1x96x168xbf16>
    %65 = vector.shape_cast %64 : vector<1x96x168xbf16> to vector<96x168xbf16>
    %cst_86 = arith.constant dense<0.000000e+00> : vector<224x168xf32>
    %66 = tpu.matmul %63, %65, %cst_86 {dimension_numbers = #tpu.dot_dimension_numbers<[1], [0], [0], [1], [0, 0, 1, 1], [], []>} : vector<224x96xbf16>, vector<96x168xbf16>, vector<224x168xf32> -> vector<224x168xf32>
    %67 = arith.addf %61, %66 : vector<224x168xf32>
    %c0_87 = arith.constant 0 : index
    %c0_88 = arith.constant 0 : index
    %68 = vector.load %arg18[%c0_87, %c0_88] : memref<224x168xf32, #tpu.memory_space<vmem>>, vector<224x168xf32>
    tpu.vector_store %arg18[%c0_87, %c0_88], %67 {strides = array<i32>} : memref<224x168xf32, #tpu.memory_space<vmem>>, vector<224x168xf32>,
    %c0_89 = arith.constant 0 : index
    %c2_90 = arith.constant 2 : index
    %c0_91 = arith.constant 0 : index
    %69 = vector.load %arg1[%c0_89, %c2_90, %c0_91] : memref<8x32x96xf32, #tpu.memory_space<vmem>>, vector<1x28x96xf32>
    %70 = vector.shape_cast %69 : vector<1x28x96xf32> to vector<28x96xf32>
    %c0_92 = arith.constant 0 : index
    %c0_93 = arith.constant 0 : index
    %71 = vector.load %arg17[%c0_92, %c0_93] : memref<224x96xf32, #tpu.memory_space<vmem>>, vector<28x96xf32>
    tpu.vector_store %arg17[%c0_92, %c0_93], %70 {strides = array<i32>} : memref<224x96xf32, #tpu.memory_space<vmem>>, vector<28x96xf32>,
    %c1_94 = arith.constant 1 : index
    %c2_95 = arith.constant 2 : index
    %c0_96 = arith.constant 0 : index
    %72 = vector.load %arg1[%c1_94, %c2_95, %c0_96] : memref<8x32x96xf32, #tpu.memory_space<vmem>>, vector<1x28x96xf32>
    %73 = vector.shape_cast %72 : vector<1x28x96xf32> to vector<28x96xf32>
    %c28_97 = arith.constant 28 : index
    %c0_98 = arith.constant 0 : index
    %74 = vector.load %arg17[%c28_97, %c0_98] : memref<224x96xf32, #tpu.memory_space<vmem>>, vector<28x96xf32>
    tpu.vector_store %arg17[%c28_97, %c0_98], %73 {strides = array<i32>} : memref<224x96xf32, #tpu.memory_space<vmem>>, vector<28x96xf32>,
    %c2_99 = arith.constant 2 : index
    %c2_100 = arith.constant 2 : index
    %c0_101 = arith.constant 0 : index
    %75 = vector.load %arg1[%c2_99, %c2_100, %c0_101] : memref<8x32x96xf32, #tpu.memory_space<vmem>>, vector<1x28x96xf32>
    %76 = vector.shape_cast %75 : vector<1x28x96xf32> to vector<28x96xf32>
    %c56_102 = arith.constant 56 : index
    %c0_103 = arith.constant 0 : index
    %77 = vector.load %arg17[%c56_102, %c0_103] : memref<224x96xf32, #tpu.memory_space<vmem>>, vector<28x96xf32>
    tpu.vector_store %arg17[%c56_102, %c0_103], %76 {strides = array<i32>} : memref<224x96xf32, #tpu.memory_space<vmem>>, vector<28x96xf32>,
    %c3_104 = arith.constant 3 : index
    %c2_105 = arith.constant 2 : index
    %c0_106 = arith.constant 0 : index
    %78 = vector.load %arg1[%c3_104, %c2_105, %c0_106] : memref<8x32x96xf32, #tpu.memory_space<vmem>>, vector<1x28x96xf32>
    %79 = vector.shape_cast %78 : vector<1x28x96xf32> to vector<28x96xf32>
    %c84_107 = arith.constant 84 : index
    %c0_108 = arith.constant 0 : index
    %80 = vector.load %arg17[%c84_107, %c0_108] : memref<224x96xf32, #tpu.memory_space<vmem>>, vector<28x96xf32>
    tpu.vector_store %arg17[%c84_107, %c0_108], %79 {strides = array<i32>} : memref<224x96xf32, #tpu.memory_space<vmem>>, vector<28x96xf32>,
    %c4_109 = arith.constant 4 : index
    %c2_110 = arith.constant 2 : index
    %c0_111 = arith.constant 0 : index
    %81 = vector.load %arg1[%c4_109, %c2_110, %c0_111] : memref<8x32x96xf32, #tpu.memory_space<vmem>>, vector<1x28x96xf32>
    %82 = vector.shape_cast %81 : vector<1x28x96xf32> to vector<28x96xf32>
    %c112_112 = arith.constant 112 : index
    %c0_113 = arith.constant 0 : index
    %83 = vector.load %arg17[%c112_112, %c0_113] : memref<224x96xf32, #tpu.memory_space<vmem>>, vector<28x96xf32>
    tpu.vector_store %arg17[%c112_112, %c0_113], %82 {strides = array<i32>} : memref<224x96xf32, #tpu.memory_space<vmem>>, vector<28x96xf32>,
    %c5_114 = arith.constant 5 : index
    %c2_115 = arith.constant 2 : index
    %c0_116 = arith.constant 0 : index
    %84 = vector.load %arg1[%c5_114, %c2_115, %c0_116] : memref<8x32x96xf32, #tpu.memory_space<vmem>>, vector<1x28x96xf32>
    %85 = vector.shape_cast %84 : vector<1x28x96xf32> to vector<28x96xf32>
    %c140_117 = arith.constant 140 : index
    %c0_118 = arith.constant 0 : index
    %86 = vector.load %arg17[%c140_117, %c0_118] : memref<224x96xf32, #tpu.memory_space<vmem>>, vector<28x96xf32>
    tpu.vector_store %arg17[%c140_117, %c0_118], %85 {strides = array<i32>} : memref<224x96xf32, #tpu.memory_space<vmem>>, vector<28x96xf32>,
    %c6_119 = arith.constant 6 : index
    %c2_120 = arith.constant 2 : index
    %c0_121 = arith.constant 0 : index
    %87 = vector.load %arg1[%c6_119, %c2_120, %c0_121] : memref<8x32x96xf32, #tpu.memory_space<vmem>>, vector<1x28x96xf32>
    %88 = vector.shape_cast %87 : vector<1x28x96xf32> to vector<28x96xf32>
    %c168_122 = arith.constant 168 : index
    %c0_123 = arith.constant 0 : index
    %89 = vector.load %arg17[%c168_122, %c0_123] : memref<224x96xf32, #tpu.memory_space<vmem>>, vector<28x96xf32>
    tpu.vector_store %arg17[%c168_122, %c0_123], %88 {strides = array<i32>} : memref<224x96xf32, #tpu.memory_space<vmem>>, vector<28x96xf32>,
    %c7_124 = arith.constant 7 : index
    %c2_125 = arith.constant 2 : index
    %c0_126 = arith.constant 0 : index
    %90 = vector.load %arg1[%c7_124, %c2_125, %c0_126] : memref<8x32x96xf32, #tpu.memory_space<vmem>>, vector<1x28x96xf32>
    %91 = vector.shape_cast %90 : vector<1x28x96xf32> to vector<28x96xf32>
    %c196_127 = arith.constant 196 : index
    %c0_128 = arith.constant 0 : index
    %92 = vector.load %arg17[%c196_127, %c0_128] : memref<224x96xf32, #tpu.memory_space<vmem>>, vector<28x96xf32>
    tpu.vector_store %arg17[%c196_127, %c0_128], %91 {strides = array<i32>} : memref<224x96xf32, #tpu.memory_space<vmem>>, vector<28x96xf32>,
    %c0_129 = arith.constant 0 : index
    %c0_130 = arith.constant 0 : index
    %93 = vector.load %arg18[%c0_129, %c0_130] : memref<224x168xf32, #tpu.memory_space<vmem>>, vector<224x168xf32>
    %c0_131 = arith.constant 0 : index
    %c0_132 = arith.constant 0 : index
    %94 = vector.load %arg17[%c0_131, %c0_132] : memref<224x96xf32, #tpu.memory_space<vmem>>, vector<224x96xf32>
    %95 = arith.truncf %94 : vector<224x96xf32> to vector<224x96xbf16>
    %c2_133 = arith.constant 2 : index
    %c0_134 = arith.constant 0 : index
    %c0_135 = arith.constant 0 : index
    %96 = vector.load %arg2[%c2_133, %c0_134, %c0_135] : memref<5x96x168xbf16, #tpu.memory_space<vmem>>, vector<1x96x168xbf16>
    %97 = vector.shape_cast %96 : vector<1x96x168xbf16> to vector<96x168xbf16>
    %cst_136 = arith.constant dense<0.000000e+00> : vector<224x168xf32>
    %98 = tpu.matmul %95, %97, %cst_136 {dimension_numbers = #tpu.dot_dimension_numbers<[1], [0], [0], [1], [0, 0, 1, 1], [], []>} : vector<224x96xbf16>, vector<96x168xbf16>, vector<224x168xf32> -> vector<224x168xf32>
    %99 = arith.addf %93, %98 : vector<224x168xf32>
    %c0_137 = arith.constant 0 : index
    %c0_138 = arith.constant 0 : index
    %100 = vector.load %arg18[%c0_137, %c0_138] : memref<224x168xf32, #tpu.memory_space<vmem>>, vector<224x168xf32>
    tpu.vector_store %arg18[%c0_137, %c0_138], %99 {strides = array<i32>} : memref<224x168xf32, #tpu.memory_space<vmem>>, vector<224x168xf32>,
    %c0_139 = arith.constant 0 : index
    %c3_140 = arith.constant 3 : index
    %c0_141 = arith.constant 0 : index
    %101 = vector.load %arg1[%c0_139, %c3_140, %c0_141] : memref<8x32x96xf32, #tpu.memory_space<vmem>>, vector<1x28x96xf32>
    %102 = vector.shape_cast %101 : vector<1x28x96xf32> to vector<28x96xf32>
    %c0_142 = arith.constant 0 : index
    %c0_143 = arith.constant 0 : index
    %103 = vector.load %arg17[%c0_142, %c0_143] : memref<224x96xf32, #tpu.memory_space<vmem>>, vector<28x96xf32>
    tpu.vector_store %arg17[%c0_142, %c0_143], %102 {strides = array<i32>} : memref<224x96xf32, #tpu.memory_space<vmem>>, vector<28x96xf32>,
    %c1_144 = arith.constant 1 : index
    %c3_145 = arith.constant 3 : index
    %c0_146 = arith.constant 0 : index
    %104 = vector.load %arg1[%c1_144, %c3_145, %c0_146] : memref<8x32x96xf32, #tpu.memory_space<vmem>>, vector<1x28x96xf32>
    %105 = vector.shape_cast %104 : vector<1x28x96xf32> to vector<28x96xf32>
    %c28_147 = arith.constant 28 : index
    %c0_148 = arith.constant 0 : index
    %106 = vector.load %arg17[%c28_147, %c0_148] : memref<224x96xf32, #tpu.memory_space<vmem>>, vector<28x96xf32>
    tpu.vector_store %arg17[%c28_147, %c0_148], %105 {strides = array<i32>} : memref<224x96xf32, #tpu.memory_space<vmem>>, vector<28x96xf32>,
    %c2_149 = arith.constant 2 : index
    %c3_150 = arith.constant 3 : index
    %c0_151 = arith.constant 0 : index
    %107 = vector.load %arg1[%c2_149, %c3_150, %c0_151] : memref<8x32x96xf32, #tpu.memory_space<vmem>>, vector<1x28x96xf32>
    %108 = vector.shape_cast %107 : vector<1x28x96xf32> to vector<28x96xf32>
    %c56_152 = arith.constant 56 : index
    %c0_153 = arith.constant 0 : index
    %109 = vector.load %arg17[%c56_152, %c0_153] : memref<224x96xf32, #tpu.memory_space<vmem>>, vector<28x96xf32>
    tpu.vector_store %arg17[%c56_152, %c0_153], %108 {strides = array<i32>} : memref<224x96xf32, #tpu.memory_space<vmem>>, vector<28x96xf32>,
    %c3_154 = arith.constant 3 : index
    %c3_155 = arith.constant 3 : index
    %c0_156 = arith.constant 0 : index
    %110 = vector.load %arg1[%c3_154, %c3_155, %c0_156] : memref<8x32x96xf32, #tpu.memory_space<vmem>>, vector<1x28x96xf32>
    %111 = vector.shape_cast %110 : vector<1x28x96xf32> to vector<28x96xf32>
    %c84_157 = arith.constant 84 : index
    %c0_158 = arith.constant 0 : index
    %112 = vector.load %arg17[%c84_157, %c0_158] : memref<224x96xf32, #tpu.memory_space<vmem>>, vector<28x96xf32>
    tpu.vector_store %arg17[%c84_157, %c0_158], %111 {strides = array<i32>} : memref<224x96xf32, #tpu.memory_space<vmem>>, vector<28x96xf32>,
    %c4_159 = arith.constant 4 : index
    %c3_160 = arith.constant 3 : index
    %c0_161 = arith.constant 0 : index
    %113 = vector.load %arg1[%c4_159, %c3_160, %c0_161] : memref<8x32x96xf32, #tpu.memory_space<vmem>>, vector<1x28x96xf32>
    %114 = vector.shape_cast %113 : vector<1x28x96xf32> to vector<28x96xf32>
    %c112_162 = arith.constant 112 : index
    %c0_163 = arith.constant 0 : index
    %115 = vector.load %arg17[%c112_162, %c0_163] : memref<224x96xf32, #tpu.memory_space<vmem>>, vector<28x96xf32>
    tpu.vector_store %arg17[%c112_162, %c0_163], %114 {strides = array<i32>} : memref<224x96xf32, #tpu.memory_space<vmem>>, vector<28x96xf32>,
    %c5_164 = arith.constant 5 : index
    %c3_165 = arith.constant 3 : index
    %c0_166 = arith.constant 0 : index
    %116 = vector.load %arg1[%c5_164, %c3_165, %c0_166] : memref<8x32x96xf32, #tpu.memory_space<vmem>>, vector<1x28x96xf32>
    %117 = vector.shape_cast %116 : vector<1x28x96xf32> to vector<28x96xf32>
    %c140_167 = arith.constant 140 : index
    %c0_168 = arith.constant 0 : index
    %118 = vector.load %arg17[%c140_167, %c0_168] : memref<224x96xf32, #tpu.memory_space<vmem>>, vector<28x96xf32>
    tpu.vector_store %arg17[%c140_167, %c0_168], %117 {strides = array<i32>} : memref<224x96xf32, #tpu.memory_space<vmem>>, vector<28x96xf32>,
    %c6_169 = arith.constant 6 : index
    %c3_170 = arith.constant 3 : index
    %c0_171 = arith.constant 0 : index
    %119 = vector.load %arg1[%c6_169, %c3_170, %c0_171] : memref<8x32x96xf32, #tpu.memory_space<vmem>>, vector<1x28x96xf32>
    %120 = vector.shape_cast %119 : vector<1x28x96xf32> to vector<28x96xf32>
    %c168_172 = arith.constant 168 : index
    %c0_173 = arith.constant 0 : index
    %121 = vector.load %arg17[%c168_172, %c0_173] : memref<224x96xf32, #tpu.memory_space<vmem>>, vector<28x96xf32>
    tpu.vector_store %arg17[%c168_172, %c0_173], %120 {strides = array<i32>} : memref<224x96xf32, #tpu.memory_space<vmem>>, vector<28x96xf32>,
    %c7_174 = arith.constant 7 : index
    %c3_175 = arith.constant 3 : index
    %c0_176 = arith.constant 0 : index
    %122 = vector.load %arg1[%c7_174, %c3_175, %c0_176] : memref<8x32x96xf32, #tpu.memory_space<vmem>>, vector<1x28x96xf32>
    %123 = vector.shape_cast %122 : vector<1x28x96xf32> to vector<28x96xf32>
    %c196_177 = arith.constant 196 : index
    %c0_178 = arith.constant 0 : index
    %124 = vector.load %arg17[%c196_177, %c0_178] : memref<224x96xf32, #tpu.memory_space<vmem>>, vector<28x96xf32>
    tpu.vector_store %arg17[%c196_177, %c0_178], %123 {strides = array<i32>} : memref<224x96xf32, #tpu.memory_space<vmem>>, vector<28x96xf32>,
    %c0_179 = arith.constant 0 : index
    %c0_180 = arith.constant 0 : index
    %125 = vector.load %arg18[%c0_179, %c0_180] : memref<224x168xf32, #tpu.memory_space<vmem>>, vector<224x168xf32>
    %c0_181 = arith.constant 0 : index
    %c0_182 = arith.constant 0 : index
    %126 = vector.load %arg17[%c0_181, %c0_182] : memref<224x96xf32, #tpu.memory_space<vmem>>, vector<224x96xf32>
    %127 = arith.truncf %126 : vector<224x96xf32> to vector<224x96xbf16>
    %c3_183 = arith.constant 3 : index
    %c0_184 = arith.constant 0 : index
    %c0_185 = arith.constant 0 : index
    %128 = vector.load %arg2[%c3_183, %c0_184, %c0_185] : memref<5x96x168xbf16, #tpu.memory_space<vmem>>, vector<1x96x168xbf16>
    %129 = vector.shape_cast %128 : vector<1x96x168xbf16> to vector<96x168xbf16>
    %cst_186 = arith.constant dense<0.000000e+00> : vector<224x168xf32>
    %130 = tpu.matmul %127, %129, %cst_186 {dimension_numbers = #tpu.dot_dimension_numbers<[1], [0], [0], [1], [0, 0, 1, 1], [], []>} : vector<224x96xbf16>, vector<96x168xbf16>, vector<224x168xf32> -> vector<224x168xf32>
    %131 = arith.addf %125, %130 : vector<224x168xf32>
    %c0_187 = arith.constant 0 : index
    %c0_188 = arith.constant 0 : index
    %132 = vector.load %arg18[%c0_187, %c0_188] : memref<224x168xf32, #tpu.memory_space<vmem>>, vector<224x168xf32>
    tpu.vector_store %arg18[%c0_187, %c0_188], %131 {strides = array<i32>} : memref<224x168xf32, #tpu.memory_space<vmem>>, vector<224x168xf32>,
    %c0_189 = arith.constant 0 : index
    %c4_190 = arith.constant 4 : index
    %c0_191 = arith.constant 0 : index
    %133 = vector.load %arg1[%c0_189, %c4_190, %c0_191] : memref<8x32x96xf32, #tpu.memory_space<vmem>>, vector<1x28x96xf32>
    %134 = vector.shape_cast %133 : vector<1x28x96xf32> to vector<28x96xf32>
    %c0_192 = arith.constant 0 : index
    %c0_193 = arith.constant 0 : index
    %135 = vector.load %arg17[%c0_192, %c0_193] : memref<224x96xf32, #tpu.memory_space<vmem>>, vector<28x96xf32>
    tpu.vector_store %arg17[%c0_192, %c0_193], %134 {strides = array<i32>} : memref<224x96xf32, #tpu.memory_space<vmem>>, vector<28x96xf32>,
    %c1_194 = arith.constant 1 : index
    %c4_195 = arith.constant 4 : index
    %c0_196 = arith.constant 0 : index
    %136 = vector.load %arg1[%c1_194, %c4_195, %c0_196] : memref<8x32x96xf32, #tpu.memory_space<vmem>>, vector<1x28x96xf32>
    %137 = vector.shape_cast %136 : vector<1x28x96xf32> to vector<28x96xf32>
    %c28_197 = arith.constant 28 : index
    %c0_198 = arith.constant 0 : index
    %138 = vector.load %arg17[%c28_197, %c0_198] : memref<224x96xf32, #tpu.memory_space<vmem>>, vector<28x96xf32>
    tpu.vector_store %arg17[%c28_197, %c0_198], %137 {strides = array<i32>} : memref<224x96xf32, #tpu.memory_space<vmem>>, vector<28x96xf32>,
    %c2_199 = arith.constant 2 : index
    %c4_200 = arith.constant 4 : index
    %c0_201 = arith.constant 0 : index
    %139 = vector.load %arg1[%c2_199, %c4_200, %c0_201] : memref<8x32x96xf32, #tpu.memory_space<vmem>>, vector<1x28x96xf32>
    %140 = vector.shape_cast %139 : vector<1x28x96xf32> to vector<28x96xf32>
    %c56_202 = arith.constant 56 : index
    %c0_203 = arith.constant 0 : index
    %141 = vector.load %arg17[%c56_202, %c0_203] : memref<224x96xf32, #tpu.memory_space<vmem>>, vector<28x96xf32>
    tpu.vector_store %arg17[%c56_202, %c0_203], %140 {strides = array<i32>} : memref<224x96xf32, #tpu.memory_space<vmem>>, vector<28x96xf32>,
    %c3_204 = arith.constant 3 : index
    %c4_205 = arith.constant 4 : index
    %c0_206 = arith.constant 0 : index
    %142 = vector.load %arg1[%c3_204, %c4_205, %c0_206] : memref<8x32x96xf32, #tpu.memory_space<vmem>>, vector<1x28x96xf32>
    %143 = vector.shape_cast %142 : vector<1x28x96xf32> to vector<28x96xf32>
    %c84_207 = arith.constant 84 : index
    %c0_208 = arith.constant 0 : index
    %144 = vector.load %arg17[%c84_207, %c0_208] : memref<224x96xf32, #tpu.memory_space<vmem>>, vector<28x96xf32>
    tpu.vector_store %arg17[%c84_207, %c0_208], %143 {strides = array<i32>} : memref<224x96xf32, #tpu.memory_space<vmem>>, vector<28x96xf32>,
    %c4_209 = arith.constant 4 : index
    %c4_210 = arith.constant 4 : index
    %c0_211 = arith.constant 0 : index
    %145 = vector.load %arg1[%c4_209, %c4_210, %c0_211] : memref<8x32x96xf32, #tpu.memory_space<vmem>>, vector<1x28x96xf32>
    %146 = vector.shape_cast %145 : vector<1x28x96xf32> to vector<28x96xf32>
    %c112_212 = arith.constant 112 : index
    %c0_213 = arith.constant 0 : index
    %147 = vector.load %arg17[%c112_212, %c0_213] : memref<224x96xf32, #tpu.memory_space<vmem>>, vector<28x96xf32>
    tpu.vector_store %arg17[%c112_212, %c0_213], %146 {strides = array<i32>} : memref<224x96xf32, #tpu.memory_space<vmem>>, vector<28x96xf32>,
    %c5_214 = arith.constant 5 : index
    %c4_215 = arith.constant 4 : index
    %c0_216 = arith.constant 0 : index
    %148 = vector.load %arg1[%c5_214, %c4_215, %c0_216] : memref<8x32x96xf32, #tpu.memory_space<vmem>>, vector<1x28x96xf32>
    %149 = vector.shape_cast %148 : vector<1x28x96xf32> to vector<28x96xf32>
    %c140_217 = arith.constant 140 : index
    %c0_218 = arith.constant 0 : index
    %150 = vector.load %arg17[%c140_217, %c0_218] : memref<224x96xf32, #tpu.memory_space<vmem>>, vector<28x96xf32>
    tpu.vector_store %arg17[%c140_217, %c0_218], %149 {strides = array<i32>} : memref<224x96xf32, #tpu.memory_space<vmem>>, vector<28x96xf32>,
    %c6_219 = arith.constant 6 : index
    %c4_220 = arith.constant 4 : index
    %c0_221 = arith.constant 0 : index
    %151 = vector.load %arg1[%c6_219, %c4_220, %c0_221] : memref<8x32x96xf32, #tpu.memory_space<vmem>>, vector<1x28x96xf32>
    %152 = vector.shape_cast %151 : vector<1x28x96xf32> to vector<28x96xf32>
    %c168_222 = arith.constant 168 : index
    %c0_223 = arith.constant 0 : index
    %153 = vector.load %arg17[%c168_222, %c0_223] : memref<224x96xf32, #tpu.memory_space<vmem>>, vector<28x96xf32>
    tpu.vector_store %arg17[%c168_222, %c0_223], %152 {strides = array<i32>} : memref<224x96xf32, #tpu.memory_space<vmem>>, vector<28x96xf32>,
    %c7_224 = arith.constant 7 : index
    %c4_225 = arith.constant 4 : index
    %c0_226 = arith.constant 0 : index
    %154 = vector.load %arg1[%c7_224, %c4_225, %c0_226] : memref<8x32x96xf32, #tpu.memory_space<vmem>>, vector<1x28x96xf32>
    %155 = vector.shape_cast %154 : vector<1x28x96xf32> to vector<28x96xf32>
    %c196_227 = arith.constant 196 : index
    %c0_228 = arith.constant 0 : index
    %156 = vector.load %arg17[%c196_227, %c0_228] : memref<224x96xf32, #tpu.memory_space<vmem>>, vector<28x96xf32>
    tpu.vector_store %arg17[%c196_227, %c0_228], %155 {strides = array<i32>} : memref<224x96xf32, #tpu.memory_space<vmem>>, vector<28x96xf32>,
    %c0_229 = arith.constant 0 : index
    %c0_230 = arith.constant 0 : index
    %157 = vector.load %arg18[%c0_229, %c0_230] : memref<224x168xf32, #tpu.memory_space<vmem>>, vector<224x168xf32>
    %c0_231 = arith.constant 0 : index
    %c0_232 = arith.constant 0 : index
    %158 = vector.load %arg17[%c0_231, %c0_232] : memref<224x96xf32, #tpu.memory_space<vmem>>, vector<224x96xf32>
    %159 = arith.truncf %158 : vector<224x96xf32> to vector<224x96xbf16>
    %c4_233 = arith.constant 4 : index
    %c0_234 = arith.constant 0 : index
    %c0_235 = arith.constant 0 : index
    %160 = vector.load %arg2[%c4_233, %c0_234, %c0_235] : memref<5x96x168xbf16, #tpu.memory_space<vmem>>, vector<1x96x168xbf16>
    %161 = vector.shape_cast %160 : vector<1x96x168xbf16> to vector<96x168xbf16>
    %cst_236 = arith.constant dense<0.000000e+00> : vector<224x168xf32>
    %162 = tpu.matmul %159, %161, %cst_236 {dimension_numbers = #tpu.dot_dimension_numbers<[1], [0], [0], [1], [0, 0, 1, 1], [], []>} : vector<224x96xbf16>, vector<96x168xbf16>, vector<224x168xf32> -> vector<224x168xf32>
    %163 = arith.addf %157, %162 : vector<224x168xf32>
    %c0_237 = arith.constant 0 : index
    %c0_238 = arith.constant 0 : index
    %164 = vector.load %arg18[%c0_237, %c0_238] : memref<224x168xf32, #tpu.memory_space<vmem>>, vector<224x168xf32>
    tpu.vector_store %arg18[%c0_237, %c0_238], %163 {strides = array<i32>} : memref<224x168xf32, #tpu.memory_space<vmem>>, vector<224x168xf32>,
    %c0_239 = arith.constant 0 : index
    %c0_240 = arith.constant 0 : index
    %c0_241 = arith.constant 0 : index
    %165 = vector.load %arg4[%c0_239, %c0_240, %c0_241] : memref<2x112x224xf32, #tpu.memory_space<vmem>>, vector<1x112x224xf32>
    %166 = vector.shape_cast %165 : vector<1x112x224xf32> to vector<112x224xf32>
    %c0_242 = arith.constant 0 : index
    %c0_243 = arith.constant 0 : index
    %167 = vector.load %arg18[%c0_242, %c0_243] : memref<224x168xf32, #tpu.memory_space<vmem>>, vector<224x168xf32>
    %cst_244 = arith.constant dense<0.000000e+00> : vector<112x168xf32>
    %168 = tpu.matmul %166, %167, %cst_244 {dimension_numbers = #tpu.dot_dimension_numbers<[1], [0], [0], [1], [0, 0, 1, 1], [], []>} : vector<112x224xf32>, vector<224x168xf32>, vector<112x168xf32> -> vector<112x168xf32>
    %c1_245 = arith.constant 1 : index
    %c0_246 = arith.constant 0 : index
    %c0_247 = arith.constant 0 : index
    %169 = vector.load %arg4[%c1_245, %c0_246, %c0_247] : memref<2x112x224xf32, #tpu.memory_space<vmem>>, vector<1x112x224xf32>
    %170 = vector.shape_cast %169 : vector<1x112x224xf32> to vector<112x224xf32>
    %c0_248 = arith.constant 0 : index
    %c0_249 = arith.constant 0 : index
    %171 = vector.load %arg18[%c0_248, %c0_249] : memref<224x168xf32, #tpu.memory_space<vmem>>, vector<224x168xf32>
    %cst_250 = arith.constant dense<0.000000e+00> : vector<112x168xf32>
    %172 = tpu.matmul %170, %171, %cst_250 {dimension_numbers = #tpu.dot_dimension_numbers<[1], [0], [0], [1], [0, 0, 1, 1], [], []>} : vector<112x224xf32>, vector<224x168xf32>, vector<112x168xf32> -> vector<112x168xf32>
    %173 = arith.maximumf %168, %172 : vector<112x168xf32>
    %c0_251 = arith.constant 0 : index
    %c0_252 = arith.constant 0 : index
    %c0_253 = arith.constant 0 : index
    %174 = vector.load %arg5[%c0_251, %c0_252, %c0_253] : memref<2x168x84xf32, #tpu.memory_space<vmem>>, vector<1x168x84xf32>
    %175 = vector.shape_cast %174 : vector<1x168x84xf32> to vector<168x84xf32>
    %cst_254 = arith.constant dense<0.000000e+00> : vector<112x84xf32>
    %176 = tpu.matmul %173, %175, %cst_254 {dimension_numbers = #tpu.dot_dimension_numbers<[1], [0], [0], [1], [0, 0, 1, 1], [], []>} : vector<112x168xf32>, vector<168x84xf32>, vector<112x84xf32> -> vector<112x84xf32>
    %c1_255 = arith.constant 1 : index
    %c0_256 = arith.constant 0 : index
    %c0_257 = arith.constant 0 : index
    %177 = vector.load %arg5[%c1_255, %c0_256, %c0_257] : memref<2x168x84xf32, #tpu.memory_space<vmem>>, vector<1x168x84xf32>
    %178 = vector.shape_cast %177 : vector<1x168x84xf32> to vector<168x84xf32>
    %cst_258 = arith.constant dense<0.000000e+00> : vector<112x84xf32>
    %179 = tpu.matmul %173, %178, %cst_258 {dimension_numbers = #tpu.dot_dimension_numbers<[1], [0], [0], [1], [0, 0, 1, 1], [], []>} : vector<112x168xf32>, vector<168x84xf32>, vector<112x84xf32> -> vector<112x84xf32>
    %180 = arith.maximumf %176, %179 : vector<112x84xf32>
    %cst_259 = arith.constant 0.000000e+00 : f32
    %181 = vector.broadcast %cst_259 : f32 to vector<112x84xf32>
    %182 = arith.maximumf %180, %181 : vector<112x84xf32>
    %c0_260 = arith.constant 0 : index
    %c0_261 = arith.constant 0 : index
    %183 = vector.load %arg19[%c0_260, %c0_261] : memref<112x84xf32, #tpu.memory_space<vmem>>, vector<112x84xf32>
    tpu.vector_store %arg19[%c0_260, %c0_261], %182 {strides = array<i32>} : memref<112x84xf32, #tpu.memory_space<vmem>>, vector<112x84xf32>,
    %cst_262 = arith.constant 0.000000e+00 : f32
    %184 = vector.broadcast %cst_262 : f32 to vector<80x160xf32>
    %c0_263 = arith.constant 0 : index
    %c0_264 = arith.constant 0 : index
    %185 = vector.load %arg7[%c0_263, %c0_264] : memref<1x160xf32, #tpu.memory_space<vmem>>, vector<1x160xf32>
    %186 = vector.broadcast %185 : vector<1x160xf32> to vector<80x160xf32>
    %187 = arith.addf %184, %186 : vector<80x160xf32>
    %c0_265 = arith.constant 0 : index
    %c0_266 = arith.constant 0 : index
    %188 = vector.load %arg21[%c0_265, %c0_266] : memref<80x160xf32, #tpu.memory_space<vmem>>, vector<80x160xf32>
    tpu.vector_store %arg21[%c0_265, %c0_266], %187 {strides = array<i32>} : memref<80x160xf32, #tpu.memory_space<vmem>>, vector<80x160xf32>,
    %c0_267 = arith.constant 0 : index
    %c0_268 = arith.constant 0 : index
    %189 = vector.load %arg19[%c0_267, %c0_268] : memref<112x84xf32, #tpu.memory_space<vmem>>, vector<10x84xf32>
    %c0_269 = arith.constant 0 : index
    %c0_270 = arith.constant 0 : index
    %190 = vector.load %arg20[%c0_269, %c0_270] : memref<80x84xf32, #tpu.memory_space<vmem>>, vector<10x84xf32>
    tpu.vector_store %arg20[%c0_269, %c0_270], %189 {strides = array<i32>} : memref<80x84xf32, #tpu.memory_space<vmem>>, vector<10x84xf32>,
    %c14 = arith.constant 14 : index
    %c0_271 = arith.constant 0 : index
    %191 = vector.load %arg19[%c14, %c0_271] : memref<112x84xf32, #tpu.memory_space<vmem>>, vector<10x84xf32>
    %c10 = arith.constant 10 : index
    %c0_272 = arith.constant 0 : index
    %192 = vector.load %arg20[%c10, %c0_272] : memref<80x84xf32, #tpu.memory_space<vmem>>, vector<10x84xf32>
    tpu.vector_store %arg20[%c10, %c0_272], %191 {strides = array<i32>} : memref<80x84xf32, #tpu.memory_space<vmem>>, vector<10x84xf32>,
    %c28_273 = arith.constant 28 : index
    %c0_274 = arith.constant 0 : index
    %193 = vector.load %arg19[%c28_273, %c0_274] : memref<112x84xf32, #tpu.memory_space<vmem>>, vector<10x84xf32>
    %c20 = arith.constant 20 : index
    %c0_275 = arith.constant 0 : index
    %194 = vector.load %arg20[%c20, %c0_275] : memref<80x84xf32, #tpu.memory_space<vmem>>, vector<10x84xf32>
    tpu.vector_store %arg20[%c20, %c0_275], %193 {strides = array<i32>} : memref<80x84xf32, #tpu.memory_space<vmem>>, vector<10x84xf32>,
    %c42 = arith.constant 42 : index
    %c0_276 = arith.constant 0 : index
    %195 = vector.load %arg19[%c42, %c0_276] : memref<112x84xf32, #tpu.memory_space<vmem>>, vector<10x84xf32>
    %c30 = arith.constant 30 : index
    %c0_277 = arith.constant 0 : index
    %196 = vector.load %arg20[%c30, %c0_277] : memref<80x84xf32, #tpu.memory_space<vmem>>, vector<10x84xf32>
    tpu.vector_store %arg20[%c30, %c0_277], %195 {strides = array<i32>} : memref<80x84xf32, #tpu.memory_space<vmem>>, vector<10x84xf32>,
    %c56_278 = arith.constant 56 : index
    %c0_279 = arith.constant 0 : index
    %197 = vector.load %arg19[%c56_278, %c0_279] : memref<112x84xf32, #tpu.memory_space<vmem>>, vector<10x84xf32>
    %c40 = arith.constant 40 : index
    %c0_280 = arith.constant 0 : index
    %198 = vector.load %arg20[%c40, %c0_280] : memref<80x84xf32, #tpu.memory_space<vmem>>, vector<10x84xf32>
    tpu.vector_store %arg20[%c40, %c0_280], %197 {strides = array<i32>} : memref<80x84xf32, #tpu.memory_space<vmem>>, vector<10x84xf32>,
    %c70 = arith.constant 70 : index
    %c0_281 = arith.constant 0 : index
    %199 = vector.load %arg19[%c70, %c0_281] : memref<112x84xf32, #tpu.memory_space<vmem>>, vector<10x84xf32>
    %c50 = arith.constant 50 : index
    %c0_282 = arith.constant 0 : index
    %200 = vector.load %arg20[%c50, %c0_282] : memref<80x84xf32, #tpu.memory_space<vmem>>, vector<10x84xf32>
    tpu.vector_store %arg20[%c50, %c0_282], %199 {strides = array<i32>} : memref<80x84xf32, #tpu.memory_space<vmem>>, vector<10x84xf32>,
    %c84_283 = arith.constant 84 : index
    %c0_284 = arith.constant 0 : index
    %201 = vector.load %arg19[%c84_283, %c0_284] : memref<112x84xf32, #tpu.memory_space<vmem>>, vector<10x84xf32>
    %c60 = arith.constant 60 : index
    %c0_285 = arith.constant 0 : index
    %202 = vector.load %arg20[%c60, %c0_285] : memref<80x84xf32, #tpu.memory_space<vmem>>, vector<10x84xf32>
    tpu.vector_store %arg20[%c60, %c0_285], %201 {strides = array<i32>} : memref<80x84xf32, #tpu.memory_space<vmem>>, vector<10x84xf32>,
    %c98 = arith.constant 98 : index
    %c0_286 = arith.constant 0 : index
    %203 = vector.load %arg19[%c98, %c0_286] : memref<112x84xf32, #tpu.memory_space<vmem>>, vector<10x84xf32>
    %c70_287 = arith.constant 70 : index
    %c0_288 = arith.constant 0 : index
    %204 = vector.load %arg20[%c70_287, %c0_288] : memref<80x84xf32, #tpu.memory_space<vmem>>, vector<10x84xf32>
    tpu.vector_store %arg20[%c70_287, %c0_288], %203 {strides = array<i32>} : memref<80x84xf32, #tpu.memory_space<vmem>>, vector<10x84xf32>,
    %c0_289 = arith.constant 0 : index
    %c0_290 = arith.constant 0 : index
    %205 = vector.load %arg21[%c0_289, %c0_290] : memref<80x160xf32, #tpu.memory_space<vmem>>, vector<80x160xf32>
    %c0_291 = arith.constant 0 : index
    %c0_292 = arith.constant 0 : index
    %206 = vector.load %arg20[%c0_291, %c0_292] : memref<80x84xf32, #tpu.memory_space<vmem>>, vector<80x84xf32>
    %207 = arith.truncf %206 : vector<80x84xf32> to vector<80x84xbf16>
    %c0_293 = arith.constant 0 : index
    %c0_294 = arith.constant 0 : index
    %c0_295 = arith.constant 0 : index
    %208 = vector.load %arg6[%c0_293, %c0_294, %c0_295] : memref<5x84x160xbf16, #tpu.memory_space<vmem>>, vector<1x84x160xbf16>
    %209 = vector.shape_cast %208 : vector<1x84x160xbf16> to vector<84x160xbf16>
    %cst_296 = arith.constant dense<0.000000e+00> : vector<80x160xf32>
    %210 = tpu.matmul %207, %209, %cst_296 {dimension_numbers = #tpu.dot_dimension_numbers<[1], [0], [0], [1], [0, 0, 1, 1], [], []>} : vector<80x84xbf16>, vector<84x160xbf16>, vector<80x160xf32> -> vector<80x160xf32>
    %211 = arith.addf %205, %210 : vector<80x160xf32>
    %c0_297 = arith.constant 0 : index
    %c0_298 = arith.constant 0 : index
    %212 = vector.load %arg21[%c0_297, %c0_298] : memref<80x160xf32, #tpu.memory_space<vmem>>, vector<80x160xf32>
    tpu.vector_store %arg21[%c0_297, %c0_298], %211 {strides = array<i32>} : memref<80x160xf32, #tpu.memory_space<vmem>>, vector<80x160xf32>,
    %c1_299 = arith.constant 1 : index
    %c0_300 = arith.constant 0 : index
    %213 = vector.load %arg19[%c1_299, %c0_300] : memref<112x84xf32, #tpu.memory_space<vmem>>, vector<10x84xf32>
    %c0_301 = arith.constant 0 : index
    %c0_302 = arith.constant 0 : index
    %214 = vector.load %arg20[%c0_301, %c0_302] : memref<80x84xf32, #tpu.memory_space<vmem>>, vector<10x84xf32>
    tpu.vector_store %arg20[%c0_301, %c0_302], %213 {strides = array<i32>} : memref<80x84xf32, #tpu.memory_space<vmem>>, vector<10x84xf32>,
    %c15 = arith.constant 15 : index
    %c0_303 = arith.constant 0 : index
    %215 = vector.load %arg19[%c15, %c0_303] : memref<112x84xf32, #tpu.memory_space<vmem>>, vector<10x84xf32>
    %c10_304 = arith.constant 10 : index
    %c0_305 = arith.constant 0 : index
    %216 = vector.load %arg20[%c10_304, %c0_305] : memref<80x84xf32, #tpu.memory_space<vmem>>, vector<10x84xf32>
    tpu.vector_store %arg20[%c10_304, %c0_305], %215 {strides = array<i32>} : memref<80x84xf32, #tpu.memory_space<vmem>>, vector<10x84xf32>,
    %c29 = arith.constant 29 : index
    %c0_306 = arith.constant 0 : index
    %217 = vector.load %arg19[%c29, %c0_306] : memref<112x84xf32, #tpu.memory_space<vmem>>, vector<10x84xf32>
    %c20_307 = arith.constant 20 : index
    %c0_308 = arith.constant 0 : index
    %218 = vector.load %arg20[%c20_307, %c0_308] : memref<80x84xf32, #tpu.memory_space<vmem>>, vector<10x84xf32>
    tpu.vector_store %arg20[%c20_307, %c0_308], %217 {strides = array<i32>} : memref<80x84xf32, #tpu.memory_space<vmem>>, vector<10x84xf32>,
    %c43 = arith.constant 43 : index
    %c0_309 = arith.constant 0 : index
    %219 = vector.load %arg19[%c43, %c0_309] : memref<112x84xf32, #tpu.memory_space<vmem>>, vector<10x84xf32>
    %c30_310 = arith.constant 30 : index
    %c0_311 = arith.constant 0 : index
    %220 = vector.load %arg20[%c30_310, %c0_311] : memref<80x84xf32, #tpu.memory_space<vmem>>, vector<10x84xf32>
    tpu.vector_store %arg20[%c30_310, %c0_311], %219 {strides = array<i32>} : memref<80x84xf32, #tpu.memory_space<vmem>>, vector<10x84xf32>,
    %c57 = arith.constant 57 : index
    %c0_312 = arith.constant 0 : index
    %221 = vector.load %arg19[%c57, %c0_312] : memref<112x84xf32, #tpu.memory_space<vmem>>, vector<10x84xf32>
    %c40_313 = arith.constant 40 : index
    %c0_314 = arith.constant 0 : index
    %222 = vector.load %arg20[%c40_313, %c0_314] : memref<80x84xf32, #tpu.memory_space<vmem>>, vector<10x84xf32>
    tpu.vector_store %arg20[%c40_313, %c0_314], %221 {strides = array<i32>} : memref<80x84xf32, #tpu.memory_space<vmem>>, vector<10x84xf32>,
    %c71 = arith.constant 71 : index
    %c0_315 = arith.constant 0 : index
    %223 = vector.load %arg19[%c71, %c0_315] : memref<112x84xf32, #tpu.memory_space<vmem>>, vector<10x84xf32>
    %c50_316 = arith.constant 50 : index
    %c0_317 = arith.constant 0 : index
    %224 = vector.load %arg20[%c50_316, %c0_317] : memref<80x84xf32, #tpu.memory_space<vmem>>, vector<10x84xf32>
    tpu.vector_store %arg20[%c50_316, %c0_317], %223 {strides = array<i32>} : memref<80x84xf32, #tpu.memory_space<vmem>>, vector<10x84xf32>,
    %c85 = arith.constant 85 : index
    %c0_318 = arith.constant 0 : index
    %225 = vector.load %arg19[%c85, %c0_318] : memref<112x84xf32, #tpu.memory_space<vmem>>, vector<10x84xf32>
    %c60_319 = arith.constant 60 : index
    %c0_320 = arith.constant 0 : index
    %226 = vector.load %arg20[%c60_319, %c0_320] : memref<80x84xf32, #tpu.memory_space<vmem>>, vector<10x84xf32>
    tpu.vector_store %arg20[%c60_319, %c0_320], %225 {strides = array<i32>} : memref<80x84xf32, #tpu.memory_space<vmem>>, vector<10x84xf32>,
    %c99 = arith.constant 99 : index
    %c0_321 = arith.constant 0 : index
    %227 = vector.load %arg19[%c99, %c0_321] : memref<112x84xf32, #tpu.memory_space<vmem>>, vector<10x84xf32>
    %c70_322 = arith.constant 70 : index
    %c0_323 = arith.constant 0 : index
    %228 = vector.load %arg20[%c70_322, %c0_323] : memref<80x84xf32, #tpu.memory_space<vmem>>, vector<10x84xf32>
    tpu.vector_store %arg20[%c70_322, %c0_323], %227 {strides = array<i32>} : memref<80x84xf32, #tpu.memory_space<vmem>>, vector<10x84xf32>,
    %c0_324 = arith.constant 0 : index
    %c0_325 = arith.constant 0 : index
    %229 = vector.load %arg21[%c0_324, %c0_325] : memref<80x160xf32, #tpu.memory_space<vmem>>, vector<80x160xf32>
    %c0_326 = arith.constant 0 : index
    %c0_327 = arith.constant 0 : index
    %230 = vector.load %arg20[%c0_326, %c0_327] : memref<80x84xf32, #tpu.memory_space<vmem>>, vector<80x84xf32>
    %231 = arith.truncf %230 : vector<80x84xf32> to vector<80x84xbf16>
    %c1_328 = arith.constant 1 : index
    %c0_329 = arith.constant 0 : index
    %c0_330 = arith.constant 0 : index
    %232 = vector.load %arg6[%c1_328, %c0_329, %c0_330] : memref<5x84x160xbf16, #tpu.memory_space<vmem>>, vector<1x84x160xbf16>
    %233 = vector.shape_cast %232 : vector<1x84x160xbf16> to vector<84x160xbf16>
    %cst_331 = arith.constant dense<0.000000e+00> : vector<80x160xf32>
    %234 = tpu.matmul %231, %233, %cst_331 {dimension_numbers = #tpu.dot_dimension_numbers<[1], [0], [0], [1], [0, 0, 1, 1], [], []>} : vector<80x84xbf16>, vector<84x160xbf16>, vector<80x160xf32> -> vector<80x160xf32>
    %235 = arith.addf %229, %234 : vector<80x160xf32>
    %c0_332 = arith.constant 0 : index
    %c0_333 = arith.constant 0 : index
    %236 = vector.load %arg21[%c0_332, %c0_333] : memref<80x160xf32, #tpu.memory_space<vmem>>, vector<80x160xf32>
    tpu.vector_store %arg21[%c0_332, %c0_333], %235 {strides = array<i32>} : memref<80x160xf32, #tpu.memory_space<vmem>>, vector<80x160xf32>,
    %c2_334 = arith.constant 2 : index
    %c0_335 = arith.constant 0 : index
    %237 = vector.load %arg19[%c2_334, %c0_335] : memref<112x84xf32, #tpu.memory_space<vmem>>, vector<10x84xf32>
    %c0_336 = arith.constant 0 : index
    %c0_337 = arith.constant 0 : index
    %238 = vector.load %arg20[%c0_336, %c0_337] : memref<80x84xf32, #tpu.memory_space<vmem>>, vector<10x84xf32>
    tpu.vector_store %arg20[%c0_336, %c0_337], %237 {strides = array<i32>} : memref<80x84xf32, #tpu.memory_space<vmem>>, vector<10x84xf32>,
    %c16 = arith.constant 16 : index
    %c0_338 = arith.constant 0 : index
    %239 = vector.load %arg19[%c16, %c0_338] : memref<112x84xf32, #tpu.memory_space<vmem>>, vector<10x84xf32>
    %c10_339 = arith.constant 10 : index
    %c0_340 = arith.constant 0 : index
    %240 = vector.load %arg20[%c10_339, %c0_340] : memref<80x84xf32, #tpu.memory_space<vmem>>, vector<10x84xf32>
    tpu.vector_store %arg20[%c10_339, %c0_340], %239 {strides = array<i32>} : memref<80x84xf32, #tpu.memory_space<vmem>>, vector<10x84xf32>,
    %c30_341 = arith.constant 30 : index
    %c0_342 = arith.constant 0 : index
    %241 = vector.load %arg19[%c30_341, %c0_342] : memref<112x84xf32, #tpu.memory_space<vmem>>, vector<10x84xf32>
    %c20_343 = arith.constant 20 : index
    %c0_344 = arith.constant 0 : index
    %242 = vector.load %arg20[%c20_343, %c0_344] : memref<80x84xf32, #tpu.memory_space<vmem>>, vector<10x84xf32>
    tpu.vector_store %arg20[%c20_343, %c0_344], %241 {strides = array<i32>} : memref<80x84xf32, #tpu.memory_space<vmem>>, vector<10x84xf32>,
    %c44 = arith.constant 44 : index
    %c0_345 = arith.constant 0 : index
    %243 = vector.load %arg19[%c44, %c0_345] : memref<112x84xf32, #tpu.memory_space<vmem>>, vector<10x84xf32>
    %c30_346 = arith.constant 30 : index
    %c0_347 = arith.constant 0 : index
    %244 = vector.load %arg20[%c30_346, %c0_347] : memref<80x84xf32, #tpu.memory_space<vmem>>, vector<10x84xf32>
    tpu.vector_store %arg20[%c30_346, %c0_347], %243 {strides = array<i32>} : memref<80x84xf32, #tpu.memory_space<vmem>>, vector<10x84xf32>,
    %c58 = arith.constant 58 : index
    %c0_348 = arith.constant 0 : index
    %245 = vector.load %arg19[%c58, %c0_348] : memref<112x84xf32, #tpu.memory_space<vmem>>, vector<10x84xf32>
    %c40_349 = arith.constant 40 : index
    %c0_350 = arith.constant 0 : index
    %246 = vector.load %arg20[%c40_349, %c0_350] : memref<80x84xf32, #tpu.memory_space<vmem>>, vector<10x84xf32>
    tpu.vector_store %arg20[%c40_349, %c0_350], %245 {strides = array<i32>} : memref<80x84xf32, #tpu.memory_space<vmem>>, vector<10x84xf32>,
    %c72 = arith.constant 72 : index
    %c0_351 = arith.constant 0 : index
    %247 = vector.load %arg19[%c72, %c0_351] : memref<112x84xf32, #tpu.memory_space<vmem>>, vector<10x84xf32>
    %c50_352 = arith.constant 50 : index
    %c0_353 = arith.constant 0 : index
    %248 = vector.load %arg20[%c50_352, %c0_353] : memref<80x84xf32, #tpu.memory_space<vmem>>, vector<10x84xf32>
    tpu.vector_store %arg20[%c50_352, %c0_353], %247 {strides = array<i32>} : memref<80x84xf32, #tpu.memory_space<vmem>>, vector<10x84xf32>,
    %c86 = arith.constant 86 : index
    %c0_354 = arith.constant 0 : index
    %249 = vector.load %arg19[%c86, %c0_354] : memref<112x84xf32, #tpu.memory_space<vmem>>, vector<10x84xf32>
    %c60_355 = arith.constant 60 : index
    %c0_356 = arith.constant 0 : index
    %250 = vector.load %arg20[%c60_355, %c0_356] : memref<80x84xf32, #tpu.memory_space<vmem>>, vector<10x84xf32>
    tpu.vector_store %arg20[%c60_355, %c0_356], %249 {strides = array<i32>} : memref<80x84xf32, #tpu.memory_space<vmem>>, vector<10x84xf32>,
    %c100 = arith.constant 100 : index
    %c0_357 = arith.constant 0 : index
    %251 = vector.load %arg19[%c100, %c0_357] : memref<112x84xf32, #tpu.memory_space<vmem>>, vector<10x84xf32>
    %c70_358 = arith.constant 70 : index
    %c0_359 = arith.constant 0 : index
    %252 = vector.load %arg20[%c70_358, %c0_359] : memref<80x84xf32, #tpu.memory_space<vmem>>, vector<10x84xf32>
    tpu.vector_store %arg20[%c70_358, %c0_359], %251 {strides = array<i32>} : memref<80x84xf32, #tpu.memory_space<vmem>>, vector<10x84xf32>,
    %c0_360 = arith.constant 0 : index
    %c0_361 = arith.constant 0 : index
    %253 = vector.load %arg21[%c0_360, %c0_361] : memref<80x160xf32, #tpu.memory_space<vmem>>, vector<80x160xf32>
    %c0_362 = arith.constant 0 : index
    %c0_363 = arith.constant 0 : index
    %254 = vector.load %arg20[%c0_362, %c0_363] : memref<80x84xf32, #tpu.memory_space<vmem>>, vector<80x84xf32>
    %255 = arith.truncf %254 : vector<80x84xf32> to vector<80x84xbf16>
    %c2_364 = arith.constant 2 : index
    %c0_365 = arith.constant 0 : index
    %c0_366 = arith.constant 0 : index
    %256 = vector.load %arg6[%c2_364, %c0_365, %c0_366] : memref<5x84x160xbf16, #tpu.memory_space<vmem>>, vector<1x84x160xbf16>
    %257 = vector.shape_cast %256 : vector<1x84x160xbf16> to vector<84x160xbf16>
    %cst_367 = arith.constant dense<0.000000e+00> : vector<80x160xf32>
    %258 = tpu.matmul %255, %257, %cst_367 {dimension_numbers = #tpu.dot_dimension_numbers<[1], [0], [0], [1], [0, 0, 1, 1], [], []>} : vector<80x84xbf16>, vector<84x160xbf16>, vector<80x160xf32> -> vector<80x160xf32>
    %259 = arith.addf %253, %258 : vector<80x160xf32>
    %c0_368 = arith.constant 0 : index
    %c0_369 = arith.constant 0 : index
    %260 = vector.load %arg21[%c0_368, %c0_369] : memref<80x160xf32, #tpu.memory_space<vmem>>, vector<80x160xf32>
    tpu.vector_store %arg21[%c0_368, %c0_369], %259 {strides = array<i32>} : memref<80x160xf32, #tpu.memory_space<vmem>>, vector<80x160xf32>,
    %c3_370 = arith.constant 3 : index
    %c0_371 = arith.constant 0 : index
    %261 = vector.load %arg19[%c3_370, %c0_371] : memref<112x84xf32, #tpu.memory_space<vmem>>, vector<10x84xf32>
    %c0_372 = arith.constant 0 : index
    %c0_373 = arith.constant 0 : index
    %262 = vector.load %arg20[%c0_372, %c0_373] : memref<80x84xf32, #tpu.memory_space<vmem>>, vector<10x84xf32>
    tpu.vector_store %arg20[%c0_372, %c0_373], %261 {strides = array<i32>} : memref<80x84xf32, #tpu.memory_space<vmem>>, vector<10x84xf32>,
    %c17 = arith.constant 17 : index
    %c0_374 = arith.constant 0 : index
    %263 = vector.load %arg19[%c17, %c0_374] : memref<112x84xf32, #tpu.memory_space<vmem>>, vector<10x84xf32>
    %c10_375 = arith.constant 10 : index
    %c0_376 = arith.constant 0 : index
    %264 = vector.load %arg20[%c10_375, %c0_376] : memref<80x84xf32, #tpu.memory_space<vmem>>, vector<10x84xf32>
    tpu.vector_store %arg20[%c10_375, %c0_376], %263 {strides = array<i32>} : memref<80x84xf32, #tpu.memory_space<vmem>>, vector<10x84xf32>,
    %c31 = arith.constant 31 : index
    %c0_377 = arith.constant 0 : index
    %265 = vector.load %arg19[%c31, %c0_377] : memref<112x84xf32, #tpu.memory_space<vmem>>, vector<10x84xf32>
    %c20_378 = arith.constant 20 : index
    %c0_379 = arith.constant 0 : index
    %266 = vector.load %arg20[%c20_378, %c0_379] : memref<80x84xf32, #tpu.memory_space<vmem>>, vector<10x84xf32>
    tpu.vector_store %arg20[%c20_378, %c0_379], %265 {strides = array<i32>} : memref<80x84xf32, #tpu.memory_space<vmem>>, vector<10x84xf32>,
    %c45 = arith.constant 45 : index
    %c0_380 = arith.constant 0 : index
    %267 = vector.load %arg19[%c45, %c0_380] : memref<112x84xf32, #tpu.memory_space<vmem>>, vector<10x84xf32>
    %c30_381 = arith.constant 30 : index
    %c0_382 = arith.constant 0 : index
    %268 = vector.load %arg20[%c30_381, %c0_382] : memref<80x84xf32, #tpu.memory_space<vmem>>, vector<10x84xf32>
    tpu.vector_store %arg20[%c30_381, %c0_382], %267 {strides = array<i32>} : memref<80x84xf32, #tpu.memory_space<vmem>>, vector<10x84xf32>,
    %c59 = arith.constant 59 : index
    %c0_383 = arith.constant 0 : index
    %269 = vector.load %arg19[%c59, %c0_383] : memref<112x84xf32, #tpu.memory_space<vmem>>, vector<10x84xf32>
    %c40_384 = arith.constant 40 : index
    %c0_385 = arith.constant 0 : index
    %270 = vector.load %arg20[%c40_384, %c0_385] : memref<80x84xf32, #tpu.memory_space<vmem>>, vector<10x84xf32>
    tpu.vector_store %arg20[%c40_384, %c0_385], %269 {strides = array<i32>} : memref<80x84xf32, #tpu.memory_space<vmem>>, vector<10x84xf32>,
    %c73 = arith.constant 73 : index
    %c0_386 = arith.constant 0 : index
    %271 = vector.load %arg19[%c73, %c0_386] : memref<112x84xf32, #tpu.memory_space<vmem>>, vector<10x84xf32>
    %c50_387 = arith.constant 50 : index
    %c0_388 = arith.constant 0 : index
    %272 = vector.load %arg20[%c50_387, %c0_388] : memref<80x84xf32, #tpu.memory_space<vmem>>, vector<10x84xf32>
    tpu.vector_store %arg20[%c50_387, %c0_388], %271 {strides = array<i32>} : memref<80x84xf32, #tpu.memory_space<vmem>>, vector<10x84xf32>,
    %c87 = arith.constant 87 : index
    %c0_389 = arith.constant 0 : index
    %273 = vector.load %arg19[%c87, %c0_389] : memref<112x84xf32, #tpu.memory_space<vmem>>, vector<10x84xf32>
    %c60_390 = arith.constant 60 : index
    %c0_391 = arith.constant 0 : index
    %274 = vector.load %arg20[%c60_390, %c0_391] : memref<80x84xf32, #tpu.memory_space<vmem>>, vector<10x84xf32>
    tpu.vector_store %arg20[%c60_390, %c0_391], %273 {strides = array<i32>} : memref<80x84xf32, #tpu.memory_space<vmem>>, vector<10x84xf32>,
    %c101 = arith.constant 101 : index
    %c0_392 = arith.constant 0 : index
    %275 = vector.load %arg19[%c101, %c0_392] : memref<112x84xf32, #tpu.memory_space<vmem>>, vector<10x84xf32>
    %c70_393 = arith.constant 70 : index
    %c0_394 = arith.constant 0 : index
    %276 = vector.load %arg20[%c70_393, %c0_394] : memref<80x84xf32, #tpu.memory_space<vmem>>, vector<10x84xf32>
    tpu.vector_store %arg20[%c70_393, %c0_394], %275 {strides = array<i32>} : memref<80x84xf32, #tpu.memory_space<vmem>>, vector<10x84xf32>,
    %c0_395 = arith.constant 0 : index
    %c0_396 = arith.constant 0 : index
    %277 = vector.load %arg21[%c0_395, %c0_396] : memref<80x160xf32, #tpu.memory_space<vmem>>, vector<80x160xf32>
    %c0_397 = arith.constant 0 : index
    %c0_398 = arith.constant 0 : index
    %278 = vector.load %arg20[%c0_397, %c0_398] : memref<80x84xf32, #tpu.memory_space<vmem>>, vector<80x84xf32>
    %279 = arith.truncf %278 : vector<80x84xf32> to vector<80x84xbf16>
    %c3_399 = arith.constant 3 : index
    %c0_400 = arith.constant 0 : index
    %c0_401 = arith.constant 0 : index
    %280 = vector.load %arg6[%c3_399, %c0_400, %c0_401] : memref<5x84x160xbf16, #tpu.memory_space<vmem>>, vector<1x84x160xbf16>
    %281 = vector.shape_cast %280 : vector<1x84x160xbf16> to vector<84x160xbf16>
    %cst_402 = arith.constant dense<0.000000e+00> : vector<80x160xf32>
    %282 = tpu.matmul %279, %281, %cst_402 {dimension_numbers = #tpu.dot_dimension_numbers<[1], [0], [0], [1], [0, 0, 1, 1], [], []>} : vector<80x84xbf16>, vector<84x160xbf16>, vector<80x160xf32> -> vector<80x160xf32>
    %283 = arith.addf %277, %282 : vector<80x160xf32>
    %c0_403 = arith.constant 0 : index
    %c0_404 = arith.constant 0 : index
    %284 = vector.load %arg21[%c0_403, %c0_404] : memref<80x160xf32, #tpu.memory_space<vmem>>, vector<80x160xf32>
    tpu.vector_store %arg21[%c0_403, %c0_404], %283 {strides = array<i32>} : memref<80x160xf32, #tpu.memory_space<vmem>>, vector<80x160xf32>,
    %c4_405 = arith.constant 4 : index
    %c0_406 = arith.constant 0 : index
    %285 = vector.load %arg19[%c4_405, %c0_406] : memref<112x84xf32, #tpu.memory_space<vmem>>, vector<10x84xf32>
    %c0_407 = arith.constant 0 : index
    %c0_408 = arith.constant 0 : index
    %286 = vector.load %arg20[%c0_407, %c0_408] : memref<80x84xf32, #tpu.memory_space<vmem>>, vector<10x84xf32>
    tpu.vector_store %arg20[%c0_407, %c0_408], %285 {strides = array<i32>} : memref<80x84xf32, #tpu.memory_space<vmem>>, vector<10x84xf32>,
    %c18 = arith.constant 18 : index
    %c0_409 = arith.constant 0 : index
    %287 = vector.load %arg19[%c18, %c0_409] : memref<112x84xf32, #tpu.memory_space<vmem>>, vector<10x84xf32>
    %c10_410 = arith.constant 10 : index
    %c0_411 = arith.constant 0 : index
    %288 = vector.load %arg20[%c10_410, %c0_411] : memref<80x84xf32, #tpu.memory_space<vmem>>, vector<10x84xf32>
    tpu.vector_store %arg20[%c10_410, %c0_411], %287 {strides = array<i32>} : memref<80x84xf32, #tpu.memory_space<vmem>>, vector<10x84xf32>,
    %c32 = arith.constant 32 : index
    %c0_412 = arith.constant 0 : index
    %289 = vector.load %arg19[%c32, %c0_412] : memref<112x84xf32, #tpu.memory_space<vmem>>, vector<10x84xf32>
    %c20_413 = arith.constant 20 : index
    %c0_414 = arith.constant 0 : index
    %290 = vector.load %arg20[%c20_413, %c0_414] : memref<80x84xf32, #tpu.memory_space<vmem>>, vector<10x84xf32>
    tpu.vector_store %arg20[%c20_413, %c0_414], %289 {strides = array<i32>} : memref<80x84xf32, #tpu.memory_space<vmem>>, vector<10x84xf32>,
    %c46 = arith.constant 46 : index
    %c0_415 = arith.constant 0 : index
    %291 = vector.load %arg19[%c46, %c0_415] : memref<112x84xf32, #tpu.memory_space<vmem>>, vector<10x84xf32>
    %c30_416 = arith.constant 30 : index
    %c0_417 = arith.constant 0 : index
    %292 = vector.load %arg20[%c30_416, %c0_417] : memref<80x84xf32, #tpu.memory_space<vmem>>, vector<10x84xf32>
    tpu.vector_store %arg20[%c30_416, %c0_417], %291 {strides = array<i32>} : memref<80x84xf32, #tpu.memory_space<vmem>>, vector<10x84xf32>,
    %c60_418 = arith.constant 60 : index
    %c0_419 = arith.constant 0 : index
    %293 = vector.load %arg19[%c60_418, %c0_419] : memref<112x84xf32, #tpu.memory_space<vmem>>, vector<10x84xf32>
    %c40_420 = arith.constant 40 : index
    %c0_421 = arith.constant 0 : index
    %294 = vector.load %arg20[%c40_420, %c0_421] : memref<80x84xf32, #tpu.memory_space<vmem>>, vector<10x84xf32>
    tpu.vector_store %arg20[%c40_420, %c0_421], %293 {strides = array<i32>} : memref<80x84xf32, #tpu.memory_space<vmem>>, vector<10x84xf32>,
    %c74 = arith.constant 74 : index
    %c0_422 = arith.constant 0 : index
    %295 = vector.load %arg19[%c74, %c0_422] : memref<112x84xf32, #tpu.memory_space<vmem>>, vector<10x84xf32>
    %c50_423 = arith.constant 50 : index
    %c0_424 = arith.constant 0 : index
    %296 = vector.load %arg20[%c50_423, %c0_424] : memref<80x84xf32, #tpu.memory_space<vmem>>, vector<10x84xf32>
    tpu.vector_store %arg20[%c50_423, %c0_424], %295 {strides = array<i32>} : memref<80x84xf32, #tpu.memory_space<vmem>>, vector<10x84xf32>,
    %c88 = arith.constant 88 : index
    %c0_425 = arith.constant 0 : index
    %297 = vector.load %arg19[%c88, %c0_425] : memref<112x84xf32, #tpu.memory_space<vmem>>, vector<10x84xf32>
    %c60_426 = arith.constant 60 : index
    %c0_427 = arith.constant 0 : index
    %298 = vector.load %arg20[%c60_426, %c0_427] : memref<80x84xf32, #tpu.memory_space<vmem>>, vector<10x84xf32>
    tpu.vector_store %arg20[%c60_426, %c0_427], %297 {strides = array<i32>} : memref<80x84xf32, #tpu.memory_space<vmem>>, vector<10x84xf32>,
    %c102 = arith.constant 102 : index
    %c0_428 = arith.constant 0 : index
    %299 = vector.load %arg19[%c102, %c0_428] : memref<112x84xf32, #tpu.memory_space<vmem>>, vector<10x84xf32>
    %c70_429 = arith.constant 70 : index
    %c0_430 = arith.constant 0 : index
    %300 = vector.load %arg20[%c70_429, %c0_430] : memref<80x84xf32, #tpu.memory_space<vmem>>, vector<10x84xf32>
    tpu.vector_store %arg20[%c70_429, %c0_430], %299 {strides = array<i32>} : memref<80x84xf32, #tpu.memory_space<vmem>>, vector<10x84xf32>,
    %c0_431 = arith.constant 0 : index
    %c0_432 = arith.constant 0 : index
    %301 = vector.load %arg21[%c0_431, %c0_432] : memref<80x160xf32, #tpu.memory_space<vmem>>, vector<80x160xf32>
    %c0_433 = arith.constant 0 : index
    %c0_434 = arith.constant 0 : index
    %302 = vector.load %arg20[%c0_433, %c0_434] : memref<80x84xf32, #tpu.memory_space<vmem>>, vector<80x84xf32>
    %303 = arith.truncf %302 : vector<80x84xf32> to vector<80x84xbf16>
    %c4_435 = arith.constant 4 : index
    %c0_436 = arith.constant 0 : index
    %c0_437 = arith.constant 0 : index
    %304 = vector.load %arg6[%c4_435, %c0_436, %c0_437] : memref<5x84x160xbf16, #tpu.memory_space<vmem>>, vector<1x84x160xbf16>
    %305 = vector.shape_cast %304 : vector<1x84x160xbf16> to vector<84x160xbf16>
    %cst_438 = arith.constant dense<0.000000e+00> : vector<80x160xf32>
    %306 = tpu.matmul %303, %305, %cst_438 {dimension_numbers = #tpu.dot_dimension_numbers<[1], [0], [0], [1], [0, 0, 1, 1], [], []>} : vector<80x84xbf16>, vector<84x160xbf16>, vector<80x160xf32> -> vector<80x160xf32>
    %307 = arith.addf %301, %306 : vector<80x160xf32>
    %c0_439 = arith.constant 0 : index
    %c0_440 = arith.constant 0 : index
    %308 = vector.load %arg21[%c0_439, %c0_440] : memref<80x160xf32, #tpu.memory_space<vmem>>, vector<80x160xf32>
    tpu.vector_store %arg21[%c0_439, %c0_440], %307 {strides = array<i32>} : memref<80x160xf32, #tpu.memory_space<vmem>>, vector<80x160xf32>,
    %c0_441 = arith.constant 0 : index
    %c0_442 = arith.constant 0 : index
    %c0_443 = arith.constant 0 : index
    %309 = vector.load %arg8[%c0_441, %c0_442, %c0_443] : memref<2x40x80xf32, #tpu.memory_space<vmem>>, vector<1x40x80xf32>
    %310 = vector.shape_cast %309 : vector<1x40x80xf32> to vector<40x80xf32>
    %c0_444 = arith.constant 0 : index
    %c0_445 = arith.constant 0 : index
    %311 = vector.load %arg21[%c0_444, %c0_445] : memref<80x160xf32, #tpu.memory_space<vmem>>, vector<80x160xf32>
    %cst_446 = arith.constant dense<0.000000e+00> : vector<40x160xf32>
    %312 = tpu.matmul %310, %311, %cst_446 {dimension_numbers = #tpu.dot_dimension_numbers<[1], [0], [0], [1], [0, 0, 1, 1], [], []>} : vector<40x80xf32>, vector<80x160xf32>, vector<40x160xf32> -> vector<40x160xf32>
    %c1_447 = arith.constant 1 : index
    %c0_448 = arith.constant 0 : index
    %c0_449 = arith.constant 0 : index
    %313 = vector.load %arg8[%c1_447, %c0_448, %c0_449] : memref<2x40x80xf32, #tpu.memory_space<vmem>>, vector<1x40x80xf32>
    %314 = vector.shape_cast %313 : vector<1x40x80xf32> to vector<40x80xf32>
    %c0_450 = arith.constant 0 : index
    %c0_451 = arith.constant 0 : index
    %315 = vector.load %arg21[%c0_450, %c0_451] : memref<80x160xf32, #tpu.memory_space<vmem>>, vector<80x160xf32>
    %cst_452 = arith.constant dense<0.000000e+00> : vector<40x160xf32>
    %316 = tpu.matmul %314, %315, %cst_452 {dimension_numbers = #tpu.dot_dimension_numbers<[1], [0], [0], [1], [0, 0, 1, 1], [], []>} : vector<40x80xf32>, vector<80x160xf32>, vector<40x160xf32> -> vector<40x160xf32>
    %317 = arith.maximumf %312, %316 : vector<40x160xf32>
    %c0_453 = arith.constant 0 : index
    %c0_454 = arith.constant 0 : index
    %c0_455 = arith.constant 0 : index
    %318 = vector.load %arg9[%c0_453, %c0_454, %c0_455] : memref<2x160x80xf32, #tpu.memory_space<vmem>>, vector<1x160x80xf32>
    %319 = vector.shape_cast %318 : vector<1x160x80xf32> to vector<160x80xf32>
    %cst_456 = arith.constant dense<0.000000e+00> : vector<40x80xf32>
    %320 = tpu.matmul %317, %319, %cst_456 {dimension_numbers = #tpu.dot_dimension_numbers<[1], [0], [0], [1], [0, 0, 1, 1], [], []>} : vector<40x160xf32>, vector<160x80xf32>, vector<40x80xf32> -> vector<40x80xf32>
    %c1_457 = arith.constant 1 : index
    %c0_458 = arith.constant 0 : index
    %c0_459 = arith.constant 0 : index
    %321 = vector.load %arg9[%c1_457, %c0_458, %c0_459] : memref<2x160x80xf32, #tpu.memory_space<vmem>>, vector<1x160x80xf32>
    %322 = vector.shape_cast %321 : vector<1x160x80xf32> to vector<160x80xf32>
    %cst_460 = arith.constant dense<0.000000e+00> : vector<40x80xf32>
    %323 = tpu.matmul %317, %322, %cst_460 {dimension_numbers = #tpu.dot_dimension_numbers<[1], [0], [0], [1], [0, 0, 1, 1], [], []>} : vector<40x160xf32>, vector<160x80xf32>, vector<40x80xf32> -> vector<40x80xf32>
    %324 = arith.maximumf %320, %323 : vector<40x80xf32>
    %cst_461 = arith.constant 0.000000e+00 : f32
    %325 = vector.broadcast %cst_461 : f32 to vector<40x80xf32>
    %326 = arith.maximumf %324, %325 : vector<40x80xf32>
    %327 = vector.extract_strided_slice %326 {offsets = [0, 0], sizes = [1, 80], strides = [1, 1]} : vector<40x80xf32> to vector<1x80xf32>
    %c0_462 = arith.constant 0 : index
    %c0_463 = arith.constant 0 : index
    %328 = vector.load %arg22[%c0_462, %c0_463] : memref<8x400xf32, #tpu.memory_space<vmem>>, vector<1x80xf32>
    tpu.vector_store %arg22[%c0_462, %c0_463], %327 {strides = array<i32>} : memref<8x400xf32, #tpu.memory_space<vmem>>, vector<1x80xf32>,
    %329 = vector.extract_strided_slice %326 {offsets = [1, 0], sizes = [1, 80], strides = [1, 1]} : vector<40x80xf32> to vector<1x80xf32>
    %c0_464 = arith.constant 0 : index
    %c80 = arith.constant 80 : index
    %330 = vector.load %arg22[%c0_464, %c80] : memref<8x400xf32, #tpu.memory_space<vmem>>, vector<1x80xf32>
    tpu.vector_store %arg22[%c0_464, %c80], %329 {strides = array<i32>} : memref<8x400xf32, #tpu.memory_space<vmem>>, vector<1x80xf32>,
    %331 = vector.extract_strided_slice %326 {offsets = [2, 0], sizes = [1, 80], strides = [1, 1]} : vector<40x80xf32> to vector<1x80xf32>
    %c0_465 = arith.constant 0 : index
    %c160 = arith.constant 160 : index
    %332 = vector.load %arg22[%c0_465, %c160] : memref<8x400xf32, #tpu.memory_space<vmem>>, vector<1x80xf32>
    tpu.vector_store %arg22[%c0_465, %c160], %331 {strides = array<i32>} : memref<8x400xf32, #tpu.memory_space<vmem>>, vector<1x80xf32>,
    %333 = vector.extract_strided_slice %326 {offsets = [3, 0], sizes = [1, 80], strides = [1, 1]} : vector<40x80xf32> to vector<1x80xf32>
    %c0_466 = arith.constant 0 : index
    %c240 = arith.constant 240 : index
    %334 = vector.load %arg22[%c0_466, %c240] : memref<8x400xf32, #tpu.memory_space<vmem>>, vector<1x80xf32>
    tpu.vector_store %arg22[%c0_466, %c240], %333 {strides = array<i32>} : memref<8x400xf32, #tpu.memory_space<vmem>>, vector<1x80xf32>,
    %335 = vector.extract_strided_slice %326 {offsets = [4, 0], sizes = [1, 80], strides = [1, 1]} : vector<40x80xf32> to vector<1x80xf32>
    %c0_467 = arith.constant 0 : index
    %c320 = arith.constant 320 : index
    %336 = vector.load %arg22[%c0_467, %c320] : memref<8x400xf32, #tpu.memory_space<vmem>>, vector<1x80xf32>
    tpu.vector_store %arg22[%c0_467, %c320], %335 {strides = array<i32>} : memref<8x400xf32, #tpu.memory_space<vmem>>, vector<1x80xf32>,
    %337 = vector.extract_strided_slice %326 {offsets = [5, 0], sizes = [1, 80], strides = [1, 1]} : vector<40x80xf32> to vector<1x80xf32>
    %c1_468 = arith.constant 1 : index
    %c0_469 = arith.constant 0 : index
    %338 = vector.load %arg22[%c1_468, %c0_469] : memref<8x400xf32, #tpu.memory_space<vmem>>, vector<1x80xf32>
    tpu.vector_store %arg22[%c1_468, %c0_469], %337 {strides = array<i32>} : memref<8x400xf32, #tpu.memory_space<vmem>>, vector<1x80xf32>,
    %339 = vector.extract_strided_slice %326 {offsets = [6, 0], sizes = [1, 80], strides = [1, 1]} : vector<40x80xf32> to vector<1x80xf32>
    %c1_470 = arith.constant 1 : index
    %c80_471 = arith.constant 80 : index
    %340 = vector.load %arg22[%c1_470, %c80_471] : memref<8x400xf32, #tpu.memory_space<vmem>>, vector<1x80xf32>
    tpu.vector_store %arg22[%c1_470, %c80_471], %339 {strides = array<i32>} : memref<8x400xf32, #tpu.memory_space<vmem>>, vector<1x80xf32>,
    %341 = vector.extract_strided_slice %326 {offsets = [7, 0], sizes = [1, 80], strides = [1, 1]} : vector<40x80xf32> to vector<1x80xf32>
    %c1_472 = arith.constant 1 : index
    %c160_473 = arith.constant 160 : index
    %342 = vector.load %arg22[%c1_472, %c160_473] : memref<8x400xf32, #tpu.memory_space<vmem>>, vector<1x80xf32>
    tpu.vector_store %arg22[%c1_472, %c160_473], %341 {strides = array<i32>} : memref<8x400xf32, #tpu.memory_space<vmem>>, vector<1x80xf32>,
    %343 = vector.extract_strided_slice %326 {offsets = [8, 0], sizes = [1, 80], strides = [1, 1]} : vector<40x80xf32> to vector<1x80xf32>
    %c1_474 = arith.constant 1 : index
    %c240_475 = arith.constant 240 : index
    %344 = vector.load %arg22[%c1_474, %c240_475] : memref<8x400xf32, #tpu.memory_space<vmem>>, vector<1x80xf32>
    tpu.vector_store %arg22[%c1_474, %c240_475], %343 {strides = array<i32>} : memref<8x400xf32, #tpu.memory_space<vmem>>, vector<1x80xf32>,
    %345 = vector.extract_strided_slice %326 {offsets = [9, 0], sizes = [1, 80], strides = [1, 1]} : vector<40x80xf32> to vector<1x80xf32>
    %c1_476 = arith.constant 1 : index
    %c320_477 = arith.constant 320 : index
    %346 = vector.load %arg22[%c1_476, %c320_477] : memref<8x400xf32, #tpu.memory_space<vmem>>, vector<1x80xf32>
    tpu.vector_store %arg22[%c1_476, %c320_477], %345 {strides = array<i32>} : memref<8x400xf32, #tpu.memory_space<vmem>>, vector<1x80xf32>,
    %347 = vector.extract_strided_slice %326 {offsets = [10, 0], sizes = [1, 80], strides = [1, 1]} : vector<40x80xf32> to vector<1x80xf32>
    %c2_478 = arith.constant 2 : index
    %c0_479 = arith.constant 0 : index
    %348 = vector.load %arg22[%c2_478, %c0_479] : memref<8x400xf32, #tpu.memory_space<vmem>>, vector<1x80xf32>
    tpu.vector_store %arg22[%c2_478, %c0_479], %347 {strides = array<i32>} : memref<8x400xf32, #tpu.memory_space<vmem>>, vector<1x80xf32>,
    %349 = vector.extract_strided_slice %326 {offsets = [11, 0], sizes = [1, 80], strides = [1, 1]} : vector<40x80xf32> to vector<1x80xf32>
    %c2_480 = arith.constant 2 : index
    %c80_481 = arith.constant 80 : index
    %350 = vector.load %arg22[%c2_480, %c80_481] : memref<8x400xf32, #tpu.memory_space<vmem>>, vector<1x80xf32>
    tpu.vector_store %arg22[%c2_480, %c80_481], %349 {strides = array<i32>} : memref<8x400xf32, #tpu.memory_space<vmem>>, vector<1x80xf32>,
    %351 = vector.extract_strided_slice %326 {offsets = [12, 0], sizes = [1, 80], strides = [1, 1]} : vector<40x80xf32> to vector<1x80xf32>
    %c2_482 = arith.constant 2 : index
    %c160_483 = arith.constant 160 : index
    %352 = vector.load %arg22[%c2_482, %c160_483] : memref<8x400xf32, #tpu.memory_space<vmem>>, vector<1x80xf32>
    tpu.vector_store %arg22[%c2_482, %c160_483], %351 {strides = array<i32>} : memref<8x400xf32, #tpu.memory_space<vmem>>, vector<1x80xf32>,
    %353 = vector.extract_strided_slice %326 {offsets = [13, 0], sizes = [1, 80], strides = [1, 1]} : vector<40x80xf32> to vector<1x80xf32>
    %c2_484 = arith.constant 2 : index
    %c240_485 = arith.constant 240 : index
    %354 = vector.load %arg22[%c2_484, %c240_485] : memref<8x400xf32, #tpu.memory_space<vmem>>, vector<1x80xf32>
    tpu.vector_store %arg22[%c2_484, %c240_485], %353 {strides = array<i32>} : memref<8x400xf32, #tpu.memory_space<vmem>>, vector<1x80xf32>,
    %355 = vector.extract_strided_slice %326 {offsets = [14, 0], sizes = [1, 80], strides = [1, 1]} : vector<40x80xf32> to vector<1x80xf32>
    %c2_486 = arith.constant 2 : index
    %c320_487 = arith.constant 320 : index
    %356 = vector.load %arg22[%c2_486, %c320_487] : memref<8x400xf32, #tpu.memory_space<vmem>>, vector<1x80xf32>
    tpu.vector_store %arg22[%c2_486, %c320_487], %355 {strides = array<i32>} : memref<8x400xf32, #tpu.memory_space<vmem>>, vector<1x80xf32>,
    %357 = vector.extract_strided_slice %326 {offsets = [15, 0], sizes = [1, 80], strides = [1, 1]} : vector<40x80xf32> to vector<1x80xf32>
    %c3_488 = arith.constant 3 : index
    %c0_489 = arith.constant 0 : index
    %358 = vector.load %arg22[%c3_488, %c0_489] : memref<8x400xf32, #tpu.memory_space<vmem>>, vector<1x80xf32>
    tpu.vector_store %arg22[%c3_488, %c0_489], %357 {strides = array<i32>} : memref<8x400xf32, #tpu.memory_space<vmem>>, vector<1x80xf32>,
    %359 = vector.extract_strided_slice %326 {offsets = [16, 0], sizes = [1, 80], strides = [1, 1]} : vector<40x80xf32> to vector<1x80xf32>
    %c3_490 = arith.constant 3 : index
    %c80_491 = arith.constant 80 : index
    %360 = vector.load %arg22[%c3_490, %c80_491] : memref<8x400xf32, #tpu.memory_space<vmem>>, vector<1x80xf32>
    tpu.vector_store %arg22[%c3_490, %c80_491], %359 {strides = array<i32>} : memref<8x400xf32, #tpu.memory_space<vmem>>, vector<1x80xf32>,
    %361 = vector.extract_strided_slice %326 {offsets = [17, 0], sizes = [1, 80], strides = [1, 1]} : vector<40x80xf32> to vector<1x80xf32>
    %c3_492 = arith.constant 3 : index
    %c160_493 = arith.constant 160 : index
    %362 = vector.load %arg22[%c3_492, %c160_493] : memref<8x400xf32, #tpu.memory_space<vmem>>, vector<1x80xf32>
    tpu.vector_store %arg22[%c3_492, %c160_493], %361 {strides = array<i32>} : memref<8x400xf32, #tpu.memory_space<vmem>>, vector<1x80xf32>,
    %363 = vector.extract_strided_slice %326 {offsets = [18, 0], sizes = [1, 80], strides = [1, 1]} : vector<40x80xf32> to vector<1x80xf32>
    %c3_494 = arith.constant 3 : index
    %c240_495 = arith.constant 240 : index
    %364 = vector.load %arg22[%c3_494, %c240_495] : memref<8x400xf32, #tpu.memory_space<vmem>>, vector<1x80xf32>
    tpu.vector_store %arg22[%c3_494, %c240_495], %363 {strides = array<i32>} : memref<8x400xf32, #tpu.memory_space<vmem>>, vector<1x80xf32>,
    %365 = vector.extract_strided_slice %326 {offsets = [19, 0], sizes = [1, 80], strides = [1, 1]} : vector<40x80xf32> to vector<1x80xf32>
    %c3_496 = arith.constant 3 : index
    %c320_497 = arith.constant 320 : index
    %366 = vector.load %arg22[%c3_496, %c320_497] : memref<8x400xf32, #tpu.memory_space<vmem>>, vector<1x80xf32>
    tpu.vector_store %arg22[%c3_496, %c320_497], %365 {strides = array<i32>} : memref<8x400xf32, #tpu.memory_space<vmem>>, vector<1x80xf32>,
    %367 = vector.extract_strided_slice %326 {offsets = [20, 0], sizes = [1, 80], strides = [1, 1]} : vector<40x80xf32> to vector<1x80xf32>
    %c4_498 = arith.constant 4 : index
    %c0_499 = arith.constant 0 : index
    %368 = vector.load %arg22[%c4_498, %c0_499] : memref<8x400xf32, #tpu.memory_space<vmem>>, vector<1x80xf32>
    tpu.vector_store %arg22[%c4_498, %c0_499], %367 {strides = array<i32>} : memref<8x400xf32, #tpu.memory_space<vmem>>, vector<1x80xf32>,
    %369 = vector.extract_strided_slice %326 {offsets = [21, 0], sizes = [1, 80], strides = [1, 1]} : vector<40x80xf32> to vector<1x80xf32>
    %c4_500 = arith.constant 4 : index
    %c80_501 = arith.constant 80 : index
    %370 = vector.load %arg22[%c4_500, %c80_501] : memref<8x400xf32, #tpu.memory_space<vmem>>, vector<1x80xf32>
    tpu.vector_store %arg22[%c4_500, %c80_501], %369 {strides = array<i32>} : memref<8x400xf32, #tpu.memory_space<vmem>>, vector<1x80xf32>,
    %371 = vector.extract_strided_slice %326 {offsets = [22, 0], sizes = [1, 80], strides = [1, 1]} : vector<40x80xf32> to vector<1x80xf32>
    %c4_502 = arith.constant 4 : index
    %c160_503 = arith.constant 160 : index
    %372 = vector.load %arg22[%c4_502, %c160_503] : memref<8x400xf32, #tpu.memory_space<vmem>>, vector<1x80xf32>
    tpu.vector_store %arg22[%c4_502, %c160_503], %371 {strides = array<i32>} : memref<8x400xf32, #tpu.memory_space<vmem>>, vector<1x80xf32>,
    %373 = vector.extract_strided_slice %326 {offsets = [23, 0], sizes = [1, 80], strides = [1, 1]} : vector<40x80xf32> to vector<1x80xf32>
    %c4_504 = arith.constant 4 : index
    %c240_505 = arith.constant 240 : index
    %374 = vector.load %arg22[%c4_504, %c240_505] : memref<8x400xf32, #tpu.memory_space<vmem>>, vector<1x80xf32>
    tpu.vector_store %arg22[%c4_504, %c240_505], %373 {strides = array<i32>} : memref<8x400xf32, #tpu.memory_space<vmem>>, vector<1x80xf32>,
    %375 = vector.extract_strided_slice %326 {offsets = [24, 0], sizes = [1, 80], strides = [1, 1]} : vector<40x80xf32> to vector<1x80xf32>
    %c4_506 = arith.constant 4 : index
    %c320_507 = arith.constant 320 : index
    %376 = vector.load %arg22[%c4_506, %c320_507] : memref<8x400xf32, #tpu.memory_space<vmem>>, vector<1x80xf32>
    tpu.vector_store %arg22[%c4_506, %c320_507], %375 {strides = array<i32>} : memref<8x400xf32, #tpu.memory_space<vmem>>, vector<1x80xf32>,
    %377 = vector.extract_strided_slice %326 {offsets = [25, 0], sizes = [1, 80], strides = [1, 1]} : vector<40x80xf32> to vector<1x80xf32>
    %c5_508 = arith.constant 5 : index
    %c0_509 = arith.constant 0 : index
    %378 = vector.load %arg22[%c5_508, %c0_509] : memref<8x400xf32, #tpu.memory_space<vmem>>, vector<1x80xf32>
    tpu.vector_store %arg22[%c5_508, %c0_509], %377 {strides = array<i32>} : memref<8x400xf32, #tpu.memory_space<vmem>>, vector<1x80xf32>,
    %379 = vector.extract_strided_slice %326 {offsets = [26, 0], sizes = [1, 80], strides = [1, 1]} : vector<40x80xf32> to vector<1x80xf32>
    %c5_510 = arith.constant 5 : index
    %c80_511 = arith.constant 80 : index
    %380 = vector.load %arg22[%c5_510, %c80_511] : memref<8x400xf32, #tpu.memory_space<vmem>>, vector<1x80xf32>
    tpu.vector_store %arg22[%c5_510, %c80_511], %379 {strides = array<i32>} : memref<8x400xf32, #tpu.memory_space<vmem>>, vector<1x80xf32>,
    %381 = vector.extract_strided_slice %326 {offsets = [27, 0], sizes = [1, 80], strides = [1, 1]} : vector<40x80xf32> to vector<1x80xf32>
    %c5_512 = arith.constant 5 : index
    %c160_513 = arith.constant 160 : index
    %382 = vector.load %arg22[%c5_512, %c160_513] : memref<8x400xf32, #tpu.memory_space<vmem>>, vector<1x80xf32>
    tpu.vector_store %arg22[%c5_512, %c160_513], %381 {strides = array<i32>} : memref<8x400xf32, #tpu.memory_space<vmem>>, vector<1x80xf32>,
    %383 = vector.extract_strided_slice %326 {offsets = [28, 0], sizes = [1, 80], strides = [1, 1]} : vector<40x80xf32> to vector<1x80xf32>
    %c5_514 = arith.constant 5 : index
    %c240_515 = arith.constant 240 : index
    %384 = vector.load %arg22[%c5_514, %c240_515] : memref<8x400xf32, #tpu.memory_space<vmem>>, vector<1x80xf32>
    tpu.vector_store %arg22[%c5_514, %c240_515], %383 {strides = array<i32>} : memref<8x400xf32, #tpu.memory_space<vmem>>, vector<1x80xf32>,
    %385 = vector.extract_strided_slice %326 {offsets = [29, 0], sizes = [1, 80], strides = [1, 1]} : vector<40x80xf32> to vector<1x80xf32>
    %c5_516 = arith.constant 5 : index
    %c320_517 = arith.constant 320 : index
    %386 = vector.load %arg22[%c5_516, %c320_517] : memref<8x400xf32, #tpu.memory_space<vmem>>, vector<1x80xf32>
    tpu.vector_store %arg22[%c5_516, %c320_517], %385 {strides = array<i32>} : memref<8x400xf32, #tpu.memory_space<vmem>>, vector<1x80xf32>,
    %387 = vector.extract_strided_slice %326 {offsets = [30, 0], sizes = [1, 80], strides = [1, 1]} : vector<40x80xf32> to vector<1x80xf32>
    %c6_518 = arith.constant 6 : index
    %c0_519 = arith.constant 0 : index
    %388 = vector.load %arg22[%c6_518, %c0_519] : memref<8x400xf32, #tpu.memory_space<vmem>>, vector<1x80xf32>
    tpu.vector_store %arg22[%c6_518, %c0_519], %387 {strides = array<i32>} : memref<8x400xf32, #tpu.memory_space<vmem>>, vector<1x80xf32>,
    %389 = vector.extract_strided_slice %326 {offsets = [31, 0], sizes = [1, 80], strides = [1, 1]} : vector<40x80xf32> to vector<1x80xf32>
    %c6_520 = arith.constant 6 : index
    %c80_521 = arith.constant 80 : index
    %390 = vector.load %arg22[%c6_520, %c80_521] : memref<8x400xf32, #tpu.memory_space<vmem>>, vector<1x80xf32>
    tpu.vector_store %arg22[%c6_520, %c80_521], %389 {strides = array<i32>} : memref<8x400xf32, #tpu.memory_space<vmem>>, vector<1x80xf32>,
    %391 = vector.extract_strided_slice %326 {offsets = [32, 0], sizes = [1, 80], strides = [1, 1]} : vector<40x80xf32> to vector<1x80xf32>
    %c6_522 = arith.constant 6 : index
    %c160_523 = arith.constant 160 : index
    %392 = vector.load %arg22[%c6_522, %c160_523] : memref<8x400xf32, #tpu.memory_space<vmem>>, vector<1x80xf32>
    tpu.vector_store %arg22[%c6_522, %c160_523], %391 {strides = array<i32>} : memref<8x400xf32, #tpu.memory_space<vmem>>, vector<1x80xf32>,
    %393 = vector.extract_strided_slice %326 {offsets = [33, 0], sizes = [1, 80], strides = [1, 1]} : vector<40x80xf32> to vector<1x80xf32>
    %c6_524 = arith.constant 6 : index
    %c240_525 = arith.constant 240 : index
    %394 = vector.load %arg22[%c6_524, %c240_525] : memref<8x400xf32, #tpu.memory_space<vmem>>, vector<1x80xf32>
    tpu.vector_store %arg22[%c6_524, %c240_525], %393 {strides = array<i32>} : memref<8x400xf32, #tpu.memory_space<vmem>>, vector<1x80xf32>,
    %395 = vector.extract_strided_slice %326 {offsets = [34, 0], sizes = [1, 80], strides = [1, 1]} : vector<40x80xf32> to vector<1x80xf32>
    %c6_526 = arith.constant 6 : index
    %c320_527 = arith.constant 320 : index
    %396 = vector.load %arg22[%c6_526, %c320_527] : memref<8x400xf32, #tpu.memory_space<vmem>>, vector<1x80xf32>
    tpu.vector_store %arg22[%c6_526, %c320_527], %395 {strides = array<i32>} : memref<8x400xf32, #tpu.memory_space<vmem>>, vector<1x80xf32>,
    %397 = vector.extract_strided_slice %326 {offsets = [35, 0], sizes = [1, 80], strides = [1, 1]} : vector<40x80xf32> to vector<1x80xf32>
    %c7_528 = arith.constant 7 : index
    %c0_529 = arith.constant 0 : index
    %398 = vector.load %arg22[%c7_528, %c0_529] : memref<8x400xf32, #tpu.memory_space<vmem>>, vector<1x80xf32>
    tpu.vector_store %arg22[%c7_528, %c0_529], %397 {strides = array<i32>} : memref<8x400xf32, #tpu.memory_space<vmem>>, vector<1x80xf32>,
    %399 = vector.extract_strided_slice %326 {offsets = [36, 0], sizes = [1, 80], strides = [1, 1]} : vector<40x80xf32> to vector<1x80xf32>
    %c7_530 = arith.constant 7 : index
    %c80_531 = arith.constant 80 : index
    %400 = vector.load %arg22[%c7_530, %c80_531] : memref<8x400xf32, #tpu.memory_space<vmem>>, vector<1x80xf32>
    tpu.vector_store %arg22[%c7_530, %c80_531], %399 {strides = array<i32>} : memref<8x400xf32, #tpu.memory_space<vmem>>, vector<1x80xf32>,
    %401 = vector.extract_strided_slice %326 {offsets = [37, 0], sizes = [1, 80], strides = [1, 1]} : vector<40x80xf32> to vector<1x80xf32>
    %c7_532 = arith.constant 7 : index
    %c160_533 = arith.constant 160 : index
    %402 = vector.load %arg22[%c7_532, %c160_533] : memref<8x400xf32, #tpu.memory_space<vmem>>, vector<1x80xf32>
    tpu.vector_store %arg22[%c7_532, %c160_533], %401 {strides = array<i32>} : memref<8x400xf32, #tpu.memory_space<vmem>>, vector<1x80xf32>,
    %403 = vector.extract_strided_slice %326 {offsets = [38, 0], sizes = [1, 80], strides = [1, 1]} : vector<40x80xf32> to vector<1x80xf32>
    %c7_534 = arith.constant 7 : index
    %c240_535 = arith.constant 240 : index
    %404 = vector.load %arg22[%c7_534, %c240_535] : memref<8x400xf32, #tpu.memory_space<vmem>>, vector<1x80xf32>
    tpu.vector_store %arg22[%c7_534, %c240_535], %403 {strides = array<i32>} : memref<8x400xf32, #tpu.memory_space<vmem>>, vector<1x80xf32>,
    %405 = vector.extract_strided_slice %326 {offsets = [39, 0], sizes = [1, 80], strides = [1, 1]} : vector<40x80xf32> to vector<1x80xf32>
    %c7_536 = arith.constant 7 : index
    %c320_537 = arith.constant 320 : index
    %406 = vector.load %arg22[%c7_536, %c320_537] : memref<8x400xf32, #tpu.memory_space<vmem>>, vector<1x80xf32>
    tpu.vector_store %arg22[%c7_536, %c320_537], %405 {strides = array<i32>} : memref<8x400xf32, #tpu.memory_space<vmem>>, vector<1x80xf32>,
    %c0_538 = arith.constant 0 : index
    %c0_539 = arith.constant 0 : index
    %407 = vector.load %arg22[%c0_538, %c0_539] : memref<8x400xf32, #tpu.memory_space<vmem>>, vector<8x400xf32>
    %408 = arith.truncf %407 : vector<8x400xf32> to vector<8x400xbf16>
    %c0_540 = arith.constant 0 : index
    %c0_541 = arith.constant 0 : index
    %409 = vector.load %arg10[%c0_540, %c0_541] : memref<400x120xbf16, #tpu.memory_space<vmem>>, vector<400x120xbf16>
    %cst_542 = arith.constant dense<0.000000e+00> : vector<8x120xf32>
    %410 = tpu.matmul %408, %409, %cst_542 {dimension_numbers = #tpu.dot_dimension_numbers<[1], [0], [0], [1], [0, 0, 1, 1], [], []>} : vector<8x400xbf16>, vector<400x120xbf16>, vector<8x120xf32> -> vector<8x120xf32>
    %c0_543 = arith.constant 0 : index
    %c0_544 = arith.constant 0 : index
    %411 = vector.load %arg11[%c0_543, %c0_544] : memref<1x120xf32, #tpu.memory_space<vmem>>, vector<1x120xf32>
    %412 = vector.broadcast %411 : vector<1x120xf32> to vector<8x120xf32>
    %413 = arith.addf %410, %412 : vector<8x120xf32>
    %cst_545 = arith.constant 0.000000e+00 : f32
    %414 = vector.broadcast %cst_545 : f32 to vector<8x120xf32>
    %415 = arith.maximumf %413, %414 : vector<8x120xf32>
    %416 = arith.truncf %415 : vector<8x120xf32> to vector<8x120xbf16>
    %c0_546 = arith.constant 0 : index
    %c0_547 = arith.constant 0 : index
    %417 = vector.load %arg12[%c0_546, %c0_547] : memref<120x84xbf16, #tpu.memory_space<vmem>>, vector<120x84xbf16>
    %cst_548 = arith.constant dense<0.000000e+00> : vector<8x84xf32>
    %418 = tpu.matmul %416, %417, %cst_548 {dimension_numbers = #tpu.dot_dimension_numbers<[1], [0], [0], [1], [0, 0, 1, 1], [], []>} : vector<8x120xbf16>, vector<120x84xbf16>, vector<8x84xf32> -> vector<8x84xf32>
    %c0_549 = arith.constant 0 : index
    %c0_550 = arith.constant 0 : index
    %419 = vector.load %arg13[%c0_549, %c0_550] : memref<1x84xf32, #tpu.memory_space<vmem>>, vector<1x84xf32>
    %420 = vector.broadcast %419 : vector<1x84xf32> to vector<8x84xf32>
    %421 = arith.addf %418, %420 : vector<8x84xf32>
    %cst_551 = arith.constant 0.000000e+00 : f32
    %422 = vector.broadcast %cst_551 : f32 to vector<8x84xf32>
    %423 = arith.maximumf %421, %422 : vector<8x84xf32>
    %424 = arith.truncf %423 : vector<8x84xf32> to vector<8x84xbf16>
    %c0_552 = arith.constant 0 : index
    %c0_553 = arith.constant 0 : index
    %425 = vector.load %arg14[%c0_552, %c0_553] : memref<84x4xbf16, #tpu.memory_space<vmem>>, vector<84x4xbf16>
    %cst_554 = arith.constant dense<0.000000e+00> : vector<8x4xf32>
    %426 = tpu.matmul %424, %425, %cst_554 {dimension_numbers = #tpu.dot_dimension_numbers<[1], [0], [0], [1], [0, 0, 1, 1], [], []>} : vector<8x84xbf16>, vector<84x4xbf16>, vector<8x4xf32> -> vector<8x4xf32>
    %c0_555 = arith.constant 0 : index
    %c0_556 = arith.constant 0 : index
    %427 = vector.load %arg15[%c0_555, %c0_556] : memref<1x4xf32, #tpu.memory_space<vmem>>, vector<1x4xf32>
    %428 = vector.broadcast %427 : vector<1x4xf32> to vector<8x4xf32>
    %429 = arith.addf %426, %428 : vector<8x4xf32>
    %c0_557 = arith.constant 0 : index
    %c0_558 = arith.constant 0 : index
    %430 = vector.load %arg16[%c0_557, %c0_558] : memref<8x4xf32, #tpu.memory_space<vmem>>, vector<8x4xf32>
    tpu.vector_store %arg16[%c0_557, %c0_558], %429 {strides = array<i32>} : memref<8x4xf32, #tpu.memory_space<vmem>>, vector<8x4xf32>,
    return
  }
  func.func @transform_0(%arg0: i32) -> (i32, i32, i32) {
    %c0_i32 = arith.constant 0 : i32
    %c0_i32_0 = arith.constant 0 : i32
    %c0_i32_1 = arith.constant 0 : i32
    return %arg0, %c0_i32, %c0_i32_0 : i32, i32, i32
  }
  func.func @transform_1(%arg0: i32) -> (i32, i32, i32) {
    %c0_i32 = arith.constant 0 : i32
    %c0_i32_0 = arith.constant 0 : i32
    %c0_i32_1 = arith.constant 0 : i32
    %c0_i32_2 = arith.constant 0 : i32
    return %c0_i32, %c0_i32_0, %c0_i32_1 : i32, i32, i32
  }
  func.func @transform_2(%arg0: i32) -> (i32, i32) {
    %c0_i32 = arith.constant 0 : i32
    %c0_i32_0 = arith.constant 0 : i32
    %c0_i32_1 = arith.constant 0 : i32
    return %c0_i32, %c0_i32_0 : i32, i32
  }
  func.func @transform_3(%arg0: i32) -> (i32, i32, i32) {
    %c0_i32 = arith.constant 0 : i32
    %c0_i32_0 = arith.constant 0 : i32
    %c0_i32_1 = arith.constant 0 : i32
    %c0_i32_2 = arith.constant 0 : i32
    return %c0_i32, %c0_i32_0, %c0_i32_1 : i32, i32, i32
  }
  func.func @transform_4(%arg0: i32) -> (i32, i32, i32) {
    %c0_i32 = arith.constant 0 : i32
    %c0_i32_0 = arith.constant 0 : i32
    %c0_i32_1 = arith.constant 0 : i32
    %c0_i32_2 = arith.constant 0 : i32
    return %c0_i32, %c0_i32_0, %c0_i32_1 : i32, i32, i32
  }
  func.func @transform_5(%arg0: i32) -> (i32, i32, i32) {
    %c0_i32 = arith.constant 0 : i32
    %c0_i32_0 = arith.constant 0 : i32
    %c0_i32_1 = arith.constant 0 : i32
    %c0_i32_2 = arith.constant 0 : i32
    return %c0_i32, %c0_i32_0, %c0_i32_1 : i32, i32, i32
  }
  func.func @transform_6(%arg0: i32) -> (i32, i32) {
    %c0_i32 = arith.constant 0 : i32
    %c0_i32_0 = arith.constant 0 : i32
    %c0_i32_1 = arith.constant 0 : i32
    return %c0_i32, %c0_i32_0 : i32, i32
  }
  func.func @transform_7(%arg0: i32) -> (i32, i32, i32) {
    %c0_i32 = arith.constant 0 : i32
    %c0_i32_0 = arith.constant 0 : i32
    %c0_i32_1 = arith.constant 0 : i32
    %c0_i32_2 = arith.constant 0 : i32
    return %c0_i32, %c0_i32_0, %c0_i32_1 : i32, i32, i32
  }
  func.func @transform_8(%arg0: i32) -> (i32, i32, i32) {
    %c0_i32 = arith.constant 0 : i32
    %c0_i32_0 = arith.constant 0 : i32
    %c0_i32_1 = arith.constant 0 : i32
    %c0_i32_2 = arith.constant 0 : i32
    return %c0_i32, %c0_i32_0, %c0_i32_1 : i32, i32, i32
  }
  func.func @transform_9(%arg0: i32) -> (i32, i32) {
    %c0_i32 = arith.constant 0 : i32
    %c0_i32_0 = arith.constant 0 : i32
    %c0_i32_1 = arith.constant 0 : i32
    return %c0_i32, %c0_i32_0 : i32, i32
  }
  func.func @transform_10(%arg0: i32) -> (i32, i32) {
    %c0_i32 = arith.constant 0 : i32
    %c0_i32_0 = arith.constant 0 : i32
    %c0_i32_1 = arith.constant 0 : i32
    return %c0_i32, %c0_i32_0 : i32, i32
  }
  func.func @transform_11(%arg0: i32) -> (i32, i32) {
    %c0_i32 = arith.constant 0 : i32
    %c0_i32_0 = arith.constant 0 : i32
    %c0_i32_1 = arith.constant 0 : i32
    return %c0_i32, %c0_i32_0 : i32, i32
  }
  func.func @transform_12(%arg0: i32) -> (i32, i32) {
    %c0_i32 = arith.constant 0 : i32
    %c0_i32_0 = arith.constant 0 : i32
    %c0_i32_1 = arith.constant 0 : i32
    return %c0_i32, %c0_i32_0 : i32, i32
  }
  func.func @transform_13(%arg0: i32) -> (i32, i32) {
    %c0_i32 = arith.constant 0 : i32
    %c0_i32_0 = arith.constant 0 : i32
    %c0_i32_1 = arith.constant 0 : i32
    return %c0_i32, %c0_i32_0 : i32, i32
  }
  func.func @transform_14(%arg0: i32) -> (i32, i32) {
    %c0_i32 = arith.constant 0 : i32
    %c0_i32_0 = arith.constant 0 : i32
    %c0_i32_1 = arith.constant 0 : i32
    return %c0_i32, %c0_i32_0 : i32, i32
  }
  func.func @transform_15(%arg0: i32) -> (i32, i32) {
    %c0_i32 = arith.constant 0 : i32
    %c0_i32_0 = arith.constant 0 : i32
    return %arg0, %c0_i32 : i32, i32
  }
}

</mosaic_0001>

<bundles_post_ra>
// kernel: tile.13
= control target key start
LH: loop header
LB: loop body
LE: loop exit
PB: predicated region body
PF: predicated region fallthrough
CT: control target
= control target key end

     0   :  { %s40_s0 = inlined_call_operand.vmem [shape: f32[6], index: 0, kind: input, shape index: {}]   ;;  %s41_s1 = inlined_call_operand.vmem [shape: f32[28,6], index: 1, kind: output, shape index: {}]  }
   0x1   :  { %v4_v0 = vld [vmem:[%s40_s0] ss:$0 sm:$0xff] }
   0x2   :  { %5 = vst [vmem:[%s41_s1] sm:$0xff] %v4_v0  ;;  %12 = vst [vmem:[%s41_s1 + $0x8] sm:$0xff] %v4_v0 }
   0x3   :  { %13 = vst [vmem:[%s41_s1 + $0x10] sm:$0xff] %v4_v0  ;;  %14 = vst [vmem:[%s41_s1 + $0x18] sm:$0xff] %v4_v0 }

// kernel: tile.14
= control target key start
LH: loop header
LB: loop body
LE: loop exit
PB: predicated region body
PF: predicated region fallthrough
CT: control target
= control target key end

     0   :  { %vm9_vm0 = vcmask 15360   ;;  %s247_s12 = smov 126   ;;  %s248_s13 = smov 114   ;;  %vm3_vm1 = vcmask 48128   ;;  %vm13_vm2 = vcmask 31744   ;;  %vm16_vm3 = vcmask 1048560   ;;  %s377_s0 = inlined_call_operand.vmem [shape: f32[28,6], index: 0, kind: input, shape index: {}]   ;;  %s378_s1 = inlined_call_operand.vmem [shape: f32[1,168], index: 1, kind: output, shape index: {}]  }
   0x1   :  { %v191_v0 = vld [vmem:[%s377_s0 + $0x15] sm:$0x1]   ;;  %v194_v3 = vld [vmem:[%s377_s0 + $0x13] sm:$0x1]   ;;  %v193_v4 = vld [vmem:[%s377_s0 + $0x14] sm:$0x1]  }
   0x2   :  { %v192_v1 = vld [vmem:[%s377_s0 + $0x15] sm:$0x1]   ;;  %26 = vrot.lane.b32.xlu1 %v194_v3, %s248_s13  ;;  %v195_v5 = vld [vmem:[%s377_s0 + $0x12] sm:$0x1]   ;;  %s249_s18 = smov 120   ;;  %s250_s19 = smov 108  }
   0x3   :  { %v10_v2 = vsel %vm9_vm0, %v192_v1, %v191_v0  ;;  %v196_v6 = vld [vmem:[%s377_s0 + $0x11] sm:$0x1]   ;;  %v197_v7 = vld [vmem:[%s377_s0 + $0x10] sm:$0x1]   ;;  %s251_s24 = smov 102   ;;  %s252_s25 = smov 96  }
   0x4   :  { %11 = vrot.lane.b32.xlu0 %v10_v2, %s247_s12  ;;  %v198_v8 = vld [vmem:[%s377_s0 + $0xf] sm:$0x1]   ;;  %v199_v9 = vld [vmem:[%s377_s0 + $0xe] sm:$0x1]   ;;  %s253_s30 = smov 90   ;;  %s254_s2 = smov 84  }
   0x5   :  { %v2_v10 = vld [vmem:[%s377_s0] sm:$0x1]   ;;  %v200_v11 = vld [vmem:[%s377_s0 + $0xd] sm:$0x1]   ;;  %v201_v12 = vld [vmem:[%s377_s0 + $0xc] sm:$0x1]  }
   0x6   :  { %32 = vrot.lane.b32.xlu1 %v195_v5, %s250_s19  ;;  %4 = vst.msk [vmem:[#allocation0] sm:$0x1] %vm3_vm1, %v2_v10   ;;  %s255_s9 = smov 78   ;;  %s256_s10 = smov 72   ;;  %v202_v13 = vld [vmem:[%s377_s0 + $0xb] sm:$0x1]  }
   0x7   :  { %v203_v14 = vld [vmem:[%s377_s0 + $0xa] sm:$0x1]   ;;  %s257_s15 = smov 66   ;;  %s258_s16 = smov 60   ;;  %v204_v15 = vld [vmem:[%s377_s0 + $0x9] sm:$0x1]  }
   0x8   :  { %20 = vrot.lane.b32.xlu0 %v193_v4, %s249_s18  ;;  %v205_v16 = vld [vmem:[%s377_s0 + $0x8] sm:$0x1]   ;;  %s259_s21 = smov 54   ;;  %s260_s22 = smov 48   ;;  %v206_v17 = vld [vmem:[%s377_s0 + $0x7] sm:$0x1]  }
   0x9   :  { %v207_v18 = vld [vmem:[%s377_s0 + $0x6] sm:$0x1]   ;;  %s261_s27 = smov 42   ;;  %s262_s28 = smov 36   ;;  %v208_v19 = vld [vmem:[%s377_s0 + $0x1b] sm:$0x1]  }
   0xa   :  { %44 = vrot.lane.b32.xlu1 %v197_v7, %s252_s25  ;;  %v209_v20 = vld [vmem:[%s377_s0 + $0x5] sm:$0x1]   ;;  %s263_s4 = smov 34   ;;  %s264_s5 = smov 30   ;;  %v210_v21 = vld [vmem:[%s377_s0 + $0x1a] sm:$0x1]  }
   0xb   :  { %v211_v22 = vld [vmem:[%s377_s0 + $0x4] sm:$0x1]   ;;  %s266_s11 = smov 24   ;;  %v212_v23 = vld [vmem:[%s377_s0 + $0x19] sm:$0x1]   ;;  %s268_s17 = smov 18  }
   0xc   :  { %38 = vrot.lane.b32.xlu0 %v196_v6, %s251_s24  ;;  %v213_v24 = vld [vmem:[%s377_s0 + $0x3] sm:$0x1]   ;;  %v214_v25 = vld [vmem:[%s377_s0 + $0x18] sm:$0x1]   ;;  %v215_v26 = vld [vmem:[%s377_s0 + $0x2] sm:$0x1]  }
   0xd   :  { %s270_s23 = smov 12   ;;  %v216_v27 = vld [vmem:[%s377_s0 + $0x17] sm:$0x1]   ;;  %v217_v28 = vld [vmem:[%s377_s0 + $0x1] sm:$0x1]   ;;  %s272_s29 = smov 6  }
   0xe   :  { %56 = vrot.lane.b32.xlu1 %v199_v9, %s254_s2  ;;  %v218_v29 = vld [vmem:[%s377_s0 + $0x16] sm:$0x1]   ;;  %s273_s0 = smov 4   ;;  %vm22_vm4 = vcmask 1032128   ;;  %vm28_vm5 = vcmask 982928   ;;  %vm34_vm6 = vcmask 933728  }
   0xf   :  { %vm40_vm7 = vcmask 884528   ;;  %vm46_vm8 = vcmask 835328   ;;  %vm52_vm9 = vcmask 786128   ;;  %vm58_vm10 = vcmask 736928  }
  0x10   :  { %50 = vrot.lane.b32.xlu0 %v198_v8, %s253_s30  ;;  %vm64_vm11 = vcmask 687728   ;;  %vm70_vm12 = vcmask 638528   ;;  %vm76_vm13 = vcmask 589328   ;;  %vm82_vm14 = vcmask 540128  }
  0x11   :  { %vm88_vm15 = vcmask 490928   ;;  %vm94_vm0 = vcmask 441728   ;;  %vm100_vm1 = vcmask 392528  }
  0x12   :  { %68 = vrot.lane.b32.xlu1 %v201_v12, %s256_s10  ;;  %s265_s10 = smov 28  }
  0x14   :  { %62 = vrot.lane.b32.xlu0 %v200_v11, %s255_s9 }
  0x16   :  { %80 = vrot.lane.b32.xlu1 %v203_v14, %s258_s16  ;;  %s267_s16 = smov 22  }
  0x18   :  { %74 = vrot.lane.b32.xlu0 %v202_v13, %s257_s15 }
  0x1a   :  { %92 = vrot.lane.b32.xlu1 %v205_v16, %s260_s22  ;;  %s269_s22 = smov 16  }
  0x1c   :  { %86 = vrot.lane.b32.xlu0 %v204_v15, %s259_s21 }
  0x1e   :  { %104 = vrot.lane.b32.xlu1 %v207_v18, %s262_s28  ;;  %s271_s28 = smov 10  }
  0x20   :  { %98 = vrot.lane.b32.xlu0 %v206_v17, %s261_s27 }
  0x22   :  { %117 = vrot.lane.b32.xlu1 %v209_v20, %s264_s5 }
  0x24   :  { %110 = vrot.lane.b32.xlu0 %v208_v19, %s263_s4 }
  0x26   :  { %130 = vrot.lane.b32.xlu1 %v211_v22, %s266_s11 }
  0x28   :  { %123 = vrot.lane.b32.xlu0 %v210_v21, %s265_s10 }
  0x2a   :  { %143 = vrot.lane.b32.xlu1 %v213_v24, %s268_s17 }
  0x2c   :  { %136 = vrot.lane.b32.xlu0 %v212_v23, %s267_s16 }
  0x2e   :  { %156 = vrot.lane.b32.xlu1 %v215_v26, %s270_s23 }
  0x30   :  { %149 = vrot.lane.b32.xlu0 %v214_v25, %s269_s22 }
  0x32   :  { %169 = vrot.lane.b32.xlu1 %v217_v28, %s272_s29 }
  0x34   :  { %162 = vrot.lane.b32.xlu0 %v216_v27, %s271_s28 }
  0x38   :  { %175 = vrot.lane.b32.xlu0 %v218_v29, %s273_s0 }
  0x74   :  { %v27_v31 = vpop.permute.xlu1 %26  }
  0x76   :  { %v12_v30 = vpop.permute.xlu0 %11  }
  0x77   :  { %15 = vst.msk [vmem:[#allocation0 + $0x8] sm:$0x1] %vm13_vm2, %v12_v30   ;;  %vm106_vm2 = vcmask 343328  }
  0x78   :  { %17 = vst.msk [vmem:[#allocation0] sm:$0x1] %vm16_vm3, %v12_v30   ;;  %v33_v33 = vpop.permute.xlu1 %32   ;;  %vm112_vm3 = vcmask 326928  }
  0x7a   :  { %v21_v32 = vpop.permute.xlu0 %20  }
  0x7b   :  { %23 = vst.msk [vmem:[#allocation0] sm:$0x1] %vm22_vm4, %v21_v32   ;;  %vm119_vm4 = vcmask 294128  }
  0x7c   :  { %29 = vst.msk [vmem:[#allocation0] sm:$0x1] %vm28_vm5, %v27_v31   ;;  %v45_v35 = vpop.permute.xlu1 %44   ;;  %vm125_vm5 = vcmask 277728  }
  0x7d   :  { %35 = vst.msk [vmem:[#allocation0] sm:$0x1] %vm34_vm6, %v33_v33   ;;  %vm132_vm6 = vcmask 244928  }
  0x7e   :  { %v39_v34 = vpop.permute.xlu0 %38  }
  0x7f   :  { %41 = vst.msk [vmem:[#allocation0] sm:$0x1] %vm40_vm7, %v39_v34   ;;  %vm138_vm7 = vcmask 228528  }
  0x80   :  { %47 = vst.msk [vmem:[#allocation0] sm:$0x1] %vm46_vm8, %v45_v35   ;;  %v57_v37 = vpop.permute.xlu1 %56   ;;  %vm145_vm8 = vcmask 195728  }
  0x82   :  { %v51_v36 = vpop.permute.xlu0 %50  }
  0x83   :  { %53 = vst.msk [vmem:[#allocation0] sm:$0x1] %vm52_vm9, %v51_v36   ;;  %vm151_vm9 = vcmask 179328  }
  0x84   :  { %59 = vst.msk [vmem:[#allocation0] sm:$0x1] %vm58_vm10, %v57_v37   ;;  %v69_v39 = vpop.permute.xlu1 %68   ;;  %vm158_vm10 = vcmask 146528  }
  0x86   :  { %v63_v38 = vpop.permute.xlu0 %62  }
  0x87   :  { %65 = vst.msk [vmem:[#allocation0] sm:$0x1] %vm64_vm11, %v63_v38   ;;  %vm164_vm11 = vcmask 130128  }
  0x88   :  { %71 = vst.msk [vmem:[#allocation0] sm:$0x1] %vm70_vm12, %v69_v39   ;;  %v81_v41 = vpop.permute.xlu1 %80   ;;  %vm171_vm12 = vcmask 97328  }
  0x8a   :  { %v75_v40 = vpop.permute.xlu0 %74  }
  0x8b   :  { %77 = vst.msk [vmem:[#allocation0] sm:$0x1] %vm76_vm13, %v75_v40   ;;  %vm177_vm13 = vcmask 80928  }
  0x8c   :  { %83 = vst.msk [vmem:[#allocation0] sm:$0x1] %vm82_vm14, %v81_v41   ;;  %v93_v43 = vpop.permute.xlu1 %92  }
  0x8e   :  { %v87_v42 = vpop.permute.xlu0 %86  }
  0x8f   :  { %89 = vst.msk [vmem:[#allocation0] sm:$0x1] %vm88_vm15, %v87_v42  }
  0x90   :  { %95 = vst.msk [vmem:[#allocation0] sm:$0x1] %vm94_vm0, %v93_v43   ;;  %v105_v45 = vpop.permute.xlu1 %104  }
  0x92   :  { %v99_v44 = vpop.permute.xlu0 %98  }
  0x93   :  { %101 = vst.msk [vmem:[#allocation0] sm:$0x1] %vm100_vm1, %v99_v44  }
  0x94   :  { %107 = vst.msk [vmem:[#allocation0] sm:$0x1] %vm106_vm2, %v105_v45   ;;  %v118_v47 = vpop.permute.xlu1 %117  }
  0x95   :  { %120 = vst.msk [vmem:[#allocation0] sm:$0x1] %vm119_vm4, %v118_v47  }
  0x96   :  { %v111_v46 = vpop.permute.xlu0 %110  }
  0x97   :  { %114 = vst.msk [vmem:[#allocation0 + $0x8] sm:$0x1] %vm112_vm3, %v111_v46  }
  0x98   :  { %v131_v49 = vpop.permute.xlu1 %130  }
  0x99   :  { %133 = vst.msk [vmem:[#allocation0] sm:$0x1] %vm132_vm6, %v131_v49  }
  0x9a   :  { %v124_v48 = vpop.permute.xlu0 %123  }
  0x9b   :  { %127 = vst.msk [vmem:[#allocation0 + $0x8] sm:$0x1] %vm125_vm5, %v124_v48  }
  0x9c   :  { %v144_v51 = vpop.permute.xlu1 %143  }
  0x9d   :  { %146 = vst.msk [vmem:[#allocation0] sm:$0x1] %vm145_vm8, %v144_v51  }
  0x9e   :  { %v137_v50 = vpop.permute.xlu0 %136  }
  0x9f   :  { %140 = vst.msk [vmem:[#allocation0 + $0x8] sm:$0x1] %vm138_vm7, %v137_v50  }
  0xa0   :  { %v157_v53 = vpop.permute.xlu1 %156  }
  0xa1   :  { %159 = vst.msk [vmem:[#allocation0] sm:$0x1] %vm158_vm10, %v157_v53  }
  0xa2   :  { %v150_v52 = vpop.permute.xlu0 %149  }
  0xa3   :  { %153 = vst.msk [vmem:[#allocation0 + $0x8] sm:$0x1] %vm151_vm9, %v150_v52  }
  0xa4   :  { %v170_v55 = vpop.permute.xlu1 %169  }
  0xa5   :  { %172 = vst.msk [vmem:[#allocation0] sm:$0x1] %vm171_vm12, %v170_v55  }
  0xa6   :  { %v163_v54 = vpop.permute.xlu0 %162  }
  0xa7   :  { %166 = vst.msk [vmem:[#allocation0 + $0x8] sm:$0x1] %vm164_vm11, %v163_v54  }
  0xaa   :  { %v176_v56 = vpop.permute.xlu0 %175  }
  0xab   :  { %179 = vst.msk [vmem:[#allocation0 + $0x8] sm:$0x1] %vm177_vm13, %v176_v56  }
  0xac   :  { %v183_v57 = vld [vmem:[#allocation0] sm:$0x1] }
  0xad   :  { %185 = vst [vmem:[%s378_s1] sm:$0x1] %v183_v57 }
  0xb2   :  { %v187_v58 = vld [vmem:[#allocation0 + $0x8] sm:$0x1] }
  0xb3   :  { %219 = vst [vmem:[%s378_s1 + $0x1] sm:$0x1] %v187_v58 }

// kernel: tile.18
= control target key start
LH: loop header
LB: loop body
LE: loop exit
PB: predicated region body
PF: predicated region fallthrough
CT: control target
= control target key end

     0   :  { %s28_s0 = inlined_call_operand.vmem [shape: f32[16], index: 0, kind: input, shape index: {}]   ;;  %s29_s1 = inlined_call_operand.vmem [shape: f32[10,16], index: 1, kind: output, shape index: {}]  }
   0x1   :  { %v4_v0 = vld [vmem:[%s28_s0] ss:$0 sm:$0xff] }
   0x2   :  { %5 = vst [vmem:[%s29_s1] sm:$0xff] %v4_v0  ;;  %8 = vst [vmem:[%s29_s1 + $0x8] sm:$0xff] %v4_v0 }

// kernel: tile.19
= control target key start
LH: loop header
LB: loop body
LE: loop exit
PB: predicated region body
PF: predicated region fallthrough
CT: control target
= control target key end

     0   :  { %s75_s10 = smov 112   ;;  %s76_s11 = smov 80   ;;  %vm4_vm0 = vcmask 130048   ;;  %vm10_vm1 = vcmask 1048448   ;;  %vm16_vm2 = vcmask 917248   ;;  %vm22_vm3 = vcmask 786048   ;;  %s122_s0 = inlined_call_operand.vmem [shape: f32[10,16], index: 0, kind: input, shape index: {}]   ;;  %s123_s1 = inlined_call_operand.vmem [shape: f32[1,160], index: 1, kind: output, shape index: {}]  }
   0x1   :  { %v60_v0 = vld [vmem:[%s122_s0 + $0x7] sm:$0x1]   ;;  %v62_v1 = vld [vmem:[%s122_s0 + $0x5] sm:$0x1]   ;;  %v61_v2 = vld [vmem:[%s122_s0 + $0x6] sm:$0x1]  }
   0x2   :  { %8 = vrot.lane.b32.xlu0 %v60_v0, %s75_s10  ;;  %20 = vrot.lane.b32.xlu1 %v62_v1, %s76_s11  ;;  %v63_v3 = vld [vmem:[%s122_s0 + $0x4] sm:$0x1]   ;;  %s2_s16 = smov 3  ;;  %s77_s17 = smov 96   ;;  %v64_v5 = vld [vmem:[%s122_s0 + $0x3] sm:$0x1]  }
   0x3   :  { %s78_s18 = smov 64   ;;  %v3_v4 = vld [vmem:[%s122_s0] ss:$8 sm:%s2_s16]   ;;  %v65_v6 = vld [vmem:[%s122_s0 + $0x2] sm:$0x1]   ;;  %s43_s25 = smov 3 }
   0x4   :  { %5 = vst.msk [vmem:[#allocation0] ss:$8 sm:$0x3] %vm4_vm0, %v3_v4   ;;  %s79_s26 = smov 48   ;;  %s80_s27 = smov 32   ;;  %vm28_vm4 = vcmask 654848  }
   0x5   :  { %v66_v7 = vld [vmem:[%s122_s0 + $0x1] ss:$8 sm:%s43_s25]   ;;  %s81_s0 = smov 16   ;;  %vm34_vm5 = vcmask 523648   ;;  %vm40_vm6 = vcmask 392448   ;;  %vm47_vm7 = vcmask 261248  }
   0x6   :  { %14 = vrot.lane.b32.xlu0 %v61_v2, %s77_s17  ;;  %26 = vrot.lane.b32.xlu1 %v63_v3, %s78_s18 }
   0xa   :  { %32 = vrot.lane.b32.xlu0 %v64_v5, %s79_s26  ;;  %38 = vrot.lane.b32.xlu1 %v65_v6, %s80_s27 }
   0xe   :  { %45 = vrot.lane.b32.xlu0 %v66_v7, %s81_s0 }
  0x74   :  { %v9_v8 = vpop.permute.xlu0 %8   ;;  %v21_v9 = vpop.permute.xlu1 %20  }
  0x75   :  { %11 = vst.msk [vmem:[#allocation0] sm:$0x1] %vm10_vm1, %v9_v8  }
  0x78   :  { %v15_v10 = vpop.permute.xlu0 %14   ;;  %v27_v11 = vpop.permute.xlu1 %26  }
  0x79   :  { %17 = vst.msk [vmem:[#allocation0] sm:$0x1] %vm16_vm2, %v15_v10  }
  0x7a   :  { %23 = vst.msk [vmem:[#allocation0] sm:$0x1] %vm22_vm3, %v21_v9  }
  0x7b   :  { %29 = vst.msk [vmem:[#allocation0] sm:$0x1] %vm28_vm4, %v27_v11  }
  0x7c   :  { %v33_v12 = vpop.permute.xlu0 %32   ;;  %v39_v13 = vpop.permute.xlu1 %38  }
  0x7d   :  { %35 = vst.msk [vmem:[#allocation0] sm:$0x1] %vm34_vm5, %v33_v12  }
  0x7e   :  { %41 = vst.msk [vmem:[#allocation0] sm:$0x1] %vm40_vm6, %v39_v13  }
  0x80   :  { %v46_v14 = vpop.permute.xlu0 %45  }
  0x81   :  { %48 = vst.msk [vmem:[#allocation0] ss:$8 sm:$0x3] %vm47_vm7, %v46_v14  }
  0x88   :  { %v52_v15 = vld [vmem:[#allocation0] sm:$0x1]  ;;  %v56_v16 = vld [vmem:[#allocation0 + $0x8] sm:$0x1] }
  0x89   :  { %54 = vst [vmem:[%s123_s1] sm:$0x1] %v52_v15  ;;  %67 = vst [vmem:[%s123_s1 + $0x1] sm:$0x1] %v56_v16 }

// kernel: lenet_forward.1
= control target key start
LH: loop header
LB: loop body
LE: loop exit
PB: predicated region body
PF: predicated region fallthrough
CT: control target
= control target key end

     0   :  { %s8358_s18 = smov 0   ;;  %s11324_s0 = inlined_call_operand.vmem [shape: f32[16,32,96], index: 0, kind: input, shape index: {}]   ;;  %s11325_s1 = inlined_call_operand.vmem [shape: bf16[5,96,168], index: 1, kind: input, shape index: {}]   ;;  %s11326_s2 = inlined_call_operand.vmem [shape: f32[1,168], index: 2, kind: input, shape index: {}]   ;;  %s11327_s3 = inlined_call_operand.vmem [shape: f32[2,112,224], index: 3, kind: input, shape index: {}]   ;;  %s11328_s4 = inlined_call_operand.vmem [shape: f32[2,168,84], index: 4, kind: input, shape index: {}]   ;;  %s11329_s5 = inlined_call_operand.vmem [shape: bf16[5,84,160], index: 5, kind: input, shape index: {}]   ;;  %s11330_s6 = inlined_call_operand.vmem [shape: f32[1,160], index: 6, kind: input, shape index: {}]   ;;  %s11331_s7 = inlined_call_operand.vmem [shape: f32[2,40,80], index: 7, kind: input, shape index: {}]   ;;  %s11332_s8 = inlined_call_operand.vmem [shape: f32[2,160,80], index: 8, kind: input, shape index: {}]   ;;  %s11333_s9 = inlined_call_operand.vmem [shape: bf16[400,120], index: 9, kind: input, shape index: {}]   ;;  %s11334_s10 = inlined_call_operand.vmem [shape: f32[1,120], index: 10, kind: input, shape index: {}]   ;;  %s11335_s11 = inlined_call_operand.vmem [shape: bf16[120,84], index: 11, kind: input, shape index: {}]   ;;  %s11336_s12 = inlined_call_operand.vmem [shape: f32[1,84], index: 12, kind: input, shape index: {}]   ;;  %s11337_s13 = inlined_call_operand.vmem [shape: bf16[84,4], index: 13, kind: input, shape index: {}]   ;;  %s11338_s14 = inlined_call_operand.vmem [shape: f32[1,4], index: 14, kind: input, shape index: {}]   ;;  %s11339_s15 = inlined_call_operand.vmem [shape: f32[16,4], index: 15, kind: output, shape index: {}]  }
   0x1 LB: > { %s8364_s19 = sadd.s32 4294967295, %s8268_s18   ;;  %p7032_p0 = scmp.ge.s32.totalorder %s8268_s18, 1  ;;  %s8268_s18 = sphi %s8358_s18, %s25_s18  }
   0x2   : > { %p439_p1 = scmp.lt.s32.totalorder %s8268_s18, 3 }
   0x4   : > { %p440_p2 = pnand %p7032_p0, %p439_p1 }
   0x6   : > { %443 = sbr.rel (%p440_p2) target bundleno = 2767 (0xacf), region = 80 }
   0xd   : > { %v8049_v0 = vld [vmem:[%s11325_s1 + $0x4] ss:$8 sps:$4 sm:$0xff]   ;;  %s7033_s22 = sshll.u32 %s8364_s19, 3  ;;  %v8051_v1 = vld [vmem:[%s11325_s1] ss:$8 sps:$4 sm:$0xff]   ;;  %v11340_v2 = vmov 0  }
   0xe   : > { %887 = vmatprep.mubr.bf16.mxu0 %v11340_v2  ;;  %p488_p3 = scmp.lt.s32.totalorder %s7033_s22, 15  ;;  %1449 = vmatprep.mubr.bf16.mxu1 %v11340_v2  ;;  %v8052_v3 = vld [vmem:[%s11325_s1 + $0x14] ss:$8 sps:$4 sm:$0xff]   ;;  %v8054_v4 = vld [vmem:[%s11325_s1 + $0x10] ss:$8 sps:$4 sm:$0xff]   ;;  %vm574_vm0 = vcmask 785408  }
   0xf   : > { %855 = vmatprep.subr.bf16.mxu0 %v8049_v0  ;;  %v8055_v5 = vld [vmem:[%s11325_s1 + $0x24] ss:$8 sps:$4 sm:$0xff]   ;;  %v8060_v7 = vld [vmem:[%s11325_s1 + $0x60] ss:$8 sps:$4 sm:$0xff]   ;;  %v8064_v9 = vld [vmem:[%s11325_s1 + $0x74] ss:$8 sps:$4 sm:$0xff]  }
  0x10   : > { %856 = vmatpush1.bf16.msra.mxu0 %v8051_v1  ;;  %s11384_s22 = smov (!%p488_p3, %s7033_s22), 15  ;;  %v8058_v6 = vld [vmem:[%s11325_s1 + $0x64] ss:$8 sps:$4 sm:$0xff]   ;;  %v8057_v8 = vld [vmem:[%s11325_s1 + $0x20] ss:$8 sps:$4 sm:$0xff]   ;;  %vm578_vm1 = vcmask 781312  }
  0x11   : > { %857 = vmatprep.subr.bf16.mxu0 %v8052_v3  ;;  %1417 = vmatprep.subr.bf16.mxu1 %v8058_v6  ;;  %v8066_v10 = vld [vmem:[%s11325_s1 + $0x70] ss:$8 sps:$4 sm:$0xff]   ;;  %s7686_s29 = sshll.u32 %s11384_s22, 5  ;;  %v8061_v11 = vld [vmem:[%s11325_s1 + $0x34] ss:$8 sps:$4 sm:$0xff]   ;;  %vm514_vm2 = vcmask 326656  }
  0x12   : > { %1418 = vmatpush1.bf16.msra.mxu1 %v8060_v7  ;;  %v8063_v12 = vld [vmem:[%s11325_s1 + $0x30] ss:$8 sps:$4 sm:$0xff]   ;;  %v8070_v13 = vld [vmem:[%s11325_s1 + $0x84] ss:$8 sps:$4 sm:$0xff]   ;;  %s8413_s26 = scalar_lea.vmem %s11324_s0, %s7686_s29  ;;  %v8072_v15 = vld [vmem:[%s11325_s1 + $0x80] ss:$8 sps:$4 sm:$0xff]  }
  0x13   : > { %1419 = vmatprep.subr.bf16.mxu1 %v8064_v9  ;;  %v8067_v14 = vld [vmem:[%s11325_s1 + $0x44] ss:$8 sps:$4 sm:$0xff]   ;;  %v8076_v16 = vld [vmem:[%s11325_s1 + $0x94] ss:$8 sps:$4 sm:$0xff]   ;;  %v8069_v19 = vld [vmem:[%s11325_s1 + $0x40] ss:$8 sps:$4 sm:$0xff]  }
  0x14   : > { %858 = vmatpush1.bf16.msra.mxu0 %v8054_v4  ;;  %v570_v17 = vld [vmem:[%s8413_s26] sm:$0xff]  ;;  %v571_v18 = vld [vmem:[%s8413_s26 + $0x8] sm:$0xff]  ;;  %v8073_v20 = vld [vmem:[%s11325_s1 + $0x54] ss:$8 sps:$4 sm:$0xff]   ;;  %vm4493_vm3 = vcmask 1041408   ;;  %vm4294_vm4 = vcmask 687104  }
  0x15   : > { %859 = vmatprep.subr.bf16.mxu0 %v8055_v5  ;;  %575 = vst.msk [vmem:[#allocation2] sm:$0xff] %vm574_vm0, %v570_v17  ;;  %576 = vst.msk [vmem:[#allocation2 + $0x8] sm:$0xff] %vm574_vm0, %v571_v18  ;;  %v8078_v21 = vld [vmem:[%s11325_s1 + $0x90] ss:$8 sps:$4 sm:$0xff]   ;;  %v8079_v22 = vld [vmem:[%s11325_s1 + $0xa4] ss:$8 sps:$4 sm:$0xff]  }
  0x16   : > { %1420 = vmatpush1.bf16.msra.mxu1 %v8066_v10  ;;  %v8075_v23 = vld [vmem:[%s11325_s1 + $0x50] ss:$8 sps:$4 sm:$0xff]   ;;  %v1140_v24 = vld [vmem:[%s8413_s26 + $0x1] sm:$0xff]  ;;  %v8085_v31 = vld [vmem:[%s11325_s1 + $0xb4] ss:$8 sps:$4 sm:$0xff]   ;;  %vm4347_vm5 = vcmask 680960  }
  0x17   : > { %1421 = vmatprep.subr.bf16.mxu1 %v8070_v13  ;;  %v1141_v25 = vld [vmem:[%s8413_s26 + $0x9] sm:$0xff]  ;;  %v573_v28 = vld [vmem:[%s8413_s26 + $0x18] sm:$0xf]  ;;  %v7037_v29 = vld [vmem:[%s8413_s26 + $0x20] sm:$0xff]  ;;  %vm4324_vm6 = vcmask 261120   ;;  %vm5760_vm7 = vcmask 654336  }
  0x18   : > { %860 = vmatpush1.bf16.msra.mxu0 %v8057_v8  ;;  %v572_v26 = vld [vmem:[%s8413_s26 + $0x10] sm:$0xff]  ;;  %v8081_v27 = vld [vmem:[%s11325_s1 + $0xa0] ss:$8 sps:$4 sm:$0xff]   ;;  %v8084_v30 = vld [vmem:[%s11325_s1 + $0xc4] ss:$8 sps:$4 sm:$0xff]   ;;  %585 = vst.msk [vmem:[#allocation2 + $0x1c] sm:$0xff] %vm574_vm0, %v7037_v29 }
  0x19   : > { %861 = vmatprep.subr.bf16.mxu0 %v8061_v11  ;;  %577 = vst.msk [vmem:[#allocation2 + $0x10] sm:$0xff] %vm574_vm0, %v572_v26  ;;  %v7038_v35 = vld [vmem:[%s8413_s26 + $0x28] sm:$0xff]  ;;  %v7039_v36 = vld [vmem:[%s8413_s26 + $0x30] sm:$0xff]  ;;  %v1143_v41 = vld [vmem:[%s8413_s26 + $0x19] sm:$0xf]  ;;  %vm6243_vm8 = vcmask 647168  }
  0x1a   : > { %1422 = vmatpush1.bf16.msra.mxu1 %v8072_v15  ;;  %579 = vst.msk [vmem:[#allocation2 + $0x18] sm:$0xf] %vm578_vm1, %v573_v28  ;;  %v8082_v37 = vld [vmem:[%s11325_s1 + $0xc0] ss:$8 sps:$4 sm:$0xff]   ;;  %v8087_v38 = vld [vmem:[%s11325_s1 + $0xb0] ss:$8 sps:$4 sm:$0xff]  }
  0x1b   : > { %1423 = vmatprep.subr.bf16.mxu1 %v8076_v16  ;;  %586 = vst.msk [vmem:[#allocation2 + $0x24] sm:$0xff] %vm574_vm0, %v7038_v35  ;;  %587 = vst.msk [vmem:[#allocation2 + $0x2c] sm:$0xff] %vm574_vm0, %v7039_v36  ;;  %v1142_v39 = vld [vmem:[%s8413_s26 + $0x11] sm:$0xff]  ;;  %v7041_v43 = vld [vmem:[%s8413_s26 + $0x40] sm:$0xff]  ;;  %s8273_s30 = smov 32   ;;  %s8274_s16 = smov 80  }
  0x1c   : > { %862 = vmatpush1.bf16.msra.mxu0 %v8063_v12  ;;  %v699_v32 = vld [vmem:[#allocation2] sm:$0xff]  ;;  %v700_v33 = vld [vmem:[#allocation2 + $0x8] sm:$0xff]  ;;  %v8090_v40 = vld [vmem:[%s11325_s1 + $0xd4] ss:$8 sps:$4 sm:$0xff]   ;;  %594 = vst.msk [vmem:[#allocation2 + $0x38] sm:$0xff] %vm574_vm0, %v7041_v43  ;;  %s8275_s17 = smov 112  }
  0x1d   : > { %863 = vmatprep.subr.bf16.mxu0 %v8067_v14  ;;  %v727_v34 = vpack.c.bf16 %v700_v33, %v699_v32  ;;  %1144 = vst.msk [vmem:[#allocation2] sm:$0xff] %vm574_vm0, %v1140_v24  ;;  %1145 = vst.msk [vmem:[#allocation2 + $0x8] sm:$0xff] %vm574_vm0, %v1141_v25  ;;  %v7040_v42 = vld [vmem:[%s8413_s26 + $0x38] sm:$0xf]  ;;  %v1702_v45 = vld [vmem:[%s8413_s26 + $0x2] sm:$0xff]  ;;  %s8276_s29 = smov 64  }
  0x1e   : > { %1424 = vmatpush1.bf16.msra.mxu1 %v8078_v21  ;;  %v1703_v46 = vld [vmem:[%s8413_s26 + $0xa] sm:$0xff]  ;;  %588 = vst.msk [vmem:[#allocation2 + $0x34] sm:$0xf] %vm578_vm1, %v7040_v42  ;;  %v7091_v48 = vld [vmem:[%s8413_s26 + $0x21] sm:$0xff]  ;;  %v7094_v60 = vld [vmem:[%s8413_s26 + $0x39] sm:$0xf] }
  0x1f   : > { %1425 = vmatprep.subr.bf16.mxu1 %v8079_v22  ;;  %v8088_v49 = vld [vmem:[%s11325_s1 + $0xd0] ss:$8 sps:$4 sm:$0xff]   ;;  %v7042_v51 = vld [vmem:[%s8413_s26 + $0x48] sm:$0xff]  ;;  %v7045_v0 = vld [vmem:[%s8413_s26 + $0x60] sm:$0xff]  ;;  %vm6250_vm9 = vcmask 1041024   ;;  %vm6252_vm10 = vcmask 253952  }
  0x20   : > { %864 = vmatpush1.bf16.msra.mxu0 %v8069_v19  ;;  %v701_v44 = vld [vmem:[#allocation2 + $0x10] sm:$0xff]  ;;  %595 = vst.msk [vmem:[#allocation2 + $0x40] sm:$0xff] %vm574_vm0, %v7042_v51  ;;  %v7095_v61 = vld [vmem:[%s8413_s26 + $0x41] sm:$0xff]  ;;  %v7044_v62 = vld [vmem:[%s8413_s26 + $0x58] sm:$0xf]  ;;  %vm6266_vm11 = vcmask 516096  }
  0x21   : > { %865 = vmatprep.subr.bf16.mxu0 %v8073_v20  ;;  %v702_v47 = vld [vmem:[#allocation2 + $0x18] sm:$0xff]  ;;  %1146 = vst.msk [vmem:[#allocation2 + $0x10] sm:$0xff] %vm574_vm0, %v1142_v39  ;;  %v7092_v50 = vld [vmem:[%s8413_s26 + $0x29] sm:$0xff]  ;;  %603 = vst.msk [vmem:[#allocation2 + $0x54] sm:$0xff] %vm574_vm0, %v7045_v0  ;;  %vm6258_vm12 = vcmask 909568   ;;  %vm6264_vm13 = vcmask 1041280  }
  0x22   : > { %1426 = vmatpush1.bf16.msra.mxu1 %v8081_v27  ;;  %1147 = vst.msk [vmem:[#allocation2 + $0x18] sm:$0xf] %vm578_vm1, %v1143_v41  ;;  %v7043_v52 = vld [vmem:[%s8413_s26 + $0x50] sm:$0xff]  ;;  %v728_v55 = vpack.c.bf16 %v702_v47, %v701_v44  ;;  %v8498_v57 = vld [vmem:[#allocation2 + $0x20] sm:$0xff]  ;;  %v8500_v58 = vld [vmem:[#allocation2 + $0x28] sm:$0xff]  ;;  %vm6272_vm14 = vcmask 1040896  }
  0x23   : > { %1427 = vmatprep.subr.bf16.mxu1 %v8085_v31  ;;  %596 = vst.msk [vmem:[#allocation2 + $0x48] sm:$0xff] %vm574_vm0, %v7043_v52  ;;  %v7093_v59 = vld [vmem:[%s8413_s26 + $0x31] sm:$0xff]  ;;  %1152 = vst.msk [vmem:[#allocation2 + $0x1c] sm:$0xff] %vm574_vm0, %v7091_v48  ;;  %v7046_v1 = vld [vmem:[%s8413_s26 + $0x68] sm:$0xff]  ;;  %v729_v20 = vpack.c.bf16 %v8500_v58, %v8498_v57  ;;  %vm6274_vm15 = vcmask 122880   ;;  %p494_p4 = scmp.lt.s32.totalorder %s8364_s19, 1 }
  0x24   : > { %866 = vmatpush1.bf16.msra.mxu0 %v8075_v23  ;;  %v1260_v53 = vld [vmem:[#allocation2] sm:$0xff]  ;;  %v1261_v54 = vld [vmem:[#allocation2 + $0x8] sm:$0xff]  ;;  %1153 = vst.msk [vmem:[#allocation2 + $0x24] sm:$0xff] %vm574_vm0, %v7092_v50  ;;  %v1704_v63 = vld [vmem:[%s8413_s26 + $0x12] sm:$0xff] }
  0x25   : > { %1979 = vmatprep.subr.bf16.mxu0 %v8084_v30  ;;  %v1288_v56 = vpack.c.bf16 %v1261_v54, %v1260_v53  ;;  %1706 = vst.msk [vmem:[#allocation2] sm:$0xff] %vm574_vm0, %v1702_v45  ;;  %1707 = vst.msk [vmem:[#allocation2 + $0x8] sm:$0xff] %vm574_vm0, %v1703_v46  ;;  %v2264_v3 = vld [vmem:[%s8413_s26 + $0x3] sm:$0xff]  ;;  %v2265_v4 = vld [vmem:[%s8413_s26 + $0xb] sm:$0xff]  ;;  %s11386_s19 = smov (!%p494_p4, %s8364_s19), 1 }
  0x26   : > { %1428 = vmatpush1.bf16.msra.mxu1 %v8087_v38  ;;  %597 = vst.msk [vmem:[#allocation2 + $0x50] sm:$0xf] %vm578_vm1, %v7044_v62  ;;  %v8516_v5 = vld [vmem:[#allocation2 + $0x30] sm:$0xff]  ;;  %v8518_v6 = vld [vmem:[#allocation2 + $0x38] sm:$0xff]  ;;  %v7157_v9 = vld [vmem:[%s8413_s26 + $0x22] sm:$0xff]  ;;  %s7036_s22 = sshll.u32 %s11386_s19, 3 }
  0x27   : > { %7077 = vmatmul.mubr.msk.bf16.vlgmr.msra.gmra.mrb[0].mxu0 %vm574_vm0, %v727_v34  ;;  %v7096_v7 = vld [vmem:[%s8413_s26 + $0x49] sm:$0xff]  ;;  %604 = vst.msk [vmem:[#allocation2 + $0x5c] sm:$0xff] %vm574_vm0, %v7046_v1  ;;  %1154 = vst.msk [vmem:[#allocation2 + $0x2c] sm:$0xff] %vm574_vm0, %v7093_v59  ;;  %v7097_v10 = vld [vmem:[%s8413_s26 + $0x51] sm:$0xff]  ;;  %v730_v47 = vpack.c.bf16 %v8518_v6, %v8516_v5  ;;  %s497_s21 = scalar_lea.vmem %s11339_s15, %s7036_s22 }
  0x28   : > { %1980 = vmatpush1.bf16.msra.mxu0 %v8082_v37  ;;  %897 = vmatprep.mubr.bf16.mxu0 %v11340_v2  ;;  %v1262_v8 = vld [vmem:[#allocation2 + $0x10] sm:$0xff]  ;;  %1155 = vst.msk [vmem:[#allocation2 + $0x34] sm:$0xf] %vm578_vm1, %v7094_v60  ;;  %v8091_v11 = vld [vmem:[%s11325_s1 + $0xe0] ss:$8 sps:$4 sm:$0xff]  }
  0x29   : > { %1981 = vmatprep.subr.bf16.mxu0 %v8090_v40  ;;  %7143 = vmatmul.mubr.msk.bf16.vlgmr.msra.gmra.mrb[0].mxu1 %vm574_vm0, %v1288_v56  ;;  %1160 = vst.msk [vmem:[#allocation2 + $0x38] sm:$0xff] %vm574_vm0, %v7095_v61  ;;  %1708 = vst.msk [vmem:[#allocation2 + $0x10] sm:$0xff] %vm574_vm0, %v1704_v63  ;;  %v8093_v12 = vld [vmem:[%s11325_s1 + $0xe4] ss:$8 sps:$4 sm:$0xff]   ;;  %v7047_v15 = vld [vmem:[%s8413_s26 + $0x70] sm:$0xff] }
  0x2a   : > { %1459 = vmatprep.mubr.bf16.mxu1 %v11340_v2  ;;  %v8537_v13 = vld [vmem:[#allocation2 + $0x40] sm:$0xff]  ;;  %v8539_v14 = vld [vmem:[#allocation2 + $0x48] sm:$0xff]  ;;  %v7048_v19 = vld [vmem:[%s8413_s26 + $0x78] sm:$0xf]  ;;  %605 = vst.msk [vmem:[#allocation2 + $0x64] sm:$0xff] %vm574_vm0, %v7047_v15 }
  0x2b   : > { %v7158_v18 = vld [vmem:[%s8413_s26 + $0x2a] sm:$0xff]  ;;  %1161 = vst.msk [vmem:[#allocation2 + $0x40] sm:$0xff] %vm574_vm0, %v7096_v7  ;;  %1162 = vst.msk [vmem:[#allocation2 + $0x48] sm:$0xff] %vm574_vm0, %v7097_v10  ;;  %v1263_v21 = vld [vmem:[#allocation2 + $0x18] sm:$0xff] }
  0x2c   : > { %1982 = vmatpush1.bf16.msra.mxu0 %v8088_v49  ;;  %v8542_v16 = vld [vmem:[#allocation2] sm:$0xff]  ;;  %v8544_v17 = vld [vmem:[#allocation2 + $0x8] sm:$0xff]  ;;  %v7098_v23 = vld [vmem:[%s8413_s26 + $0x59] sm:$0xf]  ;;  %606 = vst.msk [vmem:[#allocation2 + $0x6c] sm:$0xf] %vm578_vm1, %v7048_v19  ;;  %v1289_v25 = vpack.c.bf16 %v1263_v21, %v1262_v8  ;;  %v731_v8 = vpack.c.bf16 %v8539_v14, %v8537_v13 }
  0x2d   : > { %1983 = vmatprep.subr.bf16.mxu0 %v8093_v12  ;;  %2268 = vst.msk [vmem:[#allocation2] sm:$0xff] %vm574_vm0, %v2264_v3  ;;  %2269 = vst.msk [vmem:[#allocation2 + $0x8] sm:$0xff] %vm574_vm0, %v2265_v4  ;;  %v1264_v22 = vld [vmem:[#allocation2 + $0x20] sm:$0xff]  ;;  %v7159_v26 = vld [vmem:[%s8413_s26 + $0x32] sm:$0xff] }
  0x2e   : > { %1714 = vst.msk [vmem:[#allocation2 + $0x1c] sm:$0xff] %vm574_vm0, %v7157_v9  ;;  %v7161_v27 = vld [vmem:[%s8413_s26 + $0x42] sm:$0xff]  ;;  %v8563_v29 = vld [vmem:[#allocation2 + $0x50] sm:$0xff]  ;;  %v8565_v30 = vld [vmem:[#allocation2 + $0x58] sm:$0xff] }
  0x2f   : > { %7078 = vmatmul.mubr.msk.bf16.gmra.mrb[4].mxu0 %vm574_vm0, %v728_v55  ;;  %v7099_v28 = vld [vmem:[%s8413_s26 + $0x61] sm:$0xff]  ;;  %v7162_v31 = vld [vmem:[%s8413_s26 + $0x4a] sm:$0xff]  ;;  %1163 = vst.msk [vmem:[#allocation2 + $0x50] sm:$0xf] %vm578_vm1, %v7098_v23  ;;  %v7163_v36 = vld [vmem:[%s8413_s26 + $0x52] sm:$0xff] }
  0x30   : > { %907 = vmatprep.mubr.bf16.mxu0 %v11340_v2  ;;  %1984 = vmatpush1.bf16.msra.mxu0 %v8091_v11  ;;  %v7049_v32 = vld [vmem:[%s8413_s26 + $0x80] sm:$0xff]  ;;  %v1265_v33 = vld [vmem:[#allocation2 + $0x28] sm:$0xff]  ;;  %v8570_v34 = vld [vmem:[#allocation2 + $0x30] sm:$0xff]  ;;  %1168 = vst.msk [vmem:[#allocation2 + $0x54] sm:$0xff] %vm574_vm0, %v7099_v28 }
  0x31   : > { %7144 = vmatmul.mubr.msk.bf16.gmra.mrb[4].mxu1 %vm574_vm0, %v1289_v25  ;;  %v8572_v35 = vld [vmem:[#allocation2 + $0x38] sm:$0xff]  ;;  %612 = vst.msk [vmem:[#allocation2 + $0x70] sm:$0xff] %vm574_vm0, %v7049_v32  ;;  %1715 = vst.msk [vmem:[#allocation2 + $0x24] sm:$0xff] %vm574_vm0, %v7158_v18  ;;  %v7100_v37 = vld [vmem:[%s8413_s26 + $0x69] sm:$0xff]  ;;  %v1290_v45 = vpack.c.bf16 %v1265_v33, %v1264_v22 }
  0x32   : > { %1469 = vmatprep.mubr.bf16.mxu1 %v11340_v2  ;;  %1716 = vst.msk [vmem:[#allocation2 + $0x2c] sm:$0xff] %vm574_vm0, %v7159_v26  ;;  %1722 = vst.msk [vmem:[#allocation2 + $0x38] sm:$0xff] %vm574_vm0, %v7161_v27  ;;  %v7050_v38 = vld [vmem:[%s8413_s26 + $0x88] sm:$0xff]  ;;  %v7102_v39 = vld [vmem:[%s8413_s26 + $0x79] sm:$0xf]  ;;  %v1291_v4 = vpack.c.bf16 %v8572_v35, %v8570_v34 }
  0x33   : > { %613 = vst.msk [vmem:[#allocation2 + $0x78] sm:$0xff] %vm574_vm0, %v7050_v38  ;;  %v7101_v40 = vld [vmem:[%s8413_s26 + $0x71] sm:$0xff]  ;;  %v8589_v41 = vld [vmem:[#allocation2 + $0x40] sm:$0xff]  ;;  %v8591_v42 = vld [vmem:[#allocation2 + $0x48] sm:$0xff] }
  0x34   : > { %v8593_v43 = vld [vmem:[#allocation2 + $0x60] sm:$0xff]  ;;  %1723 = vst.msk [vmem:[#allocation2 + $0x40] sm:$0xff] %vm574_vm0, %v7162_v31  ;;  %1724 = vst.msk [vmem:[#allocation2 + $0x48] sm:$0xff] %vm574_vm0, %v7163_v36  ;;  %v8598_v46 = vld [vmem:[#allocation2 + $0x68] sm:$0xff]  ;;  %v1292_v33 = vpack.c.bf16 %v8591_v42, %v8589_v41  ;;  %v732_v36 = vpack.c.bf16 %v8565_v30, %v8563_v29 }
  0x35   : > { %v7103_v44 = vld [vmem:[%s8413_s26 + $0x81] sm:$0xff]  ;;  %1169 = vst.msk [vmem:[#allocation2 + $0x5c] sm:$0xff] %vm574_vm0, %v7100_v37  ;;  %1170 = vst.msk [vmem:[#allocation2 + $0x64] sm:$0xff] %vm574_vm0, %v7101_v40  ;;  %v8094_v48 = vld [vmem:[%s11325_s1 + $0xf0] ss:$8 sps:$4 sm:$0xff]  }
  0x36   : > { %1171 = vst.msk [vmem:[#allocation2 + $0x6c] sm:$0xf] %vm578_vm1, %v7102_v39  ;;  %v8096_v49 = vld [vmem:[%s11325_s1 + $0xf4] ss:$8 sps:$4 sm:$0xff]   ;;  %v7052_v51 = vld [vmem:[%s8413_s26 + $0x98] sm:$0xf] }
  0x37   : > { %7079 = vmatmul.mubr.msk.bf16.gmra.mrb[8].mxu0 %vm574_vm0, %v729_v20  ;;  %v7051_v50 = vld [vmem:[%s8413_s26 + $0x90] sm:$0xff]  ;;  %v7053_v52 = vld [vmem:[%s8413_s26 + $0xa0] sm:$0xff]  ;;  %1985 = vmatprep.subr.bf16.mxu0 %v8096_v49  ;;  %615 = vst.msk [vmem:[#allocation2 + $0x88] sm:$0xf] %vm578_vm1, %v7052_v51  ;;  %v7054_v58 = vld [vmem:[%s8413_s26 + $0xa8] sm:$0xff] }
  0x38   : > { %917 = vmatprep.mubr.bf16.mxu0 %v11340_v2  ;;  %614 = vst.msk [vmem:[#allocation2 + $0x80] sm:$0xff] %vm574_vm0, %v7051_v50  ;;  %v7165_v53 = vld [vmem:[%s8413_s26 + $0x62] sm:$0xff]  ;;  %v8616_v54 = vld [vmem:[#allocation2 + $0x70] sm:$0xff]  ;;  %621 = vst.msk [vmem:[#allocation2 + $0x8c] sm:$0xff] %vm574_vm0, %v7053_v52  ;;  %1986 = vmatpush1.bf16.msra.mxu0 %v8094_v48 }
  0x39   : > { %v7104_v55 = vld [vmem:[%s8413_s26 + $0x89] sm:$0xff]  ;;  %7145 = vmatmul.mubr.msk.bf16.gmra.mrb[8].mxu1 %vm574_vm0, %v1290_v45  ;;  %1176 = vst.msk [vmem:[#allocation2 + $0x70] sm:$0xff] %vm574_vm0, %v7103_v44  ;;  %v7167_v57 = vld [vmem:[%s8413_s26 + $0x72] sm:$0xff]  ;;  %622 = vst.msk [vmem:[#allocation2 + $0x94] sm:$0xff] %vm574_vm0, %v7054_v58 }
  0x3a   : > { %v7166_v56 = vld [vmem:[%s8413_s26 + $0x6a] sm:$0xff]  ;;  %1479 = vmatprep.mubr.bf16.mxu1 %v11340_v2  ;;  %v8630_v60 = vld [vmem:[#allocation2 + $0x78] sm:$0xff]  ;;  %v7169_v10 = vld [vmem:[%s8413_s26 + $0x82] sm:$0xff] }
  0x3b   : > { %v8628_v59 = vld [vmem:[#allocation2 + $0x50] sm:$0xff]  ;;  %1177 = vst.msk [vmem:[#allocation2 + $0x78] sm:$0xff] %vm574_vm0, %v7104_v55  ;;  %v7106_v63 = vld [vmem:[%s8413_s26 + $0x99] sm:$0xf]  ;;  %v8097_v1 = vld [vmem:[%s11325_s1 + $0x100] ss:$8 sps:$4 sm:$0xff]  }
  0x3c   : > { %v7105_v61 = vld [vmem:[%s8413_s26 + $0x91] sm:$0xff]  ;;  %v8099_v3 = vld [vmem:[%s11325_s1 + $0x104] ss:$8 sps:$4 sm:$0xff]   ;;  %v7110_v27 = vld [vmem:[%s8413_s26 + $0xb9] sm:$0xf] }
  0x3d   : > { %v7055_v62 = vld [vmem:[%s8413_s26 + $0xb0] sm:$0xff]  ;;  %v8639_v0 = vld [vmem:[#allocation2 + $0x58] sm:$0xff]  ;;  %v8650_v5 = vld [vmem:[#allocation2 + $0x60] sm:$0xff]  ;;  %1987 = vmatprep.subr.bf16.mxu0 %v8099_v3 }
  0x3e   : > { %623 = vst.msk [vmem:[#allocation2 + $0x9c] sm:$0xff] %vm574_vm0, %v7055_v62  ;;  %1730 = vst.msk [vmem:[#allocation2 + $0x54] sm:$0xff] %vm574_vm0, %v7165_v53  ;;  %v8652_v6 = vld [vmem:[#allocation2 + $0x68] sm:$0xff]  ;;  %v7056_v7 = vld [vmem:[%s8413_s26 + $0xb8] sm:$0xf]  ;;  %1988 = vmatpush1.bf16.msra.mxu0 %v8097_v1 }
  0x3f   : > { %7080 = vmatmul.mubr.msk.bf16.gmra.mrb[12].mxu0 %vm574_vm0, %v730_v47  ;;  %1731 = vst.msk [vmem:[#allocation2 + $0x5c] sm:$0xff] %vm574_vm0, %v7166_v56  ;;  %1732 = vst.msk [vmem:[#allocation2 + $0x64] sm:$0xff] %vm574_vm0, %v7167_v57  ;;  %v8659_v9 = vld [vmem:[#allocation2 + $0x80] sm:$0xff]  ;;  %v8664_v12 = vld [vmem:[#allocation2 + $0x88] sm:$0xff]  ;;  %v1293_v57 = vpack.c.bf16 %v8639_v0, %v8628_v59 }
  0x40   : > { %927 = vmatprep.mubr.bf16.mxu0 %v11340_v2  ;;  %624 = vst.msk [vmem:[#allocation2 + $0xa4] sm:$0xf] %vm578_vm1, %v7056_v7  ;;  %v7057_v11 = vld [vmem:[%s8413_s26 + $0xc0] sm:$0xff]  ;;  %1179 = vst.msk [vmem:[#allocation2 + $0x88] sm:$0xf] %vm578_vm1, %v7106_v63  ;;  %v8670_v13 = vld [vmem:[#allocation2 + $0x70] sm:$0xff]  ;;  %v733_v63 = vpack.c.bf16 %v8598_v46, %v8593_v43 }
  0x41   : > { %1178 = vst.msk [vmem:[#allocation2 + $0x80] sm:$0xff] %vm574_vm0, %v7105_v61  ;;  %v7107_v15 = vld [vmem:[%s8413_s26 + $0xa1] sm:$0xff]  ;;  %630 = vst.msk [vmem:[#allocation2 + $0xa8] sm:$0xff] %vm574_vm0, %v7057_v11  ;;  %v7170_v14 = vld [vmem:[%s8413_s26 + $0x8a] sm:$0xff]  ;;  %7146 = vmatmul.mubr.msk.bf16.gmra.mrb[12].mxu1 %vm574_vm0, %v1291_v4 }
  0x42   : > { %v7108_v18 = vld [vmem:[%s8413_s26 + $0xa9] sm:$0xff]  ;;  %1738 = vst.msk [vmem:[#allocation2 + $0x70] sm:$0xff] %vm574_vm0, %v7169_v10  ;;  %1489 = vmatprep.mubr.bf16.mxu1 %v11340_v2  ;;  %v8681_v21 = vld [vmem:[#allocation2 + $0x78] sm:$0xff]  ;;  %v7111_v28 = vld [vmem:[%s8413_s26 + $0xc1] sm:$0xff] }
  0x43   : > { %v8676_v19 = vld [vmem:[#allocation2 + $0x90] sm:$0xff]  ;;  %v7058_v20 = vld [vmem:[%s8413_s26 + $0xc8] sm:$0xff]  ;;  %1739 = vst.msk [vmem:[#allocation2 + $0x78] sm:$0xff] %vm574_vm0, %v7170_v14  ;;  %v7060_v31 = vld [vmem:[%s8413_s26 + $0xd8] sm:$0xf] }
  0x44   : > { %1184 = vst.msk [vmem:[#allocation2 + $0x8c] sm:$0xff] %vm574_vm0, %v7107_v15  ;;  %v7059_v23 = vld [vmem:[%s8413_s26 + $0xd0] sm:$0xff]  ;;  %631 = vst.msk [vmem:[#allocation2 + $0xb0] sm:$0xff] %vm574_vm0, %v7058_v20  ;;  %v7061_v32 = vld [vmem:[%s8413_s26 + $0xe0] sm:$0xff] }
  0x45   : > { %v8683_v22 = vld [vmem:[#allocation2 + $0x98] sm:$0xff]  ;;  %632 = vst.msk [vmem:[#allocation2 + $0xb8] sm:$0xff] %vm574_vm0, %v7059_v23  ;;  %v7062_v35 = vld [vmem:[%s8413_s26 + $0xe8] sm:$0xff]  ;;  %639 = vst.msk [vmem:[#allocation2 + $0xc4] sm:$0xff] %vm574_vm0, %v7061_v32  ;;  %v1294_v23 = vpack.c.bf16 %v8652_v6, %v8650_v5 }
  0x46   : > { %v7171_v25 = vld [vmem:[%s8413_s26 + $0x92] sm:$0xff]  ;;  %1185 = vst.msk [vmem:[#allocation2 + $0x94] sm:$0xff] %vm574_vm0, %v7108_v18  ;;  %v7173_v39 = vld [vmem:[%s8413_s26 + $0xa2] sm:$0xff]  ;;  %640 = vst.msk [vmem:[#allocation2 + $0xcc] sm:$0xff] %vm574_vm0, %v7062_v35 }
  0x47   : > { %7081 = vmatmul.mubr.msk.bf16.gmra.mrb[16].mxu0 %vm574_vm0, %v731_v8  ;;  %v7109_v26 = vld [vmem:[%s8413_s26 + $0xb1] sm:$0xff]  ;;  %v8700_v34 = vld [vmem:[#allocation2 + $0xa0] sm:$0xff]  ;;  %633 = vst.msk [vmem:[#allocation2 + $0xc0] sm:$0xf] %vm578_vm1, %v7060_v31  ;;  %v7112_v40 = vld [vmem:[%s8413_s26 + $0xc9] sm:$0xff] }
  0x48   : > { %937 = vmatprep.mubr.bf16.mxu0 %v11340_v2  ;;  %v8707_v37 = vld [vmem:[#allocation2 + $0x80] sm:$0xff]  ;;  %v8709_v38 = vld [vmem:[#allocation2 + $0xa8] sm:$0xff]  ;;  %1186 = vst.msk [vmem:[#allocation2 + $0x9c] sm:$0xff] %vm574_vm0, %v7109_v26  ;;  %v7113_v41 = vld [vmem:[%s8413_s26 + $0xd1] sm:$0xff] }
  0x49   : > { %1187 = vst.msk [vmem:[#allocation2 + $0xa4] sm:$0xf] %vm578_vm1, %v7110_v27  ;;  %v7114_v29 = vld [vmem:[%s8413_s26 + $0xd9] sm:$0xf]  ;;  %7147 = vmatmul.mubr.msk.bf16.gmra.mrb[16].mxu1 %vm574_vm0, %v1292_v33  ;;  %v7174_v45 = vld [vmem:[%s8413_s26 + $0xaa] sm:$0xff]  ;;  %v7177_v53 = vld [vmem:[%s8413_s26 + $0xc2] sm:$0xff] }
  0x4a   : > { %1740 = vst.msk [vmem:[#allocation2 + $0x80] sm:$0xff] %vm574_vm0, %v7171_v25  ;;  %1192 = vst.msk [vmem:[#allocation2 + $0xa8] sm:$0xff] %vm574_vm0, %v7111_v28  ;;  %v8100_v30 = vld [vmem:[%s11325_s1 + $0x110] ss:$8 sps:$4 sm:$0xff]   ;;  %v8102_v42 = vld [vmem:[%s11325_s1 + $0x114] ss:$8 sps:$4 sm:$0xff]   ;;  %1499 = vmatprep.mubr.bf16.mxu1 %v11340_v2  ;;  %v734_v25 = vpack.c.bf16 %v8630_v60, %v8616_v54 }
  0x4b   : > { %v8727_v44 = vld [vmem:[#allocation2 + $0x88] sm:$0xff]  ;;  %v8730_v47 = vld [vmem:[#allocation2 + $0xb0] sm:$0xff]  ;;  %1989 = vmatprep.subr.bf16.mxu0 %v8102_v42  ;;  %v7064_v0 = vld [vmem:[%s8413_s26 + $0xf8] sm:$0xf] }
  0x4c   : > { %v7175_v48 = vld [vmem:[%s8413_s26 + $0xb2] sm:$0xff]  ;;  %1193 = vst.msk [vmem:[#allocation2 + $0xb0] sm:$0xff] %vm574_vm0, %v7112_v40  ;;  %v8103_v51 = vld [vmem:[%s11325_s1 + $0x120] ss:$8 sps:$4 sm:$0xff]   ;;  %v8105_v52 = vld [vmem:[%s11325_s1 + $0x124] ss:$8 sps:$4 sm:$0xff]   ;;  %1990 = vmatpush1.bf16.msra.mxu0 %v8100_v30 }
  0x4d   : > { %v8735_v49 = vld [vmem:[#allocation2 + $0x90] sm:$0xff]  ;;  %v8737_v50 = vld [vmem:[#allocation2 + $0xb8] sm:$0xff]  ;;  %v8761_v62 = vld [vmem:[#allocation2 + $0xc8] sm:$0xff]  ;;  %2541 = vmatprep.subr.bf16.mxu1 %v8105_v52  ;;  %642 = vst.msk [vmem:[#allocation2 + $0xdc] sm:$0xf] %vm578_vm1, %v7064_v0 }
  0x4e   : > { %1746 = vst.msk [vmem:[#allocation2 + $0x8c] sm:$0xff] %vm574_vm0, %v7173_v39  ;;  %1194 = vst.msk [vmem:[#allocation2 + $0xb8] sm:$0xff] %vm574_vm0, %v7113_v41  ;;  %v8750_v55 = vld [vmem:[#allocation2 + $0xc0] sm:$0xff]  ;;  %v8108_v56 = vld [vmem:[%s11325_s1 + $0x134] ss:$8 sps:$4 sm:$0xff]   ;;  %2542 = vmatpush1.bf16.msra.mxu1 %v8103_v51  ;;  %v1295_v51 = vpack.c.bf16 %v8681_v21, %v8670_v13 }
  0x4f   : > { %7082 = vmatmul.mubr.msk.bf16.gmra.mrb[20].mxu0 %vm574_vm0, %v732_v36  ;;  %v8757_v58 = vld [vmem:[#allocation2 + $0x98] sm:$0xff]  ;;  %1195 = vst.msk [vmem:[#allocation2 + $0xc0] sm:$0xf] %vm578_vm1, %v7114_v29  ;;  %v7063_v59 = vld [vmem:[%s8413_s26 + $0xf0] sm:$0xff]  ;;  %2543 = vmatprep.subr.bf16.mxu1 %v8108_v56  ;;  %v7115_v43 = vld [vmem:[%s8413_s26 + $0xe1] sm:$0xff] }
  0x50   : > { %947 = vmatprep.mubr.bf16.mxu0 %v11340_v2  ;;  %v8759_v61 = vld [vmem:[#allocation2 + $0xa0] sm:$0xff]  ;;  %1747 = vst.msk [vmem:[#allocation2 + $0x94] sm:$0xff] %vm574_vm0, %v7174_v45  ;;  %v7178_v3 = vld [vmem:[%s8413_s26 + $0xca] sm:$0xff]  ;;  %641 = vst.msk [vmem:[#allocation2 + $0xd4] sm:$0xff] %vm574_vm0, %v7063_v59 }
  0x51   : > { %v8767_v1 = vld [vmem:[#allocation2 + $0xa8] sm:$0xff]  ;;  %1748 = vst.msk [vmem:[#allocation2 + $0x9c] sm:$0xff] %vm574_vm0, %v7175_v48  ;;  %v8106_v4 = vld [vmem:[%s11325_s1 + $0x130] ss:$8 sps:$4 sm:$0xff]   ;;  %1200 = vst.msk [vmem:[#allocation2 + $0xc4] sm:$0xff] %vm574_vm0, %v7115_v43  ;;  %7148 = vmatmul.mubr.msk.bf16.gmra.mrb[20].mxu1 %vm574_vm0, %v1293_v57 }
  0x52   : > { %1754 = vst.msk [vmem:[#allocation2 + $0xa8] sm:$0xff] %vm574_vm0, %v7177_v53  ;;  %v7179_v46 = vld [vmem:[%s8413_s26 + $0xd2] sm:$0xff]  ;;  %v8111_v8 = vld [vmem:[%s11325_s1 + $0x144] ss:$8 sps:$4 sm:$0xff]   ;;  %1509 = vmatprep.mubr.bf16.mxu1 %v11340_v2  ;;  %2544 = vmatpush1.bf16.msra.mxu1 %v8106_v4  ;;  %v8109_v14 = vld [vmem:[%s11325_s1 + $0x140] ss:$8 sps:$4 sm:$0xff]  }
  0x53   : > { %v8783_v7 = vld [vmem:[#allocation2 + $0xb0] sm:$0xff]  ;;  %v7118_v15 = vld [vmem:[%s8413_s26 + $0xf9] sm:$0xf]  ;;  %2545 = vmatprep.subr.bf16.mxu1 %v8111_v8  ;;  %v8117_v54 = vld [vmem:[%s11325_s1 + $0x164] ss:$8 sps:$4 sm:$0xff]  }
  0x54   : > { %1755 = vst.msk [vmem:[#allocation2 + $0xb0] sm:$0xff] %vm574_vm0, %v7178_v3  ;;  %v7116_v11 = vld [vmem:[%s8413_s26 + $0xe9] sm:$0xff]  ;;  %v8114_v18 = vld [vmem:[%s11325_s1 + $0x154] ss:$8 sps:$4 sm:$0xff]   ;;  %v8843_v40 = vld [vmem:[#allocation2] sm:$0xff] }
  0x55   : > { %v8790_v10 = vld [vmem:[#allocation2 + $0xb8] sm:$0xff]  ;;  %v8120_v60 = vld [vmem:[%s11325_s1 + $0x184] ss:$8 sps:$4 sm:$0xff]   ;;  %v8115_v5 = vld [vmem:[%s11325_s1 + $0x160] ss:$8 sps:$4 sm:$0xff]  }
  0x56   : > { %1756 = vst.msk [vmem:[#allocation2 + $0xb8] sm:$0xff] %vm574_vm0, %v7179_v46  ;;  %v7117_v20 = vld [vmem:[%s8413_s26 + $0xf1] sm:$0xff]  ;;  %2546 = vmatpush1.bf16.msra.mxu1 %v8109_v14  ;;  %v1705_v6 = vld [vmem:[%s8413_s26 + $0x1a] sm:$0xf]  ;;  %v7181_v31 = vld [vmem:[%s8413_s26 + $0xe2] sm:$0xff]  ;;  %3103 = vmatprep.subr.bf16.mxu0 %v8120_v60 }
  0x57   : > { %7083 = vmatmul.mubr.msk.bf16.gmra.mrb[24].mxu0 %vm574_vm0, %v733_v63  ;;  %v8808_v26 = vld [vmem:[#allocation2 + $0xd0] sm:$0xff]  ;;  %v8810_v27 = vld [vmem:[#allocation2 + $0xd8] sm:$0xff]  ;;  %2547 = vmatprep.subr.bf16.mxu1 %v8114_v18  ;;  %1709 = vst.msk [vmem:[#allocation2 + $0x18] sm:$0xf] %vm578_vm1, %v1705_v6  ;;  %v8845_v41 = vld [vmem:[#allocation2 + $0x8] sm:$0xff]  ;;  %v735_v63 = vpack.c.bf16 %v8664_v12, %v8659_v9  ;;  %v1296_v18 = vpack.c.bf16 %v8727_v44, %v8707_v37 }
  0x58   : > { %957 = vmatprep.mubr.bf16.mxu0 %v11340_v2  ;;  %1201 = vst.msk [vmem:[#allocation2 + $0xcc] sm:$0xff] %vm574_vm0, %v7116_v11  ;;  %v8112_v28 = vld [vmem:[%s11325_s1 + $0x150] ss:$8 sps:$4 sm:$0xff]   ;;  %1202 = vst.msk [vmem:[#allocation2 + $0xd4] sm:$0xff] %vm574_vm0, %v7117_v20  ;;  %v8123_v35 = vld [vmem:[%s11325_s1 + $0x174] ss:$8 sps:$4 sm:$0xff]  }
  0x59   : > { %1203 = vst.msk [vmem:[#allocation2 + $0xdc] sm:$0xf] %vm578_vm1, %v7118_v15  ;;  %7149 = vmatmul.mubr.msk.bf16.gmra.mrb[24].mxu1 %vm574_vm0, %v1294_v23  ;;  %v7182_v32 = vld [vmem:[%s8413_s26 + $0xea] sm:$0xff]  ;;  %v7183_v33 = vld [vmem:[%s8413_s26 + $0xf2] sm:$0xff]  ;;  %v8848_v30 = vld [vmem:[#allocation2 + $0xc0] sm:$0xff] }
  0x5a   : > { %1519 = vmatprep.mubr.bf16.mxu1 %v11340_v2  ;;  %v8838_v36 = vld [vmem:[#allocation2 + $0x10] sm:$0xff]  ;;  %2548 = vmatpush1.bf16.msra.mxu1 %v8112_v28  ;;  %v2826_v29 = vld [vmem:[%s8413_s26 + $0x4] sm:$0xff]  ;;  %v2267_v53 = vld [vmem:[%s8413_s26 + $0x1b] sm:$0xf] }
  0x5b   : > { %v2266_v39 = vld [vmem:[%s8413_s26 + $0x13] sm:$0xff]  ;;  %2549 = vmatprep.subr.bf16.mxu1 %v8117_v54  ;;  %2830 = vst.msk [vmem:[#allocation2] sm:$0xff] %vm574_vm0, %v2826_v29  ;;  %v8852_v45 = vld [vmem:[#allocation2 + $0x20] sm:$0xff]  ;;  %v8854_v48 = vld [vmem:[#allocation2 + $0x28] sm:$0xff] }
  0x5c   : > { %2270 = vst.msk [vmem:[#allocation2 + $0x10] sm:$0xff] %vm574_vm0, %v2266_v39  ;;  %v2827_v42 = vld [vmem:[%s8413_s26 + $0xc] sm:$0xff]  ;;  %v7223_v21 = vld [vmem:[%s8413_s26 + $0x23] sm:$0xff]  ;;  %v2828_v3 = vld [vmem:[%s8413_s26 + $0x14] sm:$0xff] }
  0x5d   : > { %v8121_v52 = vld [vmem:[%s11325_s1 + $0x170] ss:$8 sps:$4 sm:$0xff]   ;;  %2831 = vst.msk [vmem:[#allocation2 + $0x8] sm:$0xff] %vm574_vm0, %v2827_v42  ;;  %v7227_v46 = vld [vmem:[%s8413_s26 + $0x43] sm:$0xff]  ;;  %v2829_v20 = vld [vmem:[%s8413_s26 + $0x1c] sm:$0xf] }
  0x5e   : > { %v7224_v57 = vld [vmem:[%s8413_s26 + $0x2b] sm:$0xff]  ;;  %2550 = vmatpush1.bf16.msra.mxu1 %v8115_v5  ;;  %v7160_v9 = vld [vmem:[%s8413_s26 + $0x3a] sm:$0xf]  ;;  %v8897_v8 = vld [vmem:[#allocation2 + $0x40] sm:$0xff] }
  0x5f   : > { %7084 = vmatmul.mubr.msk.bf16.gmra.mrb[28].mxu0 %vm574_vm0, %v734_v25  ;;  %v8868_v59 = vld [vmem:[#allocation2 + $0xc8] sm:$0xff]  ;;  %v8870_v0 = vld [vmem:[#allocation2 + $0xd0] sm:$0xff]  ;;  %2277 = vst.msk [vmem:[#allocation2 + $0x24] sm:$0xff] %vm574_vm0, %v7224_v57  ;;  %2551 = vmatprep.subr.bf16.mxu1 %v8123_v35  ;;  %v8882_v12 = vld [vmem:[#allocation2 + $0x18] sm:$0xff]  ;;  %v736_v25 = vpack.c.bf16 %v8683_v22, %v8676_v19 }
  0x60   : > { %967 = vmatprep.mubr.bf16.mxu0 %v11340_v2  ;;  %v8872_v13 = vld [vmem:[#allocation2 + $0xd8] sm:$0xff]  ;;  %1762 = vst.msk [vmem:[#allocation2 + $0xc4] sm:$0xff] %vm574_vm0, %v7181_v31  ;;  %1763 = vst.msk [vmem:[#allocation2 + $0xcc] sm:$0xff] %vm574_vm0, %v7182_v32  ;;  %v8899_v11 = vld [vmem:[#allocation2 + $0x48] sm:$0xff] }
  0x61   : > { %1764 = vst.msk [vmem:[#allocation2 + $0xd4] sm:$0xff] %vm574_vm0, %v7183_v33  ;;  %7150 = vmatmul.mubr.msk.bf16.gmra.mrb[28].mxu1 %vm574_vm0, %v1295_v51  ;;  %v8885_v4 = vld [vmem:[#allocation2 + $0x38] sm:$0xff]  ;;  %2276 = vst.msk [vmem:[#allocation2 + $0x1c] sm:$0xff] %vm574_vm0, %v7223_v21  ;;  %v7228_v15 = vld [vmem:[%s8413_s26 + $0x4b] sm:$0xff] }
  0x62   : > { %1717 = vst.msk [vmem:[#allocation2 + $0x34] sm:$0xf] %vm578_vm1, %v7160_v9  ;;  %1529 = vmatprep.mubr.bf16.mxu1 %v11340_v2  ;;  %2271 = vst.msk [vmem:[#allocation2 + $0x18] sm:$0xf] %vm578_vm1, %v2267_v53  ;;  %2552 = vmatpush1.bf16.msra.mxu1 %v8121_v52  ;;  %v7229_v14 = vld [vmem:[%s8413_s26 + $0x53] sm:$0xff]  ;;  %v7289_v5 = vld [vmem:[%s8413_s26 + $0x24] sm:$0xff] }
  0x63   : > { %v8891_v43 = vld [vmem:[#allocation2 + $0x10] sm:$0xff]  ;;  %2284 = vst.msk [vmem:[#allocation2 + $0x38] sm:$0xff] %vm574_vm0, %v7227_v46  ;;  %2285 = vst.msk [vmem:[#allocation2 + $0x40] sm:$0xff] %vm574_vm0, %v7228_v15  ;;  %v7226_v54 = vld [vmem:[%s8413_s26 + $0x3b] sm:$0xf]  ;;  %v737_v15 = vpack.c.bf16 %v8709_v38, %v8700_v34 }
  0x64   : > { %2832 = vst.msk [vmem:[#allocation2 + $0x10] sm:$0xff] %vm574_vm0, %v2828_v3  ;;  %2286 = vst.msk [vmem:[#allocation2 + $0x48] sm:$0xff] %vm574_vm0, %v7229_v14  ;;  %v7225_v28 = vld [vmem:[%s8413_s26 + $0x33] sm:$0xff]  ;;  %v7293_v6 = vld [vmem:[%s8413_s26 + $0x44] sm:$0xff] }
  0x65   : > { %v7164_v60 = vld [vmem:[%s8413_s26 + $0x5a] sm:$0xf]  ;;  %v7294_v22 = vld [vmem:[%s8413_s26 + $0x4c] sm:$0xff]  ;;  %v8942_v29 = vld [vmem:[#allocation2 + $0x60] sm:$0xff] }
  0x66   : > { %1725 = vst.msk [vmem:[#allocation2 + $0x50] sm:$0xf] %vm578_vm1, %v7164_v60  ;;  %v8918_v37 = vld [vmem:[#allocation2 + $0x58] sm:$0xff]  ;;  %v7232_v42 = vld [vmem:[%s8413_s26 + $0x6b] sm:$0xff]  ;;  %v7231_v52 = vld [vmem:[%s8413_s26 + $0x63] sm:$0xff] }
  0x67   : > { %7085 = vmatmul.mubr.msk.bf16.gmra.mrb[32].mxu0 %vm574_vm0, %v735_v63  ;;  %v7295_v33 = vld [vmem:[%s8413_s26 + $0x54] sm:$0xff]  ;;  %v7290_v51 = vld [vmem:[%s8413_s26 + $0x2c] sm:$0xff]  ;;  %2293 = vst.msk [vmem:[#allocation2 + $0x5c] sm:$0xff] %vm574_vm0, %v7232_v42  ;;  %v1297_v63 = vpack.c.bf16 %v8757_v58, %v8735_v49  ;;  %v7292_v3 = vld [vmem:[%s8413_s26 + $0x3c] sm:$0xf] }
  0x68   : > { %977 = vmatprep.mubr.bf16.mxu0 %v11340_v2  ;;  %v8927_v19 = vld [vmem:[#allocation2 + $0x20] sm:$0xff]  ;;  %v7168_v35 = vld [vmem:[%s8413_s26 + $0x7a] sm:$0xf]  ;;  %v8960_v46 = vld [vmem:[#allocation2 + $0x70] sm:$0xff] }
  0x69   : > { %v8920_v44 = vld [vmem:[#allocation2 + $0x30] sm:$0xff]  ;;  %7151 = vmatmul.mubr.msk.bf16.gmra.mrb[32].mxu1 %vm574_vm0, %v1296_v18  ;;  %v8923_v31 = vld [vmem:[#allocation2 + $0x18] sm:$0xff]  ;;  %1733 = vst.msk [vmem:[#allocation2 + $0x6c] sm:$0xf] %vm578_vm1, %v7168_v35  ;;  %v7235_v49 = vld [vmem:[%s8413_s26 + $0x83] sm:$0xff] }
  0x6a   : > { %2278 = vst.msk [vmem:[#allocation2 + $0x2c] sm:$0xff] %vm574_vm0, %v7225_v28  ;;  %1539 = vmatprep.mubr.bf16.mxu1 %v11340_v2  ;;  %2838 = vst.msk [vmem:[#allocation2 + $0x1c] sm:$0xff] %vm574_vm0, %v7289_v5  ;;  %v8934_v32 = vld [vmem:[#allocation2 + $0x38] sm:$0xff]  ;;  %v8947_v53 = vld [vmem:[#allocation2 + $0x40] sm:$0xff] }
  0x6b   : > { %2279 = vst.msk [vmem:[#allocation2 + $0x34] sm:$0xf] %vm578_vm1, %v7226_v54  ;;  %2833 = vst.msk [vmem:[#allocation2 + $0x18] sm:$0xf] %vm578_vm1, %v2829_v20  ;;  %v7230_v39 = vld [vmem:[%s8413_s26 + $0x5b] sm:$0xf] }
  0x6c   : > { %2846 = vst.msk [vmem:[#allocation2 + $0x38] sm:$0xff] %vm574_vm0, %v7293_v6  ;;  %v8949_v57 = vld [vmem:[#allocation2 + $0x48] sm:$0xff]  ;;  %v7291_v21 = vld [vmem:[%s8413_s26 + $0x34] sm:$0xff]  ;;  %2847 = vst.msk [vmem:[#allocation2 + $0x40] sm:$0xff] %vm574_vm0, %v7294_v22 }
  0x6d   : > { %2848 = vst.msk [vmem:[#allocation2 + $0x48] sm:$0xff] %vm574_vm0, %v7295_v33  ;;  %v8964_v14 = vld [vmem:[#allocation2 + $0x50] sm:$0xff]  ;;  %v8966_v18 = vld [vmem:[#allocation2 + $0x78] sm:$0xff]  ;;  %2300 = vst.msk [vmem:[#allocation2 + $0x70] sm:$0xff] %vm574_vm0, %v7235_v49 }
  0x6e   : > { %2287 = vst.msk [vmem:[#allocation2 + $0x50] sm:$0xf] %vm578_vm1, %v7230_v39  ;;  %v7233_v20 = vld [vmem:[%s8413_s26 + $0x73] sm:$0xff]  ;;  %v7236_v28 = vld [vmem:[%s8413_s26 + $0x8b] sm:$0xff]  ;;  %v7234_v54 = vld [vmem:[%s8413_s26 + $0x7b] sm:$0xf] }
  0x6f   : > { %7086 = vmatmul.mubr.msk.bf16.gmra.mrb[36].mxu0 %vm574_vm0, %v736_v25  ;;  %2292 = vst.msk [vmem:[#allocation2 + $0x54] sm:$0xff] %vm574_vm0, %v7231_v52  ;;  %2301 = vst.msk [vmem:[#allocation2 + $0x78] sm:$0xff] %vm574_vm0, %v7236_v28  ;;  %v7172_v5 = vld [vmem:[%s8413_s26 + $0x9a] sm:$0xf]  ;;  %v9000_v33 = vld [vmem:[#allocation2 + $0x80] sm:$0xff]  ;;  %v1298_v52 = vpack.c.bf16 %v8767_v1, %v8759_v61 }
  0x70   : > { %987 = vmatprep.mubr.bf16.mxu0 %v11340_v2  ;;  %v8990_v60 = vld [vmem:[#allocation2 + $0x68] sm:$0xff]  ;;  %v7296_v22 = vld [vmem:[%s8413_s26 + $0x5c] sm:$0xf]  ;;  %1741 = vst.msk [vmem:[#allocation2 + $0x88] sm:$0xf] %vm578_vm1, %v7172_v5  ;;  %v7237_v35 = vld [vmem:[%s8413_s26 + $0x93] sm:$0xff] }
  0x71   : > { %v8978_v34 = vld [vmem:[#allocation2 + $0x28] sm:$0xff]  ;;  %7152 = vmatmul.mubr.msk.bf16.gmra.mrb[36].mxu1 %vm574_vm0, %v1297_v63  ;;  %2294 = vst.msk [vmem:[#allocation2 + $0x64] sm:$0xff] %vm574_vm0, %v7233_v20  ;;  %2302 = vst.msk [vmem:[#allocation2 + $0x80] sm:$0xff] %vm574_vm0, %v7237_v35  ;;  %v9009_v63 = vld [vmem:[#allocation2 + $0x90] sm:$0xff] }
  0x72   : > { %v8980_v38 = vld [vmem:[#allocation2 + $0x30] sm:$0xff]  ;;  %2839 = vst.msk [vmem:[#allocation2 + $0x24] sm:$0xff] %vm574_vm0, %v7290_v51  ;;  %1549 = vmatprep.mubr.bf16.mxu1 %v11340_v2  ;;  %v7297_v39 = vld [vmem:[%s8413_s26 + $0x64] sm:$0xff]  ;;  %v7176_v1 = vld [vmem:[%s8413_s26 + $0xba] sm:$0xf] }
  0x73   : > { %2840 = vst.msk [vmem:[#allocation2 + $0x2c] sm:$0xff] %vm574_vm0, %v7291_v21  ;;  %v7301_v42 = vld [vmem:[%s8413_s26 + $0x84] sm:$0xff]  ;;  %v7302_v51 = vld [vmem:[%s8413_s26 + $0x8c] sm:$0xff]  ;;  %v9011_v21 = vld [vmem:[#allocation2 + $0x98] sm:$0xff] }
  0x74   : > { %2841 = vst.msk [vmem:[#allocation2 + $0x34] sm:$0xf] %vm578_vm1, %v7292_v3  ;;  %2295 = vst.msk [vmem:[#allocation2 + $0x6c] sm:$0xf] %vm578_vm1, %v7234_v54  ;;  %v7240_v3 = vld [vmem:[%s8413_s26 + $0xab] sm:$0xff]  ;;  %v7299_v54 = vld [vmem:[%s8413_s26 + $0x74] sm:$0xff] }
  0x75   : > { %v7298_v28 = vld [vmem:[%s8413_s26 + $0x6c] sm:$0xff]  ;;  %2309 = vst.msk [vmem:[#allocation2 + $0x94] sm:$0xff] %vm574_vm0, %v7240_v3  ;;  %v7239_v61 = vld [vmem:[%s8413_s26 + $0xa3] sm:$0xff]  ;;  %v501_v3 = vlaneseq  ;;  %v7303_v6 = vld [vmem:[%s8413_s26 + $0x94] sm:$0xff] }
  0x76   : > { %v9016_v49 = vld [vmem:[#allocation2 + $0x50] sm:$0xff]  ;;  %v9018_v20 = vld [vmem:[#allocation2 + $0x58] sm:$0xff]  ;;  %1749 = vst.msk [vmem:[#allocation2 + $0xa4] sm:$0xf] %vm578_vm1, %v7176_v1  ;;  %v1299_v1 = vpack.c.bf16 %v8790_v10, %v8783_v7  ;;  %v7309_v9 = vld [vmem:[%s8413_s26 + $0xc4] sm:$0xff] }
  0x77   : > { %7087 = vmatmul.mubr.msk.bf16.gmra.mrb[40].mxu0 %vm574_vm0, %v737_v15  ;;  %v738_v15 = vpack.c.bf16 %v8737_v50, %v8730_v47  ;;  %v9022_v5 = vld [vmem:[#allocation2 + $0x70] sm:$0xff]  ;;  %2849 = vst.msk [vmem:[#allocation2 + $0x50] sm:$0xf] %vm578_vm1, %v7296_v22  ;;  %v7300_v47 = vld [vmem:[%s8413_s26 + $0x7c] sm:$0xf]  ;;  %v9043_v22 = vld [vmem:[#allocation2 + $0xa8] sm:$0xff] }
  0x78   : > { %997 = vmatprep.mubr.bf16.mxu0 %v11340_v2  ;;  %2854 = vst.msk [vmem:[#allocation2 + $0x54] sm:$0xff] %vm574_vm0, %v7297_v39  ;;  %v7238_v50 = vld [vmem:[%s8413_s26 + $0x9b] sm:$0xf]  ;;  %2862 = vst.msk [vmem:[#allocation2 + $0x70] sm:$0xff] %vm574_vm0, %v7301_v42  ;;  %v9047_v39 = vld [vmem:[#allocation2 + $0x60] sm:$0xff] }
  0x79   : > { %v9033_v35 = vld [vmem:[#allocation2 + $0x78] sm:$0xff]  ;;  %7153 = vmatmul.mubr.msk.bf16.gmra.mrb[40].mxu1 %vm574_vm0, %v1298_v52  ;;  %11350 = vst [vmem:[#allocation8_spill] sm:$0xff] %v9043_v22  ;;  %v9051_v25 = vld [vmem:[#allocation2 + $0x88] sm:$0xff]  ;;  %2855 = vst.msk [vmem:[#allocation2 + $0x5c] sm:$0xff] %vm574_vm0, %v7298_v28  ;;  %v739_v52 = vpack.c.bf16 %v8761_v62, %v8750_v55 }
  0x7a   : > { %2863 = vst.msk [vmem:[#allocation2 + $0x78] sm:$0xff] %vm574_vm0, %v7302_v51  ;;  %1559 = vmatprep.mubr.bf16.mxu1 %v11340_v2  ;;  %2308 = vst.msk [vmem:[#allocation2 + $0x8c] sm:$0xff] %vm574_vm0, %v7239_v61  ;;  %v7243_v28 = vld [vmem:[%s8413_s26 + $0xc3] sm:$0xff]  ;;  %v7244_v61 = vld [vmem:[%s8413_s26 + $0xcb] sm:$0xff] }
  0x7b   : > { %v9049_v42 = vld [vmem:[#allocation2 + $0x68] sm:$0xff]  ;;  %2303 = vst.msk [vmem:[#allocation2 + $0x88] sm:$0xf] %vm578_vm1, %v7238_v50  ;;  %v9075_v50 = vld [vmem:[#allocation2 + $0xb8] sm:$0xff] }
  0x7c   : > { %2856 = vst.msk [vmem:[#allocation2 + $0x64] sm:$0xff] %vm574_vm0, %v7299_v54  ;;  %v9068_v54 = vshrl.u32 %v501_v3, 7  ;;  %2316 = vst.msk [vmem:[#allocation2 + $0xa8] sm:$0xff] %vm574_vm0, %v7243_v28  ;;  %v7245_v51 = vld [vmem:[%s8413_s26 + $0xd3] sm:$0xff]  ;;  %v7242_v58 = vld [vmem:[%s8413_s26 + $0xbb] sm:$0xf] }
  0x7d   : > { %2857 = vst.msk [vmem:[#allocation2 + $0x6c] sm:$0xf] %vm578_vm1, %v7300_v47  ;;  %v9073_v47 = vld [vmem:[#allocation2 + $0xb0] sm:$0xff]  ;;  %11353 = vst [vmem:[#allocation11_spill] sm:$0xff] %v9075_v50  ;;  %v7180_v7 = vld [vmem:[%s8413_s26 + $0xda] sm:$0xf] }
  0x7e   : > { %11351 = vst [vmem:[#allocation9_spill] sm:$0xff] %v9068_v54  ;;  %11352 = vst [vmem:[#allocation10_spill] sm:$0xff] %v9073_v47  ;;  %v7241_v3 = vld [vmem:[%s8413_s26 + $0xb3] sm:$0xff]  ;;  %v7304_v10 = vld [vmem:[%s8413_s26 + $0x9c] sm:$0xf]  ;;  %v11345_v23 = vsub.s32 0, %v9068_v54 }
  0x7f   : > { %7088 = vmatmul.mubr.msk.bf16.gmra.mrb[44].mxu0 %vm574_vm0, %v738_v15  ;;  %v9064_v15 = vld [vmem:[#allocation2 + $0x80] sm:$0xff]  ;;  %2317 = vst.msk [vmem:[#allocation2 + $0xb0] sm:$0xff] %vm574_vm0, %v7244_v61  ;;  %2318 = vst.msk [vmem:[#allocation2 + $0xb8] sm:$0xff] %vm574_vm0, %v7245_v51  ;;  %v11349_v55 = vsub.s32 1, %v9068_v54  ;;  %v9097_v61 = vld [vmem:[#allocation2 + $0xc8] sm:$0xff] }
  0x80   : > { %1007 = vmatprep.mubr.bf16.mxu0 %v11340_v2  ;;  %2864 = vst.msk [vmem:[#allocation2 + $0x80] sm:$0xff] %vm574_vm0, %v7303_v6  ;;  %v7305_v28 = vld [vmem:[%s8413_s26 + $0xa4] sm:$0xff]  ;;  %v7246_v6 = vld [vmem:[%s8413_s26 + $0xdb] sm:$0xf]  ;;  %v7306_v22 = vld [vmem:[%s8413_s26 + $0xac] sm:$0xff] }
  0x81   : > { %1757 = vst.msk [vmem:[#allocation2 + $0xc0] sm:$0xf] %vm578_vm1, %v7180_v7  ;;  %7154 = vmatmul.mubr.msk.bf16.gmra.mrb[44].mxu1 %vm574_vm0, %v1299_v1  ;;  %v9095_v62 = vld [vmem:[#allocation2 + $0xa0] sm:$0xff]  ;;  %v9107_v1 = vld [vmem:[#allocation2 + $0x90] sm:$0xff] }
  0x82   : > { %11354 = vst [vmem:[#allocation12_spill] sm:$0xff] %v9095_v62  ;;  %1569 = vmatprep.mubr.bf16.mxu1 %v11340_v2  ;;  %v9101_v51 = vld [vmem:[#allocation2 + $0x88] sm:$0xff]  ;;  %2310 = vst.msk [vmem:[#allocation2 + $0x9c] sm:$0xff] %vm574_vm0, %v7241_v3  ;;  %v7311_v56 = vld [vmem:[%s8413_s26 + $0xd4] sm:$0xff] }
  0x83   : > { %2311 = vst.msk [vmem:[#allocation2 + $0xa4] sm:$0xf] %vm578_vm1, %v7242_v58  ;;  %2865 = vst.msk [vmem:[#allocation2 + $0x88] sm:$0xf] %vm578_vm1, %v7304_v10  ;;  %v7310_v7 = vld [vmem:[%s8413_s26 + $0xcc] sm:$0xff]  ;;  %v7247_v47 = vld [vmem:[%s8413_s26 + $0xe3] sm:$0xff] }
  0x84   : > { %2870 = vst.msk [vmem:[#allocation2 + $0x8c] sm:$0xff] %vm574_vm0, %v7305_v28  ;;  %v499_v58 = vld [vmem:[%s11326_s2] sm:$0x3]  ;;  %v9120_v3 = vld [vmem:[#allocation2 + $0xa8] sm:$0xff]  ;;  %v7184_v28 = vld [vmem:[%s8413_s26 + $0xfa] sm:$0xf] }
  0x85   : > { %v9124_v24 = vrot.slane %v499_v58, %v11345_v23  ;;  %v508_v10 = vrot.slane %v499_v58, %v11349_v55  ;;  %2878 = vst.msk [vmem:[#allocation2 + $0xa8] sm:$0xff] %vm574_vm0, %v7309_v9  ;;  %v7248_v62 = vld [vmem:[%s8413_s26 + $0xeb] sm:$0xff]  ;;  %v740_v23 = vpack.c.bf16 %v8810_v27, %v8808_v26  ;;  %v7307_v26 = vld [vmem:[%s8413_s26 + $0xb4] sm:$0xff]  ;;  %v7308_v27 = vld [vmem:[%s8413_s26 + $0xbc] sm:$0xf] }
  0x86   : > { %v9135_v50 = vld [vmem:[#allocation2 + $0xb0] sm:$0xff]  ;;  %1765 = vst.msk [vmem:[#allocation2 + $0xdc] sm:$0xf] %vm578_vm1, %v7184_v28  ;;  %v9142_v54 = vld [vmem:[#allocation2 + $0xb8] sm:$0xff] }
  0x87   : > { %7089 = vmatmul.mubr.msk.bf16.gmra.mrb[48].mxu0 %vm574_vm0, %v739_v52  ;;  %v9129_v52 = vld [vmem:[#allocation2 + $0xd0] sm:$0xff]  ;;  %2879 = vst.msk [vmem:[#allocation2 + $0xb0] sm:$0xff] %vm574_vm0, %v7310_v7  ;;  %566 = vst [vmem:[#allocation3 + $0x1a0] sm:$0xff] %v9124_v24 }
  0x88   : > { %1017 = vmatprep.mubr.bf16.mxu0 %v11340_v2  ;;  %v1300_v2 = vpack.c.bf16 %v8868_v59, %v8848_v30  ;;  %568 = vst [vmem:[#allocation3 + $0x1b0] sm:$0xff] %v9124_v24  ;;  %515 = vst.msk [vmem:[#allocation3 + $0x8] sm:$0xff] %vm514_vm2, %v508_v10  ;;  %v9178_v30 = vld [vmem:[#allocation2 + $0xc0] sm:$0xff]  ;;  %v7249_v7 = vld [vmem:[%s8413_s26 + $0xf3] sm:$0xff] }
  0x89   : > { %517 = vst.msk [vmem:[#allocation3 + $0x18] sm:$0xff] %vm514_vm2, %v508_v10  ;;  %519 = vst.msk [vmem:[#allocation3 + $0x28] sm:$0xff] %vm514_vm2, %v508_v10  ;;  %v8126_v55 = vld [vmem:[%s11325_s1 + $0x194] ss:$8 sps:$4 sm:$0xff]  }
  0x8a   : > { %521 = vst.msk [vmem:[#allocation3 + $0x38] sm:$0xff] %vm514_vm2, %v508_v10  ;;  %523 = vst.msk [vmem:[#allocation3 + $0x48] sm:$0xff] %vm514_vm2, %v508_v10  ;;  %7155 = vmatmul.mubr.msk.bf16.gmra.mrb[48].mxu1 %vm574_vm0, %v1300_v2  ;;  %v9191_v58 = vld [vmem:[#allocation2 + $0xa0] sm:$0xff]  ;;  %v7316_v59 = vld [vmem:[%s8413_s26 + $0xfc] sm:$0xf] }
  0x8b   : > { %525 = vst.msk [vmem:[#allocation3 + $0x58] sm:$0xff] %vm514_vm2, %v508_v10  ;;  %527 = vst.msk [vmem:[#allocation3 + $0x68] sm:$0xff] %vm514_vm2, %v508_v10 }
  0x8c   : > { %529 = vst.msk [vmem:[#allocation3 + $0x78] sm:$0xff] %vm514_vm2, %v508_v10  ;;  %531 = vst.msk [vmem:[#allocation3 + $0x88] sm:$0xff] %vm514_vm2, %v508_v10 }
  0x8d   : > { %533 = vst.msk [vmem:[#allocation3 + $0x98] sm:$0xff] %vm514_vm2, %v508_v10  ;;  %535 = vst.msk [vmem:[#allocation3 + $0xa8] sm:$0xff] %vm514_vm2, %v508_v10  ;;  %v9204_v2 = vld [vmem:[#allocation2 + $0xd8] sm:$0xff] }
  0x8e   : > { %537 = vst.msk [vmem:[#allocation3 + $0xb8] sm:$0xff] %vm514_vm2, %v508_v10  ;;  %539 = vst.msk [vmem:[#allocation3 + $0xc8] sm:$0xff] %vm514_vm2, %v508_v10 }
  0x8f   : > { %541 = vst.msk [vmem:[#allocation3 + $0xd8] sm:$0xff] %vm514_vm2, %v508_v10  ;;  %543 = vst.msk [vmem:[#allocation3 + $0xe8] sm:$0xff] %vm514_vm2, %v508_v10  ;;  %7090 = vmatmul.mubr.msk.bf16.gmra.mrb[52].mxu0 %vm574_vm0, %v740_v23  ;;  %v1301_v23 = vpack.c.bf16 %v8872_v13, %v8870_v0  ;;  %v2412_v13 = vpack.c.bf16 %v8845_v41, %v8843_v40  ;;  %v8132_v40 = vld [vmem:[%s11325_s1 + $0x1b4] ss:$8 sps:$4 sm:$0xff]   ;;  %v8130_v41 = vld [vmem:[%s11325_s1 + $0x1b0] ss:$8 sps:$4 sm:$0xff]  }
  0x90   : > { %545 = vst.msk [vmem:[#allocation3 + $0xf8] sm:$0xff] %vm514_vm2, %v508_v10  ;;  %547 = vst.msk [vmem:[#allocation3 + $0x108] sm:$0xff] %vm514_vm2, %v508_v10 }
  0x91   : > { %549 = vst.msk [vmem:[#allocation3 + $0x118] sm:$0xff] %vm514_vm2, %v508_v10  ;;  %551 = vst.msk [vmem:[#allocation3 + $0x128] sm:$0xff] %vm514_vm2, %v508_v10 }
  0x92   : > { %553 = vst.msk [vmem:[#allocation3 + $0x138] sm:$0xff] %vm514_vm2, %v508_v10  ;;  %555 = vst.msk [vmem:[#allocation3 + $0x148] sm:$0xff] %vm514_vm2, %v508_v10 }
  0x93   : > { %557 = vst.msk [vmem:[#allocation3 + $0x158] sm:$0xff] %vm514_vm2, %v508_v10  ;;  %559 = vst.msk [vmem:[#allocation3 + $0x168] sm:$0xff] %vm514_vm2, %v508_v10 }
  0x94   : > { %561 = vst.msk [vmem:[#allocation3 + $0x178] sm:$0xff] %vm514_vm2, %v508_v10  ;;  %563 = vst.msk [vmem:[#allocation3 + $0x188] sm:$0xff] %vm514_vm2, %v508_v10 }
  0x95   : > { %565 = vst.msk [vmem:[#allocation3 + $0x198] sm:$0xff] %vm514_vm2, %v508_v10  ;;  %567 = vst.msk [vmem:[#allocation3 + $0x1a8] sm:$0xff] %vm514_vm2, %v508_v10 }
  0x96   : > { %569 = vst.msk [vmem:[#allocation3 + $0x1b8] sm:$0xff] %vm514_vm2, %v508_v10  ;;  %v7250_v10 = vld [vmem:[%s8413_s26 + $0xfb] sm:$0xf] }
  0x97   : > { %2325 = vst.msk [vmem:[#allocation2 + $0xcc] sm:$0xff] %vm574_vm0, %v7248_v62  ;;  %2880 = vst.msk [vmem:[#allocation2 + $0xb8] sm:$0xff] %vm574_vm0, %v7311_v56  ;;  %v9189_v62 = vld [vmem:[#allocation2 + $0x98] sm:$0xff]  ;;  %v11355_v56 = vmov 0  }
  0x98   : > { %2319 = vst.msk [vmem:[#allocation2 + $0xc0] sm:$0xf] %vm578_vm1, %v7246_v6  ;;  %1579 = vmatprep.mubr.bf16.mxu1 %v11355_v56  ;;  %v2421_v28 = vpack.c.bf16 %v9189_v62, %v9107_v1  ;;  %2873 = vst.msk [vmem:[#allocation2 + $0xa4] sm:$0xf] %vm578_vm1, %v7308_v27  ;;  %2011 = vmatprep.mubr.bf16.mxu0 %v11355_v56  ;;  %v8118_v27 = vld [vmem:[%s11325_s1 + $0x180] ss:$8 sps:$4 sm:$0xff]  }
  0x99   : > { %2324 = vst.msk [vmem:[#allocation2 + $0xc4] sm:$0xff] %vm574_vm0, %v7247_v47  ;;  %2871 = vst.msk [vmem:[#allocation2 + $0x94] sm:$0xff] %vm574_vm0, %v7306_v22  ;;  %v7312_v22 = vld [vmem:[%s8413_s26 + $0xdc] sm:$0xf]  ;;  %7156 = vmatmul.mubr.msk.bf16.gmra.mrb[52].mxu1 %vm574_vm0, %v1301_v23  ;;  %v8124_v6 = vld [vmem:[%s11325_s1 + $0x190] ss:$8 sps:$4 sm:$0xff]   ;;  %v11356_v47 = vpack.c.bf16 %v8544_v17, %v8542_v16 }
  0x9a   : > { %2872 = vst.msk [vmem:[#allocation2 + $0x9c] sm:$0xff] %vm574_vm0, %v7307_v26  ;;  %2326 = vst.msk [vmem:[#allocation2 + $0xd4] sm:$0xff] %vm574_vm0, %v7249_v7  ;;  %v7313_v26 = vld [vmem:[%s8413_s26 + $0xe4] sm:$0xff]  ;;  %v7314_v7 = vld [vmem:[%s8413_s26 + $0xec] sm:$0xff]  ;;  %2573 = vmatprep.mubr.bf16.mxu1 %v11355_v56 }
  0x9b   : > { %2327 = vst.msk [vmem:[#allocation2 + $0xdc] sm:$0xf] %vm578_vm1, %v7250_v10  ;;  %v7315_v10 = vld [vmem:[%s8413_s26 + $0xf4] sm:$0xff]  ;;  %7209 = vmatmul.mubr.msk.bf16.vlgmr.msra.gmra.mrb[56].mxu0 %vm574_vm0, %v11356_v47  ;;  %v8129_v23 = vld [vmem:[%s11325_s1 + $0x1a4] ss:$8 sps:$4 sm:$0xff]  }
  0x9c   : > { %3104 = vmatpush1.bf16.msra.mxu0 %v8118_v27  ;;  %2021 = vmatprep.mubr.bf16.mxu0 %v11355_v56  ;;  %v8127_v16 = vld [vmem:[%s11325_s1 + $0x1a0] ss:$8 sps:$4 sm:$0xff]   ;;  %v8138_v47 = vld [vmem:[%s11325_s1 + $0x1d4] ss:$8 sps:$4 sm:$0xff]   ;;  %v11357_v27 = vpack.c.bf16 %v8854_v48, %v8852_v45  ;;  %v2415_v45 = vpack.c.bf16 %v8934_v32, %v8980_v38  ;;  %v11358_v48 = vpack.c.bf16 %v8899_v11, %v8897_v8 }
  0x9d   : > { %3105 = vmatprep.subr.bf16.mxu0 %v8126_v55  ;;  %v1851_v55 = vpack.c.bf16 %v8882_v12, %v8838_v36  ;;  %v8135_v36 = vld [vmem:[%s11325_s1 + $0x1c4] ss:$8 sps:$4 sm:$0xff]   ;;  %v2413_v12 = vpack.c.bf16 %v8923_v31, %v8891_v43  ;;  %v2414_v43 = vpack.c.bf16 %v8978_v34, %v8927_v19  ;;  %v1853_v31 = vpack.c.bf16 %v8885_v4, %v8920_v44  ;;  %v11373_v34 = vld [vmem:[#allocation11_spill] sm:$0xff]  ;;  %v11374_v38 = vld [vmem:[#allocation10_spill] sm:$0xff] }
  0x9e   : > { %v11359_v4 = vpack.c.bf16 %v8949_v57, %v8947_v53  ;;  %v11360_v44 = vpack.c.bf16 %v8918_v37, %v8964_v14  ;;  %v11361_v8 = vpack.c.bf16 %v9018_v20, %v9016_v49  ;;  %v11362_v11 = vpack.c.bf16 %v8990_v60, %v8942_v29  ;;  %v11370_v14 = vld [vmem:[#allocation12_spill] sm:$0xff]  ;;  %v648_v62 = vld [vmem:[#allocation3 + $0x28] sm:$0xff] }
  0x9f   : > { %v11363_v37 = vpack.c.bf16 %v9049_v42, %v9047_v39  ;;  %v11364_v19 = vpack.c.bf16 %v8966_v18, %v8960_v46  ;;  %v11365_v32 = vpack.c.bf16 %v9033_v35, %v9022_v5  ;;  %v11366_v29 = vpack.c.bf16 %v9051_v25, %v9000_v33  ;;  %v11369_v46 = vld [vmem:[#allocation8_spill] sm:$0xff]  ;;  %v646_v5 = vld [vmem:[#allocation3 + $0x18] sm:$0xff] }
  0xa0   : > { %v9220_v9 = vld [vmem:[#allocation2 + $0xc0] sm:$0xff]  ;;  %v9222_v0 = vld [vmem:[#allocation2 + $0xc8] sm:$0xff]  ;;  %3106 = vmatpush1.bf16.msra.mxu0 %v8124_v6  ;;  %v8136_v6 = vld [vmem:[%s11325_s1 + $0x1d0] ss:$8 sps:$4 sm:$0xff]   ;;  %v11367_v53 = vpack.c.bf16 %v9101_v51, %v9064_v15  ;;  %v11368_v57 = vpack.c.bf16 %v9011_v21, %v9009_v63  ;;  %v11371_v18 = vpack.c.bf16 %v11369_v46, %v11370_v14  ;;  %v11372_v25 = vpack.c.bf16 %v9120_v3, %v9191_v58 }
  0xa1   : > { %2881 = vst.msk [vmem:[#allocation2 + $0xc0] sm:$0xf] %vm578_vm1, %v7312_v22  ;;  %v9244_v22 = vld [vmem:[#allocation2 + $0xd0] sm:$0xff]  ;;  %3107 = vmatprep.subr.bf16.mxu0 %v8129_v23  ;;  %7275 = vmatmul.mubr.msk.bf16.vlgmr.msra.gmra.mrb[56].mxu1 %vm574_vm0, %v2412_v13  ;;  %v11375_v60 = vpack.c.bf16 %v11373_v34, %v11374_v38  ;;  %v11376_v33 = vpack.c.bf16 %v9142_v54, %v9135_v50  ;;  %v644_v21 = vld [vmem:[#allocation3 + $0x8] sm:$0xff]  ;;  %v2946_v3 = vld [vmem:[#allocation2] sm:$0xff] }
  0xa2   : > { %2886 = vst.msk [vmem:[#allocation2 + $0xc4] sm:$0xff] %vm574_vm0, %v7313_v26  ;;  %v9246_v26 = vld [vmem:[#allocation2 + $0xd8] sm:$0xff]  ;;  %2887 = vst.msk [vmem:[#allocation2 + $0xcc] sm:$0xff] %vm574_vm0, %v7314_v7  ;;  %2583 = vmatprep.mubr.bf16.mxu1 %v11355_v56  ;;  %v11377_v63 = vpack.c.bf16 %v9097_v61, %v9178_v30  ;;  %v11378_v50 = vpack.c.bf16 %v9222_v0, %v9220_v9  ;;  %v11379_v51 = vpack.c.bf16 %v9204_v2, %v9129_v52  ;;  %v2947_v30 = vld [vmem:[#allocation2 + $0x8] sm:$0xff] }
  0xa3   : > { %v2425_v17 = vpack.c.bf16 %v9246_v26, %v9244_v22  ;;  %2888 = vst.msk [vmem:[#allocation2 + $0xd4] sm:$0xff] %vm574_vm0, %v7315_v10  ;;  %7210 = vmatmul.mubr.msk.bf16.gmra.mrb[60].mxu0 %vm574_vm0, %v1851_v55  ;;  %v650_v7 = vld [vmem:[#allocation3 + $0x38] sm:$0xff]  ;;  %v2974_v10 = vpack.c.bf16 %v2947_v30, %v2946_v3  ;;  %v2950_v38 = vld [vmem:[#allocation2 + $0x20] sm:$0xff] }
  0xa4   : > { %2889 = vst.msk [vmem:[#allocation2 + $0xdc] sm:$0xf] %vm578_vm1, %v7316_v59  ;;  %2031 = vmatprep.mubr.bf16.mxu0 %v11355_v56  ;;  %3108 = vmatpush1.bf16.msra.mxu0 %v8127_v16  ;;  %v8133_v59 = vld [vmem:[%s11325_s1 + $0x1c0] ss:$8 sps:$4 sm:$0xff]   ;;  %vm6830_vm1 = vcmask 1043456  }
  0xa5   : > { %3109 = vmatprep.subr.bf16.mxu0 %v8132_v40 }
  0xa8   : > { %3110 = vmatpush1.bf16.msra.mxu0 %v8130_v41 }
  0xa9   : > { %3111 = vmatprep.subr.bf16.mxu0 %v8135_v36  ;;  %7276 = vmatmul.mubr.msk.bf16.gmra.mrb[60].mxu1 %vm574_vm0, %v2413_v12 }
  0xaa   : > { %2593 = vmatprep.mubr.bf16.mxu1 %v11355_v56 }
  0xab   : > { %7211 = vmatmul.mubr.msk.bf16.gmra.mrb[64].mxu0 %vm574_vm0, %v11357_v27  ;;  %v2948_v27 = vld [vmem:[#allocation2 + $0x10] sm:$0xff] }
  0xac   : > { %2041 = vmatprep.mubr.bf16.mxu0 %v11355_v56  ;;  %3112 = vmatpush1.bf16.msra.mxu0 %v8133_v59 }
  0xad   : > { %3113 = vmatprep.subr.bf16.mxu0 %v8138_v47 }
  0xb0   : > { %3114 = vmatpush1.bf16.msra.mxu0 %v8136_v6 }
  0xb1   : > { %7277 = vmatmul.mubr.msk.bf16.gmra.mrb[64].mxu1 %vm574_vm0, %v2414_v43  ;;  %v2949_v43 = vld [vmem:[#allocation2 + $0x18] sm:$0xff] }
  0xb2   : > { %2603 = vmatprep.mubr.bf16.mxu1 %v11355_v56 }
  0xb3   : > { %7212 = vmatmul.mubr.msk.bf16.gmra.mrb[68].mxu0 %vm574_vm0, %v1853_v31  ;;  %v652_v31 = vld [vmem:[#allocation3 + $0x48] sm:$0xff] }
  0xb4   : > { %2051 = vmatprep.mubr.bf16.mxu0 %v11355_v56 }
  0xb9   : > { %7278 = vmatmul.mubr.msk.bf16.gmra.mrb[68].mxu1 %vm574_vm0, %v2415_v45 }
  0xba   : > { %2613 = vmatprep.mubr.bf16.mxu1 %v11355_v56 }
  0xbb   : > { %7213 = vmatmul.mubr.msk.bf16.gmra.mrb[72].mxu0 %vm574_vm0, %v11358_v48 }
  0xbc   : > { %2061 = vmatprep.mubr.bf16.mxu0 %v11355_v56 }
  0xc1   : > { %7279 = vmatmul.mubr.msk.bf16.gmra.mrb[72].mxu1 %vm574_vm0, %v11359_v4  ;;  %v654_v4 = vld [vmem:[#allocation3 + $0x58] sm:$0xff] }
  0xc2   : > { %2623 = vmatprep.mubr.bf16.mxu1 %v11355_v56 }
  0xc3   : > { %7214 = vmatmul.mubr.msk.bf16.gmra.mrb[76].mxu0 %vm574_vm0, %v11360_v44 }
  0xc4   : > { %2071 = vmatprep.mubr.bf16.mxu0 %v11355_v56 }
  0xc9   : > { %7280 = vmatmul.mubr.msk.bf16.gmra.mrb[76].mxu1 %vm574_vm0, %v11361_v8  ;;  %v2975_v8 = vpack.c.bf16 %v2949_v43, %v2948_v27 }
  0xca   : > { %2633 = vmatprep.mubr.bf16.mxu1 %v11355_v56 }
  0xcb   : > { %7215 = vmatmul.mubr.msk.bf16.gmra.mrb[80].mxu0 %vm574_vm0, %v11362_v11 }
  0xcc   : > { %2081 = vmatprep.mubr.bf16.mxu0 %v11355_v56 }
  0xd1   : > { %7281 = vmatmul.mubr.msk.bf16.gmra.mrb[80].mxu1 %vm574_vm0, %v11363_v37 }
  0xd2   : > { %2643 = vmatprep.mubr.bf16.mxu1 %v11355_v56 }
  0xd3   : > { %7216 = vmatmul.mubr.msk.bf16.gmra.mrb[84].mxu0 %vm574_vm0, %v11364_v19 }
  0xd4   : > { %2091 = vmatprep.mubr.bf16.mxu0 %v11355_v56 }
  0xd9   : > { %7282 = vmatmul.mubr.msk.bf16.gmra.mrb[84].mxu1 %vm574_vm0, %v11365_v32 }
  0xda   : > { %2653 = vmatprep.mubr.bf16.mxu1 %v11355_v56 }
  0xdb   : > { %7217 = vmatmul.mubr.msk.bf16.gmra.mrb[88].mxu0 %vm574_vm0, %v11366_v29 }
  0xdc   : > { %2101 = vmatprep.mubr.bf16.mxu0 %v11355_v56 }
  0xe1   : > { %7283 = vmatmul.mubr.msk.bf16.gmra.mrb[88].mxu1 %vm574_vm0, %v11367_v53 }
  0xe2   : > { %2663 = vmatprep.mubr.bf16.mxu1 %v11355_v56 }
  0xe3   : > { %7218 = vmatmul.mubr.msk.bf16.gmra.mrb[92].mxu0 %vm574_vm0, %v11368_v57 }
  0xe4   : > { %2111 = vmatprep.mubr.bf16.mxu0 %v11355_v56 }
  0xe9   : > { %7284 = vmatmul.mubr.msk.bf16.gmra.mrb[92].mxu1 %vm574_vm0, %v2421_v28 }
  0xea   : > { %2673 = vmatprep.mubr.bf16.mxu1 %v11355_v56 }
  0xeb   : > { %7219 = vmatmul.mubr.msk.bf16.gmra.mrb[96].mxu0 %vm574_vm0, %v11371_v18 }
  0xec   : > { %2121 = vmatprep.mubr.bf16.mxu0 %v11355_v56 }
  0xf1   : > { %7285 = vmatmul.mubr.msk.bf16.gmra.mrb[96].mxu1 %vm574_vm0, %v11372_v25 }
  0xf2   : > { %2683 = vmatprep.mubr.bf16.mxu1 %v11355_v56 }
  0xf3   : > { %7220 = vmatmul.mubr.msk.bf16.gmra.mrb[100].mxu0 %vm574_vm0, %v11375_v60  ;;  %v2951_v60 = vld [vmem:[#allocation2 + $0x28] sm:$0xff] }
  0xf4   : > { %2131 = vmatprep.mubr.bf16.mxu0 %v11355_v56 }
  0xf9   : > { %7286 = vmatmul.mubr.msk.bf16.gmra.mrb[100].mxu1 %vm574_vm0, %v11376_v33  ;;  %v656_v33 = vld [vmem:[#allocation3 + $0x68] sm:$0xff] }
  0xfa   : > { %2693 = vmatprep.mubr.bf16.mxu1 %v11355_v56  ;;  %v889_v49 = vpop.f32.mrb[0].mxu0 }
  0xfb   : > { %7221 = vmatmul.mubr.msk.bf16.gmra.mrb[104].mxu0 %vm574_vm0, %v11377_v63  ;;  %v891_v20 = vpop.f32.mrb[1].mxu0  ;;  %v1028_v42 = vadd.f32 %v889_v49, %v9124_v24 }
  0xfc   : > { %2141 = vmatprep.mubr.bf16.mxu0 %v11355_v56  ;;  %v1029_v35 = vadd.f32 %v891_v20, %v644_v21  ;;  %v893_v39 = vpop.f32.mrb[2].mxu0  ;;  %v1451_v1 = vpop.f32.mrb[0].mxu1 }
  0xfd   : > { %v895_v15 = vpop.f32.mrb[3].mxu0  ;;  %v1030_v61 = vadd.f32 %v893_v39, %v9124_v24  ;;  %v9402_v9 = vadd.f32 %v1451_v1, %v1028_v42  ;;  %v1453_v58 = vpop.f32.mrb[1].mxu1  ;;  %v2976_v42 = vpack.c.bf16 %v2951_v60, %v2950_v38 }
  0xfe   : > { %1085 = vst.msk [vmem:[#allocation3 + $0x8] sm:$0xff] %vm514_vm2, %v1029_v35  ;;  %v1031_v54 = vadd.f32 %v895_v15, %v646_v5  ;;  %v1455_v0 = vpop.f32.mrb[2].mxu1  ;;  %v658_v35 = vld [vmem:[#allocation3 + $0x78] sm:$0xff] }
  0xff   : > { %v9404_v52 = vadd.f32 %v1455_v0, %v1030_v61  ;;  %v1457_v2 = vpop.f32.mrb[3].mxu1 }
 0x100   : > { %1087 = vst.msk [vmem:[#allocation3 + $0x18] sm:$0xff] %vm514_vm2, %v1031_v54 }
 0x101   : > { %7287 = vmatmul.mubr.msk.bf16.gmra.mrb[104].mxu1 %vm574_vm0, %v11378_v50 }
 0x102   : > { %2703 = vmatprep.mubr.bf16.mxu1 %v11355_v56  ;;  %v899_v28 = vpop.f32.mrb[4].mxu0 }
 0x103   : > { %7222 = vmatmul.mubr.msk.bf16.gmra.mrb[108].mxu0 %vm574_vm0, %v11379_v51  ;;  %v901_v13 = vpop.f32.mrb[5].mxu0  ;;  %v1032_v41 = vadd.f32 %v899_v28, %v9124_v24 }
 0x104   : > { %3135 = vmatprep.mubr.bf16.mxu0 %v11355_v56  ;;  %v1033_v23 = vadd.f32 %v901_v13, %v648_v62  ;;  %v903_v16 = vpop.f32.mrb[6].mxu0  ;;  %v1461_v45 = vpop.f32.mrb[4].mxu1  ;;  %v2952_v13 = vld [vmem:[#allocation2 + $0x30] sm:$0xff] }
 0x105   : > { %v905_v55 = vpop.f32.mrb[7].mxu0  ;;  %v1205_v40 = vld [vmem:[#allocation3 + $0x8] sm:$0xff]  ;;  %v1034_v47 = vadd.f32 %v903_v16, %v9124_v24  ;;  %v9418_v26 = vadd.f32 %v1461_v45, %v1032_v41  ;;  %v662_v41 = vld [vmem:[#allocation3 + $0x98] sm:$0xff] }
 0x106   : > { %1089 = vst.msk [vmem:[#allocation3 + $0x28] sm:$0xff] %vm514_vm2, %v1033_v23  ;;  %v1035_v36 = vadd.f32 %v905_v55, %v650_v7  ;;  %v1591_v12 = vadd.f32 %v1453_v58, %v1205_v40  ;;  %v2953_v7 = vld [vmem:[#allocation2 + $0x38] sm:$0xff] }
 0x107   : > { %v1207_v59 = vld [vmem:[#allocation3 + $0x18] sm:$0xff] }
 0x108   : > { %1091 = vst.msk [vmem:[#allocation3 + $0x38] sm:$0xff] %vm514_vm2, %v1035_v36  ;;  %1647 = vst.msk [vmem:[#allocation3 + $0x8] sm:$0xff] %vm514_vm2, %v1591_v12  ;;  %v1593_v6 = vadd.f32 %v1457_v2, %v1207_v59  ;;  %v660_v2 = vld [vmem:[#allocation3 + $0x88] sm:$0xff]  ;;  %v2977_v12 = vpack.c.bf16 %v2953_v7, %v2952_v13 }
 0x109   : > { %7288 = vmatmul.mubr.msk.bf16.gmra.mrb[108].mxu1 %vm574_vm0, %v2425_v17  ;;  %v1463_v17 = vpop.f32.mrb[5].mxu1 }
 0x10a   : > { %1649 = vst.msk [vmem:[#allocation3 + $0x18] sm:$0xff] %vm514_vm2, %v1593_v6  ;;  %v909_v22 = vpop.f32.mrb[8].mxu0  ;;  %v1465_v44 = vpop.f32.mrb[6].mxu1 }
 0x10b   : > { %7341 = vmatmul.mubr.msk.bf16.vlgmr.msra.gmra.mrb[112].mxu0 %vm574_vm0, %v2974_v10  ;;  %v911_v48 = vpop.f32.mrb[9].mxu0  ;;  %v9420_v19 = vadd.f32 %v1465_v44, %v1034_v47  ;;  %v1467_v32 = vpop.f32.mrb[7].mxu1  ;;  %v1036_v57 = vadd.f32 %v909_v22, %v9124_v24 }
 0x10c   : > { %3145 = vmatprep.mubr.bf16.mxu0 %v11355_v56  ;;  %v1037_v11 = vadd.f32 %v911_v48, %v652_v31  ;;  %v913_v37 = vpop.f32.mrb[10].mxu0  ;;  %v1471_v63 = vpop.f32.mrb[8].mxu1 }
 0x10d   : > { %v915_v29 = vpop.f32.mrb[11].mxu0  ;;  %v1209_v53 = vld [vmem:[#allocation3 + $0x28] sm:$0xff]  ;;  %v1038_v25 = vadd.f32 %v913_v37, %v9124_v24  ;;  %v9430_v49 = vadd.f32 %v1471_v63, %v1036_v57  ;;  %v1473_v20 = vpop.f32.mrb[9].mxu1 }
 0x10e   : > { %1093 = vst.msk [vmem:[#allocation3 + $0x48] sm:$0xff] %vm514_vm2, %v1037_v11  ;;  %v1039_v46 = vadd.f32 %v915_v29, %v654_v4  ;;  %v1595_v14 = vadd.f32 %v1463_v17, %v1209_v53  ;;  %v1475_v39 = vpop.f32.mrb[10].mxu1  ;;  %v2955_v11 = vld [vmem:[#allocation2 + $0x48] sm:$0xff] }
 0x10f   : > { %v1211_v18 = vld [vmem:[#allocation3 + $0x38] sm:$0xff]  ;;  %v9432_v50 = vadd.f32 %v1475_v39, %v1038_v25  ;;  %v1477_v61 = vpop.f32.mrb[11].mxu1  ;;  %v664_v37 = vld [vmem:[#allocation3 + $0xa8] sm:$0xff] }
 0x110   : > { %1095 = vst.msk [vmem:[#allocation3 + $0x58] sm:$0xff] %vm514_vm2, %v1039_v46  ;;  %1651 = vst.msk [vmem:[#allocation3 + $0x28] sm:$0xff] %vm514_vm2, %v1595_v14  ;;  %v1597_v34 = vadd.f32 %v1467_v32, %v1211_v18  ;;  %v666_v14 = vld [vmem:[#allocation3 + $0xb8] sm:$0xff] }
 0x112   : > { %1653 = vst.msk [vmem:[#allocation3 + $0x38] sm:$0xff] %vm514_vm2, %v1597_v34  ;;  %v919_v21 = vpop.f32.mrb[12].mxu0 }
 0x113   : > { %7342 = vmatmul.mubr.msk.bf16.gmra.mrb[116].mxu0 %vm574_vm0, %v2975_v8  ;;  %v921_v5 = vpop.f32.mrb[13].mxu0  ;;  %v1040_v3 = vadd.f32 %v919_v21, %v9124_v24  ;;  %v2954_v8 = vld [vmem:[#allocation2 + $0x40] sm:$0xff] }
 0x114   : > { %3155 = vmatprep.mubr.bf16.mxu0 %v11355_v56  ;;  %v1041_v15 = vadd.f32 %v921_v5, %v656_v33  ;;  %v923_v54 = vpop.f32.mrb[14].mxu0  ;;  %v1481_v10 = vpop.f32.mrb[12].mxu1  ;;  %v2978_v25 = vpack.c.bf16 %v2955_v11, %v2954_v8  ;;  %v674_v8 = vld [vmem:[#allocation3 + $0xf8] sm:$0xff] }
 0x115   : > { %v925_v51 = vpop.f32.mrb[15].mxu0  ;;  %v1213_v1 = vld [vmem:[#allocation3 + $0x48] sm:$0xff]  ;;  %v1042_v28 = vadd.f32 %v923_v54, %v9124_v24  ;;  %v9442_v16 = vadd.f32 %v1481_v10, %v1040_v3  ;;  %v1483_v55 = vpop.f32.mrb[13].mxu1  ;;  %v2956_v54 = vld [vmem:[#allocation2 + $0x50] sm:$0xff] }
 0x116   : > { %1097 = vst.msk [vmem:[#allocation3 + $0x68] sm:$0xff] %vm514_vm2, %v1041_v15  ;;  %v1043_v30 = vadd.f32 %v925_v51, %v658_v35  ;;  %v1599_v62 = vadd.f32 %v1473_v20, %v1213_v1  ;;  %v1485_v36 = vpop.f32.mrb[14].mxu1  ;;  %v668_v51 = vld [vmem:[#allocation3 + $0xc8] sm:$0xff] }
 0x117   : > { %v1215_v58 = vld [vmem:[#allocation3 + $0x58] sm:$0xff]  ;;  %v9444_v6 = vadd.f32 %v1485_v36, %v1042_v28  ;;  %v1487_v27 = vpop.f32.mrb[15].mxu1 }
 0x118   : > { %1099 = vst.msk [vmem:[#allocation3 + $0x78] sm:$0xff] %vm514_vm2, %v1043_v30  ;;  %1655 = vst.msk [vmem:[#allocation3 + $0x48] sm:$0xff] %vm514_vm2, %v1599_v62  ;;  %v1601_v0 = vadd.f32 %v1477_v61, %v1215_v58  ;;  %v2957_v61 = vld [vmem:[#allocation2 + $0x58] sm:$0xff] }
 0x119   : > { %v670_v28 = vld [vmem:[#allocation3 + $0xd8] sm:$0xff]  ;;  %v2979_v13 = vpack.c.bf16 %v2957_v61, %v2956_v54 }
 0x11a   : > { %1657 = vst.msk [vmem:[#allocation3 + $0x58] sm:$0xff] %vm514_vm2, %v1601_v0  ;;  %v929_v23 = vpop.f32.mrb[16].mxu0 }
 0x11b   : > { %7343 = vmatmul.mubr.msk.bf16.gmra.mrb[120].mxu0 %vm574_vm0, %v2976_v42  ;;  %v931_v40 = vpop.f32.mrb[17].mxu0  ;;  %v1044_v45 = vadd.f32 %v929_v23, %v9124_v24 }
 0x11c   : > { %3165 = vmatprep.mubr.bf16.mxu0 %v11355_v56  ;;  %v1045_v59 = vadd.f32 %v931_v40, %v660_v2  ;;  %v933_v47 = vpop.f32.mrb[18].mxu0  ;;  %v1491_v32 = vpop.f32.mrb[16].mxu1 }
 0x11d   : > { %v935_v43 = vpop.f32.mrb[19].mxu0  ;;  %v1217_v31 = vld [vmem:[#allocation3 + $0x68] sm:$0xff]  ;;  %v1046_v4 = vadd.f32 %v933_v47, %v9124_v24  ;;  %v9454_v53 = vadd.f32 %v1491_v32, %v1044_v45  ;;  %v1493_v57 = vpop.f32.mrb[17].mxu1 }
 0x11e   : > { %1101 = vst.msk [vmem:[#allocation3 + $0x88] sm:$0xff] %vm514_vm2, %v1045_v59  ;;  %v1047_v22 = vadd.f32 %v935_v43, %v662_v41  ;;  %v1603_v17 = vadd.f32 %v1483_v55, %v1217_v31  ;;  %v1495_v18 = vpop.f32.mrb[18].mxu1  ;;  %v2958_v43 = vld [vmem:[#allocation2 + $0x60] sm:$0xff]  ;;  %v2959_v31 = vld [vmem:[#allocation2 + $0x68] sm:$0xff] }
 0x11f   : > { %v1219_v48 = vld [vmem:[#allocation3 + $0x78] sm:$0xff]  ;;  %v9456_v60 = vadd.f32 %v1495_v18, %v1046_v4  ;;  %v1497_v33 = vpop.f32.mrb[19].mxu1  ;;  %v672_v45 = vld [vmem:[#allocation3 + $0xe8] sm:$0xff] }
 0x120   : > { %1103 = vst.msk [vmem:[#allocation3 + $0x98] sm:$0xff] %vm514_vm2, %v1047_v22  ;;  %1659 = vst.msk [vmem:[#allocation3 + $0x68] sm:$0xff] %vm514_vm2, %v1603_v17  ;;  %v1605_v44 = vadd.f32 %v1487_v27, %v1219_v48 }
 0x122   : > { %1661 = vst.msk [vmem:[#allocation3 + $0x78] sm:$0xff] %vm514_vm2, %v1605_v44  ;;  %v939_v29 = vpop.f32.mrb[20].mxu0 }
 0x123   : > { %7344 = vmatmul.mubr.msk.bf16.gmra.mrb[124].mxu0 %vm574_vm0, %v2977_v12  ;;  %v941_v46 = vpop.f32.mrb[21].mxu0  ;;  %v1048_v20 = vadd.f32 %v939_v29, %v9124_v24 }
 0x124   : > { %3175 = vmatprep.mubr.bf16.mxu0 %v11355_v56  ;;  %v1049_v34 = vadd.f32 %v941_v46, %v664_v37  ;;  %v943_v38 = vpop.f32.mrb[22].mxu0  ;;  %v1501_v1 = vpop.f32.mrb[20].mxu1  ;;  %v2980_v37 = vpack.c.bf16 %v2959_v31, %v2958_v43 }
 0x125   : > { %v945_v63 = vpop.f32.mrb[23].mxu0  ;;  %v1221_v21 = vld [vmem:[#allocation3 + $0x88] sm:$0xff]  ;;  %v1050_v42 = vadd.f32 %v943_v38, %v9124_v24  ;;  %v9466_v30 = vadd.f32 %v1501_v1, %v1048_v20  ;;  %v1503_v62 = vpop.f32.mrb[21].mxu1  ;;  %v2960_v20 = vld [vmem:[#allocation2 + $0x70] sm:$0xff] }
 0x126   : > { %1105 = vst.msk [vmem:[#allocation3 + $0xa8] sm:$0xff] %vm514_vm2, %v1049_v34  ;;  %v1051_v5 = vadd.f32 %v945_v63, %v666_v14  ;;  %v1607_v35 = vadd.f32 %v1493_v57, %v1221_v21  ;;  %v1505_v0 = vpop.f32.mrb[22].mxu1 }
 0x127   : > { %v1223_v39 = vld [vmem:[#allocation3 + $0x98] sm:$0xff]  ;;  %v9468_v10 = vadd.f32 %v1505_v0, %v1050_v42  ;;  %v1507_v23 = vpop.f32.mrb[23].mxu1 }
 0x128   : > { %1107 = vst.msk [vmem:[#allocation3 + $0xb8] sm:$0xff] %vm514_vm2, %v1051_v5  ;;  %1663 = vst.msk [vmem:[#allocation3 + $0x88] sm:$0xff] %vm514_vm2, %v1607_v35  ;;  %v1609_v15 = vadd.f32 %v1497_v33, %v1223_v39  ;;  %v2961_v5 = vld [vmem:[#allocation2 + $0x78] sm:$0xff]  ;;  %v676_v35 = vld [vmem:[#allocation3 + $0x108] sm:$0xff] }
 0x129   : > { %v2981_v1 = vpack.c.bf16 %v2961_v5, %v2960_v20  ;;  %v684_v20 = vld [vmem:[#allocation3 + $0x148] sm:$0xff] }
 0x12a   : > { %1665 = vst.msk [vmem:[#allocation3 + $0x98] sm:$0xff] %vm514_vm2, %v1609_v15  ;;  %v949_v3 = vpop.f32.mrb[24].mxu0 }
 0x12b   : > { %7345 = vmatmul.mubr.msk.bf16.gmra.mrb[128].mxu0 %vm574_vm0, %v2978_v25  ;;  %v951_v58 = vpop.f32.mrb[25].mxu0  ;;  %v1052_v41 = vadd.f32 %v949_v3, %v9124_v24 }
 0x12c   : > { %3185 = vmatprep.mubr.bf16.mxu0 %v11355_v56  ;;  %v1053_v7 = vadd.f32 %v951_v58, %v668_v51  ;;  %v953_v2 = vpop.f32.mrb[26].mxu0  ;;  %v1511_v22 = vpop.f32.mrb[24].mxu1  ;;  %v678_v51 = vld [vmem:[#allocation3 + $0x118] sm:$0xff] }
 0x12d   : > { %v955_v55 = vpop.f32.mrb[27].mxu0  ;;  %v1225_v40 = vld [vmem:[#allocation3 + $0xa8] sm:$0xff]  ;;  %v1054_v47 = vadd.f32 %v953_v2, %v9124_v24  ;;  %v9478_v48 = vadd.f32 %v1511_v22, %v1052_v41  ;;  %v1513_v4 = vpop.f32.mrb[25].mxu1 }
 0x12e   : > { %1109 = vst.msk [vmem:[#allocation3 + $0xc8] sm:$0xff] %vm514_vm2, %v1053_v7  ;;  %v1055_v36 = vadd.f32 %v955_v55, %v670_v28  ;;  %v1611_v12 = vadd.f32 %v1503_v62, %v1225_v40  ;;  %v1515_v11 = vpop.f32.mrb[26].mxu1  ;;  %v9494_v7 = vld [vmem:[#allocation3 + $0x1a0] sm:$0xff] }
 0x12f   : > { %v1227_v59 = vld [vmem:[#allocation3 + $0xb8] sm:$0xff]  ;;  %v9480_v57 = vadd.f32 %v1515_v11, %v1054_v47  ;;  %v1517_v46 = vpop.f32.mrb[27].mxu1  ;;  %v680_v47 = vld [vmem:[#allocation3 + $0x128] sm:$0xff] }
 0x130   : > { %1111 = vst.msk [vmem:[#allocation3 + $0xd8] sm:$0xff] %vm514_vm2, %v1055_v36  ;;  %1667 = vst.msk [vmem:[#allocation3 + $0xa8] sm:$0xff] %vm514_vm2, %v1611_v12  ;;  %v1613_v27 = vadd.f32 %v1507_v23, %v1227_v59  ;;  %v2962_v12 = vld [vmem:[#allocation2 + $0x80] sm:$0xff]  ;;  %v2963_v59 = vld [vmem:[#allocation2 + $0x88] sm:$0xff] }
 0x132   : > { %1669 = vst.msk [vmem:[#allocation3 + $0xb8] sm:$0xff] %vm514_vm2, %v1613_v27  ;;  %v959_v17 = vpop.f32.mrb[28].mxu0 }
 0x133   : > { %7346 = vmatmul.mubr.msk.bf16.gmra.mrb[132].mxu0 %vm574_vm0, %v2979_v13  ;;  %v961_v44 = vpop.f32.mrb[29].mxu0  ;;  %v1056_v25 = vadd.f32 %v959_v17, %v9124_v24  ;;  %v682_v17 = vld [vmem:[#allocation3 + $0x138] sm:$0xff] }
 0x134   : > { %3195 = vmatprep.mubr.bf16.mxu0 %v11355_v56  ;;  %v1057_v32 = vadd.f32 %v961_v44, %v672_v45  ;;  %v963_v29 = vpop.f32.mrb[30].mxu0  ;;  %v1521_v39 = vpop.f32.mrb[28].mxu1  ;;  %v2982_v44 = vpack.c.bf16 %v2963_v59, %v2962_v12  ;;  %v2966_v12 = vld [vmem:[#allocation2 + $0xa0] sm:$0xff]  ;;  %v2967_v59 = vld [vmem:[#allocation2 + $0xa8] sm:$0xff] }
 0x135   : > { %v965_v14 = vpop.f32.mrb[31].mxu0  ;;  %v1229_v18 = vld [vmem:[#allocation3 + $0xc8] sm:$0xff]  ;;  %v1058_v63 = vadd.f32 %v963_v29, %v9124_v24  ;;  %v9490_v15 = vadd.f32 %v1521_v39, %v1056_v25  ;;  %v1523_v54 = vpop.f32.mrb[29].mxu1 }
 0x136   : > { %1113 = vst.msk [vmem:[#allocation3 + $0xe8] sm:$0xff] %vm514_vm2, %v1057_v32  ;;  %v1059_v34 = vadd.f32 %v965_v14, %v674_v8  ;;  %v1615_v38 = vadd.f32 %v1513_v4, %v1229_v18  ;;  %v1525_v24 = vpop.f32.mrb[30].mxu1 }
 0x137   : > { %v1231_v33 = vld [vmem:[#allocation3 + $0xd8] sm:$0xff]  ;;  %v9492_v58 = vadd.f32 %v1525_v24, %v1058_v63  ;;  %v1527_v28 = vpop.f32.mrb[31].mxu1  ;;  %v2964_v63 = vld [vmem:[#allocation2 + $0x90] sm:$0xff] }
 0x138   : > { %1115 = vst.msk [vmem:[#allocation3 + $0xf8] sm:$0xff] %vm514_vm2, %v1059_v34  ;;  %1671 = vst.msk [vmem:[#allocation3 + $0xc8] sm:$0xff] %vm514_vm2, %v1615_v38  ;;  %v1617_v21 = vadd.f32 %v1517_v46, %v1231_v33 }
 0x13a   : > { %1673 = vst.msk [vmem:[#allocation3 + $0xd8] sm:$0xff] %vm514_vm2, %v1617_v21  ;;  %v969_v42 = vpop.f32.mrb[32].mxu0  ;;  %v2965_v21 = vld [vmem:[#allocation2 + $0x98] sm:$0xff] }
 0x13b   : > { %7347 = vmatmul.mubr.msk.bf16.gmra.mrb[136].mxu0 %vm574_vm0, %v2980_v37  ;;  %v971_v61 = vpop.f32.mrb[33].mxu0  ;;  %v1060_v2 = vadd.f32 %v9494_v7, %v969_v42  ;;  %v2983_v24 = vpack.c.bf16 %v2965_v21, %v2964_v63 }
 0x13c   : > { %3205 = vmatprep.mubr.bf16.mxu0 %v11355_v56  ;;  %v1061_v3 = vadd.f32 %v971_v61, %v676_v35  ;;  %v973_v62 = vpop.f32.mrb[34].mxu0  ;;  %v1531_v27 = vpop.f32.mrb[32].mxu1  ;;  %v686_v61 = vld [vmem:[#allocation3 + $0x158] sm:$0xff] }
 0x13d   : > { %v975_v0 = vpop.f32.mrb[35].mxu0  ;;  %v1233_v13 = vld [vmem:[#allocation3 + $0xe8] sm:$0xff]  ;;  %v1062_v41 = vadd.f32 %v9494_v7, %v973_v62  ;;  %v9504_v31 = vadd.f32 %v1531_v27, %v1060_v2  ;;  %v1533_v45 = vpop.f32.mrb[33].mxu1 }
 0x13e   : > { %1117 = vst.msk [vmem:[#allocation3 + $0x108] sm:$0xff] %vm514_vm2, %v1061_v3  ;;  %v1063_v23 = vadd.f32 %v975_v0, %v678_v51  ;;  %v1619_v55 = vadd.f32 %v1523_v54, %v1233_v13  ;;  %v1535_v4 = vpop.f32.mrb[34].mxu1 }
 0x13f   : > { %v1235_v40 = vld [vmem:[#allocation3 + $0xf8] sm:$0xff]  ;;  %v9506_v37 = vadd.f32 %v1535_v4, %v1062_v41  ;;  %v1537_v32 = vpop.f32.mrb[35].mxu1 }
 0x140   : > { %1119 = vst.msk [vmem:[#allocation3 + $0x118] sm:$0xff] %vm514_vm2, %v1063_v23  ;;  %1675 = vst.msk [vmem:[#allocation3 + $0xe8] sm:$0xff] %vm514_vm2, %v1619_v55  ;;  %v1621_v36 = vadd.f32 %v1527_v28, %v1235_v40  ;;  %v690_v4 = vld [vmem:[#allocation3 + $0x178] sm:$0xff] }
 0x142   : > { %1677 = vst.msk [vmem:[#allocation3 + $0xf8] sm:$0xff] %vm514_vm2, %v1621_v36  ;;  %v979_v43 = vpop.f32.mrb[36].mxu0 }
 0x143   : > { %7348 = vmatmul.mubr.msk.bf16.gmra.mrb[140].mxu0 %vm574_vm0, %v2981_v1  ;;  %v981_v22 = vpop.f32.mrb[37].mxu0  ;;  %v1064_v14 = vadd.f32 %v9494_v7, %v979_v43 }
 0x144   : > { %3215 = vmatprep.mubr.bf16.mxu0 %v11355_v56  ;;  %v1065_v8 = vadd.f32 %v981_v22, %v680_v47  ;;  %v983_v11 = vpop.f32.mrb[38].mxu0  ;;  %v1541_v5 = vpop.f32.mrb[36].mxu1  ;;  %v688_v47 = vld [vmem:[#allocation3 + $0x168] sm:$0xff] }
 0x145   : > { %v985_v29 = vpop.f32.mrb[39].mxu0  ;;  %v1237_v46 = vld [vmem:[#allocation3 + $0x108] sm:$0xff]  ;;  %v1066_v38 = vadd.f32 %v9494_v7, %v983_v11  ;;  %v9516_v39 = vadd.f32 %v1541_v5, %v1064_v14  ;;  %v1543_v42 = vpop.f32.mrb[37].mxu1  ;;  %v2969_v5 = vld [vmem:[#allocation2 + $0xb8] sm:$0xff] }
 0x146   : > { %1121 = vst.msk [vmem:[#allocation3 + $0x128] sm:$0xff] %vm514_vm2, %v1065_v8  ;;  %v1067_v18 = vadd.f32 %v985_v29, %v682_v17  ;;  %v1623_v25 = vadd.f32 %v1533_v45, %v1237_v46  ;;  %v1545_v51 = vpop.f32.mrb[38].mxu1  ;;  %v2984_v8 = vpack.c.bf16 %v2967_v59, %v2966_v12 }
 0x147   : > { %v1239_v34 = vld [vmem:[#allocation3 + $0x118] sm:$0xff]  ;;  %v9518_v62 = vadd.f32 %v1545_v51, %v1066_v38  ;;  %v1547_v28 = vpop.f32.mrb[39].mxu1 }
 0x148   : > { %1123 = vst.msk [vmem:[#allocation3 + $0x138] sm:$0xff] %vm514_vm2, %v1067_v18  ;;  %1679 = vst.msk [vmem:[#allocation3 + $0x108] sm:$0xff] %vm514_vm2, %v1623_v25  ;;  %v1625_v33 = vadd.f32 %v1537_v32, %v1239_v34 }
 0x14a   : > { %1681 = vst.msk [vmem:[#allocation3 + $0x118] sm:$0xff] %vm514_vm2, %v1625_v33  ;;  %v989_v35 = vpop.f32.mrb[40].mxu0 }
 0x14b   : > { %7349 = vmatmul.mubr.msk.bf16.gmra.mrb[144].mxu0 %vm574_vm0, %v2982_v44  ;;  %v991_v54 = vpop.f32.mrb[41].mxu0  ;;  %v1068_v2 = vadd.f32 %v9494_v7, %v989_v35  ;;  %v692_v35 = vld [vmem:[#allocation3 + $0x188] sm:$0xff] }
 0x14c   : > { %3225 = vmatprep.mubr.bf16.mxu0 %v11355_v56  ;;  %v1069_v1 = vadd.f32 %v991_v54, %v684_v20  ;;  %v993_v3 = vpop.f32.mrb[42].mxu0  ;;  %v1551_v27 = vpop.f32.mrb[40].mxu1  ;;  %v2968_v20 = vld [vmem:[#allocation2 + $0xb0] sm:$0xff] }
 0x14d   : > { %v995_v0 = vpop.f32.mrb[43].mxu0  ;;  %v1241_v13 = vld [vmem:[#allocation3 + $0x128] sm:$0xff]  ;;  %v1070_v41 = vadd.f32 %v9494_v7, %v993_v3  ;;  %v9528_v45 = vadd.f32 %v1551_v27, %v1068_v2  ;;  %v1553_v22 = vpop.f32.mrb[41].mxu1 }
 0x14e   : > { %1125 = vst.msk [vmem:[#allocation3 + $0x148] sm:$0xff] %vm514_vm2, %v1069_v1  ;;  %v1071_v23 = vadd.f32 %v995_v0, %v686_v61  ;;  %v1627_v55 = vadd.f32 %v1543_v42, %v1241_v13  ;;  %v1555_v44 = vpop.f32.mrb[42].mxu1  ;;  %v694_v1 = vld [vmem:[#allocation3 + $0x198] sm:$0xff] }
 0x14f   : > { %v1243_v40 = vld [vmem:[#allocation3 + $0x138] sm:$0xff]  ;;  %v9530_v29 = vadd.f32 %v1555_v44, %v1070_v41  ;;  %v1557_v46 = vpop.f32.mrb[43].mxu1 }
 0x150   : > { %1127 = vst.msk [vmem:[#allocation3 + $0x158] sm:$0xff] %vm514_vm2, %v1071_v23  ;;  %1683 = vst.msk [vmem:[#allocation3 + $0x128] sm:$0xff] %vm514_vm2, %v1627_v55  ;;  %v1629_v36 = vadd.f32 %v1547_v28, %v1243_v40  ;;  %v2985_v28 = vpack.c.bf16 %v2969_v5, %v2968_v20 }
 0x152   : > { %1685 = vst.msk [vmem:[#allocation3 + $0x138] sm:$0xff] %vm514_vm2, %v1629_v36  ;;  %v999_v43 = vpop.f32.mrb[44].mxu0 }
 0x153   : > { %7350 = vmatmul.mubr.msk.bf16.gmra.mrb[148].mxu0 %vm574_vm0, %v2983_v24  ;;  %v1001_v17 = vpop.f32.mrb[45].mxu0  ;;  %v1072_v25 = vadd.f32 %v9494_v7, %v999_v43  ;;  %v2970_v43 = vld [vmem:[#allocation2 + $0xc0] sm:$0xff] }
 0x154   : > { %3235 = vmatprep.mubr.bf16.mxu0 %v11355_v56  ;;  %v1073_v11 = vadd.f32 %v1001_v17, %v688_v47  ;;  %v1003_v32 = vpop.f32.mrb[46].mxu0  ;;  %v1561_v42 = vpop.f32.mrb[44].mxu1  ;;  %v696_v17 = vld [vmem:[#allocation3 + $0x1a8] sm:$0xff] }
 0x155   : > { %v1005_v14 = vpop.f32.mrb[47].mxu0  ;;  %v1245_v18 = vld [vmem:[#allocation3 + $0x148] sm:$0xff]  ;;  %v1074_v63 = vadd.f32 %v9494_v7, %v1003_v32  ;;  %v9540_v61 = vadd.f32 %v1561_v42, %v1072_v25  ;;  %v1563_v51 = vpop.f32.mrb[45].mxu1  ;;  %v695_v32 = vld [vmem:[#allocation3 + $0x1a0] sm:$0xff] }
 0x156   : > { %1129 = vst.msk [vmem:[#allocation3 + $0x168] sm:$0xff] %vm514_vm2, %v1073_v11  ;;  %v1075_v34 = vadd.f32 %v1005_v14, %v690_v4  ;;  %v1631_v38 = vadd.f32 %v1553_v22, %v1245_v18  ;;  %v1565_v3 = vpop.f32.mrb[46].mxu1  ;;  %v2971_v22 = vld [vmem:[#allocation2 + $0xc8] sm:$0xff] }
 0x157   : > { %v1247_v33 = vld [vmem:[#allocation3 + $0x158] sm:$0xff]  ;;  %v9542_v2 = vadd.f32 %v1565_v3, %v1074_v63  ;;  %v1567_v23 = vpop.f32.mrb[47].mxu1  ;;  %v2986_v18 = vpack.c.bf16 %v2971_v22, %v2970_v43  ;;  %v697_v63 = vld [vmem:[#allocation3 + $0x1b0] sm:$0xff] }
 0x158   : > { %1131 = vst.msk [vmem:[#allocation3 + $0x178] sm:$0xff] %vm514_vm2, %v1075_v34  ;;  %1687 = vst.msk [vmem:[#allocation3 + $0x148] sm:$0xff] %vm514_vm2, %v1631_v38  ;;  %v1633_v21 = vadd.f32 %v1557_v46, %v1247_v33  ;;  %v2973_v3 = vld [vmem:[#allocation2 + $0xd8] sm:$0xff] }
 0x15a   : > { %1689 = vst.msk [vmem:[#allocation3 + $0x158] sm:$0xff] %vm514_vm2, %v1633_v21  ;;  %v1009_v54 = vpop.f32.mrb[48].mxu0 }
 0x15b   : > { %7351 = vmatmul.mubr.msk.bf16.gmra.mrb[152].mxu0 %vm574_vm0, %v2984_v8  ;;  %v1011_v24 = vpop.f32.mrb[49].mxu0  ;;  %v1076_v41 = vadd.f32 %v9494_v7, %v1009_v54 }
 0x15c   : > { %3245 = vmatprep.mubr.bf16.mxu0 %v11355_v56  ;;  %v1077_v0 = vadd.f32 %v1011_v24, %v692_v35  ;;  %v1013_v13 = vpop.f32.mrb[50].mxu0 }
 0x15d   : > { %v1015_v55 = vpop.f32.mrb[51].mxu0  ;;  %v1249_v40 = vld [vmem:[#allocation3 + $0x168] sm:$0xff]  ;;  %v1078_v47 = vadd.f32 %v9494_v7, %v1013_v13  ;;  %v1571_v4 = vpop.f32.mrb[48].mxu1  ;;  %v698_v7 = vld [vmem:[#allocation3 + $0x1b8] sm:$0xff] }
 0x15e   : > { %1133 = vst.msk [vmem:[#allocation3 + $0x188] sm:$0xff] %vm514_vm2, %v1077_v0  ;;  %v1079_v36 = vadd.f32 %v1015_v55, %v694_v1  ;;  %v1635_v12 = vadd.f32 %v1563_v51, %v1249_v40  ;;  %v9552_v8 = vadd.f32 %v1571_v4, %v1076_v41  ;;  %v1573_v11 = vpop.f32.mrb[49].mxu1  ;;  %v2972_v1 = vld [vmem:[#allocation2 + $0xd0] sm:$0xff]  ;;  %v1767_v40 = vld [vmem:[#allocation3 + $0x8] sm:$0xff]  ;;  %v1769_v4 = vld [vmem:[#allocation3 + $0x18] sm:$0xff] }
 0x15f   : > { %v1251_v59 = vld [vmem:[#allocation3 + $0x178] sm:$0xff]  ;;  %v1575_v14 = vpop.f32.mrb[50].mxu1 }
 0x160   : > { %1135 = vst.msk [vmem:[#allocation3 + $0x198] sm:$0xff] %vm514_vm2, %v1079_v36  ;;  %1691 = vst.msk [vmem:[#allocation3 + $0x168] sm:$0xff] %vm514_vm2, %v1635_v12  ;;  %v1637_v27 = vadd.f32 %v1567_v23, %v1251_v59  ;;  %v9554_v38 = vadd.f32 %v1575_v14, %v1078_v47  ;;  %v1577_v33 = vpop.f32.mrb[51].mxu1  ;;  %v2987_v12 = vpack.c.bf16 %v2973_v3, %v2972_v1 }
 0x162   : > { %1693 = vst.msk [vmem:[#allocation3 + $0x178] sm:$0xff] %vm514_vm2, %v1637_v27  ;;  %v1019_v44 = vpop.f32.mrb[52].mxu0 }
 0x163   : > { %7352 = vmatmul.mubr.msk.bf16.gmra.mrb[156].mxu0 %vm574_vm0, %v2985_v28  ;;  %v1021_v46 = vpop.f32.mrb[53].mxu0  ;;  %v1080_v5 = vadd.f32 %v1019_v44, %v695_v32 }
 0x164   : > { %3255 = vmatprep.mubr.bf16.mxu0 %v11355_v56  ;;  %v1081_v25 = vadd.f32 %v1021_v46, %v696_v17  ;;  %v1023_v34 = vpop.f32.mrb[54].mxu0 }
 0x165   : > { %v1025_v21 = vpop.f32.mrb[55].mxu0  ;;  %v1253_v20 = vld [vmem:[#allocation3 + $0x188] sm:$0xff]  ;;  %v1082_v51 = vadd.f32 %v1023_v34, %v697_v63 }
 0x166   : > { %1137 = vst.msk [vmem:[#allocation3 + $0x1a8] sm:$0xff] %vm514_vm2, %v1081_v25  ;;  %v1083_v35 = vadd.f32 %v1025_v21, %v698_v7  ;;  %v1639_v42 = vadd.f32 %v1573_v11, %v1253_v20  ;;  %v1771_v34 = vld [vmem:[#allocation3 + $0x28] sm:$0xff] }
 0x167   : > { %v1255_v54 = vld [vmem:[#allocation3 + $0x198] sm:$0xff] }
 0x168   : > { %1139 = vst.msk [vmem:[#allocation3 + $0x1b8] sm:$0xff] %vm514_vm2, %v1083_v35  ;;  %1695 = vst.msk [vmem:[#allocation3 + $0x188] sm:$0xff] %vm514_vm2, %v1639_v42  ;;  %v1641_v24 = vadd.f32 %v1577_v33, %v1255_v54  ;;  %v1773_v54 = vld [vmem:[#allocation3 + $0x38] sm:$0xff] }
 0x16a   : > { %1697 = vst.msk [vmem:[#allocation3 + $0x198] sm:$0xff] %vm514_vm2, %v1641_v24 }
 0x16b   : > { %7353 = vmatmul.mubr.msk.bf16.gmra.mrb[160].mxu0 %vm574_vm0, %v2986_v18 }
 0x16c   : > { %3265 = vmatprep.mubr.bf16.mxu0 %v11355_v56  ;;  %v1581_v28 = vpop.f32.mrb[52].mxu1 }
 0x16d   : > { %v9562_v13 = vadd.f32 %v1581_v28, %v1080_v5  ;;  %v1583_v23 = vpop.f32.mrb[53].mxu1  ;;  %v1257_v17 = vld [vmem:[#allocation3 + $0x1a8] sm:$0xff] }
 0x16e   : > { %v2013_v0 = vpop.f32.mrb[56].mxu0  ;;  %v1585_v36 = vpop.f32.mrb[54].mxu1  ;;  %v1643_v11 = vadd.f32 %v1583_v23, %v1257_v17 }
 0x16f   : > { %v2152_v55 = vadd.f32 %v2013_v0, %v9402_v9  ;;  %v2015_v41 = vpop.f32.mrb[57].mxu0  ;;  %v9565_v27 = vadd.f32 %v1585_v36, %v1082_v51  ;;  %v1587_v43 = vpop.f32.mrb[55].mxu1  ;;  %v1259_v46 = vld [vmem:[#allocation3 + $0x1b8] sm:$0xff] }
 0x170   : > { %v2153_v59 = vadd.f32 %v2015_v41, %v1767_v40  ;;  %v2017_v47 = vpop.f32.mrb[58].mxu0  ;;  %1699 = vst.msk [vmem:[#allocation3 + $0x1a8] sm:$0xff] %vm514_vm2, %v1643_v11  ;;  %v1645_v9 = vadd.f32 %v1587_v43, %v1259_v46  ;;  %v1775_v41 = vld [vmem:[#allocation3 + $0x48] sm:$0xff] }
 0x171   : > { %v2154_v22 = vadd.f32 %v2017_v47, %v9404_v52  ;;  %v2019_v44 = vpop.f32.mrb[59].mxu0 }
 0x172   : > { %2209 = vst.msk [vmem:[#allocation3 + $0x8] sm:$0xff] %vm514_vm2, %v2153_v59  ;;  %v2155_v32 = vadd.f32 %v2019_v44, %v1769_v4  ;;  %1701 = vst.msk [vmem:[#allocation3 + $0x1b8] sm:$0xff] %vm514_vm2, %v1645_v9  ;;  %v1777_v4 = vld [vmem:[#allocation3 + $0x58] sm:$0xff] }
 0x173   : > { %7354 = vmatmul.mubr.msk.bf16.gmra.mrb[164].mxu0 %vm574_vm0, %v2987_v12 }
 0x174   : > { %2211 = vst.msk [vmem:[#allocation3 + $0x18] sm:$0xff] %vm514_vm2, %v2155_v32  ;;  %v2575_v7 = vpop.f32.mrb[56].mxu1 }
 0x175   : > { %v9573_v52 = vadd.f32 %v2575_v7, %v2152_v55  ;;  %v2577_v18 = vpop.f32.mrb[57].mxu1 }
 0x176   : > { %v2023_v14 = vpop.f32.mrb[60].mxu0  ;;  %v2579_v63 = vpop.f32.mrb[58].mxu1 }
 0x177   : > { %v2156_v25 = vadd.f32 %v2023_v14, %v9418_v26  ;;  %v2025_v33 = vpop.f32.mrb[61].mxu0  ;;  %v9576_v5 = vadd.f32 %v2579_v63, %v2154_v22  ;;  %v2581_v35 = vpop.f32.mrb[59].mxu1 }
 0x178   : > { %v2157_v21 = vadd.f32 %v2025_v33, %v1771_v34  ;;  %v2027_v20 = vpop.f32.mrb[62].mxu0  ;;  %v1779_v34 = vld [vmem:[#allocation3 + $0x68] sm:$0xff] }
 0x179   : > { %v2158_v42 = vadd.f32 %v2027_v20, %v9420_v19  ;;  %v2029_v51 = vpop.f32.mrb[63].mxu0  ;;  %v2329_v24 = vld [vmem:[#allocation3 + $0x8] sm:$0xff] }
 0x17a   : > { %2213 = vst.msk [vmem:[#allocation3 + $0x28] sm:$0xff] %vm514_vm2, %v2157_v21  ;;  %v2159_v1 = vadd.f32 %v2029_v51, %v1773_v54  ;;  %v2715_v3 = vadd.f32 %v2577_v18, %v2329_v24  ;;  %v1781_v51 = vld [vmem:[#allocation3 + $0x78] sm:$0xff] }
 0x17b   : > { %v2331_v28 = vld [vmem:[#allocation3 + $0x18] sm:$0xff] }
 0x17c   : > { %2215 = vst.msk [vmem:[#allocation3 + $0x38] sm:$0xff] %vm514_vm2, %v2159_v1  ;;  %2771 = vst.msk [vmem:[#allocation3 + $0x8] sm:$0xff] %vm514_vm2, %v2715_v3  ;;  %v2717_v26 = vadd.f32 %v2581_v35, %v2331_v28  ;;  %v2585_v0 = vpop.f32.mrb[60].mxu1 }
 0x17d   : > { %v9583_v55 = vadd.f32 %v2585_v0, %v2156_v25  ;;  %v2587_v19 = vpop.f32.mrb[61].mxu1 }
 0x17e   : > { %2773 = vst.msk [vmem:[#allocation3 + $0x18] sm:$0xff] %vm514_vm2, %v2717_v26  ;;  %v2033_v23 = vpop.f32.mrb[64].mxu0  ;;  %v2589_v12 = vpop.f32.mrb[62].mxu1 }
 0x17f   : > { %v2160_v40 = vadd.f32 %v2033_v23, %v9430_v49  ;;  %v2035_v36 = vpop.f32.mrb[65].mxu0  ;;  %v9586_v43 = vadd.f32 %v2589_v12, %v2158_v42  ;;  %v2591_v22 = vpop.f32.mrb[63].mxu1 }
 0x180   : > { %v2161_v59 = vadd.f32 %v2035_v36, %v1775_v41  ;;  %v2037_v47 = vpop.f32.mrb[66].mxu0  ;;  %v1783_v41 = vld [vmem:[#allocation3 + $0x88] sm:$0xff] }
 0x181   : > { %v2162_v17 = vadd.f32 %v2037_v47, %v9432_v50  ;;  %v2039_v44 = vpop.f32.mrb[67].mxu0  ;;  %v2333_v11 = vld [vmem:[#allocation3 + $0x28] sm:$0xff] }
 0x182   : > { %2217 = vst.msk [vmem:[#allocation3 + $0x48] sm:$0xff] %vm514_vm2, %v2161_v59  ;;  %v2163_v32 = vadd.f32 %v2039_v44, %v1777_v4  ;;  %v2719_v46 = vadd.f32 %v2587_v19, %v2333_v11  ;;  %v1785_v44 = vld [vmem:[#allocation3 + $0x98] sm:$0xff] }
 0x183   : > { %v2335_v9 = vld [vmem:[#allocation3 + $0x38] sm:$0xff] }
 0x184   : > { %2219 = vst.msk [vmem:[#allocation3 + $0x58] sm:$0xff] %vm514_vm2, %v2163_v32  ;;  %2775 = vst.msk [vmem:[#allocation3 + $0x28] sm:$0xff] %vm514_vm2, %v2719_v46  ;;  %v2721_v49 = vadd.f32 %v2591_v22, %v2335_v9  ;;  %v2595_v7 = vpop.f32.mrb[64].mxu1 }
 0x185   : > { %v9593_v18 = vadd.f32 %v2595_v7, %v2160_v40  ;;  %v2597_v50 = vpop.f32.mrb[65].mxu1 }
 0x186   : > { %2777 = vst.msk [vmem:[#allocation3 + $0x38] sm:$0xff] %vm514_vm2, %v2721_v49  ;;  %v2043_v14 = vpop.f32.mrb[68].mxu0  ;;  %v2599_v63 = vpop.f32.mrb[66].mxu1 }
 0x187   : > { %v2164_v25 = vadd.f32 %v2043_v14, %v9442_v16  ;;  %v2045_v33 = vpop.f32.mrb[69].mxu0  ;;  %v9596_v35 = vadd.f32 %v2599_v63, %v2162_v17  ;;  %v2601_v42 = vpop.f32.mrb[67].mxu1 }
 0x188   : > { %v2165_v21 = vadd.f32 %v2045_v33, %v1779_v34  ;;  %v2047_v20 = vpop.f32.mrb[70].mxu0  ;;  %v1787_v34 = vld [vmem:[#allocation3 + $0xa8] sm:$0xff] }
 0x189   : > { %v2166_v54 = vadd.f32 %v2047_v20, %v9444_v6  ;;  %v2049_v24 = vpop.f32.mrb[71].mxu0  ;;  %v2337_v1 = vld [vmem:[#allocation3 + $0x48] sm:$0xff] }
 0x18a   : > { %2221 = vst.msk [vmem:[#allocation3 + $0x68] sm:$0xff] %vm514_vm2, %v2165_v21  ;;  %v2167_v3 = vadd.f32 %v2049_v24, %v1781_v51  ;;  %v2723_v28 = vadd.f32 %v2597_v50, %v2337_v1  ;;  %v1789_v24 = vld [vmem:[#allocation3 + $0xb8] sm:$0xff] }
 0x18b   : > { %v2339_v26 = vld [vmem:[#allocation3 + $0x58] sm:$0xff] }
 0x18c   : > { %2223 = vst.msk [vmem:[#allocation3 + $0x78] sm:$0xff] %vm514_vm2, %v2167_v3  ;;  %2779 = vst.msk [vmem:[#allocation3 + $0x48] sm:$0xff] %vm514_vm2, %v2723_v28  ;;  %v2725_v16 = vadd.f32 %v2601_v42, %v2339_v26  ;;  %v2605_v0 = vpop.f32.mrb[68].mxu1 }
 0x18d   : > { %v9603_v19 = vadd.f32 %v2605_v0, %v2164_v25  ;;  %v2607_v6 = vpop.f32.mrb[69].mxu1 }
 0x18e   : > { %2781 = vst.msk [vmem:[#allocation3 + $0x58] sm:$0xff] %vm514_vm2, %v2725_v16  ;;  %v2053_v23 = vpop.f32.mrb[72].mxu0  ;;  %v2609_v12 = vpop.f32.mrb[70].mxu1 }
 0x18f   : > { %v2168_v40 = vadd.f32 %v2053_v23, %v9454_v53  ;;  %v2055_v36 = vpop.f32.mrb[73].mxu0  ;;  %v9606_v22 = vadd.f32 %v2609_v12, %v2166_v54  ;;  %v2611_v17 = vpop.f32.mrb[71].mxu1 }
 0x190   : > { %v2169_v59 = vadd.f32 %v2055_v36, %v1783_v41  ;;  %v2057_v47 = vpop.f32.mrb[74].mxu0  ;;  %v1791_v41 = vld [vmem:[#allocation3 + $0xc8] sm:$0xff] }
 0x191   : > { %v2170_v4 = vadd.f32 %v2057_v47, %v9456_v60  ;;  %v2059_v11 = vpop.f32.mrb[75].mxu0  ;;  %v2341_v32 = vld [vmem:[#allocation3 + $0x68] sm:$0xff] }
 0x192   : > { %2225 = vst.msk [vmem:[#allocation3 + $0x88] sm:$0xff] %vm514_vm2, %v2169_v59  ;;  %v2171_v46 = vadd.f32 %v2059_v11, %v1785_v44  ;;  %v2727_v9 = vadd.f32 %v2607_v6, %v2341_v32  ;;  %v1793_v11 = vld [vmem:[#allocation3 + $0xd8] sm:$0xff] }
 0x193   : > { %v2343_v49 = vld [vmem:[#allocation3 + $0x78] sm:$0xff] }
 0x194   : > { %2227 = vst.msk [vmem:[#allocation3 + $0x98] sm:$0xff] %vm514_vm2, %v2171_v46  ;;  %2783 = vst.msk [vmem:[#allocation3 + $0x68] sm:$0xff] %vm514_vm2, %v2727_v9  ;;  %v2729_v53 = vadd.f32 %v2611_v17, %v2343_v49  ;;  %v2615_v7 = vpop.f32.mrb[72].mxu1 }
 0x195   : > { %v9613_v50 = vadd.f32 %v2615_v7, %v2168_v40  ;;  %v2617_v60 = vpop.f32.mrb[73].mxu1 }
 0x196   : > { %2785 = vst.msk [vmem:[#allocation3 + $0x78] sm:$0xff] %vm514_vm2, %v2729_v53  ;;  %v2063_v14 = vpop.f32.mrb[76].mxu0  ;;  %v2619_v63 = vpop.f32.mrb[74].mxu1 }
 0x197   : > { %v2172_v25 = vadd.f32 %v2063_v14, %v9466_v30  ;;  %v2065_v33 = vpop.f32.mrb[77].mxu0  ;;  %v9616_v42 = vadd.f32 %v2619_v63, %v2170_v4  ;;  %v2621_v54 = vpop.f32.mrb[75].mxu1 }
 0x198   : > { %v2173_v21 = vadd.f32 %v2065_v33, %v1787_v34  ;;  %v2067_v20 = vpop.f32.mrb[78].mxu0  ;;  %v1795_v34 = vld [vmem:[#allocation3 + $0xe8] sm:$0xff] }
 0x199   : > { %v2174_v51 = vadd.f32 %v2067_v20, %v9468_v10  ;;  %v2069_v1 = vpop.f32.mrb[79].mxu0  ;;  %v2345_v3 = vld [vmem:[#allocation3 + $0x88] sm:$0xff] }
 0x19a   : > { %2229 = vst.msk [vmem:[#allocation3 + $0xa8] sm:$0xff] %vm514_vm2, %v2173_v21  ;;  %v2175_v28 = vadd.f32 %v2069_v1, %v1789_v24  ;;  %v2731_v26 = vadd.f32 %v2617_v60, %v2345_v3  ;;  %v1797_v1 = vld [vmem:[#allocation3 + $0xf8] sm:$0xff] }
 0x19b   : > { %v2347_v16 = vld [vmem:[#allocation3 + $0x98] sm:$0xff] }
 0x19c   : > { %2231 = vst.msk [vmem:[#allocation3 + $0xb8] sm:$0xff] %vm514_vm2, %v2175_v28  ;;  %2787 = vst.msk [vmem:[#allocation3 + $0x88] sm:$0xff] %vm514_vm2, %v2731_v26  ;;  %v2733_v30 = vadd.f32 %v2621_v54, %v2347_v16  ;;  %v2625_v0 = vpop.f32.mrb[76].mxu1 }
 0x19d   : > { %v9623_v6 = vadd.f32 %v2625_v0, %v2172_v25  ;;  %v2627_v10 = vpop.f32.mrb[77].mxu1 }
 0x19e   : > { %2789 = vst.msk [vmem:[#allocation3 + $0x98] sm:$0xff] %vm514_vm2, %v2733_v30  ;;  %v2073_v23 = vpop.f32.mrb[80].mxu0  ;;  %v2629_v12 = vpop.f32.mrb[78].mxu1 }
 0x19f   : > { %v2176_v40 = vadd.f32 %v2073_v23, %v9478_v48  ;;  %v2075_v36 = vpop.f32.mrb[81].mxu0  ;;  %v9626_v17 = vadd.f32 %v2629_v12, %v2174_v51  ;;  %v2631_v4 = vpop.f32.mrb[79].mxu1 }
 0x1a0   : > { %v2177_v59 = vadd.f32 %v2075_v36, %v1791_v41  ;;  %v2077_v47 = vpop.f32.mrb[82].mxu0  ;;  %v1799_v41 = vld [vmem:[#allocation3 + $0x108] sm:$0xff] }
 0x1a1   : > { %v2178_v44 = vadd.f32 %v2077_v47, %v9480_v57  ;;  %v2079_v32 = vpop.f32.mrb[83].mxu0  ;;  %v2349_v46 = vld [vmem:[#allocation3 + $0xa8] sm:$0xff] }
 0x1a2   : > { %2233 = vst.msk [vmem:[#allocation3 + $0xc8] sm:$0xff] %vm514_vm2, %v2177_v59  ;;  %v2179_v9 = vadd.f32 %v2079_v32, %v1793_v11  ;;  %v2735_v49 = vadd.f32 %v2627_v10, %v2349_v46  ;;  %v1801_v32 = vld [vmem:[#allocation3 + $0x118] sm:$0xff] }
 0x1a3   : > { %v2351_v53 = vld [vmem:[#allocation3 + $0xb8] sm:$0xff] }
 0x1a4   : > { %2235 = vst.msk [vmem:[#allocation3 + $0xd8] sm:$0xff] %vm514_vm2, %v2179_v9  ;;  %2791 = vst.msk [vmem:[#allocation3 + $0xa8] sm:$0xff] %vm514_vm2, %v2735_v49  ;;  %v2737_v48 = vadd.f32 %v2631_v4, %v2351_v53  ;;  %v2635_v7 = vpop.f32.mrb[80].mxu1 }
 0x1a5   : > { %v9633_v60 = vadd.f32 %v2635_v7, %v2176_v40  ;;  %v2637_v57 = vpop.f32.mrb[81].mxu1 }
 0x1a6   : > { %2793 = vst.msk [vmem:[#allocation3 + $0xb8] sm:$0xff] %vm514_vm2, %v2737_v48  ;;  %v2083_v14 = vpop.f32.mrb[84].mxu0  ;;  %v2639_v63 = vpop.f32.mrb[82].mxu1 }
 0x1a7   : > { %v2180_v25 = vadd.f32 %v2083_v14, %v9490_v15  ;;  %v2085_v33 = vpop.f32.mrb[85].mxu0  ;;  %v9636_v54 = vadd.f32 %v2639_v63, %v2178_v44  ;;  %v2641_v51 = vpop.f32.mrb[83].mxu1 }
 0x1a8   : > { %v2181_v21 = vadd.f32 %v2085_v33, %v1795_v34  ;;  %v2087_v20 = vpop.f32.mrb[86].mxu0  ;;  %v1803_v34 = vld [vmem:[#allocation3 + $0x128] sm:$0xff] }
 0x1a9   : > { %v2182_v24 = vadd.f32 %v2087_v20, %v9492_v58  ;;  %v2089_v3 = vpop.f32.mrb[87].mxu0  ;;  %v2353_v28 = vld [vmem:[#allocation3 + $0xc8] sm:$0xff] }
 0x1aa   : > { %2237 = vst.msk [vmem:[#allocation3 + $0xe8] sm:$0xff] %vm514_vm2, %v2181_v21  ;;  %v2183_v26 = vadd.f32 %v2089_v3, %v1797_v1  ;;  %v2739_v16 = vadd.f32 %v2637_v57, %v2353_v28  ;;  %v1805_v3 = vld [vmem:[#allocation3 + $0x138] sm:$0xff] }
 0x1ab   : > { %v2355_v30 = vld [vmem:[#allocation3 + $0xd8] sm:$0xff] }
 0x1ac   : > { %2239 = vst.msk [vmem:[#allocation3 + $0xf8] sm:$0xff] %vm514_vm2, %v2183_v26  ;;  %2795 = vst.msk [vmem:[#allocation3 + $0xc8] sm:$0xff] %vm514_vm2, %v2739_v16  ;;  %v2741_v15 = vadd.f32 %v2641_v51, %v2355_v30  ;;  %v2645_v0 = vpop.f32.mrb[84].mxu1 }
 0x1ad   : > { %v9643_v10 = vadd.f32 %v2645_v0, %v2180_v25  ;;  %v2647_v58 = vpop.f32.mrb[85].mxu1 }
 0x1ae   : > { %2797 = vst.msk [vmem:[#allocation3 + $0xd8] sm:$0xff] %vm514_vm2, %v2741_v15  ;;  %v2093_v23 = vpop.f32.mrb[88].mxu0  ;;  %v2649_v12 = vpop.f32.mrb[86].mxu1 }
 0x1af   : > { %v2184_v40 = vadd.f32 %v2093_v23, %v9504_v31  ;;  %v2095_v36 = vpop.f32.mrb[89].mxu0  ;;  %v9646_v4 = vadd.f32 %v2649_v12, %v2182_v24  ;;  %v2651_v44 = vpop.f32.mrb[87].mxu1 }
 0x1b0   : > { %v2185_v59 = vadd.f32 %v2095_v36, %v1799_v41  ;;  %v2097_v47 = vpop.f32.mrb[90].mxu0  ;;  %v1807_v41 = vld [vmem:[#allocation3 + $0x148] sm:$0xff] }
 0x1b1   : > { %v2186_v11 = vadd.f32 %v2097_v47, %v9506_v37  ;;  %v2099_v46 = vpop.f32.mrb[91].mxu0  ;;  %v2357_v9 = vld [vmem:[#allocation3 + $0xe8] sm:$0xff] }
 0x1b2   : > { %2241 = vst.msk [vmem:[#allocation3 + $0x108] sm:$0xff] %vm514_vm2, %v2185_v59  ;;  %v2187_v49 = vadd.f32 %v2099_v46, %v1801_v32  ;;  %v2743_v53 = vadd.f32 %v2647_v58, %v2357_v9  ;;  %v1809_v46 = vld [vmem:[#allocation3 + $0x158] sm:$0xff] }
 0x1b3   : > { %v2359_v48 = vld [vmem:[#allocation3 + $0xf8] sm:$0xff] }
 0x1b4   : > { %2243 = vst.msk [vmem:[#allocation3 + $0x118] sm:$0xff] %vm514_vm2, %v2187_v49  ;;  %2799 = vst.msk [vmem:[#allocation3 + $0xe8] sm:$0xff] %vm514_vm2, %v2743_v53  ;;  %v2745_v31 = vadd.f32 %v2651_v44, %v2359_v48  ;;  %v2655_v7 = vpop.f32.mrb[88].mxu1 }
 0x1b5   : > { %v9653_v57 = vadd.f32 %v2655_v7, %v2184_v40  ;;  %v2657_v37 = vpop.f32.mrb[89].mxu1 }
 0x1b6   : > { %2801 = vst.msk [vmem:[#allocation3 + $0xf8] sm:$0xff] %vm514_vm2, %v2745_v31  ;;  %v2103_v14 = vpop.f32.mrb[92].mxu0  ;;  %v2659_v63 = vpop.f32.mrb[90].mxu1 }
 0x1b7   : > { %v2188_v25 = vadd.f32 %v2103_v14, %v9516_v39  ;;  %v2105_v33 = vpop.f32.mrb[93].mxu0  ;;  %v9656_v51 = vadd.f32 %v2659_v63, %v2186_v11  ;;  %v2661_v24 = vpop.f32.mrb[91].mxu1 }
 0x1b8   : > { %v2189_v21 = vadd.f32 %v2105_v33, %v1803_v34  ;;  %v2107_v20 = vpop.f32.mrb[94].mxu0  ;;  %v1811_v34 = vld [vmem:[#allocation3 + $0x168] sm:$0xff] }
 0x1b9   : > { %v2190_v1 = vadd.f32 %v2107_v20, %v9518_v62  ;;  %v2109_v28 = vpop.f32.mrb[95].mxu0  ;;  %v2361_v26 = vld [vmem:[#allocation3 + $0x108] sm:$0xff] }
 0x1ba   : > { %2245 = vst.msk [vmem:[#allocation3 + $0x128] sm:$0xff] %vm514_vm2, %v2189_v21  ;;  %v2191_v16 = vadd.f32 %v2109_v28, %v1805_v3  ;;  %v2747_v30 = vadd.f32 %v2657_v37, %v2361_v26  ;;  %v1813_v28 = vld [vmem:[#allocation3 + $0x178] sm:$0xff] }
 0x1bb   : > { %v2363_v15 = vld [vmem:[#allocation3 + $0x118] sm:$0xff] }
 0x1bc   : > { %2247 = vst.msk [vmem:[#allocation3 + $0x138] sm:$0xff] %vm514_vm2, %v2191_v16  ;;  %2803 = vst.msk [vmem:[#allocation3 + $0x108] sm:$0xff] %vm514_vm2, %v2747_v30  ;;  %v2749_v39 = vadd.f32 %v2661_v24, %v2363_v15  ;;  %v2665_v0 = vpop.f32.mrb[92].mxu1 }
 0x1bd   : > { %v9663_v58 = vadd.f32 %v2665_v0, %v2188_v25  ;;  %v2667_v62 = vpop.f32.mrb[93].mxu1 }
 0x1be   : > { %2805 = vst.msk [vmem:[#allocation3 + $0x118] sm:$0xff] %vm514_vm2, %v2749_v39  ;;  %v2113_v23 = vpop.f32.mrb[96].mxu0  ;;  %v2669_v12 = vpop.f32.mrb[94].mxu1 }
 0x1bf   : > { %v2192_v40 = vadd.f32 %v2113_v23, %v9528_v45  ;;  %v2115_v36 = vpop.f32.mrb[97].mxu0  ;;  %v9666_v44 = vadd.f32 %v2669_v12, %v2190_v1  ;;  %v2671_v11 = vpop.f32.mrb[95].mxu1 }
 0x1c0   : > { %v2193_v59 = vadd.f32 %v2115_v36, %v1807_v41  ;;  %v2117_v47 = vpop.f32.mrb[98].mxu0  ;;  %v1815_v41 = vld [vmem:[#allocation3 + $0x188] sm:$0xff] }
 0x1c1   : > { %v2194_v32 = vadd.f32 %v2117_v47, %v9530_v29  ;;  %v2119_v9 = vpop.f32.mrb[99].mxu0  ;;  %v2365_v49 = vld [vmem:[#allocation3 + $0x128] sm:$0xff] }
 0x1c2   : > { %2249 = vst.msk [vmem:[#allocation3 + $0x148] sm:$0xff] %vm514_vm2, %v2193_v59  ;;  %v2195_v53 = vadd.f32 %v2119_v9, %v1809_v46  ;;  %v2751_v48 = vadd.f32 %v2667_v62, %v2365_v49  ;;  %v1817_v9 = vld [vmem:[#allocation3 + $0x198] sm:$0xff] }
 0x1c3   : > { %v2367_v31 = vld [vmem:[#allocation3 + $0x138] sm:$0xff] }
 0x1c4   : > { %2251 = vst.msk [vmem:[#allocation3 + $0x158] sm:$0xff] %vm514_vm2, %v2195_v53  ;;  %2807 = vst.msk [vmem:[#allocation3 + $0x128] sm:$0xff] %vm514_vm2, %v2751_v48  ;;  %v2753_v45 = vadd.f32 %v2671_v11, %v2367_v31  ;;  %v2675_v7 = vpop.f32.mrb[96].mxu1 }
 0x1c5   : > { %v9673_v37 = vadd.f32 %v2675_v7, %v2192_v40  ;;  %v2677_v29 = vpop.f32.mrb[97].mxu1 }
 0x1c6   : > { %2809 = vst.msk [vmem:[#allocation3 + $0x138] sm:$0xff] %vm514_vm2, %v2753_v45  ;;  %v2123_v14 = vpop.f32.mrb[100].mxu0  ;;  %v2679_v63 = vpop.f32.mrb[98].mxu1 }
 0x1c7   : > { %v2196_v25 = vadd.f32 %v2123_v14, %v9540_v61  ;;  %v2125_v33 = vpop.f32.mrb[101].mxu0  ;;  %v9676_v24 = vadd.f32 %v2679_v63, %v2194_v32  ;;  %v2681_v1 = vpop.f32.mrb[99].mxu1 }
 0x1c8   : > { %v2197_v21 = vadd.f32 %v2125_v33, %v1811_v34  ;;  %v2127_v20 = vpop.f32.mrb[102].mxu0  ;;  %v1819_v34 = vld [vmem:[#allocation3 + $0x1a8] sm:$0xff] }
 0x1c9   : > { %v2198_v3 = vadd.f32 %v2127_v20, %v9542_v2  ;;  %v2129_v26 = vpop.f32.mrb[103].mxu0  ;;  %v2369_v16 = vld [vmem:[#allocation3 + $0x148] sm:$0xff] }
 0x1ca   : > { %2253 = vst.msk [vmem:[#allocation3 + $0x168] sm:$0xff] %vm514_vm2, %v2197_v21  ;;  %v2199_v30 = vadd.f32 %v2129_v26, %v1813_v28  ;;  %v2755_v15 = vadd.f32 %v2677_v29, %v2369_v16  ;;  %v3389_v28 = vld [vmem:[%s11327_s3 + $0x8] sm:$0xff]  ;;  %v1821_v16 = vld [vmem:[#allocation3 + $0x1b8] sm:$0xff] }
 0x1cb   : > { %v2371_v39 = vld [vmem:[#allocation3 + $0x158] sm:$0xff]  ;;  %7355 = vmatprep.mubr.msk.f32.mxu1 %vm574_vm0, %v3389_v28 }
 0x1cc   : > { %2255 = vst.msk [vmem:[#allocation3 + $0x178] sm:$0xff] %vm514_vm2, %v2199_v30  ;;  %2811 = vst.msk [vmem:[#allocation3 + $0x148] sm:$0xff] %vm514_vm2, %v2755_v15  ;;  %v2757_v61 = vadd.f32 %v2681_v1, %v2371_v39  ;;  %v2685_v0 = vpop.f32.mrb[100].mxu1 }
 0x1cd   : > { %v9683_v62 = vadd.f32 %v2685_v0, %v2196_v25  ;;  %v2687_v2 = vpop.f32.mrb[101].mxu1 }
 0x1ce   : > { %2813 = vst.msk [vmem:[#allocation3 + $0x158] sm:$0xff] %vm514_vm2, %v2757_v61  ;;  %v2133_v23 = vpop.f32.mrb[104].mxu0  ;;  %v2689_v12 = vpop.f32.mrb[102].mxu1 }
 0x1cf   : > { %v2200_v40 = vadd.f32 %v2133_v23, %v9552_v8  ;;  %v2135_v36 = vpop.f32.mrb[105].mxu0  ;;  %v9686_v11 = vadd.f32 %v2689_v12, %v2198_v3  ;;  %v2691_v32 = vpop.f32.mrb[103].mxu1 }
 0x1d0   : > { %v2201_v59 = vadd.f32 %v2135_v36, %v1815_v41  ;;  %v2137_v47 = vpop.f32.mrb[106].mxu0  ;;  %v2891_v36 = vld [vmem:[#allocation3 + $0x8] sm:$0xff] }
 0x1d1   : > { %v2202_v46 = vadd.f32 %v2137_v47, %v9554_v38  ;;  %v2139_v49 = vpop.f32.mrb[107].mxu0  ;;  %v2373_v53 = vld [vmem:[#allocation3 + $0x168] sm:$0xff] }
 0x1d2   : > { %2257 = vst.msk [vmem:[#allocation3 + $0x188] sm:$0xff] %vm514_vm2, %v2201_v59  ;;  %v2203_v48 = vadd.f32 %v2139_v49, %v1817_v9  ;;  %v2759_v31 = vadd.f32 %v2687_v2, %v2373_v53 }
 0x1d3   : > { %v2375_v45 = vld [vmem:[#allocation3 + $0x178] sm:$0xff] }
 0x1d4   : > { %2259 = vst.msk [vmem:[#allocation3 + $0x198] sm:$0xff] %vm514_vm2, %v2203_v48  ;;  %2815 = vst.msk [vmem:[#allocation3 + $0x168] sm:$0xff] %vm514_vm2, %v2759_v31  ;;  %v2761_v8 = vadd.f32 %v2691_v32, %v2375_v45  ;;  %v2695_v7 = vpop.f32.mrb[104].mxu1  ;;  %v2893_v48 = vld [vmem:[#allocation3 + $0x18] sm:$0xff] }
 0x1d5   : > { %v9693_v29 = vadd.f32 %v2695_v7, %v2200_v40  ;;  %v2697_v38 = vpop.f32.mrb[105].mxu1 }
 0x1d6   : > { %2817 = vst.msk [vmem:[#allocation3 + $0x178] sm:$0xff] %vm514_vm2, %v2761_v8  ;;  %v2143_v14 = vpop.f32.mrb[108].mxu0  ;;  %v2699_v63 = vpop.f32.mrb[106].mxu1 }
 0x1d7   : > { %v2204_v25 = vadd.f32 %v2143_v14, %v9562_v13  ;;  %v2145_v33 = vpop.f32.mrb[109].mxu0  ;;  %v9696_v1 = vadd.f32 %v2699_v63, %v2202_v46  ;;  %v2701_v3 = vpop.f32.mrb[107].mxu1 }
 0x1d8   : > { %v2205_v21 = vadd.f32 %v2145_v33, %v1819_v34  ;;  %v2147_v20 = vpop.f32.mrb[110].mxu0 }
 0x1d9   : > { %v2206_v26 = vadd.f32 %v2147_v20, %v9565_v27  ;;  %v2149_v30 = vpop.f32.mrb[111].mxu0  ;;  %v2377_v15 = vld [vmem:[#allocation3 + $0x188] sm:$0xff]  ;;  %v2897_v20 = vld [vmem:[#allocation3 + $0x38] sm:$0xff] }
 0x1da   : > { %2261 = vst.msk [vmem:[#allocation3 + $0x1a8] sm:$0xff] %vm514_vm2, %v2205_v21  ;;  %v2207_v13 = vadd.f32 %v2149_v30, %v1821_v16  ;;  %v2763_v39 = vadd.f32 %v2697_v38, %v2377_v15 }
 0x1db   : > { %v2379_v61 = vld [vmem:[#allocation3 + $0x198] sm:$0xff] }
 0x1dc   : > { %2263 = vst.msk [vmem:[#allocation3 + $0x1b8] sm:$0xff] %vm514_vm2, %v2207_v13  ;;  %2819 = vst.msk [vmem:[#allocation3 + $0x188] sm:$0xff] %vm514_vm2, %v2763_v39  ;;  %v2765_v0 = vadd.f32 %v2701_v3, %v2379_v61  ;;  %v2705_v23 = vpop.f32.mrb[108].mxu1  ;;  %v2899_v39 = vld [vmem:[#allocation3 + $0x48] sm:$0xff] }
 0x1dd   : > { %v9707_v27 = vadd.f32 %v2705_v23, %v2204_v25  ;;  %v2707_v40 = vpop.f32.mrb[109].mxu1  ;;  %v2895_v25 = vld [vmem:[#allocation3 + $0x28] sm:$0xff] }
 0x1de   : > { %2821 = vst.msk [vmem:[#allocation3 + $0x198] sm:$0xff] %vm514_vm2, %v2765_v0  ;;  %v3137_v2 = vpop.f32.mrb[112].mxu0  ;;  %v2709_v59 = vpop.f32.mrb[110].mxu1 }
 0x1df   : > { %v3276_v41 = vadd.f32 %v3137_v2, %v9573_v52  ;;  %v3139_v12 = vpop.f32.mrb[113].mxu0  ;;  %v9710_v46 = vadd.f32 %v2709_v59, %v2206_v26  ;;  %v2711_v9 = vpop.f32.mrb[111].mxu1  ;;  %v2901_v2 = vld [vmem:[#allocation3 + $0x58] sm:$0xff] }
 0x1e0   : > { %v3277_v47 = vadd.f32 %v3139_v12, %v2891_v36  ;;  %v3141_v32 = vpop.f32.mrb[114].mxu0 }
 0x1e1   : > { %v3278_v49 = vadd.f32 %v3141_v32, %v9576_v5  ;;  %v2381_v53 = vld [vmem:[#allocation3 + $0x1a8] sm:$0xff]  ;;  %v3143_v31 = vpop.f32.mrb[115].mxu0 }
 0x1e2   : > { %3333 = vst.msk [vmem:[#allocation3 + $0x8] sm:$0xff] %vm514_vm2, %v3277_v47  ;;  %v2767_v45 = vadd.f32 %v2707_v40, %v2381_v53  ;;  %v3279_v8 = vadd.f32 %v3143_v31, %v2893_v48  ;;  %v2905_v31 = vld [vmem:[#allocation3 + $0x78] sm:$0xff] }
 0x1e3   : > { %v2383_v7 = vld [vmem:[#allocation3 + $0x1b8] sm:$0xff]  ;;  %v9714_v14 = vpack.c.bf16 %v3278_v49, %v3276_v41 }
 0x1e4   : > { %2823 = vst.msk [vmem:[#allocation3 + $0x1a8] sm:$0xff] %vm514_vm2, %v2767_v45  ;;  %3335 = vst.msk [vmem:[#allocation3 + $0x18] sm:$0xff] %vm514_vm2, %v3279_v8  ;;  %v2769_v52 = vadd.f32 %v2711_v9, %v2383_v7  ;;  %v2903_v9 = vld [vmem:[#allocation3 + $0x68] sm:$0xff] }
 0x1e6   : > { %2825 = vst.msk [vmem:[#allocation3 + $0x1b8] sm:$0xff] %vm514_vm2, %v2769_v52  ;;  %v3147_v38 = vpop.f32.mrb[116].mxu0 }
 0x1e7   : > { %v3280_v5 = vadd.f32 %v3147_v38, %v9583_v55  ;;  %v3149_v34 = vpop.f32.mrb[117].mxu0 }
 0x1e8   : > { %v3281_v33 = vadd.f32 %v3149_v34, %v2895_v25  ;;  %v3151_v63 = vpop.f32.mrb[118].mxu0  ;;  %v2907_v34 = vld [vmem:[#allocation3 + $0x88] sm:$0xff] }
 0x1e9   : > { %v3282_v21 = vadd.f32 %v3151_v63, %v9586_v43  ;;  %v3153_v3 = vpop.f32.mrb[119].mxu0  ;;  %v3417_v26 = vld [vmem:[#allocation3 + $0x8] sm:$0xff] }
 0x1ea   : > { %3337 = vst.msk [vmem:[#allocation3 + $0x28] sm:$0xff] %vm514_vm2, %v3281_v33  ;;  %v3283_v28 = vadd.f32 %v3153_v3, %v2897_v20  ;;  %v2909_v20 = vld [vmem:[#allocation3 + $0x98] sm:$0xff] }
 0x1eb   : > { %v3419_v16 = vld [vmem:[#allocation3 + $0x18] sm:$0xff]  ;;  %v9722_v30 = vpack.c.bf16 %v3282_v21, %v3280_v5 }
 0x1ec   : > { %3339 = vst.msk [vmem:[#allocation3 + $0x38] sm:$0xff] %vm514_vm2, %v3283_v28  ;;  %v9725_v15 = vpack.c.bf16 %v3419_v16, %v3417_v26 }
 0x1ee   : > { %v3157_v55 = vpop.f32.mrb[120].mxu0  ;;  %7762 = vmatprep.subr.bf16.mxu1 %v9725_v15 }
 0x1ef   : > { %v3284_v13 = vadd.f32 %v3157_v55, %v9593_v18  ;;  %v3159_v43 = vpop.f32.mrb[121].mxu0  ;;  %7764 = vmatpush1.bf16.msra.mxu1 %v9714_v14 }
 0x1f0   : > { %v3285_v61 = vadd.f32 %v3159_v43, %v2899_v39  ;;  %v3161_v0 = vpop.f32.mrb[122].mxu0  ;;  %v2911_v43 = vld [vmem:[#allocation3 + $0xa8] sm:$0xff] }
 0x1f1   : > { %v3286_v23 = vadd.f32 %v3161_v0, %v9596_v35  ;;  %v3163_v40 = vpop.f32.mrb[123].mxu0  ;;  %v3421_v36 = vld [vmem:[#allocation3 + $0x28] sm:$0xff] }
 0x1f2   : > { %3341 = vst.msk [vmem:[#allocation3 + $0x48] sm:$0xff] %vm514_vm2, %v3285_v61  ;;  %v3287_v41 = vadd.f32 %v3163_v40, %v2901_v2  ;;  %v2913_v2 = vld [vmem:[#allocation3 + $0xb8] sm:$0xff] }
 0x1f3   : > { %v3423_v12 = vld [vmem:[#allocation3 + $0x38] sm:$0xff]  ;;  %v9732_v59 = vpack.c.bf16 %v3286_v23, %v3284_v13 }
 0x1f4   : > { %3343 = vst.msk [vmem:[#allocation3 + $0x58] sm:$0xff] %vm514_vm2, %v3287_v41  ;;  %v9735_v18 = vpack.c.bf16 %v3423_v12, %v3421_v36 }
 0x1f6   : > { %v3167_v47 = vpop.f32.mrb[124].mxu0  ;;  %7766 = vmatprep.subr.bf16.mxu1 %v9735_v18 }
 0x1f7   : > { %v3288_v32 = vadd.f32 %v3167_v47, %v9603_v19  ;;  %v3169_v35 = vpop.f32.mrb[125].mxu0  ;;  %7768 = vmatpush1.bf16.msra.mxu1 %v9722_v30 }
 0x1f8   : > { %v3289_v49 = vadd.f32 %v3169_v35, %v2903_v9  ;;  %v3171_v53 = vpop.f32.mrb[126].mxu0  ;;  %v2915_v35 = vld [vmem:[#allocation3 + $0xc8] sm:$0xff] }
 0x1f9   : > { %v3290_v48 = vadd.f32 %v3171_v53, %v9606_v22  ;;  %v3173_v45 = vpop.f32.mrb[127].mxu0  ;;  %v3425_v7 = vld [vmem:[#allocation3 + $0x48] sm:$0xff] }
 0x1fa   : > { %3345 = vst.msk [vmem:[#allocation3 + $0x68] sm:$0xff] %vm514_vm2, %v3289_v49  ;;  %v3291_v8 = vadd.f32 %v3173_v45, %v2905_v31  ;;  %v2917_v31 = vld [vmem:[#allocation3 + $0xd8] sm:$0xff] }
 0x1fb   : > { %v3427_v52 = vld [vmem:[#allocation3 + $0x58] sm:$0xff]  ;;  %v9742_v38 = vpack.c.bf16 %v3290_v48, %v3288_v32 }
 0x1fc   : > { %3347 = vst.msk [vmem:[#allocation3 + $0x78] sm:$0xff] %vm514_vm2, %v3291_v8  ;;  %v9745_v19 = vpack.c.bf16 %v3427_v52, %v3425_v7 }
 0x1fe   : > { %v3177_v5 = vpop.f32.mrb[128].mxu0  ;;  %7770 = vmatprep.subr.bf16.mxu1 %v9745_v19 }
 0x1ff   : > { %v3292_v25 = vadd.f32 %v3177_v5, %v9613_v50  ;;  %v3179_v22 = vpop.f32.mrb[129].mxu0  ;;  %7772 = vmatpush1.bf16.msra.mxu1 %v9732_v59 }
 0x200   : > { %v3293_v33 = vadd.f32 %v3179_v22, %v2907_v34  ;;  %v3181_v63 = vpop.f32.mrb[130].mxu0  ;;  %v2919_v22 = vld [vmem:[#allocation3 + $0xe8] sm:$0xff] }
 0x201   : > { %v3294_v21 = vadd.f32 %v3181_v63, %v9616_v42  ;;  %v3183_v3 = vpop.f32.mrb[131].mxu0  ;;  %v3429_v26 = vld [vmem:[#allocation3 + $0x68] sm:$0xff] }
 0x202   : > { %3349 = vst.msk [vmem:[#allocation3 + $0x88] sm:$0xff] %vm514_vm2, %v3293_v33  ;;  %v3295_v28 = vadd.f32 %v3183_v3, %v2909_v20  ;;  %v2921_v20 = vld [vmem:[#allocation3 + $0xf8] sm:$0xff] }
 0x203   : > { %v3431_v16 = vld [vmem:[#allocation3 + $0x78] sm:$0xff]  ;;  %v9752_v55 = vpack.c.bf16 %v3294_v21, %v3292_v25 }
 0x204   : > { %3351 = vst.msk [vmem:[#allocation3 + $0x98] sm:$0xff] %vm514_vm2, %v3295_v28  ;;  %v9755_v50 = vpack.c.bf16 %v3431_v16, %v3429_v26 }
 0x206   : > { %v3187_v13 = vpop.f32.mrb[132].mxu0  ;;  %7774 = vmatprep.subr.bf16.mxu1 %v9755_v50 }
 0x207   : > { %v3296_v39 = vadd.f32 %v3187_v13, %v9623_v6  ;;  %v3189_v42 = vpop.f32.mrb[133].mxu0  ;;  %7776 = vmatpush1.bf16.msra.mxu1 %v9742_v38 }
 0x208   : > { %v3297_v61 = vadd.f32 %v3189_v42, %v2911_v43  ;;  %v3191_v0 = vpop.f32.mrb[134].mxu0  ;;  %v2923_v42 = vld [vmem:[#allocation3 + $0x108] sm:$0xff] }
 0x209   : > { %v3298_v23 = vadd.f32 %v3191_v0, %v9626_v17  ;;  %v3193_v40 = vpop.f32.mrb[135].mxu0  ;;  %v3433_v36 = vld [vmem:[#allocation3 + $0x88] sm:$0xff] }
 0x20a   : > { %3353 = vst.msk [vmem:[#allocation3 + $0xa8] sm:$0xff] %vm514_vm2, %v3297_v61  ;;  %v3299_v41 = vadd.f32 %v3193_v40, %v2913_v2  ;;  %v2925_v2 = vld [vmem:[#allocation3 + $0x118] sm:$0xff] }
 0x20b   : > { %v3435_v12 = vld [vmem:[#allocation3 + $0x98] sm:$0xff]  ;;  %v9762_v47 = vpack.c.bf16 %v3298_v23, %v3296_v39 }
 0x20c   : > { %3355 = vst.msk [vmem:[#allocation3 + $0xb8] sm:$0xff] %vm514_vm2, %v3299_v41  ;;  %v9765_v6 = vpack.c.bf16 %v3435_v12, %v3433_v36 }
 0x20e   : > { %v3197_v32 = vpop.f32.mrb[136].mxu0  ;;  %7778 = vmatprep.subr.bf16.mxu1 %v9765_v6 }
 0x20f   : > { %v3300_v9 = vadd.f32 %v3197_v32, %v9633_v60  ;;  %v3199_v17 = vpop.f32.mrb[137].mxu0  ;;  %7780 = vmatpush1.bf16.msra.mxu1 %v9752_v55 }
 0x210   : > { %v3301_v49 = vadd.f32 %v3199_v17, %v2915_v35  ;;  %v3201_v53 = vpop.f32.mrb[138].mxu0  ;;  %v2927_v17 = vld [vmem:[#allocation3 + $0x128] sm:$0xff] }
 0x211   : > { %v3302_v48 = vadd.f32 %v3201_v53, %v9636_v54  ;;  %v3203_v45 = vpop.f32.mrb[139].mxu0  ;;  %v3437_v7 = vld [vmem:[#allocation3 + $0xa8] sm:$0xff] }
 0x212   : > { %3357 = vst.msk [vmem:[#allocation3 + $0xc8] sm:$0xff] %vm514_vm2, %v3301_v49  ;;  %v3303_v8 = vadd.f32 %v3203_v45, %v2917_v31  ;;  %v2929_v31 = vld [vmem:[#allocation3 + $0x138] sm:$0xff] }
 0x213   : > { %v3439_v52 = vld [vmem:[#allocation3 + $0xb8] sm:$0xff]  ;;  %v9772_v5 = vpack.c.bf16 %v3302_v48, %v3300_v9 }
 0x214   : > { %3359 = vst.msk [vmem:[#allocation3 + $0xd8] sm:$0xff] %vm514_vm2, %v3303_v8  ;;  %v9775_v60 = vpack.c.bf16 %v3439_v52, %v3437_v7 }
 0x216   : > { %v3207_v25 = vpop.f32.mrb[140].mxu0  ;;  %7782 = vmatprep.subr.bf16.mxu1 %v9775_v60 }
 0x217   : > { %v3304_v34 = vadd.f32 %v3207_v25, %v9643_v10  ;;  %v3209_v54 = vpop.f32.mrb[141].mxu0  ;;  %7784 = vmatpush1.bf16.msra.mxu1 %v9762_v47 }
 0x218   : > { %v3305_v33 = vadd.f32 %v3209_v54, %v2919_v22  ;;  %v3211_v63 = vpop.f32.mrb[142].mxu0  ;;  %v2931_v54 = vld [vmem:[#allocation3 + $0x148] sm:$0xff] }
 0x219   : > { %v3306_v21 = vadd.f32 %v3211_v63, %v9646_v4  ;;  %v3213_v3 = vpop.f32.mrb[143].mxu0  ;;  %v3441_v26 = vld [vmem:[#allocation3 + $0xc8] sm:$0xff] }
 0x21a   : > { %3361 = vst.msk [vmem:[#allocation3 + $0xe8] sm:$0xff] %vm514_vm2, %v3305_v33  ;;  %v3307_v28 = vadd.f32 %v3213_v3, %v2921_v20  ;;  %v2933_v20 = vld [vmem:[#allocation3 + $0x158] sm:$0xff] }
 0x21b   : > { %v3443_v16 = vld [vmem:[#allocation3 + $0xd8] sm:$0xff]  ;;  %v9782_v13 = vpack.c.bf16 %v3306_v21, %v3304_v34 }
 0x21c   : > { %3363 = vst.msk [vmem:[#allocation3 + $0xf8] sm:$0xff] %vm514_vm2, %v3307_v28  ;;  %v9785_v10 = vpack.c.bf16 %v3443_v16, %v3441_v26 }
 0x21e   : > { %v3217_v39 = vpop.f32.mrb[144].mxu0  ;;  %7786 = vmatprep.subr.bf16.mxu1 %v9785_v10 }
 0x21f   : > { %v3308_v43 = vadd.f32 %v3217_v39, %v9653_v57  ;;  %v3219_v4 = vpop.f32.mrb[145].mxu0  ;;  %7788 = vmatpush1.bf16.msra.mxu1 %v9772_v5 }
 0x220   : > { %v3309_v61 = vadd.f32 %v3219_v4, %v2923_v42  ;;  %v3221_v0 = vpop.f32.mrb[146].mxu0  ;;  %v2935_v4 = vld [vmem:[#allocation3 + $0x168] sm:$0xff] }
 0x221   : > { %v3310_v23 = vadd.f32 %v3221_v0, %v9656_v51  ;;  %v3223_v40 = vpop.f32.mrb[147].mxu0  ;;  %v3445_v36 = vld [vmem:[#allocation3 + $0xe8] sm:$0xff] }
 0x222   : > { %3365 = vst.msk [vmem:[#allocation3 + $0x108] sm:$0xff] %vm514_vm2, %v3309_v61  ;;  %v3311_v41 = vadd.f32 %v3223_v40, %v2925_v2  ;;  %v2937_v2 = vld [vmem:[#allocation3 + $0x178] sm:$0xff] }
 0x223   : > { %v3447_v12 = vld [vmem:[#allocation3 + $0xf8] sm:$0xff]  ;;  %v9792_v32 = vpack.c.bf16 %v3310_v23, %v3308_v43 }
 0x224   : > { %3367 = vst.msk [vmem:[#allocation3 + $0x118] sm:$0xff] %vm514_vm2, %v3311_v41  ;;  %v9795_v57 = vpack.c.bf16 %v3447_v12, %v3445_v36 }
 0x226   : > { %v3227_v9 = vpop.f32.mrb[148].mxu0  ;;  %7790 = vmatprep.subr.bf16.mxu1 %v9795_v57 }
 0x227   : > { %v3312_v35 = vadd.f32 %v3227_v9, %v9663_v58  ;;  %v3229_v51 = vpop.f32.mrb[149].mxu0  ;;  %7792 = vmatpush1.bf16.msra.mxu1 %v9782_v13 }
 0x228   : > { %v3313_v49 = vadd.f32 %v3229_v51, %v2927_v17  ;;  %v3231_v53 = vpop.f32.mrb[150].mxu0  ;;  %v2939_v51 = vld [vmem:[#allocation3 + $0x188] sm:$0xff] }
 0x229   : > { %v3314_v48 = vadd.f32 %v3231_v53, %v9666_v44  ;;  %v3233_v45 = vpop.f32.mrb[151].mxu0  ;;  %v3449_v7 = vld [vmem:[#allocation3 + $0x108] sm:$0xff] }
 0x22a   : > { %3369 = vst.msk [vmem:[#allocation3 + $0x128] sm:$0xff] %vm514_vm2, %v3313_v49  ;;  %v3315_v8 = vadd.f32 %v3233_v45, %v2929_v31  ;;  %v2941_v31 = vld [vmem:[#allocation3 + $0x198] sm:$0xff] }
 0x22b   : > { %v3451_v52 = vld [vmem:[#allocation3 + $0x118] sm:$0xff]  ;;  %v9802_v25 = vpack.c.bf16 %v3314_v48, %v3312_v35 }
 0x22c   : > { %3371 = vst.msk [vmem:[#allocation3 + $0x138] sm:$0xff] %vm514_vm2, %v3315_v8  ;;  %v9805_v58 = vpack.c.bf16 %v3451_v52, %v3449_v7 }
 0x22e   : > { %v3237_v34 = vpop.f32.mrb[152].mxu0  ;;  %7794 = vmatprep.subr.bf16.mxu1 %v9805_v58 }
 0x22f   : > { %v3316_v22 = vadd.f32 %v3237_v34, %v9673_v37  ;;  %v3239_v44 = vpop.f32.mrb[153].mxu0  ;;  %7796 = vmatpush1.bf16.msra.mxu1 %v9792_v32 }
 0x230   : > { %v3317_v33 = vadd.f32 %v3239_v44, %v2931_v54  ;;  %v3241_v63 = vpop.f32.mrb[154].mxu0  ;;  %v3912_v54 = vld [vmem:[%s11328_s4 + $0x8] sm:$0xff]  ;;  %v3913_v44 = vld [vmem:[%s11328_s4 + $0x10] sm:$0xff] }
 0x231   : > { %v3318_v21 = vadd.f32 %v3241_v63, %v9676_v24  ;;  %v3243_v3 = vpop.f32.mrb[155].mxu0  ;;  %v3453_v26 = vld [vmem:[#allocation3 + $0x128] sm:$0xff] }
 0x232   : > { %3373 = vst.msk [vmem:[#allocation3 + $0x148] sm:$0xff] %vm514_vm2, %v3317_v33  ;;  %v3319_v28 = vadd.f32 %v3243_v3, %v2933_v20  ;;  %v2943_v63 = vld [vmem:[#allocation3 + $0x1a8] sm:$0xff]  ;;  %v8271_v20 = vmov 0.0|0.0  }
 0x233   : > { %v3455_v16 = vld [vmem:[#allocation3 + $0x138] sm:$0xff]  ;;  %v9812_v39 = vpack.c.bf16 %v3318_v21, %v3316_v22  ;;  %7873 = vmatprep.subr.bf16.mxu0 %v8271_v20 }
 0x234   : > { %3375 = vst.msk [vmem:[#allocation3 + $0x158] sm:$0xff] %vm514_vm2, %v3319_v28  ;;  %v9815_v37 = vpack.c.bf16 %v3455_v16, %v3453_v26  ;;  %v3914_v28 = vld [vmem:[%s11328_s4 + $0x18] sm:$0xff] }
 0x236   : > { %v3247_v43 = vpop.f32.mrb[156].mxu0  ;;  %7798 = vmatprep.subr.bf16.mxu1 %v9815_v37 }
 0x237   : > { %v3320_v42 = vadd.f32 %v3247_v43, %v9683_v62  ;;  %v3249_v24 = vpop.f32.mrb[157].mxu0  ;;  %7800 = vmatpush1.bf16.msra.mxu1 %v9802_v25 }
 0x238   : > { %v3321_v61 = vadd.f32 %v3249_v24, %v2935_v4  ;;  %v3251_v0 = vpop.f32.mrb[158].mxu0 }
 0x239   : > { %v3322_v23 = vadd.f32 %v3251_v0, %v9686_v11  ;;  %v3253_v40 = vpop.f32.mrb[159].mxu0  ;;  %v3457_v36 = vld [vmem:[#allocation3 + $0x148] sm:$0xff] }
 0x23a   : > { %3377 = vst.msk [vmem:[#allocation3 + $0x168] sm:$0xff] %vm514_vm2, %v3321_v61  ;;  %v3323_v41 = vadd.f32 %v3253_v40, %v2937_v2  ;;  %v3915_v61 = vld [vmem:[%s11328_s4 + $0x20] sm:$0xff]  ;;  %v3916_v0 = vld [vmem:[%s11328_s4 + $0x28] sm:$0xff] }
 0x23b   : > { %v3459_v12 = vld [vmem:[#allocation3 + $0x158] sm:$0xff]  ;;  %v9822_v9 = vpack.c.bf16 %v3322_v23, %v3320_v42 }
 0x23c   : > { %3379 = vst.msk [vmem:[#allocation3 + $0x178] sm:$0xff] %vm514_vm2, %v3323_v41  ;;  %v9825_v62 = vpack.c.bf16 %v3459_v12, %v3457_v36  ;;  %v2945_v42 = vld [vmem:[#allocation3 + $0x1b8] sm:$0xff]  ;;  %v7880_v41 = vpack.c.bf16 %v3916_v0, %v3915_v61  ;;  %v3917_v36 = vld [vmem:[%s11328_s4 + $0x30] sm:$0xff] }
 0x23d   : > { %v3918_v12 = vld [vmem:[%s11328_s4 + $0x38] sm:$0xff]  ;;  %v3921_v61 = vld [vmem:[%s11328_s4 + $0x50] sm:$0xff] }
 0x23e   : > { %v3257_v35 = vpop.f32.mrb[160].mxu0  ;;  %7802 = vmatprep.subr.bf16.mxu1 %v9825_v62  ;;  %v3922_v0 = vld [vmem:[%s11328_s4 + $0x58] sm:$0xff] }
 0x23f   : > { %v3324_v17 = vadd.f32 %v3257_v35, %v9693_v29  ;;  %v3259_v11 = vpop.f32.mrb[161].mxu0  ;;  %7804 = vmatpush1.bf16.msra.mxu1 %v9812_v39  ;;  %v7883_v35 = vpack.c.bf16 %v3918_v12, %v3917_v36  ;;  %v7389_v36 = vld [vmem:[%s11327_s3 + $0x180] sm:$0xff] }
 0x240   : > { %v3325_v49 = vadd.f32 %v3259_v11, %v2939_v51  ;;  %v3261_v53 = vpop.f32.mrb[162].mxu0  ;;  %v3920_v51 = vld [vmem:[%s11328_s4 + $0x48] sm:$0xff] }
 0x241   : > { %v3326_v48 = vadd.f32 %v3261_v53, %v9696_v1  ;;  %v3263_v45 = vpop.f32.mrb[163].mxu0  ;;  %v3461_v7 = vld [vmem:[#allocation3 + $0x168] sm:$0xff]  ;;  %v3911_v1 = vld [vmem:[%s11328_s4] sm:$0xff] }
 0x242   : > { %3381 = vst.msk [vmem:[#allocation3 + $0x188] sm:$0xff] %vm514_vm2, %v3325_v49  ;;  %v3327_v8 = vadd.f32 %v3263_v45, %v2941_v31  ;;  %v7874_v3 = vpack.c.bf16 %v3912_v54, %v3911_v1  ;;  %v3388_v31 = vld [vmem:[%s11327_s3] sm:$0xff]  ;;  %v3391_v45 = vld [vmem:[%s11327_s3 + $0x18] sm:$0xff]  ;;  %v7374_v1 = vld [vmem:[%s11327_s3 + $0x108] sm:$0xff] }
 0x243   : > { %v3463_v52 = vld [vmem:[#allocation3 + $0x178] sm:$0xff]  ;;  %v9832_v34 = vpack.c.bf16 %v3326_v48, %v3324_v17  ;;  %v3919_v17 = vld [vmem:[%s11328_s4 + $0x40] sm:$0xff] }
 0x244   : > { %3383 = vst.msk [vmem:[#allocation3 + $0x198] sm:$0xff] %vm514_vm2, %v3327_v8  ;;  %v9835_v29 = vpack.c.bf16 %v3463_v52, %v3461_v7  ;;  %7875 = vmatpush1.bf16.msra.mxu0 %v7874_v3  ;;  %v7886_v48 = vpack.c.bf16 %v3920_v51, %v3919_v17  ;;  %v3390_v8 = vld [vmem:[%s11327_s3 + $0x10] sm:$0xff]  ;;  %v3395_v7 = vld [vmem:[%s11327_s3 + $0x38] sm:$0xff]  ;;  %v7370_v52 = vld [vmem:[%s11327_s3 + $0xe8] sm:$0xff] }
 0x245   : > { %7876 = vmatprep.subr.bf16.mxu0 %v8271_v20  ;;  %v7373_v54 = vld [vmem:[%s11327_s3 + $0x100] sm:$0xff]  ;;  %v7380_v3 = vld [vmem:[%s11327_s3 + $0x138] sm:$0xff]  ;;  %v7391_v17 = vld [vmem:[%s11327_s3 + $0x190] sm:$0xff] }
 0x246   : > { %v3267_v22 = vpop.f32.mrb[164].mxu0  ;;  %7806 = vmatprep.subr.bf16.mxu1 %v9835_v29  ;;  %v7394_v51 = vld [vmem:[%s11327_s3 + $0x1a8] sm:$0xff] }
 0x247   : > { %v3328_v33 = vadd.f32 %v3267_v22, %v9707_v27  ;;  %v3269_v21 = vpop.f32.mrb[165].mxu0  ;;  %7808 = vmatpush1.bf16.msra.mxu1 %v9822_v9  ;;  %v7877_v27 = vpack.c.bf16 %v3914_v28, %v3913_v44  ;;  %v7371_v22 = vld [vmem:[%s11327_s3 + $0xf0] sm:$0xff]  ;;  %v7376_v44 = vld [vmem:[%s11327_s3 + $0x118] sm:$0xff] }
 0x248   : > { %v3329_v26 = vadd.f32 %v3269_v21, %v2943_v63  ;;  %v3271_v16 = vpop.f32.mrb[166].mxu0  ;;  %v7378_v63 = vld [vmem:[%s11327_s3 + $0x128] sm:$0xff]  ;;  %v7377_v21 = vld [vmem:[%s11327_s3 + $0x120] sm:$0xff]  ;;  %v7379_v28 = vld [vmem:[%s11327_s3 + $0x130] sm:$0xff] }
 0x249   : > { %3384 = vst [vmem:[#allocation3 + $0x1a0] sm:$0xff] %v3328_v33  ;;  %v3330_v43 = vadd.f32 %v3271_v16, %v9710_v46  ;;  %v3273_v4 = vpop.f32.mrb[167].mxu0  ;;  %v3465_v23 = vld [vmem:[#allocation3 + $0x188] sm:$0xff]  ;;  %7878 = vmatpush1.bf16.msra.mxu0 %v7877_v27  ;;  %v7381_v16 = vld [vmem:[%s11327_s3 + $0x140] sm:$0xff] }
 0x24a   : > { %3385 = vst.msk [vmem:[#allocation3 + $0x1a8] sm:$0xff] %vm514_vm2, %v3329_v26  ;;  %v3331_v24 = vadd.f32 %v3273_v4, %v2945_v42  ;;  %7879 = vmatprep.subr.bf16.mxu0 %v8271_v20  ;;  %v7382_v26 = vld [vmem:[%s11327_s3 + $0x148] sm:$0xff]  ;;  %v7383_v42 = vld [vmem:[%s11327_s3 + $0x150] sm:$0xff]  ;;  %v7385_v27 = vld [vmem:[%s11327_s3 + $0x160] sm:$0xff] }
 0x24b   : > { %3386 = vst [vmem:[#allocation3 + $0x1b0] sm:$0xff] %v3330_v43  ;;  %v3467_v46 = vld [vmem:[#allocation3 + $0x198] sm:$0xff]  ;;  %v9862_v2 = vpack.c.bf16 %v3330_v43, %v3328_v33  ;;  %v7375_v33 = vld [vmem:[%s11327_s3 + $0x110] sm:$0xff]  ;;  %v7386_v4 = vld [vmem:[%s11327_s3 + $0x168] sm:$0xff] }
 0x24c   : > { %3387 = vst.msk [vmem:[#allocation3 + $0x1b8] sm:$0xff] %vm514_vm2, %v3331_v24  ;;  %v9865_v40 = vpack.c.bf16 %v3467_v46, %v3465_v23  ;;  %v7384_v43 = vld [vmem:[%s11327_s3 + $0x158] sm:$0xff]  ;;  %v7387_v23 = vld [vmem:[%s11327_s3 + $0x170] sm:$0xff]  ;;  %v7889_v46 = vpack.c.bf16 %v3922_v0, %v3921_v61 }
 0x24d   : > { %7881 = vmatpush1.bf16.msra.mxu0 %v7880_v41  ;;  %v7388_v24 = vld [vmem:[%s11327_s3 + $0x178] sm:$0xff]  ;;  %v7426_v41 = vld [vmem:[%s11328_s4 + $0xb0] sm:$0xff] }
 0x24e   : > { %7810 = vmatprep.subr.bf16.mxu1 %v9865_v40  ;;  %7882 = vmatprep.subr.bf16.mxu0 %v8271_v20 }
 0x24f   : > { %7812 = vmatpush1.bf16.msra.mxu1 %v9832_v34 }
 0x251   : > { %v3469_v11 = vld [vmem:[#allocation3 + $0x1a8] sm:$0xff]  ;;  %7884 = vmatpush1.bf16.msra.mxu0 %v7883_v35  ;;  %v7392_v35 = vld [vmem:[%s11327_s3 + $0x198] sm:$0xff] }
 0x252   : > { %7885 = vmatprep.subr.bf16.mxu0 %v8271_v20 }
 0x253   : > { %v3471_v49 = vld [vmem:[#allocation3 + $0x1b8] sm:$0xff] }
 0x254   : > { %v9883_v53 = vpack.c.bf16 %v3471_v49, %v3469_v11  ;;  %v3923_v11 = vld [vmem:[%s11328_s4 + $0x60] sm:$0xff]  ;;  %v3924_v49 = vld [vmem:[%s11328_s4 + $0x68] sm:$0xff] }
 0x255   : > { %7887 = vmatpush1.bf16.msra.mxu0 %v7886_v48  ;;  %v7892_v48 = vpack.c.bf16 %v3924_v49, %v3923_v11 }
 0x256   : > { %7814 = vmatprep.subr.bf16.mxu1 %v9883_v53  ;;  %7888 = vmatprep.subr.bf16.mxu0 %v8271_v20 }
 0x257   : > { %7816 = vmatpush1.bf16.msra.mxu1 %v9862_v2 }
 0x258   : > { %7818 = vmatprep.subr.bf16.mxu1 %v9725_v15  ;;  %v3393_v15 = vld [vmem:[%s11327_s3 + $0x28] sm:$0xff] }
 0x259   : > { %7890 = vmatpush1.bf16.msra.mxu0 %v7889_v46 }
 0x25a   : > { %3579 = vmatmul.mubr.f32.vlgmr.msra.gmra.mrb[112].mxu1 %v3388_v31  ;;  %7891 = vmatprep.subr.bf16.mxu0 %v8271_v20  ;;  %v7428_v31 = vld [vmem:[%s11328_s4 + $0xc0] sm:$0xff] }
 0x25b   : > { %7820 = vmatpush1.bf16.msra.mxu1 %v9714_v14  ;;  %7356 = vmatprep.mubr.msk.f32.mxu1 %vm574_vm0, %v3391_v45  ;;  %v3392_v14 = vld [vmem:[%s11327_s3 + $0x20] sm:$0xff] }
 0x25c   : > { %7822 = vmatprep.subr.bf16.mxu1 %v9735_v18  ;;  %v3397_v18 = vld [vmem:[%s11327_s3 + $0x48] sm:$0xff]  ;;  %v7393_v45 = vld [vmem:[%s11327_s3 + $0x1a0] sm:$0xff] }
 0x25d   : > { %7893 = vmatpush1.bf16.msra.mxu0 %v7892_v48 }
 0x25e   : > { %3585 = vmatmul.mubr.f32.gmra.mrb[114].mxu1 %v3390_v8  ;;  %7894 = vmatprep.subr.bf16.mxu0 %v8271_v20 }
 0x25f   : > { %7824 = vmatpush1.bf16.msra.mxu1 %v9722_v30  ;;  %7357 = vmatprep.mubr.msk.f32.mxu1 %vm574_vm0, %v3393_v15  ;;  %v3394_v30 = vld [vmem:[%s11327_s3 + $0x30] sm:$0xff]  ;;  %v7396_v15 = vld [vmem:[%s11327_s3 + $0x1b8] sm:$0xff] }
 0x260   : > { %7826 = vmatprep.subr.bf16.mxu1 %v9745_v19  ;;  %v3399_v19 = vld [vmem:[%s11327_s3 + $0x58] sm:$0xff] }
 0x262   : > { %3591 = vmatmul.mubr.f32.gmra.mrb[116].mxu1 %v3392_v14  ;;  %v7429_v14 = vld [vmem:[%s11328_s4 + $0xc8] sm:$0xff] }
 0x263   : > { %7828 = vmatpush1.bf16.msra.mxu1 %v9732_v59  ;;  %7358 = vmatprep.mubr.msk.f32.mxu1 %vm574_vm0, %v3395_v7  ;;  %v3396_v59 = vld [vmem:[%s11327_s3 + $0x40] sm:$0xff]  ;;  %v7430_v7 = vld [vmem:[%s11328_s4 + $0xd0] sm:$0xff] }
 0x264   : > { %7830 = vmatprep.subr.bf16.mxu1 %v9755_v50  ;;  %v3401_v50 = vld [vmem:[%s11327_s3 + $0x68] sm:$0xff] }
 0x266   : > { %3597 = vmatmul.mubr.f32.gmra.mrb[118].mxu1 %v3394_v30  ;;  %v7395_v30 = vld [vmem:[%s11327_s3 + $0x1b0] sm:$0xff] }
 0x267   : > { %7832 = vmatpush1.bf16.msra.mxu1 %v9742_v38  ;;  %7359 = vmatprep.mubr.msk.f32.mxu1 %vm574_vm0, %v3397_v18  ;;  %v3398_v38 = vld [vmem:[%s11327_s3 + $0x50] sm:$0xff]  ;;  %v7910_v18 = vpack.c.bf16 %v7430_v7, %v7429_v14 }
 0x268   : > { %7834 = vmatprep.subr.bf16.mxu1 %v9765_v6  ;;  %v3403_v6 = vld [vmem:[%s11327_s3 + $0x78] sm:$0xff] }
 0x26a   : > { %3603 = vmatmul.mubr.f32.gmra.mrb[120].mxu1 %v3396_v59  ;;  %v3925_v59 = vld [vmem:[%s11328_s4 + $0x70] sm:$0xff] }
 0x26b   : > { %7836 = vmatpush1.bf16.msra.mxu1 %v9752_v55  ;;  %7360 = vmatprep.mubr.msk.f32.mxu1 %vm574_vm0, %v3399_v19  ;;  %v3400_v55 = vld [vmem:[%s11327_s3 + $0x60] sm:$0xff]  ;;  %v3926_v19 = vld [vmem:[%s11328_s4 + $0x78] sm:$0xff] }
 0x26c   : > { %7838 = vmatprep.subr.bf16.mxu1 %v9775_v60  ;;  %v3405_v60 = vld [vmem:[%s11327_s3 + $0x88] sm:$0xff] }
 0x26e   : > { %3609 = vmatmul.mubr.f32.gmra.mrb[122].mxu1 %v3398_v38  ;;  %v7431_v38 = vld [vmem:[%s11328_s4 + $0xd8] sm:$0xff] }
 0x26f   : > { %7840 = vmatpush1.bf16.msra.mxu1 %v9762_v47  ;;  %7361 = vmatprep.mubr.msk.f32.mxu1 %vm574_vm0, %v3401_v50  ;;  %v3402_v47 = vld [vmem:[%s11327_s3 + $0x70] sm:$0xff]  ;;  %v7895_v50 = vpack.c.bf16 %v3926_v19, %v3925_v59 }
 0x270   : > { %7842 = vmatprep.subr.bf16.mxu1 %v9785_v10  ;;  %v3407_v10 = vld [vmem:[%s11327_s3 + $0x98] sm:$0xff] }
 0x271   : > { %7896 = vmatpush1.bf16.msra.mxu0 %v7895_v50 }
 0x272   : > { %3615 = vmatmul.mubr.f32.gmra.mrb[124].mxu1 %v3400_v55  ;;  %v7432_v55 = vld [vmem:[%s11328_s4 + $0xe0] sm:$0xff]  ;;  %7897 = vmatprep.subr.bf16.mxu0 %v8271_v20 }
 0x273   : > { %7844 = vmatpush1.bf16.msra.mxu1 %v9772_v5  ;;  %7362 = vmatprep.mubr.msk.f32.mxu1 %vm574_vm0, %v3403_v6  ;;  %v3404_v5 = vld [vmem:[%s11327_s3 + $0x80] sm:$0xff]  ;;  %v7913_v6 = vpack.c.bf16 %v7432_v55, %v7431_v38 }
 0x274   : > { %7846 = vmatprep.subr.bf16.mxu1 %v9795_v57  ;;  %v3409_v57 = vld [vmem:[%s11327_s3 + $0xa8] sm:$0xff] }
 0x275   : > { %v8139_v55 = vld [vmem:[%s11329_s5] ss:$8 sps:$4 sm:$0xff]  }
 0x276   : > { %3621 = vmatmul.mubr.f32.gmra.mrb[126].mxu1 %v3402_v47  ;;  %v7433_v47 = vld [vmem:[%s11328_s4 + $0xe8] sm:$0xff] }
 0x277   : > { %7848 = vmatpush1.bf16.msra.mxu1 %v9782_v13  ;;  %7363 = vmatprep.mubr.msk.f32.mxu1 %vm574_vm0, %v3405_v60  ;;  %v3406_v13 = vld [vmem:[%s11327_s3 + $0x90] sm:$0xff] }
 0x278   : > { %7850 = vmatprep.subr.bf16.mxu1 %v9805_v58  ;;  %v3411_v58 = vld [vmem:[%s11327_s3 + $0xb8] sm:$0xff]  ;;  %v7434_v60 = vld [vmem:[%s11328_s4 + $0xf0] sm:$0xff] }
 0x27a   : > { %3627 = vmatmul.mubr.f32.gmra.mrb[128].mxu1 %v3404_v5  ;;  %v7916_v5 = vpack.c.bf16 %v7434_v60, %v7433_v47 }
 0x27b   : > { %7852 = vmatpush1.bf16.msra.mxu1 %v9792_v32  ;;  %7364 = vmatprep.mubr.msk.f32.mxu1 %vm574_vm0, %v3407_v10  ;;  %v3408_v32 = vld [vmem:[%s11327_s3 + $0xa0] sm:$0xff] }
 0x27c   : > { %7854 = vmatprep.subr.bf16.mxu1 %v9815_v37  ;;  %v3413_v37 = vld [vmem:[%s11327_s3 + $0xc8] sm:$0xff]  ;;  %v3927_v10 = vld [vmem:[%s11328_s4 + $0x80] sm:$0xff] }
 0x27e   : > { %3633 = vmatmul.mubr.f32.gmra.mrb[130].mxu1 %v3406_v13  ;;  %v3928_v13 = vld [vmem:[%s11328_s4 + $0x88] sm:$0xff] }
 0x27f   : > { %7856 = vmatpush1.bf16.msra.mxu1 %v9802_v25  ;;  %7365 = vmatprep.mubr.msk.f32.mxu1 %vm574_vm0, %v3409_v57  ;;  %v3410_v25 = vld [vmem:[%s11327_s3 + $0xb0] sm:$0xff]  ;;  %v7435_v57 = vld [vmem:[%s11328_s4 + $0xf8] sm:$0xff] }
 0x280   : > { %7858 = vmatprep.subr.bf16.mxu1 %v9825_v62  ;;  %v3415_v62 = vld [vmem:[%s11327_s3 + $0xd8] sm:$0xff] }
 0x282   : > { %3639 = vmatmul.mubr.f32.gmra.mrb[132].mxu1 %v3408_v32  ;;  %v7898_v32 = vpack.c.bf16 %v3928_v13, %v3927_v10 }
 0x283   : > { %7860 = vmatpush1.bf16.msra.mxu1 %v9812_v39  ;;  %7366 = vmatprep.mubr.msk.f32.mxu1 %vm574_vm0, %v3411_v58  ;;  %v3412_v39 = vld [vmem:[%s11327_s3 + $0xc0] sm:$0xff] }
 0x284   : > { %7862 = vmatprep.subr.bf16.mxu1 %v9835_v29  ;;  %v7372_v29 = vld [vmem:[%s11327_s3 + $0xf8] sm:$0xff]  ;;  %v7436_v58 = vld [vmem:[%s11328_s4 + $0x100] sm:$0xff]  ;;  %7899 = vmatpush1.bf16.msra.mxu0 %v7898_v32 }
 0x285   : > { %7900 = vmatprep.subr.bf16.mxu0 %v8271_v20 }
 0x286   : > { %3645 = vmatmul.mubr.f32.gmra.mrb[134].mxu1 %v3410_v25  ;;  %v7919_v25 = vpack.c.bf16 %v7436_v58, %v7435_v57 }
 0x287   : > { %7864 = vmatpush1.bf16.msra.mxu1 %v9822_v9  ;;  %7367 = vmatprep.mubr.msk.f32.mxu1 %vm574_vm0, %v3413_v37  ;;  %v3414_v9 = vld [vmem:[%s11327_s3 + $0xd0] sm:$0xff]  ;;  %v7437_v37 = vld [vmem:[%s11328_s4 + $0x108] sm:$0xff] }
 0x288   : > { %7866 = vmatprep.subr.bf16.mxu1 %v9865_v40  ;;  %v7425_v40 = vld [vmem:[%s11328_s4 + $0xa8] sm:$0xff] }
 0x289   : > { %v7904_v12 = vpack.c.bf16 %v7426_v41, %v7425_v40 }
 0x28a   : > { %3651 = vmatmul.mubr.f32.gmra.mrb[136].mxu1 %v3412_v39  ;;  %v7438_v39 = vld [vmem:[%s11328_s4 + $0x110] sm:$0xff] }
 0x28b   : > { %7868 = vmatpush1.bf16.msra.mxu1 %v9832_v34  ;;  %7368 = vmatprep.mubr.msk.f32.mxu1 %vm574_vm0, %v3415_v62  ;;  %v7369_v34 = vld [vmem:[%s11327_s3 + $0xe0] sm:$0xff]  ;;  %v7922_v62 = vpack.c.bf16 %v7438_v39, %v7437_v37 }
 0x28c   : > { %7870 = vmatprep.subr.bf16.mxu1 %v9883_v53  ;;  %v7427_v53 = vld [vmem:[%s11328_s4 + $0xb8] sm:$0xff] }
 0x28d   : > { %v7907_v8 = vpack.c.bf16 %v7428_v31, %v7427_v53 }
 0x28e   : > { %3657 = vmatmul.mubr.f32.gmra.mrb[138].mxu1 %v3414_v9  ;;  %v3929_v9 = vld [vmem:[%s11328_s4 + $0x90] sm:$0xff] }
 0x28f   : > { %7872 = vmatpush1.bf16.msra.mxu1 %v9862_v2  ;;  %7397 = vmatprep.mubr.msk.f32.mxu1 %vm574_vm0, %v7370_v52  ;;  %v7390_v2 = vld [vmem:[%s11327_s3 + $0x188] sm:$0xff]  ;;  %v3930_v52 = vld [vmem:[%s11328_s4 + $0x98] sm:$0xff] }
 0x290   : > { %7903 = vmatprep.subr.bf16.mxu1 %v8271_v20 }
 0x292   : > { %3799 = vmatmul.mubr.f32.vlgmr.msra.gmra.mrb[140].mxu1 %v7369_v34  ;;  %v7439_v34 = vld [vmem:[%s11328_s4 + $0x118] sm:$0xff] }
 0x293   : > { %7398 = vmatprep.mubr.msk.f32.mxu1 %vm574_vm0, %v7372_v29  ;;  %7905 = vmatpush1.bf16.msra.mxu1 %v7904_v12  ;;  %v7901_v29 = vpack.c.bf16 %v3930_v52, %v3929_v9 }
 0x294   : > { %7906 = vmatprep.subr.bf16.mxu1 %v8271_v20 }
 0x295   : > { %7902 = vmatpush1.bf16.msra.mxu0 %v7901_v29 }
 0x296   : > { %3805 = vmatmul.mubr.f32.gmra.mrb[142].mxu1 %v7371_v22  ;;  %v7440_v22 = vld [vmem:[%s11328_s4 + $0x120] sm:$0xff] }
 0x297   : > { %7399 = vmatprep.mubr.msk.f32.mxu1 %vm574_vm0, %v7374_v1  ;;  %7908 = vmatpush1.bf16.msra.mxu1 %v7907_v8  ;;  %v7925_v1 = vpack.c.bf16 %v7440_v22, %v7439_v34 }
 0x298   : > { %7909 = vmatprep.subr.bf16.mxu1 %v8271_v20 }
 0x29a   : > { %3811 = vmatmul.mubr.f32.gmra.mrb[144].mxu1 %v7373_v54  ;;  %v7441_v54 = vld [vmem:[%s11328_s4 + $0x128] sm:$0xff] }
 0x29b   : > { %7400 = vmatprep.mubr.msk.f32.mxu1 %vm574_vm0, %v7376_v44  ;;  %7911 = vmatpush1.bf16.msra.mxu1 %v7910_v18  ;;  %v7442_v44 = vld [vmem:[%s11328_s4 + $0x130] sm:$0xff] }
 0x29c   : > { %7912 = vmatprep.subr.bf16.mxu1 %v8271_v20 }
 0x29e   : > { %3817 = vmatmul.mubr.f32.gmra.mrb[146].mxu1 %v7375_v33  ;;  %v7928_v33 = vpack.c.bf16 %v7442_v44, %v7441_v54 }
 0x29f   : > { %7401 = vmatprep.mubr.msk.f32.mxu1 %vm574_vm0, %v7378_v63  ;;  %7914 = vmatpush1.bf16.msra.mxu1 %v7913_v6  ;;  %v8272_v63 = vmov 0.0  }
 0x2a0   : > { %7915 = vmatprep.subr.bf16.mxu1 %v8271_v20  ;;  %4014 = vmatprep.subr.mxu0 %v8272_v63 }
 0x2a2   : > { %3823 = vmatmul.mubr.f32.gmra.mrb[148].mxu1 %v7377_v21  ;;  %v3931_v21 = vld [vmem:[%s11328_s4 + $0xa0] sm:$0xff] }
 0x2a3   : > { %7402 = vmatprep.mubr.msk.f32.mxu1 %vm574_vm0, %v7380_v3  ;;  %7917 = vmatpush1.bf16.msra.mxu1 %v7916_v5  ;;  %v7443_v3 = vld [vmem:[%s11328_s4 + $0x138] sm:$0xff] }
 0x2a4   : > { %7918 = vmatprep.subr.bf16.mxu1 %v8271_v20  ;;  %4015 = vmatpush1.msra.mxu0 %v3931_v21 }
 0x2a6   : > { %3829 = vmatmul.mubr.f32.gmra.mrb[150].mxu1 %v7379_v28  ;;  %v7444_v28 = vld [vmem:[%s11328_s4 + $0x140] sm:$0xff] }
 0x2a7   : > { %7403 = vmatprep.mubr.msk.f32.mxu1 %vm574_vm0, %v7382_v26  ;;  %7920 = vmatpush1.bf16.msra.mxu1 %v7919_v25  ;;  %v7931_v26 = vpack.c.bf16 %v7444_v28, %v7443_v3 }
 0x2a8   : > { %7921 = vmatprep.subr.bf16.mxu1 %v8271_v20 }
 0x2aa   : > { %3835 = vmatmul.mubr.f32.gmra.mrb[152].mxu1 %v7381_v16  ;;  %v7445_v16 = vld [vmem:[%s11328_s4 + $0x148] sm:$0xff] }
 0x2ab   : > { %7404 = vmatprep.mubr.msk.f32.mxu1 %vm574_vm0, %v7384_v43  ;;  %7923 = vmatpush1.bf16.msra.mxu1 %v7922_v62  ;;  %v8141_v43 = vld [vmem:[%s11329_s5 + $0x4] ss:$8 sps:$4 sm:$0xff]  }
 0x2ac   : > { %7924 = vmatprep.subr.bf16.mxu1 %v8271_v20  ;;  %4500 = vmatprep.subr.bf16.mxu0 %v8141_v43 }
 0x2ae   : > { %3841 = vmatmul.mubr.f32.gmra.mrb[154].mxu1 %v7383_v42 }
 0x2af   : > { %7405 = vmatprep.mubr.msk.f32.mxu1 %vm574_vm0, %v7386_v4  ;;  %7926 = vmatpush1.bf16.msra.mxu1 %v7925_v1 }
 0x2b0   : > { %7927 = vmatprep.subr.bf16.mxu1 %v8271_v20 }
 0x2b2   : > { %3847 = vmatmul.mubr.f32.gmra.mrb[156].mxu1 %v7385_v27 }
 0x2b3   : > { %7406 = vmatprep.mubr.msk.f32.mxu1 %vm574_vm0, %v7388_v24  ;;  %7929 = vmatpush1.bf16.msra.mxu1 %v7928_v33 }
 0x2b4   : > { %7930 = vmatprep.subr.bf16.mxu1 %v8271_v20 }
 0x2b6   : > { %3853 = vmatmul.mubr.f32.gmra.mrb[158].mxu1 %v7387_v23 }
 0x2b7   : > { %7407 = vmatprep.mubr.msk.f32.mxu1 %vm574_vm0, %v7390_v2  ;;  %7932 = vmatpush1.bf16.msra.mxu1 %v7931_v26 }
 0x2b8   : > { %4171 = vmatprep.subr.mxu1 %v8272_v63 }
 0x2ba   : > { %3859 = vmatmul.mubr.f32.gmra.mrb[160].mxu1 %v7389_v36 }
 0x2bb   : > { %7408 = vmatprep.mubr.msk.f32.mxu1 %vm574_vm0, %v7392_v35  ;;  %4172 = vmatpush1.msra.mxu1 %v7445_v16 }
 0x2be   : > { %3865 = vmatmul.mubr.f32.gmra.mrb[162].mxu1 %v7391_v17 }
 0x2bf   : > { %7409 = vmatprep.mubr.msk.f32.mxu1 %vm574_vm0, %v7394_v51 }
 0x2c2   : > { %3871 = vmatmul.mubr.f32.gmra.mrb[164].mxu1 %v7393_v45 }
 0x2c3   : > { %7410 = vmatprep.mubr.msk.f32.mxu1 %vm574_vm0, %v7396_v15  ;;  %vm6673_vm0 = vcmask 130048  }
 0x2c6   : > { %3877 = vmatmul.mubr.f32.gmra.mrb[166].mxu1 %v7395_v30 }
 0x32d   : > { %v3580_v42 = vpop.f32.mrb[112].mxu1 }
 0x32e   : > { %v3582_v4 = vpop.f32.mrb[113].mxu1 }
 0x331   : > { %v3586_v27 = vpop.f32.mrb[114].mxu1 }
 0x332   : > { %v3588_v24 = vpop.f32.mrb[115].mxu1 }
 0x335   : > { %v3592_v61 = vpop.f32.mrb[116].mxu1 }
 0x336   : > { %v3594_v0 = vpop.f32.mrb[117].mxu1 }
 0x339   : > { %v3598_v23 = vpop.f32.mrb[118].mxu1 }
 0x33a   : > { %v3600_v46 = vpop.f32.mrb[119].mxu1 }
 0x33d   : > { %v3604_v2 = vpop.f32.mrb[120].mxu1 }
 0x33e   : > { %v3606_v40 = vpop.f32.mrb[121].mxu1 }
 0x341   : > { %v3610_v41 = vpop.f32.mrb[122].mxu1 }
 0x342   : > { %v3612_v36 = vpop.f32.mrb[123].mxu1 }
 0x345   : > { %v10224_v12 = vpop.f32.mrb[124].mxu1 }
 0x346   : > { %v10226_v35 = vpop.f32.mrb[125].mxu1 }
 0x349   : > { %v10228_v17 = vpop.f32.mrb[126].mxu1 }
 0x34a   : > { %v10230_v51 = vpop.f32.mrb[127].mxu1 }
 0x34d   : > { %v10232_v11 = vpop.f32.mrb[128].mxu1 }
 0x34e   : > { %v10234_v49 = vpop.f32.mrb[129].mxu1 }
 0x351   : > { %v10236_v53 = vpop.f32.mrb[130].mxu1 }
 0x352   : > { %v10238_v48 = vpop.f32.mrb[131].mxu1 }
 0x355   : > { %v10240_v31 = vpop.f32.mrb[132].mxu1 }
 0x356   : > { %v10242_v45 = vpop.f32.mrb[133].mxu1 }
 0x359   : > { %v10244_v8 = vpop.f32.mrb[134].mxu1 }
 0x35a   : > { %v10246_v15 = vpop.f32.mrb[135].mxu1 }
 0x35d   : > { %v10248_v14 = vpop.f32.mrb[136].mxu1 }
 0x35e   : > { %v10250_v7 = vpop.f32.mrb[137].mxu1 }
 0x361   : > { %v10252_v30 = vpop.f32.mrb[138].mxu1 }
 0x362   : > { %v10254_v18 = vpop.f32.mrb[139].mxu1 }
 0x365   : > { %v3800_v59 = vpop.f32.mrb[140].mxu1 }
 0x366   : > { %v3883_v19 = vmax.f32 %v3580_v42, %v3800_v59  ;;  %v3802_v38 = vpop.f32.mrb[141].mxu1  ;;  %v8150_v59 = vld [vmem:[%s11329_s5 + $0x34] ss:$8 sps:$4 sm:$0xff]  }
 0x367   : > { %v3884_v50 = vmax.f32 %v3582_v4, %v3802_v38  ;;  %v8153_v38 = vld [vmem:[%s11329_s5 + $0x5c] ss:$8 sps:$4 sm:$0xff]  }
 0x368   : > { %4778 = vmatprep.subr.bf16.mxu1 %v8153_v38 }
 0x369   : > { %v3806_v6 = vpop.f32.mrb[142].mxu1  ;;  %7411 = vmatprep.mubr.msk.f32.mxu0 %vm514_vm2, %v3884_v50  ;;  %7446 = vmatprep.mubr.msk.f32.mxu1 %vm514_vm2, %v3884_v50  ;;  %v8156_v50 = vld [vmem:[%s11329_s5 + $0x44] ss:$8 sps:$4 sm:$0xff]  }
 0x36a   : > { %v3885_v47 = vmax.f32 %v3586_v27, %v3806_v6  ;;  %v3808_v60 = vpop.f32.mrb[143].mxu1  ;;  %4039 = vmatmul.mubr.f32.vlgmr.msra.gmra.mrb[168].mxu0 %v3883_v19  ;;  %4196 = vmatmul.mubr.f32.vlgmr.msra.gmra.mrb[168].mxu1 %v3883_v19  ;;  %v8148_v19 = vld [vmem:[%s11329_s5 + $0x30] ss:$8 sps:$4 sm:$0xff]   ;;  %v8154_v6 = vld [vmem:[%s11329_s5 + $0x40] ss:$8 sps:$4 sm:$0xff]  }
 0x36b   : > { %v3886_v5 = vmax.f32 %v3588_v24, %v3808_v60  ;;  %4501 = vmatpush1.bf16.msra.mxu0 %v8139_v55  ;;  %v8151_v55 = vld [vmem:[%s11329_s5 + $0x58] ss:$8 sps:$4 sm:$0xff]  }
 0x36c   : > { %4779 = vmatpush1.bf16.msra.mxu1 %v8151_v55 }
 0x36d   : > { %v3812_v10 = vpop.f32.mrb[144].mxu1  ;;  %7412 = vmatprep.mubr.msk.f32.mxu0 %vm514_vm2, %v3886_v5  ;;  %7447 = vmatprep.mubr.msk.f32.mxu1 %vm514_vm2, %v3886_v5  ;;  %v8160_v5 = vld [vmem:[%s11329_s5 + $0x6c] ss:$8 sps:$4 sm:$0xff]  }
 0x36e   : > { %v3887_v13 = vmax.f32 %v3592_v61, %v3812_v10  ;;  %v3814_v57 = vpop.f32.mrb[145].mxu1  ;;  %4044 = vmatmul.mubr.f32.gmra.mrb[170].mxu0 %v3885_v47  ;;  %4201 = vmatmul.mubr.f32.gmra.mrb[170].mxu1 %v3885_v47  ;;  %v4422_v47 = vld [vmem:[%s11329_s5 + $0x50] sm:$0x33] }
 0x36f   : > { %v3888_v32 = vmax.f32 %v3594_v0, %v3814_v57  ;;  %v7471_v60 = vcombine.high %v4422_v47, %v4422_v47  ;;  %v7470_v10 = vcombine.low %v4422_v47, %v4422_v47  ;;  %4780 = vmatprep.subr.bf16.mxu1 %v8160_v5 }
 0x371   : > { %v3818_v58 = vpop.f32.mrb[146].mxu1  ;;  %7413 = vmatprep.mubr.msk.f32.mxu0 %vm514_vm2, %v3888_v32  ;;  %7448 = vmatprep.mubr.msk.f32.mxu1 %vm514_vm2, %v3888_v32  ;;  %v4495_v57 = vsel %vm4493_vm3, %v7470_v10, 0  ;;  %v8163_v32 = vld [vmem:[%s11329_s5 + $0x7c] ss:$8 sps:$4 sm:$0xff]  }
 0x372   : > { %v3889_v25 = vmax.f32 %v3598_v23, %v3818_v58  ;;  %v3820_v37 = vpop.f32.mrb[147].mxu1  ;;  %4049 = vmatmul.mubr.f32.gmra.mrb[172].mxu0 %v3887_v13  ;;  %4206 = vmatmul.mubr.f32.gmra.mrb[172].mxu1 %v3887_v13  ;;  %v8158_v13 = vld [vmem:[%s11329_s5 + $0x68] ss:$8 sps:$4 sm:$0xff]   ;;  %v8161_v58 = vld [vmem:[%s11329_s5 + $0x78] ss:$8 sps:$4 sm:$0xff]  }
 0x373   : > { %v3890_v39 = vmax.f32 %v3600_v46, %v3820_v37  ;;  %4781 = vmatpush1.bf16.msra.mxu1 %v8158_v13  ;;  %v8164_v37 = vld [vmem:[%s11329_s5 + $0x88] ss:$8 sps:$4 sm:$0xff]  }
 0x374   : > { %4782 = vmatprep.subr.bf16.mxu1 %v8163_v32  ;;  %v8171_v13 = vld [vmem:[%s11329_s5 + $0xb0] ss:$8 sps:$4 sm:$0xff]  }
 0x375   : > { %v3824_v62 = vpop.f32.mrb[148].mxu1  ;;  %7414 = vmatprep.mubr.msk.f32.mxu0 %vm514_vm2, %v3890_v39  ;;  %7449 = vmatprep.mubr.msk.f32.mxu1 %vm514_vm2, %v3890_v39  ;;  %v8169_v39 = vld [vmem:[%s11329_s5 + $0x9c] ss:$8 sps:$4 sm:$0xff]  }
 0x376   : > { %v3891_v9 = vmax.f32 %v3604_v2, %v3824_v62  ;;  %v3826_v52 = vpop.f32.mrb[149].mxu1  ;;  %4054 = vmatmul.mubr.f32.gmra.mrb[174].mxu0 %v3889_v25  ;;  %4211 = vmatmul.mubr.f32.gmra.mrb[174].mxu1 %v3889_v25  ;;  %v8166_v25 = vld [vmem:[%s11329_s5 + $0x8c] ss:$8 sps:$4 sm:$0xff]   ;;  %v8167_v62 = vld [vmem:[%s11329_s5 + $0x98] ss:$8 sps:$4 sm:$0xff]  }
 0x377   : > { %v3892_v34 = vmax.f32 %v3606_v40, %v3826_v52  ;;  %4783 = vmatpush1.bf16.msra.mxu1 %v8161_v58 }
 0x378   : > { %4784 = vmatprep.subr.bf16.mxu1 %v8166_v25 }
 0x379   : > { %v3830_v29 = vpop.f32.mrb[150].mxu1  ;;  %7415 = vmatprep.mubr.msk.f32.mxu0 %vm514_vm2, %v3892_v34  ;;  %7450 = vmatprep.mubr.msk.f32.mxu1 %vm514_vm2, %v3892_v34 }
 0x37a   : > { %v3893_v22 = vmax.f32 %v3610_v41, %v3830_v29  ;;  %v3832_v1 = vpop.f32.mrb[151].mxu1  ;;  %4059 = vmatmul.mubr.f32.gmra.mrb[176].mxu0 %v3891_v9  ;;  %4216 = vmatmul.mubr.f32.gmra.mrb[176].mxu1 %v3891_v9  ;;  %v7488_v9 = vld [vmem:[%s11329_s5 + $0xa8] sm:$0x33] }
 0x37b   : > { %v3894_v54 = vmax.f32 %v3612_v36, %v3832_v1  ;;  %4785 = vmatpush1.bf16.msra.mxu1 %v8164_v37  ;;  %v7500_v52 = vcombine.high %v7488_v9, %v7488_v9  ;;  %v7499_v34 = vcombine.low %v7488_v9, %v7488_v9  ;;  %v8188_v1 = vld [vmem:[%s11329_s5 + $0x10c] ss:$8 sps:$4 sm:$0xff]  }
 0x37c   : > { %4786 = vmatprep.subr.bf16.mxu1 %v8169_v39 }
 0x37d   : > { %v3836_v44 = vpop.f32.mrb[152].mxu1  ;;  %7416 = vmatprep.mubr.msk.f32.mxu0 %vm514_vm2, %v3894_v54  ;;  %7451 = vmatprep.mubr.msk.f32.mxu1 %vm514_vm2, %v3894_v54  ;;  %v4773_v29 = vsel %vm4493_vm3, %v7499_v34, 0 }
 0x37e   : > { %v3895_v33 = vmax.f32 %v10224_v12, %v3836_v44  ;;  %v3838_v21 = vpop.f32.mrb[153].mxu1  ;;  %4064 = vmatmul.mubr.f32.gmra.mrb[178].mxu0 %v3893_v22  ;;  %4221 = vmatmul.mubr.f32.gmra.mrb[178].mxu1 %v3893_v22  ;;  %v8173_v22 = vld [vmem:[%s11329_s5 + $0xb4] ss:$8 sps:$4 sm:$0xff]  }
 0x37f   : > { %v3896_v3 = vmax.f32 %v10226_v35, %v3838_v21  ;;  %4787 = vmatpush1.bf16.msra.mxu1 %v8167_v62 }
 0x380   : > { %7501 = vmatprep.subr.msk.bf16.mxu1 %vm4493_vm3, %v7500_v52 }
 0x381   : > { %v3842_v28 = vpop.f32.mrb[154].mxu1  ;;  %7417 = vmatprep.mubr.msk.f32.mxu0 %vm514_vm2, %v3896_v3  ;;  %7452 = vmatprep.mubr.msk.f32.mxu1 %vm514_vm2, %v3896_v3 }
 0x382   : > { %v3897_v26 = vmax.f32 %v10228_v17, %v3842_v28  ;;  %v3844_v16 = vpop.f32.mrb[155].mxu1  ;;  %4069 = vmatmul.mubr.f32.gmra.mrb[180].mxu0 %v3895_v33  ;;  %4226 = vmatmul.mubr.f32.gmra.mrb[180].mxu1 %v3895_v33 }
 0x383   : > { %v3898_v43 = vmax.f32 %v10230_v51, %v3844_v16  ;;  %4789 = vmatpush1.bf16.msra.mxu1 %v4773_v29 }
 0x384   : > { %5334 = vmatprep.subr.bf16.mxu1 %v8188_v1 }
 0x385   : > { %v3848_v42 = vpop.f32.mrb[156].mxu1  ;;  %7418 = vmatprep.mubr.msk.f32.mxu0 %vm514_vm2, %v3898_v43  ;;  %7453 = vmatprep.mubr.msk.f32.mxu1 %vm514_vm2, %v3898_v43 }
 0x386   : > { %v3899_v4 = vmax.f32 %v10232_v11, %v3848_v42  ;;  %v3850_v27 = vpop.f32.mrb[157].mxu1  ;;  %4074 = vmatmul.mubr.f32.gmra.mrb[182].mxu0 %v3897_v26  ;;  %4231 = vmatmul.mubr.f32.gmra.mrb[182].mxu1 %v3897_v26 }
 0x387   : > { %v3900_v24 = vmax.f32 %v10234_v49, %v3850_v27 }
 0x389   : > { %v3854_v61 = vpop.f32.mrb[158].mxu1  ;;  %7419 = vmatprep.mubr.msk.f32.mxu0 %vm514_vm2, %v3900_v24  ;;  %7454 = vmatprep.mubr.msk.f32.mxu1 %vm514_vm2, %v3900_v24 }
 0x38a   : > { %v3901_v0 = vmax.f32 %v10236_v53, %v3854_v61  ;;  %v3856_v23 = vpop.f32.mrb[159].mxu1  ;;  %4079 = vmatmul.mubr.f32.gmra.mrb[184].mxu0 %v3899_v4  ;;  %4236 = vmatmul.mubr.f32.gmra.mrb[184].mxu1 %v3899_v4 }
 0x38b   : > { %v3902_v46 = vmax.f32 %v10238_v48, %v3856_v23 }
 0x38d   : > { %v3860_v2 = vpop.f32.mrb[160].mxu1  ;;  %7420 = vmatprep.mubr.msk.f32.mxu0 %vm514_vm2, %v3902_v46  ;;  %7455 = vmatprep.mubr.msk.f32.mxu1 %vm514_vm2, %v3902_v46 }
 0x38e   : > { %v3903_v40 = vmax.f32 %v10240_v31, %v3860_v2  ;;  %v3862_v41 = vpop.f32.mrb[161].mxu1  ;;  %4084 = vmatmul.mubr.f32.gmra.mrb[186].mxu0 %v3901_v0  ;;  %4241 = vmatmul.mubr.f32.gmra.mrb[186].mxu1 %v3901_v0 }
 0x38f   : > { %v3904_v36 = vmax.f32 %v10242_v45, %v3862_v41 }
 0x391   : > { %v3866_v12 = vpop.f32.mrb[162].mxu1  ;;  %7421 = vmatprep.mubr.msk.f32.mxu0 %vm514_vm2, %v3904_v36  ;;  %7456 = vmatprep.mubr.msk.f32.mxu1 %vm514_vm2, %v3904_v36 }
 0x392   : > { %v3905_v35 = vmax.f32 %v10244_v8, %v3866_v12  ;;  %v3868_v17 = vpop.f32.mrb[163].mxu1  ;;  %4089 = vmatmul.mubr.f32.gmra.mrb[188].mxu0 %v3903_v40  ;;  %4246 = vmatmul.mubr.f32.gmra.mrb[188].mxu1 %v3903_v40 }
 0x393   : > { %v3906_v51 = vmax.f32 %v10246_v15, %v3868_v17 }
 0x395   : > { %v3872_v11 = vpop.f32.mrb[164].mxu1  ;;  %7422 = vmatprep.mubr.msk.f32.mxu0 %vm514_vm2, %v3906_v51  ;;  %7457 = vmatprep.mubr.msk.f32.mxu1 %vm514_vm2, %v3906_v51 }
 0x396   : > { %v3907_v49 = vmax.f32 %v10248_v14, %v3872_v11  ;;  %v3874_v53 = vpop.f32.mrb[165].mxu1  ;;  %4094 = vmatmul.mubr.f32.gmra.mrb[190].mxu0 %v3905_v35  ;;  %4251 = vmatmul.mubr.f32.gmra.mrb[190].mxu1 %v3905_v35  ;;  %v8142_v14 = vld [vmem:[%s11329_s5 + $0x10] ss:$8 sps:$4 sm:$0xff]  }
 0x397   : > { %v3908_v48 = vmax.f32 %v10250_v7, %v3874_v53  ;;  %v8144_v7 = vld [vmem:[%s11329_s5 + $0x14] ss:$8 sps:$4 sm:$0xff]  }
 0x398   : > { %4502 = vmatprep.subr.bf16.mxu0 %v8144_v7 }
 0x399   : > { %v3878_v31 = vpop.f32.mrb[166].mxu1  ;;  %7423 = vmatprep.mubr.msk.f32.mxu0 %vm514_vm2, %v3908_v48  ;;  %7458 = vmatprep.mubr.msk.f32.mxu1 %vm514_vm2, %v3908_v48 }
 0x39a   : > { %v3909_v45 = vmax.f32 %v10252_v30, %v3878_v31  ;;  %v3880_v8 = vpop.f32.mrb[167].mxu1  ;;  %4099 = vmatmul.mubr.f32.gmra.mrb[192].mxu0 %v3907_v49  ;;  %4256 = vmatmul.mubr.f32.gmra.mrb[192].mxu1 %v3907_v49  ;;  %v8147_v30 = vld [vmem:[%s11329_s5 + $0x24] ss:$8 sps:$4 sm:$0xff]  }
 0x39b   : > { %v3910_v15 = vmax.f32 %v10254_v18, %v3880_v8  ;;  %4503 = vmatpush1.bf16.msra.mxu0 %v8142_v14  ;;  %v8145_v18 = vld [vmem:[%s11329_s5 + $0x20] ss:$8 sps:$4 sm:$0xff]  }
 0x39c   : > { %4504 = vmatprep.subr.bf16.mxu0 %v8147_v30 }
 0x39d   : > { %7424 = vmatprep.mubr.msk.f32.mxu0 %vm514_vm2, %v3910_v15  ;;  %7459 = vmatprep.mubr.msk.f32.mxu1 %vm514_vm2, %v3910_v15  ;;  %vm8277_vm2 = vmmov 0  }
 0x39e   : > { %4104 = vmatmul.mubr.f32.gmra.mrb[194].mxu0 %v3909_v45  ;;  %4261 = vmatmul.mubr.f32.gmra.mrb[194].mxu1 %v3909_v45 }
 0x39f   : > { %4532 = vmatprep.mubr.bf16.mxu0 %v11355_v56  ;;  %4810 = vmatprep.mubr.bf16.mxu1 %v11355_v56 }
 0x3a0   : > { %4505 = vmatpush1.bf16.msra.mxu0 %v8145_v18 }
 0x3a1   : > { %4506 = vmatprep.subr.bf16.mxu0 %v8150_v59 }
 0x3a4   : > { %4507 = vmatpush1.bf16.msra.mxu0 %v8148_v19 }
 0x3a5   : > { %4508 = vmatprep.subr.bf16.mxu0 %v8156_v50 }
 0x3a8   : > { %4509 = vmatpush1.bf16.msra.mxu0 %v8154_v6 }
 0x3a9   : > { %7472 = vmatprep.subr.msk.bf16.mxu0 %vm4493_vm3, %v7471_v60 }
 0x3ac   : > { %4511 = vmatpush1.bf16.msra.mxu0 %v4495_v57  ;;  %v8176_v57 = vld [vmem:[%s11329_s5 + $0xc4] ss:$8 sps:$4 sm:$0xff]  }
 0x3ad   : > { %5056 = vmatprep.subr.bf16.mxu0 %v8173_v22 }
 0x43d   : > { %v4040_v54 = vpop.f32.mrb[168].mxu0  ;;  %v4197_v44 = vpop.f32.mrb[168].mxu1 }
 0x43e   : > { %v4266_v33 = vmax.f32 %v4040_v54, %v4197_v44  ;;  %v4042_v21 = vpop.f32.mrb[169].mxu0  ;;  %v4199_v3 = vpop.f32.mrb[169].mxu1 }
 0x43f   : > { %v8174_v3 = vld [vmem:[%s11329_s5 + $0xc0] ss:$8 sps:$4 sm:$0xff]  }
 0x440   : > { %v4280_v28 = vmax.f32 %v4266_v33, 0.0 }
 0x441   : > { %v4045_v26 = vpop.f32.mrb[170].mxu0  ;;  %v4202_v16 = vpop.f32.mrb[170].mxu1 }
 0x442   : > { %4295 = vst.msk [vmem:[#allocation4] sm:$0xff] %vm4294_vm4, %v4280_v28  ;;  %v4267_v43 = vmax.f32 %v4045_v26, %v4202_v16  ;;  %v4047_v42 = vpop.f32.mrb[171].mxu0  ;;  %v4204_v4 = vpop.f32.mrb[171].mxu1 }
 0x444   : > { %v4281_v27 = vmax.f32 %v4267_v43, 0.0  ;;  %v8179_v43 = vld [vmem:[%s11329_s5 + $0xd4] ss:$8 sps:$4 sm:$0xff]  }
 0x445   : > { %v4050_v24 = vpop.f32.mrb[172].mxu0  ;;  %v4207_v61 = vpop.f32.mrb[172].mxu1 }
 0x446   : > { %4296 = vst.msk [vmem:[#allocation4 + $0x8] sm:$0xff] %vm4294_vm4, %v4281_v27  ;;  %v4268_v0 = vmax.f32 %v4050_v24, %v4207_v61  ;;  %v4052_v23 = vpop.f32.mrb[173].mxu0  ;;  %v4209_v46 = vpop.f32.mrb[173].mxu1  ;;  %v8177_v24 = vld [vmem:[%s11329_s5 + $0xd0] ss:$8 sps:$4 sm:$0xff]  }
 0x447   : > { %v8182_v61 = vld [vmem:[%s11329_s5 + $0xe4] ss:$8 sps:$4 sm:$0xff]  }
 0x448   : > { %v4282_v2 = vmax.f32 %v4268_v0, 0.0 }
 0x449   : > { %v4055_v40 = vpop.f32.mrb[174].mxu0  ;;  %v4212_v41 = vpop.f32.mrb[174].mxu1  ;;  %v4344_v36 = vld [vmem:[#allocation4] sm:$0xff] }
 0x44a   : > { %4297 = vst.msk [vmem:[#allocation4 + $0x10] sm:$0xff] %vm4294_vm4, %v4282_v2  ;;  %v4269_v12 = vmax.f32 %v4055_v40, %v4212_v41  ;;  %v4057_v35 = vpop.f32.mrb[175].mxu0  ;;  %v4214_v17 = vpop.f32.mrb[175].mxu1  ;;  %4346 = vst.msk [vmem:[#allocation5] sm:$0xff] %vm4294_vm4, %v4344_v36 }
 0x44c   : > { %v4283_v51 = vmax.f32 %v4269_v12, 0.0 }
 0x44d   : > { %v4345_v11 = vld [vmem:[#allocation4 + $0x8] sm:$0x3]  ;;  %v4060_v49 = vpop.f32.mrb[176].mxu0  ;;  %v4217_v53 = vpop.f32.mrb[176].mxu1 }
 0x44e   : > { %4348 = vst.msk [vmem:[#allocation5 + $0x8] sm:$0x3] %vm4347_vm5, %v4345_v11  ;;  %v4270_v48 = vmax.f32 %v4060_v49, %v4217_v53  ;;  %v4062_v31 = vpop.f32.mrb[177].mxu0  ;;  %v4219_v45 = vpop.f32.mrb[177].mxu1  ;;  %v4623_v19 = vld [vmem:[#allocation4 + $0x1] sm:$0xff] }
 0x44f   : > { %4298 = vst.msk [vmem:[#allocation4 + $0x18] sm:$0xff] %vm4294_vm4, %v4283_v51  ;;  %v4624_v32 = vld [vmem:[#allocation4 + $0x9] sm:$0x3]  ;;  %v8185_v45 = vld [vmem:[%s11329_s5 + $0xf4] ss:$8 sps:$4 sm:$0xff]  }
 0x450   : > { %v4284_v14 = vmax.f32 %v4270_v48, 0.0  ;;  %v4901_v44 = vld [vmem:[#allocation4 + $0x2] sm:$0xff] }
 0x451   : > { %v4349_v8 = vld [vmem:[#allocation4 + $0xe] sm:$0xff]  ;;  %v4350_v15 = vld [vmem:[#allocation4 + $0x16] sm:$0x3]  ;;  %v4065_v7 = vpop.f32.mrb[178].mxu0  ;;  %v4222_v30 = vpop.f32.mrb[178].mxu1 }
 0x452   : > { %4351 = vst.msk [vmem:[#allocation5 + $0xa] sm:$0xff] %vm4294_vm4, %v4349_v8  ;;  %v4067_v18 = vpop.f32.mrb[179].mxu0  ;;  %v4397_v59 = vld [vmem:[#allocation5] sm:$0xff]  ;;  %4299 = vst.msk [vmem:[#allocation4 + $0x20] sm:$0xff] %vm4294_vm4, %v4284_v14  ;;  %v4271_v38 = vmax.f32 %v4065_v7, %v4222_v30  ;;  %v4224_v50 = vpop.f32.mrb[179].mxu1 }
 0x453   : > { %4352 = vst.msk [vmem:[#allocation5 + $0x12] sm:$0x3] %vm4347_vm5, %v4350_v15  ;;  %v4627_v0 = vld [vmem:[#allocation4 + $0xf] sm:$0xff]  ;;  %v8180_v49 = vld [vmem:[%s11329_s5 + $0xe0] ss:$8 sps:$4 sm:$0xff]  }
 0x454   : > { %4625 = vst.msk [vmem:[#allocation5] sm:$0xff] %vm4294_vm4, %v4623_v19  ;;  %v4285_v55 = vmax.f32 %v4271_v38, 0.0  ;;  %v5179_v15 = vld [vmem:[#allocation4 + $0x3] sm:$0xff]  ;;  %v8183_v30 = vld [vmem:[%s11329_s5 + $0xf0] ss:$8 sps:$4 sm:$0xff]  }
 0x455   : > { %v4070_v6 = vpop.f32.mrb[180].mxu0  ;;  %v4227_v47 = vpop.f32.mrb[180].mxu1  ;;  %v7517_v14 = vld [vmem:[%s11329_s5 + $0x100] sm:$0x33]  ;;  %v4902_v18 = vld [vmem:[#allocation4 + $0xa] sm:$0x3] }
 0x456   : > { %4300 = vst.msk [vmem:[#allocation4 + $0x28] sm:$0xff] %vm4294_vm4, %v4285_v55  ;;  %v4072_v60 = vpop.f32.mrb[181].mxu0  ;;  %v4272_v5 = vmax.f32 %v4070_v6, %v4227_v47  ;;  %v4229_v10 = vpop.f32.mrb[181].mxu1  ;;  %v4628_v23 = vld [vmem:[#allocation4 + $0x17] sm:$0x3] }
 0x457   : > { %v8186_v38 = vld [vmem:[%s11329_s5 + $0x108] ss:$8 sps:$4 sm:$0xff]  }
 0x458   : > { %v4286_v9 = vmax.f32 %v4272_v5, 0.0  ;;  %v7528_v5 = vcombine.low %v7517_v14, %v7517_v14 }
 0x459   : > { %v4075_v58 = vpop.f32.mrb[182].mxu0  ;;  %v4232_v25 = vpop.f32.mrb[182].mxu1  ;;  %v4398_v37 = vld [vmem:[#allocation5 + $0x8] sm:$0xff]  ;;  %v4354_v62 = vld [vmem:[#allocation4 + $0x24] sm:$0x3] }
 0x45a   : > { %v4353_v39 = vld [vmem:[#allocation4 + $0x1c] sm:$0xff]  ;;  %v4273_v52 = vmax.f32 %v4075_v58, %v4232_v25  ;;  %v4077_v34 = vpop.f32.mrb[183].mxu0  ;;  %v4407_v29 = vpack.c.bf16 %v4398_v37, %v4397_v59  ;;  %4626 = vst.msk [vmem:[#allocation5 + $0x8] sm:$0x3] %vm4347_vm5, %v4624_v32  ;;  %4356 = vst.msk [vmem:[#allocation5 + $0x1c] sm:$0x3] %vm4347_vm5, %v4354_v62  ;;  %v7529_v62 = vcombine.high %v7517_v14, %v7517_v14 }
 0x45b   : > { %4355 = vst.msk [vmem:[#allocation5 + $0x14] sm:$0xff] %vm4294_vm4, %v4353_v39  ;;  %v4234_v22 = vpop.f32.mrb[183].mxu1  ;;  %4301 = vst.msk [vmem:[#allocation4 + $0x30] sm:$0xff] %vm4294_vm4, %v4286_v9  ;;  %v10397_v54 = vld [vmem:[#allocation5] sm:$0xff]  ;;  %v4631_v59 = vld [vmem:[#allocation4 + $0x1d] sm:$0xff] }
 0x45c   : > { %v4287_v1 = vmax.f32 %v4273_v52, 0.0  ;;  %7473 = vmatmul.mubr.msk.bf16.vlgmr.msra.gmra.mrb[196].mxu0 %vm4294_vm4, %v4407_v29  ;;  %4903 = vst.msk [vmem:[#allocation5] sm:$0xff] %vm4294_vm4, %v4901_v44  ;;  %v4632_v50 = vld [vmem:[#allocation4 + $0x25] sm:$0x3] }
 0x45d   : > { %v4080_v33 = vpop.f32.mrb[184].mxu0  ;;  %v4237_v21 = vpop.f32.mrb[184].mxu1  ;;  %4542 = vmatprep.mubr.bf16.mxu0 %v11355_v56  ;;  %5057 = vmatpush1.bf16.msra.mxu0 %v8171_v13  ;;  %v8192_v9 = vld [vmem:[%s11329_s5 + $0x11c] ss:$8 sps:$4 sm:$0xff]  }
 0x45e   : > { %4302 = vst.msk [vmem:[#allocation4 + $0x38] sm:$0xff] %vm4294_vm4, %v4287_v1  ;;  %v4274_v28 = vmax.f32 %v4080_v33, %v4237_v21  ;;  %v4082_v26 = vpop.f32.mrb[185].mxu0  ;;  %v4239_v16 = vpop.f32.mrb[185].mxu1  ;;  %5058 = vmatprep.subr.bf16.mxu0 %v8176_v57  ;;  %v8202_v52 = vld [vmem:[%s11329_s5 + $0x164] ss:$8 sps:$4 sm:$0xff]  }
 0x460   : > { %v4288_v42 = vmax.f32 %v4274_v28, 0.0  ;;  %v5051_v28 = vsel %vm4493_vm3, %v7528_v5, 0  ;;  %v5188_v5 = vld [vmem:[#allocation4 + $0x27] sm:$0x3] }
 0x461   : > { %v4085_v4 = vpop.f32.mrb[186].mxu0  ;;  %v4242_v27 = vpop.f32.mrb[186].mxu1  ;;  %5059 = vmatpush1.bf16.msra.mxu0 %v8174_v3 }
 0x462   : > { %4303 = vst.msk [vmem:[#allocation4 + $0x40] sm:$0xff] %vm4294_vm4, %v4288_v42  ;;  %v4275_v46 = vmax.f32 %v4085_v4, %v4242_v27  ;;  %v4087_v2 = vpop.f32.mrb[187].mxu0  ;;  %v4244_v40 = vpop.f32.mrb[187].mxu1  ;;  %v10415_v41 = vld [vmem:[#allocation5 + $0x10] sm:$0xff]  ;;  %5060 = vmatprep.subr.bf16.mxu0 %v8179_v43  ;;  %v4357_v36 = vld [vmem:[#allocation4 + $0x2a] sm:$0xff] }
 0x463   : > { %v4358_v12 = vld [vmem:[#allocation4 + $0x32] sm:$0x3]  ;;  %4629 = vst.msk [vmem:[#allocation5 + $0xa] sm:$0xff] %vm4294_vm4, %v4627_v0  ;;  %4359 = vst.msk [vmem:[#allocation5 + $0x1e] sm:$0xff] %vm4294_vm4, %v4357_v36  ;;  %v8190_v42 = vld [vmem:[%s11329_s5 + $0x118] ss:$8 sps:$4 sm:$0xff]  }
 0x464   : > { %4630 = vst.msk [vmem:[#allocation5 + $0x12] sm:$0x3] %vm4347_vm5, %v4628_v23  ;;  %4360 = vst.msk [vmem:[#allocation5 + $0x26] sm:$0x3] %vm4347_vm5, %v4358_v12  ;;  %v4289_v35 = vmax.f32 %v4275_v46, 0.0  ;;  %v10429_v8 = vld [vmem:[#allocation5] sm:$0xff] }
 0x465   : > { %v4090_v17 = vpop.f32.mrb[188].mxu0  ;;  %v4247_v51 = vpop.f32.mrb[188].mxu1  ;;  %v4361_v11 = vld [vmem:[#allocation4 + $0x38] sm:$0xff]  ;;  %5061 = vmatpush1.bf16.msra.mxu0 %v8177_v24  ;;  %5181 = vst.msk [vmem:[#allocation5] sm:$0xff] %vm4294_vm4, %v5179_v15  ;;  %v4635_v55 = vld [vmem:[#allocation4 + $0x2b] sm:$0xff] }
 0x466   : > { %4304 = vst.msk [vmem:[#allocation4 + $0x48] sm:$0xff] %vm4294_vm4, %v4289_v35  ;;  %v4276_v53 = vmax.f32 %v4090_v17, %v4247_v51  ;;  %v4092_v48 = vpop.f32.mrb[189].mxu0  ;;  %v4249_v31 = vpop.f32.mrb[189].mxu1  ;;  %4363 = vst.msk [vmem:[#allocation5 + $0x28] sm:$0xff] %vm4294_vm4, %v4361_v11  ;;  %5062 = vmatprep.subr.bf16.mxu0 %v8182_v61  ;;  %v4636_v10 = vld [vmem:[#allocation4 + $0x33] sm:$0x3] }
 0x467   : > { %v8196_v4 = vld [vmem:[%s11329_s5 + $0x12c] ss:$8 sps:$4 sm:$0xff]   ;;  %v4906_v24 = vld [vmem:[#allocation4 + $0x18] sm:$0x3]  ;;  %v4909_v61 = vld [vmem:[#allocation4 + $0x1e] sm:$0xff] }
 0x468   : > { %v4290_v7 = vmax.f32 %v4276_v53, 0.0  ;;  %v4905_v27 = vld [vmem:[#allocation4 + $0x10] sm:$0xff]  ;;  %v4910_v23 = vld [vmem:[#allocation4 + $0x26] sm:$0x3] }
 0x469   : > { %v4362_v19 = vld [vmem:[#allocation4 + $0x40] sm:$0x3]  ;;  %5063 = vmatpush1.bf16.msra.mxu0 %v8180_v49  ;;  %v4095_v6 = vpop.f32.mrb[190].mxu0  ;;  %v4252_v47 = vpop.f32.mrb[190].mxu1  ;;  %v4913_v46 = vld [vmem:[#allocation4 + $0x2c] sm:$0xff] }
 0x46a   : > { %4364 = vst.msk [vmem:[#allocation5 + $0x30] sm:$0x3] %vm4347_vm5, %v4362_v19  ;;  %v4676_v60 = vld [vmem:[#allocation5 + $0x8] sm:$0xff]  ;;  %5064 = vmatprep.subr.bf16.mxu0 %v8185_v45  ;;  %v4277_v13 = vmax.f32 %v4095_v6, %v4252_v47  ;;  %v4097_v57 = vpop.f32.mrb[191].mxu0  ;;  %v4254_v32 = vpop.f32.mrb[191].mxu1  ;;  %v4400_v58 = vld [vmem:[#allocation5 + $0x18] sm:$0xff] }
 0x46b   : > { %4305 = vst.msk [vmem:[#allocation4 + $0x50] sm:$0xff] %vm4294_vm4, %v4290_v7  ;;  %v4685_v25 = vpack.c.bf16 %v4676_v60, %v10397_v54  ;;  %v10445_v37 = vld [vmem:[#allocation5 + $0x20] sm:$0xff]  ;;  %v4408_v39 = vpack.c.bf16 %v4400_v58, %v10415_v41  ;;  %4633 = vst.msk [vmem:[#allocation5 + $0x14] sm:$0xff] %vm4294_vm4, %v4631_v59  ;;  %v5457_v54 = vld [vmem:[#allocation4 + $0x4] sm:$0xff] }
 0x46c   : > { %4904 = vst.msk [vmem:[#allocation5 + $0x8] sm:$0x3] %vm4347_vm5, %v4902_v18  ;;  %4634 = vst.msk [vmem:[#allocation5 + $0x1c] sm:$0x3] %vm4347_vm5, %v4632_v50  ;;  %v4291_v22 = vmax.f32 %v4277_v13, 0.0  ;;  %v4639_v3 = vld [vmem:[#allocation4 + $0x39] sm:$0xff] }
 0x46d   : > { %4637 = vst.msk [vmem:[#allocation5 + $0x1e] sm:$0xff] %vm4294_vm4, %v4635_v55  ;;  %v4365_v34 = vld [vmem:[#allocation4 + $0x46] sm:$0xff]  ;;  %v4366_v29 = vld [vmem:[#allocation4 + $0x4e] sm:$0x3]  ;;  %7502 = vmatmul.mubr.msk.bf16.vlgmr.msra.gmra.mrb[196].mxu1 %vm4294_vm4, %v4685_v25  ;;  %v4100_v1 = vpop.f32.mrb[192].mxu0  ;;  %5065 = vmatpush1.bf16.msra.mxu0 %v8183_v30  ;;  %v4257_v44 = vpop.f32.mrb[192].mxu1 }
 0x46e   : > { %4638 = vst.msk [vmem:[#allocation5 + $0x26] sm:$0x3] %vm4347_vm5, %v4636_v10  ;;  %4368 = vst.msk [vmem:[#allocation5 + $0x3a] sm:$0x3] %vm4347_vm5, %v4366_v29  ;;  %7474 = vmatmul.mubr.msk.bf16.gmra.mrb[200].mxu0 %vm4294_vm4, %v4408_v39  ;;  %v4102_v33 = vpop.f32.mrb[193].mxu0  ;;  %4820 = vmatprep.mubr.bf16.mxu1 %v11355_v56  ;;  %v4402_v21 = vld [vmem:[#allocation5 + $0x28] sm:$0xff]  ;;  %v4278_v16 = vmax.f32 %v4100_v1, %v4257_v44 }
 0x46f   : > { %4367 = vst.msk [vmem:[#allocation5 + $0x32] sm:$0xff] %vm4294_vm4, %v4365_v34  ;;  %v10464_v26 = vld [vmem:[#allocation5] sm:$0xff]  ;;  %4306 = vst.msk [vmem:[#allocation4 + $0x58] sm:$0xff] %vm4294_vm4, %v4291_v22  ;;  %v4259_v43 = vpop.f32.mrb[193].mxu1  ;;  %4552 = vmatprep.mubr.bf16.mxu0 %v11355_v56  ;;  %5335 = vmatpush1.bf16.msra.mxu1 %v8186_v38  ;;  %v4409_v49 = vpack.c.bf16 %v4402_v21, %v10445_v37  ;;  %v4640_v31 = vld [vmem:[#allocation4 + $0x41] sm:$0x3] }
 0x470   : > { %4641 = vst.msk [vmem:[#allocation5 + $0x28] sm:$0xff] %vm4294_vm4, %v4639_v3  ;;  %5459 = vst.msk [vmem:[#allocation5] sm:$0xff] %vm4294_vm4, %v5457_v54  ;;  %7530 = vmatprep.subr.msk.bf16.mxu0 %vm4493_vm3, %v7529_v62  ;;  %5336 = vmatprep.subr.bf16.mxu1 %v8192_v9  ;;  %v4292_v0 = vmax.f32 %v4278_v16, 0.0  ;;  %v4914_v2 = vld [vmem:[#allocation4 + $0x34] sm:$0x3]  ;;  %v4917_v19 = vld [vmem:[#allocation4 + $0x3a] sm:$0xff] }
 0x471   : > { %5067 = vmatpush1.bf16.msra.mxu0 %v5051_v28  ;;  %v4105_v40 = vpop.f32.mrb[194].mxu0  ;;  %v4262_v41 = vpop.f32.mrb[194].mxu1  ;;  %v8194_v48 = vld [vmem:[%s11329_s5 + $0x128] ss:$8 sps:$4 sm:$0xff]   ;;  %v8199_v15 = vld [vmem:[%s11329_s5 + $0x13c] ss:$8 sps:$4 sm:$0xff]  }
 0x472   : > { %5612 = vmatprep.subr.bf16.mxu0 %v8202_v52  ;;  %4307 = vst.msk [vmem:[#allocation4 + $0x60] sm:$0xff] %vm4294_vm4, %v4292_v0  ;;  %v4107_v36 = vpop.f32.mrb[195].mxu0  ;;  %v4677_v12 = vld [vmem:[#allocation5 + $0x10] sm:$0xff]  ;;  %v4279_v51 = vmax.f32 %v4105_v40, %v4262_v41  ;;  %v4264_v11 = vpop.f32.mrb[195].mxu1  ;;  %v8205_v38 = vld [vmem:[%s11329_s5 + $0x14c] ss:$8 sps:$4 sm:$0xff]  }
 0x473   : > { %5337 = vmatpush1.bf16.msra.mxu1 %v8190_v42  ;;  %4907 = vst.msk [vmem:[#allocation5 + $0xa] sm:$0xff] %vm4294_vm4, %v4905_v27  ;;  %v8197_v18 = vld [vmem:[%s11329_s5 + $0x138] ss:$8 sps:$4 sm:$0xff]   ;;  %v5180_v50 = vld [vmem:[#allocation4 + $0xb] sm:$0x3]  ;;  %v5191_v58 = vld [vmem:[#allocation4 + $0x2d] sm:$0xff] }
 0x474   : > { %v4678_v35 = vld [vmem:[#allocation5 + $0x18] sm:$0xff]  ;;  %4908 = vst.msk [vmem:[#allocation5 + $0x12] sm:$0x3] %vm4347_vm5, %v4906_v24  ;;  %5338 = vmatprep.subr.bf16.mxu1 %v8196_v4  ;;  %v4293_v30 = vmax.f32 %v4279_v51, 0.0  ;;  %v5183_v55 = vld [vmem:[#allocation4 + $0x11] sm:$0xff]  ;;  %v5187_v60 = vld [vmem:[#allocation4 + $0x1f] sm:$0xff] }
 0x475   : > { %v10478_v17 = vld [vmem:[#allocation5 + $0x20] sm:$0xff]  ;;  %v4686_v53 = vpack.c.bf16 %v4678_v35, %v4677_v12  ;;  %4911 = vst.msk [vmem:[#allocation5 + $0x14] sm:$0xff] %vm4294_vm4, %v4909_v61  ;;  %v7546_v6 = vld [vmem:[%s11329_s5 + $0x158] sm:$0x33]  ;;  %v4643_v52 = vld [vmem:[#allocation4 + $0x47] sm:$0xff] }
 0x476   : > { %4912 = vst.msk [vmem:[#allocation5 + $0x1c] sm:$0x3] %vm4347_vm5, %v4910_v23  ;;  %4916 = vst.msk [vmem:[#allocation5 + $0x26] sm:$0x3] %vm4347_vm5, %v4914_v2  ;;  %v4403_v45 = vld [vmem:[#allocation5 + $0x30] sm:$0xff]  ;;  %v4369_v14 = vld [vmem:[#allocation4 + $0x54] sm:$0xff]  ;;  %7475 = vmatmul.mubr.msk.bf16.gmra.mrb[204].mxu0 %vm4294_vm4, %v4409_v49  ;;  %v7558_v62 = vcombine.high %v7546_v6, %v7546_v6  ;;  %v7557_v9 = vcombine.low %v7546_v6, %v7546_v6 }
 0x477   : > { %4915 = vst.msk [vmem:[#allocation5 + $0x1e] sm:$0xff] %vm4294_vm4, %v4913_v46  ;;  %v4370_v7 = vld [vmem:[#allocation4 + $0x5c] sm:$0x3]  ;;  %7503 = vmatmul.mubr.msk.bf16.gmra.mrb[200].mxu1 %vm4294_vm4, %v4686_v53  ;;  %4371 = vst.msk [vmem:[#allocation5 + $0x3c] sm:$0xff] %vm4294_vm4, %v4369_v14  ;;  %4562 = vmatprep.mubr.bf16.mxu0 %v11355_v56  ;;  %v5184_v47 = vld [vmem:[#allocation4 + $0x19] sm:$0x3] }
 0x478   : > { %4642 = vst.msk [vmem:[#allocation5 + $0x30] sm:$0x3] %vm4347_vm5, %v4640_v31  ;;  %4372 = vst.msk [vmem:[#allocation5 + $0x44] sm:$0x3] %vm4347_vm5, %v4370_v7  ;;  %4830 = vmatprep.mubr.bf16.mxu1 %v11355_v56  ;;  %v4680_v59 = vld [vmem:[#allocation5 + $0x28] sm:$0xff]  ;;  %5339 = vmatpush1.bf16.msra.mxu1 %v8194_v48  ;;  %v5329_v21 = vsel %vm4493_vm3, %v7557_v9, 0 }
 0x479   : > { %4308 = vst.msk [vmem:[#allocation4 + $0x68] sm:$0xff] %vm4294_vm4, %v4293_v30  ;;  %4919 = vst.msk [vmem:[#allocation5 + $0x28] sm:$0xff] %vm4294_vm4, %v4917_v19  ;;  %5340 = vmatprep.subr.bf16.mxu1 %v8199_v15  ;;  %v8203_v10 = vld [vmem:[%s11329_s5 + $0x148] ss:$8 sps:$4 sm:$0xff]   ;;  %v4687_v25 = vpack.c.bf16 %v4680_v59, %v10478_v17  ;;  %v5192_v39 = vld [vmem:[#allocation4 + $0x35] sm:$0x3] }
 0x47a   : > { %v10514_v13 = vld [vmem:[#allocation5 + $0x8] sm:$0xff]  ;;  %v4644_v34 = vld [vmem:[#allocation4 + $0x4f] sm:$0x3]  ;;  %v5458_v44 = vld [vmem:[#allocation4 + $0xc] sm:$0x3] }
 0x47b   : > { %5182 = vst.msk [vmem:[#allocation5 + $0x8] sm:$0x3] %vm4347_vm5, %v5180_v50  ;;  %v5461_v33 = vld [vmem:[#allocation4 + $0x12] sm:$0xff]  ;;  %v5195_v28 = vld [vmem:[#allocation4 + $0x3b] sm:$0xff]  ;;  %v5466_v42 = vld [vmem:[#allocation4 + $0x28] sm:$0x3] }
 0x47c   : > { %v10516_v57 = vld [vmem:[#allocation5 + $0x10] sm:$0xff]  ;;  %5341 = vmatpush1.bf16.msra.mxu1 %v8197_v18  ;;  %v5462_v16 = vld [vmem:[#allocation4 + $0x1a] sm:$0x3]  ;;  %v5469_v4 = vld [vmem:[#allocation4 + $0x2e] sm:$0xff] }
 0x47d   : > { %5185 = vst.msk [vmem:[#allocation5 + $0xa] sm:$0xff] %vm4294_vm4, %v5183_v55  ;;  %5342 = vmatprep.subr.bf16.mxu1 %v8205_v38  ;;  %v5465_v43 = vld [vmem:[#allocation4 + $0x20] sm:$0xff]  ;;  %v5470_v23 = vld [vmem:[#allocation4 + $0x36] sm:$0x3]  ;;  %v4648_v40 = vld [vmem:[#allocation4 + $0x5d] sm:$0x3]  ;;  %v4963_v38 = vpack.c.bf16 %v10514_v13, %v10429_v8 }
 0x47e   : > { %v10518_v32 = vld [vmem:[#allocation5 + $0x18] sm:$0xff]  ;;  %5186 = vst.msk [vmem:[#allocation5 + $0x12] sm:$0x3] %vm4347_vm5, %v5184_v47  ;;  %v10526_v37 = vld [vmem:[#allocation5 + $0x20] sm:$0xff]  ;;  %v4918_v46 = vld [vmem:[#allocation4 + $0x42] sm:$0x3] }
 0x47f   : > { %5189 = vst.msk [vmem:[#allocation5 + $0x14] sm:$0xff] %vm4294_vm4, %v5187_v60  ;;  %5193 = vst.msk [vmem:[#allocation5 + $0x1e] sm:$0xff] %vm4294_vm4, %v5191_v58  ;;  %7504 = vmatmul.mubr.msk.bf16.gmra.mrb[204].mxu1 %vm4294_vm4, %v4687_v25  ;;  %v4404_v29 = vld [vmem:[#allocation5 + $0x38] sm:$0xff]  ;;  %v4647_v2 = vld [vmem:[#allocation4 + $0x55] sm:$0xff] }
 0x480   : > { %5190 = vst.msk [vmem:[#allocation5 + $0x1c] sm:$0x3] %vm4347_vm5, %v5188_v5  ;;  %5194 = vst.msk [vmem:[#allocation5 + $0x26] sm:$0x3] %vm4347_vm5, %v5192_v39  ;;  %v4373_v22 = vld [vmem:[#allocation4 + $0x62] sm:$0xff]  ;;  %v4410_v54 = vpack.c.bf16 %v4404_v29, %v4403_v45  ;;  %4840 = vmatprep.mubr.bf16.mxu1 %v11355_v56  ;;  %5343 = vmatpush1.bf16.msra.mxu1 %v8203_v10  ;;  %v10539_v3 = vld [vmem:[#allocation5 + $0x28] sm:$0xff] }
 0x481   : > { %v4374_v1 = vld [vmem:[#allocation4 + $0x6a] sm:$0x3]  ;;  %4645 = vst.msk [vmem:[#allocation5 + $0x32] sm:$0xff] %vm4294_vm4, %v4643_v52  ;;  %4375 = vst.msk [vmem:[#allocation5 + $0x46] sm:$0xff] %vm4294_vm4, %v4373_v22  ;;  %7559 = vmatprep.subr.msk.bf16.mxu1 %vm4493_vm3, %v7558_v62  ;;  %v5473_v49 = vld [vmem:[#allocation4 + $0x3c] sm:$0xff]  ;;  %v4964_v52 = vpack.c.bf16 %v10518_v32, %v10516_v57 }
 0x482   : > { %4646 = vst.msk [vmem:[#allocation5 + $0x3a] sm:$0x3] %vm4347_vm5, %v4644_v34  ;;  %4376 = vst.msk [vmem:[#allocation5 + $0x4e] sm:$0x3] %vm4347_vm5, %v4374_v1  ;;  %7476 = vmatmul.mubr.msk.bf16.gmra.mrb[208].mxu0 %vm4294_vm4, %v4410_v54  ;;  %v4651_v41 = vld [vmem:[#allocation4 + $0x63] sm:$0xff]  ;;  %v4925_v31 = vld [vmem:[#allocation4 + $0x56] sm:$0xff] }
 0x483   : > { %4572 = vmatprep.mubr.bf16.mxu0 %v11355_v56  ;;  %5197 = vst.msk [vmem:[#allocation5 + $0x28] sm:$0xff] %vm4294_vm4, %v5195_v28  ;;  %v4652_v12 = vld [vmem:[#allocation4 + $0x6b] sm:$0x3]  ;;  %v4922_v48 = vld [vmem:[#allocation4 + $0x50] sm:$0x3]  ;;  %v5203_v5 = vld [vmem:[#allocation4 + $0x57] sm:$0xff] }
 0x484   : > { %v10543_v27 = vld [vmem:[#allocation5 + $0x8] sm:$0xff]  ;;  %5345 = vmatpush1.bf16.msra.mxu1 %v5329_v21  ;;  %v4921_v53 = vld [vmem:[#allocation4 + $0x48] sm:$0xff]  ;;  %v5196_v47 = vld [vmem:[#allocation4 + $0x43] sm:$0x3] }
 0x485   : > { %5460 = vst.msk [vmem:[#allocation5 + $0x8] sm:$0x3] %vm4347_vm5, %v5458_v44  ;;  %v8200_v45 = vld [vmem:[%s11329_s5 + $0x160] ss:$8 sps:$4 sm:$0xff]   ;;  %v4926_v15 = vld [vmem:[#allocation4 + $0x5e] sm:$0x3] }
 0x486   : > { %v10545_v24 = vld [vmem:[#allocation5 + $0x10] sm:$0xff]  ;;  %v4930_v7 = vld [vmem:[#allocation4 + $0x6c] sm:$0x3]  ;;  %v8208_v50 = vld [vmem:[%s11329_s5 + $0x174] ss:$8 sps:$4 sm:$0xff]  }
 0x487   : > { %v10548_v61 = vld [vmem:[#allocation5 + $0x18] sm:$0xff]  ;;  %5463 = vst.msk [vmem:[#allocation5 + $0xa] sm:$0xff] %vm4294_vm4, %v5461_v33  ;;  %v10552_v0 = vld [vmem:[#allocation5 + $0x20] sm:$0xff]  ;;  %v5204_v10 = vld [vmem:[#allocation4 + $0x5f] sm:$0x3] }
 0x488   : > { %5464 = vst.msk [vmem:[#allocation5 + $0x12] sm:$0x3] %vm4347_vm5, %v5462_v16  ;;  %5468 = vst.msk [vmem:[#allocation5 + $0x1c] sm:$0x3] %vm4347_vm5, %v5466_v42  ;;  %v4681_v36 = vld [vmem:[#allocation5 + $0x30] sm:$0xff]  ;;  %v4405_v35 = vld [vmem:[#allocation5 + $0x40] sm:$0xff] }
 0x489   : > { %5467 = vst.msk [vmem:[#allocation5 + $0x14] sm:$0xff] %vm4294_vm4, %v5465_v43  ;;  %5471 = vst.msk [vmem:[#allocation5 + $0x1e] sm:$0xff] %vm4294_vm4, %v5469_v4  ;;  %v4406_v17 = vld [vmem:[#allocation5 + $0x48] sm:$0xff]  ;;  %v4929_v14 = vld [vmem:[#allocation4 + $0x64] sm:$0xff] }
 0x48a   : > { %5472 = vst.msk [vmem:[#allocation5 + $0x26] sm:$0x3] %vm4347_vm5, %v5470_v23  ;;  %4920 = vst.msk [vmem:[#allocation5 + $0x30] sm:$0x3] %vm4347_vm5, %v4918_v46  ;;  %v4411_v51 = vpack.c.bf16 %v4406_v17, %v4405_v35  ;;  %v10563_v11 = vld [vmem:[#allocation5 + $0x28] sm:$0xff]  ;;  %v5199_v6 = vld [vmem:[#allocation4 + $0x49] sm:$0xff]  ;;  %v4965_v23 = vpack.c.bf16 %v10539_v3, %v10526_v37  ;;  %v5241_v46 = vpack.c.bf16 %v10543_v27, %v10464_v26 }
 0x48b   : > { %4654 = vst.msk [vmem:[#allocation5 + $0x4e] sm:$0x3] %vm4347_vm5, %v4652_v12  ;;  %4650 = vst.msk [vmem:[#allocation5 + $0x44] sm:$0x3] %vm4347_vm5, %v4648_v40  ;;  %v8206_v8 = vld [vmem:[%s11329_s5 + $0x170] ss:$8 sps:$4 sm:$0xff]   ;;  %v5242_v3 = vpack.c.bf16 %v10548_v61, %v10545_v24  ;;  %v5243_v61 = vpack.c.bf16 %v10563_v11, %v10552_v0 }
 0x48c   : > { %4649 = vst.msk [vmem:[#allocation5 + $0x3c] sm:$0xff] %vm4294_vm4, %v4647_v2  ;;  %4653 = vst.msk [vmem:[#allocation5 + $0x46] sm:$0xff] %vm4294_vm4, %v4651_v41  ;;  %7477 = vmatmul.mubr.msk.bf16.gmra.mrb[212].mxu0 %vm4294_vm4, %v4411_v51  ;;  %v8213_v55 = vld [vmem:[%s11329_s5 + $0x184] ss:$8 sps:$4 sm:$0xff]   ;;  %v5200_v60 = vld [vmem:[#allocation4 + $0x51] sm:$0x3] }
 0x48d   : > { %5475 = vst.msk [vmem:[#allocation5 + $0x28] sm:$0xff] %vm4294_vm4, %v5473_v49  ;;  %5088 = vmatprep.mubr.bf16.mxu0 %v11355_v56  ;;  %v8211_v13 = vld [vmem:[%s11329_s5 + $0x180] ss:$8 sps:$4 sm:$0xff]   ;;  %v5208_v29 = vld [vmem:[#allocation4 + $0x6d] sm:$0x3]  ;;  %v5481_v21 = vld [vmem:[#allocation4 + $0x58] sm:$0xff] }
 0x48e   : > { %v5207_v62 = vld [vmem:[#allocation4 + $0x65] sm:$0xff]  ;;  %v8216_v22 = vld [vmem:[%s11329_s5 + $0x194] ss:$8 sps:$4 sm:$0xff]   ;;  %v8214_v57 = vld [vmem:[%s11329_s5 + $0x190] ss:$8 sps:$4 sm:$0xff]  }
 0x48f   : > { %v8219_v32 = vld [vmem:[%s11329_s5 + $0x1a4] ss:$8 sps:$4 sm:$0xff]   ;;  %v7575_v54 = vld [vmem:[%s11329_s5 + $0x1b0] sm:$0x33]  ;;  %v5478_v33 = vld [vmem:[#allocation4 + $0x52] sm:$0x3] }
 0x490   : > { %v5477_v1 = vld [vmem:[#allocation4 + $0x4a] sm:$0xff]  ;;  %v5474_v44 = vld [vmem:[#allocation4 + $0x44] sm:$0x3]  ;;  %v5482_v28 = vld [vmem:[#allocation4 + $0x60] sm:$0x3]  ;;  %v7586_v12 = vcombine.low %v7575_v54, %v7575_v54 }
 0x491   : > { %v8217_v16 = vld [vmem:[%s11329_s5 + $0x1a0] ss:$8 sps:$4 sm:$0xff]   ;;  %v5486_v41 = vld [vmem:[#allocation4 + $0x6e] sm:$0x3]  ;;  %v5510_v0 = vld [vmem:[#allocation5 + $0x8] sm:$0xff] }
 0x492   : > { %v5485_v43 = vld [vmem:[#allocation4 + $0x66] sm:$0xff]  ;;  %v5607_v26 = vsel %vm4493_vm3, %v7586_v12, 0  ;;  %v4309_v27 = vld [vmem:[%s11330_s6] sm:$0x3]  ;;  %v5509_v11 = vld [vmem:[#allocation5] sm:$0xff] }
 0x493   : > { %v4682_v30 = vld [vmem:[#allocation5 + $0x38] sm:$0xff]  ;;  %v4683_v18 = vld [vmem:[#allocation5 + $0x40] sm:$0xff]  ;;  %v4684_v59 = vld [vmem:[#allocation5 + $0x48] sm:$0xff] }
 0x494   : > { %v4688_v19 = vpack.c.bf16 %v4682_v30, %v4681_v36  ;;  %4923 = vst.msk [vmem:[#allocation5 + $0x32] sm:$0xff] %vm4294_vm4, %v4921_v53  ;;  %4931 = vst.msk [vmem:[#allocation5 + $0x46] sm:$0xff] %vm4294_vm4, %v4929_v14  ;;  %7531 = vmatmul.mubr.msk.bf16.vlgmr.msra.gmra.mrb[216].mxu0 %vm4294_vm4, %v4963_v38  ;;  %v4689_v9 = vpack.c.bf16 %v4684_v59, %v4683_v18  ;;  %v7587_v36 = vcombine.high %v7575_v54, %v7575_v54  ;;  %v11380_v35 = vld [vmem:[#allocation9_spill] sm:$0xff]  ;;  %v5514_v14 = vld [vmem:[#allocation5 + $0x28] sm:$0xff] }
 0x495   : > { %4924 = vst.msk [vmem:[#allocation5 + $0x3a] sm:$0x3] %vm4347_vm5, %v4922_v48  ;;  %4928 = vst.msk [vmem:[#allocation5 + $0x44] sm:$0x3] %vm4347_vm5, %v4926_v15  ;;  %5613 = vmatpush1.bf16.msra.mxu0 %v8200_v45  ;;  %5098 = vmatprep.mubr.bf16.mxu0 %v11355_v56  ;;  %v11381_v17 = vsub.s32 1, %v11380_v35  ;;  %v5519_v53 = vpack.c.bf16 %v5510_v0, %v5509_v11  ;;  %v5511_v48 = vld [vmem:[#allocation5 + $0x10] sm:$0xff] }
 0x496   : > { %4927 = vst.msk [vmem:[#allocation5 + $0x3c] sm:$0xff] %vm4294_vm4, %v4925_v31  ;;  %7505 = vmatmul.mubr.msk.bf16.gmra.mrb[208].mxu1 %vm4294_vm4, %v4688_v19  ;;  %5614 = vmatprep.subr.bf16.mxu0 %v8208_v50  ;;  %v5512_v31 = vld [vmem:[#allocation5 + $0x18] sm:$0xff] }
 0x497   : > { %4932 = vst.msk [vmem:[#allocation5 + $0x4e] sm:$0x3] %vm4347_vm5, %v4930_v7  ;;  %4850 = vmatprep.mubr.bf16.mxu1 %v11355_v56  ;;  %v4318_v51 = vrot.slane %v4309_v27, %v11381_v17  ;;  %v5520_v15 = vpack.c.bf16 %v5512_v31, %v5511_v48  ;;  %v5513_v7 = vld [vmem:[#allocation5 + $0x20] sm:$0xff] }
 0x498   : > { %v5521_v30 = vpack.c.bf16 %v5514_v14, %v5513_v7 }
 0x499   : > { %5615 = vmatpush1.bf16.msra.mxu0 %v8206_v8  ;;  %4325 = vst.msk [vmem:[#allocation6 + $0x8] sm:$0xff] %vm4324_vm6, %v4318_v51  ;;  %4327 = vst.msk [vmem:[#allocation6 + $0x18] sm:$0xff] %vm4324_vm6, %v4318_v51 }
 0x49a   : > { %5616 = vmatprep.subr.bf16.mxu0 %v8213_v55  ;;  %4329 = vst.msk [vmem:[#allocation6 + $0x28] sm:$0xff] %vm4324_vm6, %v4318_v51  ;;  %4331 = vst.msk [vmem:[#allocation6 + $0x38] sm:$0xff] %vm4324_vm6, %v4318_v51 }
 0x49b   : > { %v10595_v58 = vld [vmem:[#allocation5 + $0x30] sm:$0xff]  ;;  %4333 = vst.msk [vmem:[#allocation6 + $0x48] sm:$0xff] %vm4324_vm6, %v4318_v51  ;;  %4335 = vst.msk [vmem:[#allocation6 + $0x58] sm:$0xff] %vm4324_vm6, %v4318_v51 }
 0x49c   : > { %5198 = vst.msk [vmem:[#allocation5 + $0x30] sm:$0x3] %vm4347_vm5, %v5196_v47  ;;  %7532 = vmatmul.mubr.msk.bf16.gmra.mrb[220].mxu0 %vm4294_vm4, %v4964_v52 }
 0x49d   : > { %v4960_v25 = vld [vmem:[#allocation5 + $0x38] sm:$0xff]  ;;  %v10597_v39 = vld [vmem:[#allocation5 + $0x40] sm:$0xff]  ;;  %5108 = vmatprep.mubr.bf16.mxu0 %v11355_v56  ;;  %5617 = vmatpush1.bf16.msra.mxu0 %v8211_v13  ;;  %4337 = vst.msk [vmem:[#allocation6 + $0x68] sm:$0xff] %vm4324_vm6, %v4318_v51  ;;  %4339 = vst.msk [vmem:[#allocation6 + $0x78] sm:$0xff] %vm4324_vm6, %v4318_v51 }
 0x49e   : > { %5201 = vst.msk [vmem:[#allocation5 + $0x32] sm:$0xff] %vm4294_vm4, %v5199_v6  ;;  %v10604_v34 = vld [vmem:[#allocation5 + $0x48] sm:$0xff]  ;;  %5205 = vst.msk [vmem:[#allocation5 + $0x3c] sm:$0xff] %vm4294_vm4, %v5203_v5  ;;  %7506 = vmatmul.mubr.msk.bf16.gmra.mrb[212].mxu1 %vm4294_vm4, %v4689_v9  ;;  %5618 = vmatprep.subr.bf16.mxu0 %v8216_v22  ;;  %v4966_v37 = vpack.c.bf16 %v4960_v25, %v10595_v58  ;;  %v11382_v25 = vsub.s32 0, %v11380_v35 }
 0x49f   : > { %5202 = vst.msk [vmem:[#allocation5 + $0x3a] sm:$0x3] %vm4347_vm5, %v5200_v60  ;;  %5206 = vst.msk [vmem:[#allocation5 + $0x44] sm:$0x3] %vm4347_vm5, %v5204_v10  ;;  %5366 = vmatprep.mubr.bf16.mxu1 %v11355_v56  ;;  %v4967_v24 = vpack.c.bf16 %v10604_v34, %v10597_v39 }
 0x4a0   : > { %5209 = vst.msk [vmem:[#allocation5 + $0x46] sm:$0xff] %vm4294_vm4, %v5207_v62  ;;  %v4378_v55 = vld [vmem:[#allocation6 + $0x8] sm:$0xff]  ;;  %v4380_v60 = vld [vmem:[#allocation6 + $0x18] sm:$0xff]  ;;  %v10694_v39 = vrot.slane %v4309_v27, %v11382_v25 }
 0x4a1   : > { %5210 = vst.msk [vmem:[#allocation5 + $0x4e] sm:$0x3] %vm4347_vm5, %v5208_v29  ;;  %5619 = vmatpush1.bf16.msra.mxu0 %v8214_v57  ;;  %v4382_v52 = vld [vmem:[#allocation6 + $0x28] sm:$0xff] }
 0x4a2   : > { %5620 = vmatprep.subr.bf16.mxu0 %v8219_v32  ;;  %4341 = vst.msk [vmem:[#allocation6 + $0x88] sm:$0xff] %vm4324_vm6, %v4318_v51  ;;  %4343 = vst.msk [vmem:[#allocation6 + $0x98] sm:$0xff] %vm4324_vm6, %v4318_v51  ;;  %v4388_v27 = vld [vmem:[#allocation6 + $0x58] sm:$0xff] }
 0x4a4   : > { %7533 = vmatmul.mubr.msk.bf16.gmra.mrb[224].mxu0 %vm4294_vm4, %v4965_v23 }
 0x4a5   : > { %v5237_v42 = vld [vmem:[#allocation5 + $0x30] sm:$0xff]  ;;  %5118 = vmatprep.mubr.bf16.mxu0 %v11355_v56  ;;  %5621 = vmatpush1.bf16.msra.mxu0 %v8217_v16 }
 0x4a6   : > { %v5238_v4 = vld [vmem:[#allocation5 + $0x38] sm:$0xff]  ;;  %5476 = vst.msk [vmem:[#allocation5 + $0x30] sm:$0x3] %vm4347_vm5, %v5474_v44  ;;  %7560 = vmatmul.mubr.msk.bf16.vlgmr.msra.gmra.mrb[216].mxu1 %vm4294_vm4, %v5241_v46  ;;  %7588 = vmatprep.subr.msk.bf16.mxu0 %vm4493_vm3, %v7587_v36 }
 0x4a7   : > { %5479 = vst.msk [vmem:[#allocation5 + $0x32] sm:$0xff] %vm4294_vm4, %v5477_v1  ;;  %v5239_v2 = vld [vmem:[#allocation5 + $0x40] sm:$0xff]  ;;  %5376 = vmatprep.mubr.bf16.mxu1 %v11355_v56  ;;  %v5244_v49 = vpack.c.bf16 %v5238_v4, %v5237_v42 }
 0x4a8   : > { %5480 = vst.msk [vmem:[#allocation5 + $0x3a] sm:$0x3] %vm4347_vm5, %v5478_v33  ;;  %v5240_v40 = vld [vmem:[#allocation5 + $0x48] sm:$0xff]  ;;  %5484 = vst.msk [vmem:[#allocation5 + $0x44] sm:$0x3] %vm4347_vm5, %v5482_v28 }
 0x4a9   : > { %5487 = vst.msk [vmem:[#allocation5 + $0x46] sm:$0xff] %vm4294_vm4, %v5485_v43  ;;  %5483 = vst.msk [vmem:[#allocation5 + $0x3c] sm:$0xff] %vm4294_vm4, %v5481_v21  ;;  %5623 = vmatpush1.bf16.msra.mxu0 %v5607_v26  ;;  %v5245_v45 = vpack.c.bf16 %v5240_v40, %v5239_v2  ;;  %v4384_v33 = vld [vmem:[#allocation6 + $0x38] sm:$0xff]  ;;  %v4386_v40 = vld [vmem:[#allocation6 + $0x48] sm:$0xff] }
 0x4aa   : > { %5488 = vst.msk [vmem:[#allocation5 + $0x4e] sm:$0x3] %vm4347_vm5, %v5486_v41  ;;  %7973 = vmatprep.subr.bf16.mxu0 %v8271_v20  ;;  %vm6826_vm5 = vcmask 982016  }
 0x4ac   : > { %7534 = vmatmul.mubr.msk.bf16.gmra.mrb[228].mxu0 %vm4294_vm4, %v4966_v37 }
 0x4ad   : > { %5128 = vmatprep.mubr.bf16.mxu0 %v11355_v56 }
 0x4ae   : > { %7561 = vmatmul.mubr.msk.bf16.gmra.mrb[220].mxu1 %vm4294_vm4, %v5242_v3  ;;  %v5515_v18 = vld [vmem:[#allocation5 + $0x30] sm:$0xff] }
 0x4af   : > { %5386 = vmatprep.mubr.bf16.mxu1 %v11355_v56 }
 0x4b0   : > { %v5516_v59 = vld [vmem:[#allocation5 + $0x38] sm:$0xff]  ;;  %v5517_v38 = vld [vmem:[#allocation5 + $0x40] sm:$0xff] }
 0x4b1   : > { %v5522_v19 = vpack.c.bf16 %v5516_v59, %v5515_v18  ;;  %v5518_v50 = vld [vmem:[#allocation5 + $0x48] sm:$0xff]  ;;  %v4390_v59 = vld [vmem:[#allocation6 + $0x68] sm:$0xff] }
 0x4b2   : > { %v5523_v8 = vpack.c.bf16 %v5518_v50, %v5517_v38 }
 0x4b4   : > { %7535 = vmatmul.mubr.msk.bf16.gmra.mrb[232].mxu0 %vm4294_vm4, %v4967_v24 }
 0x4b5   : > { %5644 = vmatprep.mubr.bf16.mxu0 %v11355_v56 }
 0x4b6   : > { %7562 = vmatmul.mubr.msk.bf16.gmra.mrb[224].mxu1 %vm4294_vm4, %v5243_v61 }
 0x4b7   : > { %5396 = vmatprep.mubr.bf16.mxu1 %v11355_v56 }
 0x4bc   : > { %7589 = vmatmul.mubr.msk.bf16.vlgmr.msra.gmra.mrb[236].mxu0 %vm4294_vm4, %v5519_v53 }
 0x4bd   : > { %5654 = vmatprep.mubr.bf16.mxu0 %v11355_v56 }
 0x4be   : > { %7563 = vmatmul.mubr.msk.bf16.gmra.mrb[228].mxu1 %vm4294_vm4, %v5244_v49 }
 0x4bf   : > { %5406 = vmatprep.mubr.bf16.mxu1 %v11355_v56 }
 0x4c4   : > { %7590 = vmatmul.mubr.msk.bf16.gmra.mrb[240].mxu0 %vm4294_vm4, %v5520_v15 }
 0x4c5   : > { %5664 = vmatprep.mubr.bf16.mxu0 %v11355_v56 }
 0x4c6   : > { %7564 = vmatmul.mubr.msk.bf16.gmra.mrb[232].mxu1 %vm4294_vm4, %v5245_v45 }
 0x4c7   : > { %5840 = vmatprep.mubr.f32.mxu1 %v8272_v63 }
 0x4cc   : > { %7591 = vmatmul.mubr.msk.bf16.gmra.mrb[244].mxu0 %vm4294_vm4, %v5521_v30 }
 0x4cd   : > { %5674 = vmatprep.mubr.bf16.mxu0 %v11355_v56 }
 0x4d4   : > { %7592 = vmatmul.mubr.msk.bf16.gmra.mrb[248].mxu0 %vm4294_vm4, %v5522_v19 }
 0x4d5   : > { %5684 = vmatprep.mubr.bf16.mxu0 %v11355_v56 }
 0x4dc   : > { %7593 = vmatmul.mubr.msk.bf16.gmra.mrb[252].mxu0 %vm4294_vm4, %v5523_v8 }
 0x52f   : > { %v4534_v6 = vpop.f32.mrb[196].mxu0 }
 0x530   : > { %v4536_v47 = vpop.f32.mrb[197].mxu0  ;;  %v4583_v62 = vadd.f32 %v4534_v6, %v10694_v39 }
 0x531   : > { %v4584_v5 = vadd.f32 %v4536_v47, %v4378_v55  ;;  %v4538_v10 = vpop.f32.mrb[198].mxu0  ;;  %v4392_v47 = vld [vmem:[#allocation6 + $0x78] sm:$0xff] }
 0x532   : > { %v4540_v13 = vpop.f32.mrb[199].mxu0  ;;  %v4585_v34 = vadd.f32 %v4538_v10, %v10694_v39 }
 0x533   : > { %4604 = vst.msk [vmem:[#allocation6 + $0x8] sm:$0xff] %vm4324_vm6, %v4584_v5  ;;  %v4586_v58 = vadd.f32 %v4540_v13, %v4380_v60 }
 0x535   : > { %4606 = vst.msk [vmem:[#allocation6 + $0x18] sm:$0xff] %vm4324_vm6, %v4586_v58 }
 0x53a   : > { %v4656_v57 = vld [vmem:[#allocation6 + $0x8] sm:$0xff] }
 0x53c   : > { %v4658_v43 = vld [vmem:[#allocation6 + $0x18] sm:$0xff] }
 0x540   : > { %v4812_v9 = vpop.f32.mrb[196].mxu1 }
 0x541   : > { %v4544_v29 = vpop.f32.mrb[200].mxu0  ;;  %v10698_v22 = vadd.f32 %v4812_v9, %v4583_v62  ;;  %v4814_v32 = vpop.f32.mrb[197].mxu1  ;;  %v4394_v62 = vld [vmem:[#allocation6 + $0x88] sm:$0xff] }
 0x542   : > { %v4546_v1 = vpop.f32.mrb[201].mxu0  ;;  %v4862_v54 = vadd.f32 %v4814_v32, %v4656_v57  ;;  %v4816_v44 = vpop.f32.mrb[198].mxu1  ;;  %v4587_v2 = vadd.f32 %v4544_v29, %v10694_v39 }
 0x543   : > { %v4588_v21 = vadd.f32 %v4546_v1, %v4382_v52  ;;  %v4548_v28 = vpop.f32.mrb[202].mxu0  ;;  %v10700_v16 = vadd.f32 %v4816_v44, %v4585_v34  ;;  %v4818_v42 = vpop.f32.mrb[199].mxu1  ;;  %v4396_v34 = vld [vmem:[#allocation6 + $0x98] sm:$0xff] }
 0x544   : > { %4882 = vst.msk [vmem:[#allocation6 + $0x8] sm:$0xff] %vm4324_vm6, %v4862_v54  ;;  %v4550_v4 = vpop.f32.mrb[203].mxu0  ;;  %v4864_v23 = vadd.f32 %v4818_v42, %v4658_v43  ;;  %v4589_v12 = vadd.f32 %v4548_v28, %v10694_v39  ;;  %v5997_v28 = vld [vmem:[%s11332_s8] sm:$0xff]  ;;  %v5998_v43 = vld [vmem:[%s11332_s8 + $0x8] sm:$0xff] }
 0x545   : > { %4608 = vst.msk [vmem:[#allocation6 + $0x28] sm:$0xff] %vm4324_vm6, %v4588_v21  ;;  %v4590_v46 = vadd.f32 %v4550_v4, %v4384_v33 }
 0x546   : > { %4884 = vst.msk [vmem:[#allocation6 + $0x18] sm:$0xff] %vm4324_vm6, %v4864_v23 }
 0x547   : > { %4610 = vst.msk [vmem:[#allocation6 + $0x38] sm:$0xff] %vm4324_vm6, %v4590_v46 }
 0x549   : > { %v4554_v41 = vpop.f32.mrb[204].mxu0 }
 0x54a   : > { %v4822_v36 = vpop.f32.mrb[200].mxu1  ;;  %v4556_v37 = vpop.f32.mrb[205].mxu0  ;;  %v4591_v45 = vadd.f32 %v4554_v41, %v10694_v39  ;;  %v7974_v41 = vpack.c.bf16 %v5998_v43, %v5997_v28 }
 0x54b   : > { %v10708_v26 = vadd.f32 %v4822_v36, %v4587_v2  ;;  %v4824_v3 = vpop.f32.mrb[201].mxu1  ;;  %v4592_v35 = vadd.f32 %v4556_v37, %v4386_v40  ;;  %v4558_v17 = vpop.f32.mrb[206].mxu0  ;;  %v4934_v21 = vld [vmem:[#allocation6 + $0x8] sm:$0xff]  ;;  %v5999_v36 = vld [vmem:[%s11332_s8 + $0x10] sm:$0xff] }
 0x54c   : > { %v4826_v51 = vpop.f32.mrb[202].mxu1  ;;  %v4660_v24 = vld [vmem:[#allocation6 + $0x28] sm:$0xff]  ;;  %v4560_v0 = vpop.f32.mrb[207].mxu0  ;;  %v4593_v14 = vadd.f32 %v4558_v17, %v10694_v39  ;;  %7975 = vmatpush1.bf16.msra.mxu0 %v7974_v41 }
 0x54d   : > { %v10710_v61 = vadd.f32 %v4826_v51, %v4589_v12  ;;  %v4828_v11 = vpop.f32.mrb[203].mxu1  ;;  %4612 = vst.msk [vmem:[#allocation6 + $0x48] sm:$0xff] %vm4324_vm6, %v4592_v35  ;;  %v4866_v49 = vadd.f32 %v4824_v3, %v4660_v24  ;;  %v4594_v53 = vadd.f32 %v4560_v0, %v4388_v27  ;;  %v6000_v12 = vld [vmem:[%s11332_s8 + $0x18] sm:$0xff]  ;;  %7976 = vmatprep.subr.bf16.mxu0 %v8271_v20 }
 0x54e   : > { %v4662_v48 = vld [vmem:[#allocation6 + $0x38] sm:$0xff] }
 0x54f   : > { %4886 = vst.msk [vmem:[#allocation6 + $0x28] sm:$0xff] %vm4324_vm6, %v4866_v49  ;;  %4614 = vst.msk [vmem:[#allocation6 + $0x58] sm:$0xff] %vm4324_vm6, %v4594_v53  ;;  %v4868_v31 = vadd.f32 %v4828_v11, %v4662_v48  ;;  %v4936_v0 = vld [vmem:[#allocation6 + $0x18] sm:$0xff]  ;;  %v7977_v49 = vpack.c.bf16 %v6000_v12, %v5999_v36 }
 0x551   : > { %4888 = vst.msk [vmem:[#allocation6 + $0x38] sm:$0xff] %vm4324_vm6, %v4868_v31  ;;  %v6001_v31 = vld [vmem:[%s11332_s8 + $0x20] sm:$0xff]  ;;  %7978 = vmatpush1.bf16.msra.mxu0 %v7977_v49 }
 0x552   : > { %v4832_v15 = vpop.f32.mrb[204].mxu1  ;;  %7979 = vmatprep.subr.bf16.mxu0 %v8271_v20 }
 0x553   : > { %v10718_v7 = vadd.f32 %v4832_v15, %v4591_v45  ;;  %v4834_v30 = vpop.f32.mrb[205].mxu1 }
 0x554   : > { %v4836_v18 = vpop.f32.mrb[206].mxu1  ;;  %v4664_v19 = vld [vmem:[#allocation6 + $0x48] sm:$0xff] }
 0x555   : > { %v10720_v38 = vadd.f32 %v4836_v18, %v4593_v14  ;;  %v4838_v50 = vpop.f32.mrb[207].mxu1  ;;  %v4564_v8 = vpop.f32.mrb[208].mxu0  ;;  %v4870_v55 = vadd.f32 %v4834_v30, %v4664_v19  ;;  %v6003_v18 = vld [vmem:[%s11332_s8 + $0x30] sm:$0xff] }
 0x556   : > { %v4566_v6 = vpop.f32.mrb[209].mxu0  ;;  %v4666_v60 = vld [vmem:[#allocation6 + $0x58] sm:$0xff]  ;;  %v4595_v54 = vadd.f32 %v4564_v8, %v10694_v39 }
 0x557   : > { %v4596_v5 = vadd.f32 %v4566_v6, %v4390_v59  ;;  %v4568_v10 = vpop.f32.mrb[210].mxu0  ;;  %4890 = vst.msk [vmem:[#allocation6 + $0x48] sm:$0xff] %vm4324_vm6, %v4870_v55  ;;  %v4872_v13 = vadd.f32 %v4838_v50, %v4666_v60  ;;  %v6004_v59 = vld [vmem:[%s11332_s8 + $0x38] sm:$0xff] }
 0x558   : > { %v4570_v58 = vpop.f32.mrb[211].mxu0  ;;  %v4597_v42 = vadd.f32 %v4568_v10, %v10694_v39 }
 0x559   : > { %4616 = vst.msk [vmem:[#allocation6 + $0x68] sm:$0xff] %vm4324_vm6, %v4596_v5  ;;  %v4598_v25 = vadd.f32 %v4570_v58, %v4392_v47  ;;  %4892 = vst.msk [vmem:[#allocation6 + $0x58] sm:$0xff] %vm4324_vm6, %v4872_v13  ;;  %v4938_v47 = vld [vmem:[#allocation6 + $0x28] sm:$0xff] }
 0x55b   : > { %4618 = vst.msk [vmem:[#allocation6 + $0x78] sm:$0xff] %vm4324_vm6, %v4598_v25 }
 0x55e   : > { %v4942_v28 = vld [vmem:[#allocation6 + $0x48] sm:$0xff] }
 0x55f   : > { %v4574_v9 = vpop.f32.mrb[212].mxu0 }
 0x560   : > { %v4576_v52 = vpop.f32.mrb[213].mxu0  ;;  %v4668_v46 = vld [vmem:[#allocation6 + $0x68] sm:$0xff]  ;;  %v4599_v45 = vadd.f32 %v4574_v9, %v10694_v39 }
 0x561   : > { %v4600_v29 = vadd.f32 %v4576_v52, %v4394_v62  ;;  %v4578_v57 = vpop.f32.mrb[214].mxu0 }
 0x562   : > { %v4580_v32 = vpop.f32.mrb[215].mxu0  ;;  %v4670_v51 = vld [vmem:[#allocation6 + $0x78] sm:$0xff]  ;;  %v4601_v19 = vadd.f32 %v4578_v57, %v10694_v39 }
 0x563   : > { %4620 = vst.msk [vmem:[#allocation6 + $0x88] sm:$0xff] %vm4324_vm6, %v4600_v29  ;;  %v4602_v1 = vadd.f32 %v4580_v32, %v4396_v34  ;;  %v4940_v34 = vld [vmem:[#allocation6 + $0x38] sm:$0xff]  ;;  %v7983_v29 = vpack.c.bf16 %v6004_v59, %v6003_v18  ;;  %v6005_v32 = vld [vmem:[%s11332_s8 + $0x40] sm:$0xff] }
 0x565   : > { %4622 = vst.msk [vmem:[#allocation6 + $0x98] sm:$0xff] %vm4324_vm6, %v4602_v1 }
 0x567   : > { %v5090_v33 = vpop.f32.mrb[216].mxu0 }
 0x568   : > { %v10739_v23 = vadd.f32 %v5090_v33, %v10698_v22  ;;  %v5092_v40 = vpop.f32.mrb[217].mxu0 }
 0x569   : > { %v4842_v44 = vpop.f32.mrb[208].mxu1  ;;  %v5140_v3 = vadd.f32 %v5092_v40, %v4934_v21  ;;  %v5094_v35 = vpop.f32.mrb[218].mxu0 }
 0x56a   : > { %v10736_v4 = vadd.f32 %v4842_v44, %v4595_v54  ;;  %v4844_v2 = vpop.f32.mrb[209].mxu1  ;;  %v10750_v22 = vadd.f32 %v5094_v35, %v10700_v16  ;;  %v5096_v11 = vpop.f32.mrb[219].mxu0  ;;  %v6002_v16 = vld [vmem:[%s11332_s8 + $0x28] sm:$0xff] }
 0x56b   : > { %v4874_v37 = vadd.f32 %v4844_v2, %v4668_v46  ;;  %v4846_v27 = vpop.f32.mrb[210].mxu1  ;;  %5160 = vst.msk [vmem:[#allocation6 + $0x8] sm:$0xff] %vm4324_vm6, %v5140_v3  ;;  %v5142_v48 = vadd.f32 %v5096_v11, %v4936_v0  ;;  %v7980_v15 = vpack.c.bf16 %v6002_v16, %v6001_v31  ;;  %v4672_v55 = vld [vmem:[#allocation6 + $0x88] sm:$0xff]  ;;  %v4944_v3 = vld [vmem:[#allocation6 + $0x58] sm:$0xff] }
 0x56c   : > { %v10747_v17 = vadd.f32 %v4846_v27, %v4597_v42  ;;  %v4848_v24 = vpop.f32.mrb[211].mxu1  ;;  %v4674_v9 = vld [vmem:[#allocation6 + $0x98] sm:$0xff] }
 0x56d   : > { %4894 = vst.msk [vmem:[#allocation6 + $0x68] sm:$0xff] %vm4324_vm6, %v4874_v37  ;;  %v4876_v53 = vadd.f32 %v4848_v24, %v4670_v51  ;;  %5162 = vst.msk [vmem:[#allocation6 + $0x18] sm:$0xff] %vm4324_vm6, %v5142_v48  ;;  %7981 = vmatpush1.bf16.msra.mxu0 %v7980_v15 }
 0x56e   : > { %7982 = vmatprep.subr.bf16.mxu0 %v8271_v20 }
 0x56f   : > { %4896 = vst.msk [vmem:[#allocation6 + $0x78] sm:$0xff] %vm4324_vm6, %v4876_v53  ;;  %v5100_v30 = vpop.f32.mrb[220].mxu0 }
 0x570   : > { %v5143_v8 = vadd.f32 %v5100_v30, %v10708_v26  ;;  %v5102_v60 = vpop.f32.mrb[221].mxu0 }
 0x571   : > { %v4852_v14 = vpop.f32.mrb[212].mxu1  ;;  %v5144_v10 = vadd.f32 %v5102_v60, %v4938_v47  ;;  %v5104_v58 = vpop.f32.mrb[222].mxu0  ;;  %7984 = vmatpush1.bf16.msra.mxu0 %v7983_v29 }
 0x572   : > { %v10772_v50 = vadd.f32 %v4852_v14, %v4599_v45  ;;  %v4854_v6 = vpop.f32.mrb[213].mxu1  ;;  %v5145_v62 = vadd.f32 %v5104_v58, %v10710_v61  ;;  %v5106_v39 = vpop.f32.mrb[223].mxu0  ;;  %v6006_v61 = vld [vmem:[%s11332_s8 + $0x48] sm:$0xff]  ;;  %7985 = vmatprep.subr.bf16.mxu0 %v8271_v20 }
 0x573   : > { %v4878_v5 = vadd.f32 %v4854_v6, %v4672_v55  ;;  %v4856_v13 = vpop.f32.mrb[214].mxu1  ;;  %5164 = vst.msk [vmem:[#allocation6 + $0x28] sm:$0xff] %vm4324_vm6, %v5144_v10  ;;  %v5146_v57 = vadd.f32 %v5106_v39, %v4940_v34  ;;  %v7986_v1 = vpack.c.bf16 %v6006_v61, %v6005_v32  ;;  %v5212_v42 = vld [vmem:[#allocation6 + $0x8] sm:$0xff] }
 0x574   : > { %v10775_v25 = vadd.f32 %v4856_v13, %v4601_v19  ;;  %v4858_v52 = vpop.f32.mrb[215].mxu1  ;;  %v5214_v35 = vld [vmem:[#allocation6 + $0x18] sm:$0xff]  ;;  %v4946_v11 = vld [vmem:[#allocation6 + $0x68] sm:$0xff] }
 0x575   : > { %4898 = vst.msk [vmem:[#allocation6 + $0x88] sm:$0xff] %vm4324_vm6, %v4878_v5  ;;  %v4880_v26 = vadd.f32 %v4858_v52, %v4674_v9  ;;  %5166 = vst.msk [vmem:[#allocation6 + $0x38] sm:$0xff] %vm4324_vm6, %v5146_v57  ;;  %7987 = vmatpush1.bf16.msra.mxu0 %v7986_v1 }
 0x576   : > { %7988 = vmatprep.subr.bf16.mxu0 %v8271_v20  ;;  %v4948_v18 = vld [vmem:[#allocation6 + $0x78] sm:$0xff] }
 0x577   : > { %4900 = vst.msk [vmem:[#allocation6 + $0x98] sm:$0xff] %vm4324_vm6, %v4880_v26  ;;  %v5110_v54 = vpop.f32.mrb[224].mxu0 }
 0x578   : > { %v5147_v33 = vadd.f32 %v5110_v54, %v10718_v7  ;;  %v5112_v43 = vpop.f32.mrb[225].mxu0 }
 0x579   : > { %v5368_v44 = vpop.f32.mrb[216].mxu1  ;;  %v5148_v2 = vadd.f32 %v5112_v43, %v4942_v28  ;;  %v5114_v41 = vpop.f32.mrb[226].mxu0 }
 0x57a   : > { %v10792_v21 = vadd.f32 %v5368_v44, %v10739_v23  ;;  %v5370_v46 = vpop.f32.mrb[217].mxu1  ;;  %v5149_v12 = vadd.f32 %v5114_v41, %v10720_v38  ;;  %v5116_v27 = vpop.f32.mrb[227].mxu0  ;;  %v5216_v53 = vld [vmem:[#allocation6 + $0x28] sm:$0xff] }
 0x57b   : > { %v5418_v40 = vadd.f32 %v5370_v46, %v5212_v42  ;;  %v5372_v36 = vpop.f32.mrb[218].mxu1  ;;  %5168 = vst.msk [vmem:[#allocation6 + $0x48] sm:$0xff] %vm4324_vm6, %v5148_v2  ;;  %v5150_v23 = vadd.f32 %v5116_v27, %v4944_v3 }
 0x57c   : > { %v10796_v37 = vadd.f32 %v5372_v36, %v10750_v22  ;;  %v5374_v7 = vpop.f32.mrb[219].mxu1  ;;  %v5218_v19 = vld [vmem:[#allocation6 + $0x38] sm:$0xff]  ;;  %v4950_v5 = vld [vmem:[#allocation6 + $0x88] sm:$0xff] }
 0x57d   : > { %5438 = vst.msk [vmem:[#allocation6 + $0x8] sm:$0xff] %vm4324_vm6, %v5418_v40  ;;  %v5420_v51 = vadd.f32 %v5374_v7, %v5214_v35  ;;  %5170 = vst.msk [vmem:[#allocation6 + $0x58] sm:$0xff] %vm4324_vm6, %v5150_v23 }
 0x57e   : > { %v4952_v26 = vld [vmem:[#allocation6 + $0x98] sm:$0xff] }
 0x57f   : > { %5440 = vst.msk [vmem:[#allocation6 + $0x18] sm:$0xff] %vm4324_vm6, %v5420_v51  ;;  %v5120_v38 = vpop.f32.mrb[228].mxu0 }
 0x580   : > { %v5151_v24 = vadd.f32 %v5120_v38, %v10736_v4  ;;  %v5122_v49 = vpop.f32.mrb[229].mxu0 }
 0x581   : > { %v5378_v22 = vpop.f32.mrb[220].mxu1  ;;  %v5152_v31 = vadd.f32 %v5122_v49, %v4946_v11  ;;  %v5124_v45 = vpop.f32.mrb[230].mxu0 }
 0x582   : > { %v10804_v0 = vadd.f32 %v5378_v22, %v5143_v8  ;;  %v5380_v48 = vpop.f32.mrb[221].mxu1  ;;  %v5153_v14 = vadd.f32 %v5124_v45, %v10747_v17  ;;  %v5126_v59 = vpop.f32.mrb[231].mxu0  ;;  %v5220_v13 = vld [vmem:[#allocation6 + $0x48] sm:$0xff] }
 0x583   : > { %v5422_v16 = vadd.f32 %v5380_v48, %v5216_v53  ;;  %v5382_v15 = vpop.f32.mrb[222].mxu1  ;;  %5172 = vst.msk [vmem:[#allocation6 + $0x68] sm:$0xff] %vm4324_vm6, %v5152_v31  ;;  %v5154_v4 = vadd.f32 %v5126_v59, %v4948_v18 }
 0x584   : > { %v10807_v30 = vadd.f32 %v5382_v15, %v5145_v62  ;;  %v5384_v55 = vpop.f32.mrb[223].mxu1  ;;  %v5222_v32 = vld [vmem:[#allocation6 + $0x58] sm:$0xff]  ;;  %v5490_v42 = vld [vmem:[#allocation6 + $0x8] sm:$0xff] }
 0x585   : > { %5442 = vst.msk [vmem:[#allocation6 + $0x28] sm:$0xff] %vm4324_vm6, %v5422_v16  ;;  %v5424_v8 = vadd.f32 %v5384_v55, %v5218_v19  ;;  %5174 = vst.msk [vmem:[#allocation6 + $0x78] sm:$0xff] %vm4324_vm6, %v5154_v4 }
 0x586   : > { %v5492_v7 = vld [vmem:[#allocation6 + $0x18] sm:$0xff] }
 0x587   : > { %5444 = vst.msk [vmem:[#allocation6 + $0x38] sm:$0xff] %vm4324_vm6, %v5424_v8  ;;  %v5130_v6 = vpop.f32.mrb[232].mxu0 }
 0x588   : > { %v5155_v17 = vadd.f32 %v5130_v6, %v10772_v50  ;;  %v5132_v10 = vpop.f32.mrb[233].mxu0 }
 0x589   : > { %v5388_v47 = vpop.f32.mrb[224].mxu1  ;;  %v5156_v62 = vadd.f32 %v5132_v10, %v4950_v5  ;;  %v5134_v52 = vpop.f32.mrb[234].mxu0 }
 0x58a   : > { %v10814_v60 = vadd.f32 %v5388_v47, %v5147_v33  ;;  %v5390_v58 = vpop.f32.mrb[225].mxu1  ;;  %v5157_v39 = vadd.f32 %v5134_v52, %v10775_v25  ;;  %v5136_v57 = vpop.f32.mrb[235].mxu0  ;;  %v5224_v28 = vld [vmem:[#allocation6 + $0x68] sm:$0xff] }
 0x58b   : > { %v5426_v9 = vadd.f32 %v5390_v58, %v5220_v13  ;;  %v5392_v34 = vpop.f32.mrb[226].mxu1  ;;  %5176 = vst.msk [vmem:[#allocation6 + $0x88] sm:$0xff] %vm4324_vm6, %v5156_v62  ;;  %v5158_v50 = vadd.f32 %v5136_v57, %v4952_v26 }
 0x58c   : > { %v10817_v29 = vadd.f32 %v5392_v34, %v5149_v12  ;;  %v5394_v61 = vpop.f32.mrb[227].mxu1  ;;  %v5226_v27 = vld [vmem:[#allocation6 + $0x78] sm:$0xff]  ;;  %v5494_v48 = vld [vmem:[#allocation6 + $0x28] sm:$0xff] }
 0x58d   : > { %5446 = vst.msk [vmem:[#allocation6 + $0x48] sm:$0xff] %vm4324_vm6, %v5426_v9  ;;  %v5428_v1 = vadd.f32 %v5394_v61, %v5222_v32  ;;  %5178 = vst.msk [vmem:[#allocation6 + $0x98] sm:$0xff] %vm4324_vm6, %v5158_v50 }
 0x58e   : > { %v5496_v4 = vld [vmem:[#allocation6 + $0x38] sm:$0xff] }
 0x58f   : > { %5448 = vst.msk [vmem:[#allocation6 + $0x58] sm:$0xff] %vm4324_vm6, %v5428_v1  ;;  %v5646_v44 = vpop.f32.mrb[236].mxu0 }
 0x590   : > { %v5695_v25 = vadd.f32 %v5646_v44, %v10792_v21  ;;  %v5648_v46 = vpop.f32.mrb[237].mxu0 }
 0x591   : > { %v5398_v54 = vpop.f32.mrb[228].mxu1  ;;  %v5696_v40 = vadd.f32 %v5648_v46, %v5490_v42  ;;  %v5650_v36 = vpop.f32.mrb[238].mxu0 }
 0x592   : > { %v10823_v33 = vadd.f32 %v5398_v54, %v5151_v24  ;;  %v5400_v43 = vpop.f32.mrb[229].mxu1  ;;  %v5697_v3 = vadd.f32 %v5650_v36, %v10796_v37  ;;  %v5652_v23 = vpop.f32.mrb[239].mxu0  ;;  %v5228_v49 = vld [vmem:[#allocation6 + $0x88] sm:$0xff] }
 0x593   : > { %v5430_v2 = vadd.f32 %v5400_v43, %v5224_v28  ;;  %v5402_v41 = vpop.f32.mrb[230].mxu1  ;;  %5716 = vst.msk [vmem:[#allocation6 + $0x8] sm:$0xff] %vm4324_vm6, %v5696_v40  ;;  %v5698_v51 = vadd.f32 %v5652_v23, %v5492_v7 }
 0x594   : > { %v10826_v12 = vadd.f32 %v5402_v41, %v5153_v14  ;;  %v5404_v35 = vpop.f32.mrb[231].mxu1  ;;  %v10831_v38 = vpack.c.bf16 %v5697_v3, %v5695_v25  ;;  %v5230_v19 = vld [vmem:[#allocation6 + $0x98] sm:$0xff]  ;;  %v5498_v58 = vld [vmem:[#allocation6 + $0x48] sm:$0xff] }
 0x595   : > { %5450 = vst.msk [vmem:[#allocation6 + $0x68] sm:$0xff] %vm4324_vm6, %v5430_v2  ;;  %v5432_v21 = vadd.f32 %v5404_v35, %v5226_v27  ;;  %5718 = vst.msk [vmem:[#allocation6 + $0x18] sm:$0xff] %vm4324_vm6, %v5698_v51 }
 0x597   : > { %5452 = vst.msk [vmem:[#allocation6 + $0x78] sm:$0xff] %vm4324_vm6, %v5432_v21  ;;  %v5656_v24 = vpop.f32.mrb[240].mxu0 }
 0x598   : > { %v5699_v37 = vadd.f32 %v5656_v24, %v10804_v0  ;;  %v5658_v31 = vpop.f32.mrb[241].mxu0 }
 0x599   : > { %v5408_v22 = vpop.f32.mrb[232].mxu1  ;;  %v5700_v45 = vadd.f32 %v5658_v31, %v5494_v48  ;;  %v5660_v14 = vpop.f32.mrb[242].mxu0 }
 0x59a   : > { %v10835_v11 = vadd.f32 %v5408_v22, %v5155_v17  ;;  %v5410_v53 = vpop.f32.mrb[233].mxu1  ;;  %v5701_v59 = vadd.f32 %v5660_v14, %v10807_v30  ;;  %v5662_v8 = vpop.f32.mrb[243].mxu0  ;;  %v5741_v47 = vld [vmem:[#allocation6 + $0x8] sm:$0xff]  ;;  %v5737_v14 = vld [vmem:[%s11331_s7 + $0x10] sm:$0xff] }
 0x59b   : > { %v5434_v16 = vadd.f32 %v5410_v53, %v5228_v49  ;;  %v5412_v15 = vpop.f32.mrb[234].mxu1  ;;  %5720 = vst.msk [vmem:[#allocation6 + $0x28] sm:$0xff] %vm4324_vm6, %v5700_v45  ;;  %v5702_v6 = vadd.f32 %v5662_v8, %v5496_v4  ;;  %v5735_v45 = vld [vmem:[%s11331_s7] sm:$0xff]  ;;  %v7616_v8 = vld [vmem:[%s11332_s8 + $0xb0] sm:$0xff] }
 0x59c   : > { %v5435_v18 = vadd.f32 %v5412_v15, %v5157_v39  ;;  %v5414_v55 = vpop.f32.mrb[235].mxu1  ;;  %v5743_v17 = vld [vmem:[#allocation6 + $0x18] sm:$0xff]  ;;  %v10841_v5 = vpack.c.bf16 %v5701_v59, %v5699_v37  ;;  %v5502_v44 = vld [vmem:[#allocation6 + $0x68] sm:$0xff]  ;;  %v7614_v59 = vld [vmem:[%s11332_s8 + $0xa0] sm:$0xff] }
 0x59d   : > { %5454 = vst.msk [vmem:[#allocation6 + $0x88] sm:$0xff] %vm4324_vm6, %v5434_v16  ;;  %v5436_v0 = vadd.f32 %v5414_v55, %v5230_v19  ;;  %5722 = vst.msk [vmem:[#allocation6 + $0x38] sm:$0xff] %vm4324_vm6, %v5702_v6  ;;  %v10845_v10 = vpack.c.bf16 %v5743_v17, %v5741_v47  ;;  %v5500_v39 = vld [vmem:[#allocation6 + $0x58] sm:$0xff]  ;;  %v5736_v15 = vld [vmem:[%s11331_s7 + $0x8] sm:$0xff] }
 0x59e   : > { %v5504_v42 = vld [vmem:[#allocation6 + $0x78] sm:$0xff]  ;;  %v7615_v19 = vld [vmem:[%s11332_s8 + $0xa8] sm:$0xff]  ;;  %v7600_v6 = vld [vmem:[%s11331_s7 + $0x30] sm:$0xff] }
 0x59f   : > { %5456 = vst.msk [vmem:[#allocation6 + $0x98] sm:$0xff] %vm4324_vm6, %v5436_v0  ;;  %v5666_v30 = vpop.f32.mrb[244].mxu0  ;;  %7934 = vmatprep.subr.bf16.mxu1 %v10845_v10  ;;  %v7599_v55 = vld [vmem:[%s11331_s7 + $0x28] sm:$0xff]  ;;  %v8004_v4 = vpack.c.bf16 %v7615_v19, %v7614_v59  ;;  %v7617_v0 = vld [vmem:[%s11332_s8 + $0xb8] sm:$0xff]  ;;  %v7618_v17 = vld [vmem:[%s11332_s8 + $0xc0] sm:$0xff] }
 0x5a0   : > { %v5703_v13 = vadd.f32 %v5666_v30, %v10814_v60  ;;  %v5668_v62 = vpop.f32.mrb[245].mxu0  ;;  %7936 = vmatpush1.bf16.msra.mxu1 %v10831_v38  ;;  %v8007_v47 = vpack.c.bf16 %v7617_v0, %v7616_v8 }
 0x5a1   : > { %v5704_v9 = vadd.f32 %v5668_v62, %v5498_v58  ;;  %v5670_v52 = vpop.f32.mrb[246].mxu0  ;;  %v7621_v58 = vld [vmem:[%s11332_s8 + $0xd8] sm:$0xff]  ;;  %v7602_v62 = vld [vmem:[%s11331_s7 + $0x40] sm:$0xff] }
 0x5a2   : > { %v5705_v34 = vadd.f32 %v5670_v52, %v10817_v29  ;;  %v5672_v26 = vpop.f32.mrb[247].mxu0  ;;  %v5745_v32 = vld [vmem:[#allocation6 + $0x28] sm:$0xff]  ;;  %v7622_v52 = vld [vmem:[%s11332_s8 + $0xe0] sm:$0xff] }
 0x5a3   : > { %5724 = vst.msk [vmem:[#allocation6 + $0x48] sm:$0xff] %vm4324_vm6, %v5704_v9  ;;  %v5706_v57 = vadd.f32 %v5672_v26, %v5500_v39  ;;  %v7603_v39 = vld [vmem:[%s11331_s7 + $0x48] sm:$0xff] }
 0x5a4   : > { %v5747_v61 = vld [vmem:[#allocation6 + $0x38] sm:$0xff]  ;;  %v7943_v50 = vpack.c.bf16 %v5705_v34, %v5703_v13  ;;  %v5506_v35 = vld [vmem:[#allocation6 + $0x88] sm:$0xff]  ;;  %v7620_v13 = vld [vmem:[%s11332_s8 + $0xd0] sm:$0xff] }
 0x5a5   : > { %5726 = vst.msk [vmem:[#allocation6 + $0x58] sm:$0xff] %vm4324_vm6, %v5706_v57  ;;  %v7937_v1 = vpack.c.bf16 %v5747_v61, %v5745_v32  ;;  %v8013_v9 = vpack.c.bf16 %v7621_v58, %v7620_v13  ;;  %v7623_v34 = vld [vmem:[%s11332_s8 + $0xe8] sm:$0xff]  ;;  %v6007_v57 = vld [vmem:[%s11332_s8 + $0x50] sm:$0xff]  ;;  %v6008_v32 = vld [vmem:[%s11332_s8 + $0x58] sm:$0xff] }
 0x5a6   : > { %v5508_v51 = vld [vmem:[#allocation6 + $0x98] sm:$0xff]  ;;  %v8016_v26 = vpack.c.bf16 %v7623_v34, %v7622_v52  ;;  %v7624_v61 = vld [vmem:[%s11332_s8 + $0xf0] sm:$0xff] }
 0x5a7   : > { %v5676_v60 = vpop.f32.mrb[248].mxu0  ;;  %7938 = vmatprep.subr.bf16.mxu1 %v7937_v1 }
 0x5a8   : > { %v5707_v54 = vadd.f32 %v5676_v60, %v10823_v33  ;;  %v5678_v25 = vpop.f32.mrb[249].mxu0  ;;  %7940 = vmatpush1.bf16.msra.mxu1 %v10841_v5 }
 0x5a9   : > { %v5708_v29 = vadd.f32 %v5678_v25, %v5502_v44  ;;  %v5680_v28 = vpop.f32.mrb[250].mxu0  ;;  %v6010_v44 = vld [vmem:[%s11332_s8 + $0x68] sm:$0xff]  ;;  %v7626_v25 = vld [vmem:[%s11332_s8 + $0x100] sm:$0xff] }
 0x5aa   : > { %v5709_v43 = vadd.f32 %v5680_v28, %v10826_v12  ;;  %v5682_v46 = vpop.f32.mrb[251].mxu0  ;;  %v5749_v40 = vld [vmem:[#allocation6 + $0x48] sm:$0xff] }
 0x5ab   : > { %5728 = vst.msk [vmem:[#allocation6 + $0x68] sm:$0xff] %vm4324_vm6, %v5708_v29  ;;  %v5710_v2 = vadd.f32 %v5682_v46, %v5504_v42  ;;  %v7627_v28 = vld [vmem:[%s11332_s8 + $0x108] sm:$0xff]  ;;  %v6011_v42 = vld [vmem:[%s11332_s8 + $0x70] sm:$0xff]  ;;  %v6012_v46 = vld [vmem:[%s11332_s8 + $0x78] sm:$0xff] }
 0x5ac   : > { %v5751_v41 = vld [vmem:[#allocation6 + $0x58] sm:$0xff]  ;;  %v7947_v36 = vpack.c.bf16 %v5709_v43, %v5707_v54  ;;  %v6009_v54 = vld [vmem:[%s11332_s8 + $0x60] sm:$0xff]  ;;  %v8022_v43 = vpack.c.bf16 %v7627_v28, %v7626_v25 }
 0x5ad   : > { %5730 = vst.msk [vmem:[#allocation6 + $0x78] sm:$0xff] %vm4324_vm6, %v5710_v2  ;;  %v7941_v3 = vpack.c.bf16 %v5751_v41, %v5749_v40  ;;  %v7992_v29 = vpack.c.bf16 %v6010_v44, %v6009_v54  ;;  %v7628_v2 = vld [vmem:[%s11332_s8 + $0x110] sm:$0xff]  ;;  %v7995_v40 = vpack.c.bf16 %v6012_v46, %v6011_v42  ;;  %v7629_v41 = vld [vmem:[%s11332_s8 + $0x118] sm:$0xff] }
 0x5af   : > { %v5686_v33 = vpop.f32.mrb[252].mxu0  ;;  %7942 = vmatprep.subr.bf16.mxu1 %v7941_v3 }
 0x5b0   : > { %v5711_v27 = vadd.f32 %v5686_v33, %v10835_v11  ;;  %v5688_v7 = vpop.f32.mrb[253].mxu0  ;;  %7944 = vmatpush1.bf16.msra.mxu1 %v7943_v50  ;;  %v6014_v33 = vld [vmem:[%s11332_s8 + $0x88] sm:$0xff] }
 0x5b1   : > { %v5712_v23 = vadd.f32 %v5688_v7, %v5506_v35  ;;  %v5690_v12 = vpop.f32.mrb[254].mxu0  ;;  %v7631_v7 = vld [vmem:[%s11332_s8 + $0x128] sm:$0xff] }
 0x5b2   : > { %v5713_v21 = vadd.f32 %v5690_v12, %v5435_v18  ;;  %v5692_v22 = vpop.f32.mrb[255].mxu0  ;;  %v5753_v37 = vld [vmem:[#allocation6 + $0x68] sm:$0xff]  ;;  %v5739_v18 = vld [vmem:[%s11331_s7 + $0x20] sm:$0xff]  ;;  %v6015_v12 = vld [vmem:[%s11332_s8 + $0x90] sm:$0xff] }
 0x5b3   : > { %5732 = vst.msk [vmem:[#allocation6 + $0x88] sm:$0xff] %vm4324_vm6, %v5712_v23  ;;  %v5714_v24 = vadd.f32 %v5692_v22, %v5508_v51  ;;  %v7632_v51 = vld [vmem:[%s11332_s8 + $0x130] sm:$0xff] }
 0x5b4   : > { %v5755_v49 = vld [vmem:[#allocation6 + $0x78] sm:$0xff]  ;;  %v7951_v53 = vpack.c.bf16 %v5713_v21, %v5711_v27  ;;  %v7630_v27 = vld [vmem:[%s11332_s8 + $0x120] sm:$0xff] }
 0x5b5   : > { %5734 = vst.msk [vmem:[#allocation6 + $0x98] sm:$0xff] %vm4324_vm6, %v5714_v24  ;;  %v7945_v48 = vpack.c.bf16 %v5755_v49, %v5753_v37  ;;  %v8028_v23 = vpack.c.bf16 %v7631_v7, %v7630_v27  ;;  %v6016_v21 = vld [vmem:[%s11332_s8 + $0x98] sm:$0xff] }
 0x5b6   : > { %v8001_v22 = vpack.c.bf16 %v6016_v21, %v6015_v12  ;;  %v7633_v24 = vld [vmem:[%s11332_s8 + $0x138] sm:$0xff] }
 0x5b7   : > { %7946 = vmatprep.subr.bf16.mxu1 %v7945_v48  ;;  %v8031_v37 = vpack.c.bf16 %v7633_v24, %v7632_v51 }
 0x5b8   : > { %7948 = vmatpush1.bf16.msra.mxu1 %v7947_v36 }
 0x5ba   : > { %v5757_v11 = vld [vmem:[#allocation6 + $0x88] sm:$0xff] }
 0x5bc   : > { %v5759_v31 = vld [vmem:[#allocation6 + $0x98] sm:$0xff] }
 0x5bd   : > { %v7949_v16 = vpack.c.bf16 %v5759_v31, %v5757_v11 }
 0x5bf   : > { %7950 = vmatprep.subr.bf16.mxu1 %v7949_v16 }
 0x5c0   : > { %7952 = vmatpush1.bf16.msra.mxu1 %v7951_v53 }
 0x5c1   : > { %7954 = vmatprep.subr.bf16.mxu1 %v10845_v10  ;;  %v7601_v10 = vld [vmem:[%s11331_s7 + $0x38] sm:$0xff] }
 0x5c3   : > { %7594 = vmatmul.mubr.msk.f32.vlgmr.msra.gmra.mrb[236].mxu1 %vm5760_vm7, %v5735_v45 }
 0x5c4   : > { %7956 = vmatpush1.bf16.msra.mxu1 %v10831_v38  ;;  %5846 = vmatprep.mubr.f32.mxu1 %v8272_v63  ;;  %v5738_v38 = vld [vmem:[%s11331_s7 + $0x18] sm:$0xff] }
 0x5c5   : > { %7958 = vmatprep.subr.bf16.mxu1 %v7937_v1  ;;  %v7625_v1 = vld [vmem:[%s11332_s8 + $0xf8] sm:$0xff] }
 0x5c6   : > { %v8019_v60 = vpack.c.bf16 %v7625_v1, %v7624_v61 }
 0x5c7   : > { %7595 = vmatmul.mubr.msk.f32.gmra.mrb[238].mxu1 %vm5760_vm7, %v5736_v15 }
 0x5c8   : > { %7960 = vmatpush1.bf16.msra.mxu1 %v10841_v5  ;;  %5852 = vmatprep.mubr.f32.mxu1 %v8272_v63  ;;  %v7619_v5 = vld [vmem:[%s11332_s8 + $0xc8] sm:$0xff] }
 0x5c9   : > { %7962 = vmatprep.subr.bf16.mxu1 %v7941_v3  ;;  %v8010_v30 = vpack.c.bf16 %v7619_v5, %v7618_v17  ;;  %v6013_v3 = vld [vmem:[%s11332_s8 + $0x80] sm:$0xff] }
 0x5ca   : > { %v7998_v35 = vpack.c.bf16 %v6014_v33, %v6013_v3 }
 0x5cb   : > { %7596 = vmatmul.mubr.msk.f32.gmra.mrb[240].mxu1 %vm5760_vm7, %v5737_v14 }
 0x5cc   : > { %7964 = vmatpush1.bf16.msra.mxu1 %v7943_v50  ;;  %5858 = vmatprep.mubr.f32.mxu1 %v8272_v63  ;;  %v7989_v50 = vpack.c.bf16 %v6008_v32, %v6007_v57 }
 0x5cd   : > { %7966 = vmatprep.subr.bf16.mxu1 %v7945_v48 }
 0x5ce   : > { %7990 = vmatpush1.bf16.msra.mxu0 %v7989_v50 }
 0x5cf   : > { %7597 = vmatmul.mubr.msk.f32.gmra.mrb[242].mxu1 %vm5760_vm7, %v5738_v38  ;;  %7991 = vmatprep.subr.bf16.mxu0 %v8271_v20 }
 0x5d0   : > { %7968 = vmatpush1.bf16.msra.mxu1 %v7947_v36  ;;  %5864 = vmatprep.mubr.f32.mxu1 %v8272_v63  ;;  %v8025_v36 = vpack.c.bf16 %v7629_v41, %v7628_v2 }
 0x5d1   : > { %7970 = vmatprep.subr.bf16.mxu1 %v7949_v16 }
 0x5d2   : > { %7993 = vmatpush1.bf16.msra.mxu0 %v7992_v29 }
 0x5d3   : > { %7598 = vmatmul.mubr.msk.f32.gmra.mrb[244].mxu1 %vm5760_vm7, %v5739_v18  ;;  %7994 = vmatprep.subr.bf16.mxu0 %v8271_v20 }
 0x5d4   : > { %7972 = vmatpush1.bf16.msra.mxu1 %v7951_v53  ;;  %5956 = vmatprep.mubr.f32.mxu1 %v8272_v63 }
 0x5d5   : > { %8003 = vmatprep.subr.bf16.mxu1 %v8271_v20 }
 0x5d6   : > { %7996 = vmatpush1.bf16.msra.mxu0 %v7995_v40 }
 0x5d7   : > { %7604 = vmatmul.mubr.msk.f32.vlgmr.msra.gmra.mrb[246].mxu1 %vm5760_vm7, %v7599_v55  ;;  %7997 = vmatprep.subr.bf16.mxu0 %v8271_v20 }
 0x5d8   : > { %5962 = vmatprep.mubr.f32.mxu1 %v8272_v63  ;;  %8005 = vmatpush1.bf16.msra.mxu1 %v8004_v4 }
 0x5d9   : > { %8006 = vmatprep.subr.bf16.mxu1 %v8271_v20 }
 0x5da   : > { %7999 = vmatpush1.bf16.msra.mxu0 %v7998_v35 }
 0x5db   : > { %7605 = vmatmul.mubr.msk.f32.gmra.mrb[248].mxu1 %vm5760_vm7, %v7600_v6  ;;  %8000 = vmatprep.subr.bf16.mxu0 %v8271_v20 }
 0x5dc   : > { %5968 = vmatprep.mubr.f32.mxu1 %v8272_v63  ;;  %8008 = vmatpush1.bf16.msra.mxu1 %v8007_v47 }
 0x5dd   : > { %8009 = vmatprep.subr.bf16.mxu1 %v8271_v20 }
 0x5de   : > { %8002 = vmatpush1.bf16.msra.mxu0 %v8001_v22 }
 0x5df   : > { %7606 = vmatmul.mubr.msk.f32.gmra.mrb[250].mxu1 %vm5760_vm7, %v7601_v10 }
 0x5e0   : > { %5974 = vmatprep.mubr.f32.mxu1 %v8272_v63  ;;  %8011 = vmatpush1.bf16.msra.mxu1 %v8010_v30 }
 0x5e1   : > { %8012 = vmatprep.subr.bf16.mxu1 %v8271_v20 }
 0x5e3   : > { %7607 = vmatmul.mubr.msk.f32.gmra.mrb[252].mxu1 %vm5760_vm7, %v7602_v62 }
 0x5e4   : > { %5980 = vmatprep.mubr.f32.mxu1 %v8272_v63  ;;  %8014 = vmatpush1.bf16.msra.mxu1 %v8013_v9 }
 0x5e5   : > { %8015 = vmatprep.subr.bf16.mxu1 %v8271_v20 }
 0x5e7   : > { %7608 = vmatmul.mubr.msk.f32.gmra.mrb[254].mxu1 %vm5760_vm7, %v7603_v39 }
 0x5e8   : > { %8017 = vmatpush1.bf16.msra.mxu1 %v8016_v26 }
 0x5e9   : > { %8018 = vmatprep.subr.bf16.mxu1 %v8271_v20 }
 0x5ec   : > { %8020 = vmatpush1.bf16.msra.mxu1 %v8019_v60 }
 0x5ed   : > { %8021 = vmatprep.subr.bf16.mxu1 %v8271_v20 }
 0x5f0   : > { %8023 = vmatpush1.bf16.msra.mxu1 %v8022_v43 }
 0x5f1   : > { %8024 = vmatprep.subr.bf16.mxu1 %v8271_v20 }
 0x5f4   : > { %8026 = vmatpush1.bf16.msra.mxu1 %v8025_v36 }
 0x5f5   : > { %8027 = vmatprep.subr.bf16.mxu1 %v8271_v20 }
 0x5f8   : > { %8029 = vmatpush1.bf16.msra.mxu1 %v8028_v23 }
 0x5f9   : > { %8030 = vmatprep.subr.bf16.mxu1 %v8271_v20 }
 0x5fc   : > { %8032 = vmatpush1.bf16.msra.mxu1 %v8031_v37 }
 0x5fd   : > { %6717 = vmatprep.subr.bf16.mxu1 %v11355_v56 }
 0x696   : > { %v5842_v20 = vpop.f32.mrb[236].mxu1 }
 0x697   : > { %v5844_v49 = vpop.f32.mrb[237].mxu1 }
 0x69a   : > { %v5848_v53 = vpop.f32.mrb[238].mxu1 }
 0x69b   : > { %v5850_v48 = vpop.f32.mrb[239].mxu1 }
 0x69e   : > { %v5854_v11 = vpop.f32.mrb[240].mxu1 }
 0x69f   : > { %v5856_v31 = vpop.f32.mrb[241].mxu1 }
 0x6a2   : > { %v5860_v16 = vpop.f32.mrb[242].mxu1 }
 0x6a3   : > { %v5862_v45 = vpop.f32.mrb[243].mxu1 }
 0x6a6   : > { %v5866_v15 = vpop.f32.mrb[244].mxu1 }
 0x6a7   : > { %v5868_v14 = vpop.f32.mrb[245].mxu1 }
 0x6aa   : > { %v5958_v38 = vpop.f32.mrb[246].mxu1 }
 0x6ab   : > { %v5987_v18 = vmax.f32 %v5842_v20, %v5958_v38  ;;  %v5960_v59 = vpop.f32.mrb[247].mxu1 }
 0x6ac   : > { %v5988_v19 = vmax.f32 %v5844_v49, %v5960_v59  ;;  %v8222_v59 = vld [vmem:[%s11333_s9 + $0x40] sm:$0xff]  }
 0x6ad   : > { %7687 = vmatprep.subr.bf16.mxu0 %v8222_v59 }
 0x6ae   : > { %v5964_v55 = vpop.f32.mrb[248].mxu1  ;;  %7609 = vmatprep.mubr.msk.f32.mxu0 %vm4324_vm6, %v5988_v19  ;;  %7634 = vmatprep.mubr.msk.f32.mxu1 %vm4324_vm6, %v5988_v19 }
 0x6af   : > { %v5989_v4 = vmax.f32 %v5848_v53, %v5964_v55  ;;  %v5966_v8 = vpop.f32.mrb[249].mxu1  ;;  %6097 = vmatmul.mubr.f32.vlgmr.msra.gmra.mrb[0].mxu0 %v5987_v18  ;;  %6208 = vmatmul.mubr.f32.vlgmr.msra.gmra.mrb[0].mxu1 %v5987_v18 }
 0x6b0   : > { %v5990_v0 = vmax.f32 %v5850_v48, %v5966_v8  ;;  %v8223_v8 = vld [vmem:[%s11333_s9] sm:$0xff]  }
 0x6b1   : > { %7688 = vmatpush3.bf16.msra.mxu0 %v8223_v8 }
 0x6b2   : > { %v5970_v6 = vpop.f32.mrb[250].mxu1  ;;  %7610 = vmatprep.mubr.msk.f32.mxu0 %vm4324_vm6, %v5990_v0  ;;  %7635 = vmatprep.mubr.msk.f32.mxu1 %vm4324_vm6, %v5990_v0  ;;  %v8224_v0 = vld [vmem:[%s11333_s9 + $0x48] sm:$0xff]  }
 0x6b3   : > { %v5991_v47 = vmax.f32 %v5854_v11, %v5970_v6  ;;  %v5972_v17 = vpop.f32.mrb[251].mxu1  ;;  %6102 = vmatmul.mubr.f32.gmra.mrb[2].mxu0 %v5989_v4  ;;  %6213 = vmatmul.mubr.f32.gmra.mrb[2].mxu1 %v5989_v4 }
 0x6b4   : > { %v5992_v5 = vmax.f32 %v5856_v31, %v5972_v17  ;;  %7689 = vmatprep.subr.bf16.mxu0 %v8224_v0  ;;  %v8225_v17 = vld [vmem:[%s11333_s9 + $0x8] sm:$0xff]  }
 0x6b5   : > { %7690 = vmatpush3.bf16.msra.mxu0 %v8225_v17 }
 0x6b6   : > { %v5976_v10 = vpop.f32.mrb[252].mxu1  ;;  %7611 = vmatprep.mubr.msk.f32.mxu0 %vm4324_vm6, %v5992_v5  ;;  %7636 = vmatprep.mubr.msk.f32.mxu1 %vm4324_vm6, %v5992_v5  ;;  %v8226_v5 = vld [vmem:[%s11333_s9 + $0x80] sm:$0xff]  }
 0x6b7   : > { %v5993_v30 = vmax.f32 %v5860_v16, %v5976_v10  ;;  %v5978_v13 = vpop.f32.mrb[253].mxu1  ;;  %6107 = vmatmul.mubr.f32.gmra.mrb[4].mxu0 %v5991_v47  ;;  %6218 = vmatmul.mubr.f32.gmra.mrb[4].mxu1 %v5991_v47  ;;  %v8227_v10 = vld [vmem:[%s11333_s9 + $0x50] sm:$0xff]  }
 0x6b8   : > { %v5994_v58 = vmax.f32 %v5862_v45, %v5978_v13  ;;  %6718 = vmatpush1.bf16.msra.mxu1 %v8226_v5  ;;  %7691 = vmatprep.subr.bf16.mxu0 %v8227_v10 }
 0x6b9   : > { %6719 = vmatprep.subr.bf16.mxu1 %v11355_v56 }
 0x6ba   : > { %v5982_v62 = vpop.f32.mrb[254].mxu1  ;;  %7612 = vmatprep.mubr.msk.f32.mxu0 %vm4324_vm6, %v5994_v58  ;;  %7637 = vmatprep.mubr.msk.f32.mxu1 %vm4324_vm6, %v5994_v58  ;;  %v8228_v58 = vld [vmem:[%s11333_s9 + $0x10] sm:$0xff]  }
 0x6bb   : > { %v5995_v9 = vmax.f32 %v5866_v15, %v5982_v62  ;;  %v5984_v52 = vpop.f32.mrb[255].mxu1  ;;  %6112 = vmatmul.mubr.f32.gmra.mrb[6].mxu0 %v5993_v30  ;;  %6223 = vmatmul.mubr.f32.gmra.mrb[6].mxu1 %v5993_v30  ;;  %v8229_v62 = vld [vmem:[%s11333_s9 + $0x88] sm:$0xff]  }
 0x6bc   : > { %v5996_v34 = vmax.f32 %v5868_v14, %v5984_v52  ;;  %7692 = vmatpush3.bf16.msra.mxu0 %v8228_v58  ;;  %6720 = vmatpush1.bf16.msra.mxu1 %v8229_v62 }
 0x6bd   : > { %6721 = vmatprep.subr.bf16.mxu1 %v11355_v56 }
 0x6be   : > { %7613 = vmatprep.mubr.msk.f32.mxu0 %vm4324_vm6, %v5996_v34  ;;  %7638 = vmatprep.mubr.msk.f32.mxu1 %vm4324_vm6, %v5996_v34 }
 0x6bf   : > { %6117 = vmatmul.mubr.f32.gmra.mrb[8].mxu0 %v5995_v9  ;;  %6228 = vmatmul.mubr.f32.gmra.mrb[8].mxu1 %v5995_v9  ;;  %v8230_v9 = vld [vmem:[%s11333_s9 + $0x58] sm:$0xff]  }
 0x6c0   : > { %7693 = vmatprep.subr.bf16.mxu0 %v8230_v9 }
 0x782   : > { %v6098_v39 = vpop.f32.mrb[0].mxu0  ;;  %v6209_v26 = vpop.f32.mrb[0].mxu1 }
 0x783   : > { %v6233_v57 = vmax.f32 %v6098_v39, %v6209_v26  ;;  %v6100_v32 = vpop.f32.mrb[1].mxu0  ;;  %v6211_v61 = vpop.f32.mrb[1].mxu1 }
 0x784   : > { %v8232_v32 = vld [vmem:[%s11333_s9 + $0x90] sm:$0xff]  }
 0x785   : > { %v6238_v50 = vmax.f32 %v6233_v57, 0.0  ;;  %v8231_v57 = vld [vmem:[%s11333_s9 + $0x18] sm:$0xff]   ;;  %6722 = vmatpush1.bf16.msra.mxu1 %v8232_v32 }
 0x786   : > { %v6103_v1 = vpop.f32.mrb[2].mxu0  ;;  %v6214_v60 = vpop.f32.mrb[2].mxu1  ;;  %7694 = vmatpush3.bf16.msra.mxu0 %v8231_v57  ;;  %6723 = vmatprep.subr.bf16.mxu1 %v11355_v56  ;;  %v8248_v57 = vld [vmem:[%s11335_s11 + $0x8] sm:$0xff]  }
 0x787   : > { %v6234_v54 = vmax.f32 %v6103_v1, %v6214_v60  ;;  %v6105_v44 = vpop.f32.mrb[3].mxu0  ;;  %v6216_v25 = vpop.f32.mrb[3].mxu1  ;;  %v6285_v29 = vrot.slane %v6238_v50, 7  ;;  %v6246_v28 = vrot.slane %v6238_v50, 1  ;;  %6244 = vst.msk [vmem:[#allocation7] sm:$0x1] %vm6243_vm8, %v6238_v50 }
 0x788   : > { %v6276_v43 = vrot.slane %v6238_v50, 5  ;;  %v6279_v3 = vrot.slane %v6238_v50, 6  ;;  %v6254_v22 = vrot.slane %v6238_v50, 2  ;;  %v6260_v16 = vrot.slane %v6238_v50, 3  ;;  %v8233_v1 = vld [vmem:[%s11333_s9 + $0x60] sm:$0xff]   ;;  %v8236_v44 = vld [vmem:[%s11333_s9 + $0x68] sm:$0xff]  }
 0x789   : > { %v11029_v42 = vmax.f32 %v6234_v54, 0.0  ;;  %6286 = vrot.lane.b32.xlu1 %v6285_v29, %s8273_s30  ;;  %6247 = vrot.lane.b32.xlu0 %v6246_v28, %s8274_s16  ;;  %v6268_v18 = vrot.slane %v6238_v50, 4  ;;  %v8234_v60 = vld [vmem:[%s11333_s9 + $0x20] sm:$0xff]   ;;  %v8235_v54 = vld [vmem:[%s11333_s9 + $0x98] sm:$0xff]  }
 0x78a   : > { %v6108_v46 = vpop.f32.mrb[4].mxu0  ;;  %v6219_v2 = vpop.f32.mrb[4].mxu1  ;;  %6278 = vst.msk [vmem:[#allocation7 + $0x1] sm:$0x1] %vm6243_vm8, %v6276_v43  ;;  %7695 = vmatprep.subr.bf16.mxu0 %v8233_v1  ;;  %6724 = vmatpush1.bf16.msra.mxu1 %v8235_v54  ;;  %v8238_v25 = vld [vmem:[%s11333_s9 + $0xa0] sm:$0xff]   ;;  %v8237_v43 = vld [vmem:[%s11333_s9 + $0x28] sm:$0xff]  }
 0x78b   : > { %v6235_v40 = vmax.f32 %v6108_v46, %v6219_v2  ;;  %v6110_v41 = vpop.f32.mrb[5].mxu0  ;;  %v6221_v36 = vpop.f32.mrb[5].mxu1  ;;  %v6302_v33 = vrot.slane %v11029_v42, 2  ;;  %v6328_v27 = vrot.slane %v11029_v42, 7  ;;  %v6305_v24 = vrot.slane %v11029_v42, 3  ;;  %7696 = vmatpush3.bf16.msra.mxu0 %v8234_v60  ;;  %6725 = vmatprep.subr.bf16.mxu1 %v11355_v56  ;;  %v8241_v46 = vld [vmem:[%s11333_s9 + $0xa8] sm:$0xff]  }
 0x78c   : > { %v6296_v45 = vrot.slane %v11029_v42, 1  ;;  %v6311_v55 = vrot.slane %v11029_v42, 4  ;;  %v6316_v6 = vrot.slane %v11029_v42, 5  ;;  %v6322_v30 = vrot.slane %v11029_v42, 6  ;;  %7697 = vmatprep.subr.bf16.mxu0 %v8236_v44  ;;  %v8242_v41 = vld [vmem:[%s11333_s9 + $0x78] sm:$0xff]   ;;  %v8249_v60 = vld [vmem:[%s11335_s11 + $0x10] sm:$0xff]  }
 0x78d   : > { %v11036_v35 = vmax.f32 %v6235_v40, 0.0  ;;  %6280 = vrot.lane.b32.xlu0 %v6279_v3, %s8274_s16  ;;  %6291 = vrot.lane.b32.xlu1 %v11029_v42, %s8275_s17  ;;  %6304 = vst.msk [vmem:[#allocation7 + $0x2] sm:$0x1] %vm6243_vm8, %v6302_v33  ;;  %6330 = vst.msk [vmem:[#allocation7 + $0x3] sm:$0x1] %vm6243_vm8, %v6328_v27  ;;  %v8239_v42 = vld [vmem:[%s11333_s9 + $0x70] sm:$0xff]  }
 0x78e   : > { %v6113_v7 = vpop.f32.mrb[6].mxu0  ;;  %v6224_v23 = vpop.f32.mrb[6].mxu1  ;;  %6726 = vmatpush1.bf16.msra.mxu1 %v8238_v25  ;;  %v8240_v40 = vld [vmem:[%s11333_s9 + $0x30] sm:$0xff]   ;;  %v8243_v33 = vld [vmem:[%s11333_s9 + $0x38] sm:$0xff]   ;;  %v8251_v44 = vld [vmem:[%s11335_s11 + $0x20] sm:$0xff]  }
 0x78f   : > { %v6236_v12 = vmax.f32 %v6113_v7, %v6224_v23  ;;  %v6115_v21 = vpop.f32.mrb[7].mxu0  ;;  %v6226_v51 = vpop.f32.mrb[7].mxu1  ;;  %v6354_v37 = vrot.slane %v11036_v35, 4  ;;  %v6337_v4 = vrot.slane %v11036_v35, 1  ;;  %v6342_v47 = vrot.slane %v11036_v35, 2  ;;  %7698 = vmatpush3.bf16.msra.mxu0 %v8237_v43  ;;  %6727 = vmatprep.subr.bf16.mxu1 %v11355_v56  ;;  %v8244_v27 = vld [vmem:[%s11333_s9 + $0xb0] sm:$0xff]  }
 0x790   : > { %v6348_v13 = vrot.slane %v11036_v35, 3  ;;  %v6357_v52 = vrot.slane %v11036_v35, 5  ;;  %v6363_v39 = vrot.slane %v11036_v35, 6  ;;  %v6368_v61 = vrot.slane %v11036_v35, 7  ;;  %7699 = vmatprep.subr.bf16.mxu0 %v8239_v42  ;;  %v8245_v7 = vld [vmem:[%s11333_s9 + $0xb8] sm:$0xff]   ;;  %v8246_v23 = vld [vmem:[%s11333_s9 + $0xc0] sm:$0xff]  }
 0x791   : > { %v11045_v20 = vmax.f32 %v6236_v12, 0.0  ;;  %6255 = vrot.lane.b32.xlu0 %v6254_v22, %s8273_s30  ;;  %6306 = vrot.lane.b32.xlu1 %v6305_v24, %s8274_s16  ;;  %6356 = vst.msk [vmem:[#allocation7 + $0x4] sm:$0x1] %vm6243_vm8, %v6354_v37  ;;  %v8250_v54 = vld [vmem:[%s11335_s11 + $0x18] sm:$0xff]   ;;  %v8252_v25 = vld [vmem:[%s11335_s11 + $0x28] sm:$0xff]  }
 0x792   : > { %v6118_v49 = vpop.f32.mrb[8].mxu0  ;;  %v6229_v53 = vpop.f32.mrb[8].mxu1  ;;  %6728 = vmatpush1.bf16.msra.mxu1 %v8241_v46  ;;  %v8255_v42 = vld [vmem:[%s11337_s13] sm:$0xff]   ;;  %v8256_v46 = vld [vmem:[%s11337_s13 + $0x8] sm:$0xff]  }
 0x793   : > { %v6237_v48 = vmax.f32 %v6118_v49, %v6229_v53  ;;  %v6120_v11 = vpop.f32.mrb[9].mxu0  ;;  %v6231_v31 = vpop.f32.mrb[9].mxu1  ;;  %v6380_v15 = vrot.slane %v11045_v20, 1  ;;  %v6406_v14 = vrot.slane %v11045_v20, 6  ;;  %v6383_v34 = vrot.slane %v11045_v20, 2  ;;  %7700 = vmatpush3.bf16.msra.mxu0 %v8240_v40  ;;  %6729 = vmatprep.subr.bf16.mxu1 %v11355_v56  ;;  %v8258_v40 = vld [vmem:[%s11337_s13 + $0x18] sm:$0xff]  }
 0x794   : > { %v6389_v26 = vrot.slane %v11045_v20, 3  ;;  %v6394_v50 = vrot.slane %v11045_v20, 4  ;;  %v6409_v29 = vrot.slane %v11045_v20, 7  ;;  %7701 = vmatprep.subr.bf16.mxu0 %v8242_v41 }
 0x795   : > { %v11053_v38 = vmax.f32 %v6237_v48, 0.0  ;;  %6261 = vrot.lane.b32.xlu0 %v6260_v16, %s8275_s17  ;;  %6297 = vrot.lane.b32.xlu1 %v6296_v45, %s8276_s29  ;;  %6382 = vst.msk [vmem:[#allocation7 + $0x5] sm:$0x1] %vm6243_vm8, %v6380_v15  ;;  %6408 = vst.msk [vmem:[#allocation7 + $0x6] sm:$0x1] %vm6243_vm8, %v6406_v14 }
 0x796   : > { %6730 = vmatpush1.bf16.msra.mxu1 %v8244_v27 }
 0x797   : > { %v6432_v19 = vrot.slane %v11053_v38, 3  ;;  %v6435_v28 = vrot.slane %v11053_v38, 4  ;;  %v6441_v2 = vrot.slane %v11053_v38, 5  ;;  %v6446_v36 = vrot.slane %v11053_v38, 6  ;;  %7702 = vmatpush3.bf16.msra.mxu0 %v8243_v33  ;;  %6731 = vmatprep.subr.bf16.mxu1 %v11355_v56 }
 0x798   : > { %v6420_v3 = vrot.slane %v11053_v38, 1  ;;  %7725 = vmatprep.subr.bf16.mxu0 %v8272_v63  ;;  %v6452_v12 = vrot.slane %v11053_v38, 7  ;;  %v6426_v21 = vrot.slane %v11053_v38, 2 }
 0x799   : > { %6269 = vrot.lane.b32.xlu0 %v6268_v18, %s8276_s29  ;;  %6332 = vrot.lane.b32.xlu1 %v11036_v35, %s8274_s16  ;;  %6434 = vst.msk [vmem:[#allocation7 + $0x7] sm:$0x1] %vm6243_vm8, %v6432_v19  ;;  %v6400_v35 = vrot.slane %v11045_v20, 5 }
 0x79a   : > { %6732 = vmatpush1.bf16.msra.mxu1 %v8245_v7 }
 0x79b   : > { %6733 = vmatprep.subr.bf16.mxu1 %v11355_v56 }
 0x79d   : > { %6312 = vrot.lane.b32.xlu0 %v6311_v55, %s8273_s30  ;;  %6338 = vrot.lane.b32.xlu1 %v6337_v4, %s8273_s30 }
 0x79e   : > { %6734 = vmatpush1.bf16.msra.mxu1 %v8246_v23 }
 0x79f   : > { %7745 = vmatprep.subr.bf16.mxu1 %v8272_v63 }
 0x7a1   : > { %6317 = vrot.lane.b32.xlu0 %v6316_v6, %s8275_s17  ;;  %6343 = vrot.lane.b32.xlu1 %v6342_v47, %s8275_s17 }
 0x7a5   : > { %6323 = vrot.lane.b32.xlu0 %v6322_v30, %s8276_s29  ;;  %6349 = vrot.lane.b32.xlu1 %v6348_v13, %s8276_s29 }
 0x7a9   : > { %6358 = vrot.lane.b32.xlu0 %v6357_v52, %s8274_s16  ;;  %6384 = vrot.lane.b32.xlu1 %v6383_v34, %s8274_s16 }
 0x7ad   : > { %6364 = vrot.lane.b32.xlu0 %v6363_v39, %s8273_s30  ;;  %6390 = vrot.lane.b32.xlu1 %v6389_v26, %s8273_s30  ;;  %v8247_v39 = vld [vmem:[%s11335_s11] sm:$0xff]  }
 0x7b1   : > { %6369 = vrot.lane.b32.xlu0 %v6368_v61, %s8275_s17  ;;  %6395 = vrot.lane.b32.xlu1 %v6394_v50, %s8275_s17 }
 0x7b5   : > { %6410 = vrot.lane.b32.xlu0 %v6409_v29, %s8274_s16  ;;  %6436 = vrot.lane.b32.xlu1 %v6435_v28, %s8274_s16  ;;  %v8253_v29 = vld [vmem:[%s11335_s11 + $0x30] sm:$0xff]   ;;  %v8254_v28 = vld [vmem:[%s11335_s11 + $0x38] ss:$0 sps:$4 sm:$0xff]  }
 0x7b6   : > { %v6832_v43 = vsel %vm6830_vm1, %v8254_v28, 0 }
 0x7b9   : > { %6416 = vrot.lane.b32.xlu0 %v11053_v38, %s8273_s30  ;;  %6442 = vrot.lane.b32.xlu1 %v6441_v2, %s8273_s30  ;;  %v8257_v2 = vld [vmem:[%s11337_s13 + $0x10] sm:$0xff]  }
 0x7bd   : > { %6447 = vrot.lane.b32.xlu1 %v6446_v36, %s8275_s17  ;;  %6421 = vrot.lane.b32.xlu0 %v6420_v3, %s8275_s17 }
 0x7c1   : > { %6401 = vrot.lane.b32.xlu1 %v6400_v35, %s8276_s29  ;;  %6375 = vrot.lane.b32.xlu0 %v11045_v20, %s8276_s29  ;;  %v7639_v35 = vld [vmem:[%s11334_s10] ss:$0 sm:$0xff] }
 0x7c5   : > { %6453 = vrot.lane.b32.xlu1 %v6452_v12, %s8276_s29  ;;  %6427 = vrot.lane.b32.xlu0 %v6426_v21, %s8276_s29 }
 0x7fb   : > { %v6287_v51 = vpop.permute.xlu1 %6286  ;;  %v6248_v22 = vpop.permute.xlu0 %6247 }
 0x7fc   : > { %6251 = vst.msk [vmem:[#allocation7] sm:$0x1] %vm6250_vm9, %v6248_v22 }
 0x7fd   : > { %6253 = vst.msk [vmem:[#allocation7 + $0x8] sm:$0x1] %vm6252_vm10, %v6248_v22 }
 0x7ff   : > { %v6281_v24 = vpop.permute.xlu0 %6280  ;;  %v6292_v56 = vpop.permute.xlu1 %6291 }
 0x800   : > { %6283 = vst.msk [vmem:[#allocation7 + $0x1] sm:$0x1] %vm6250_vm9, %v6281_v24 }
 0x801   : > { %6284 = vst.msk [vmem:[#allocation7 + $0x9] sm:$0x1] %vm6252_vm10, %v6281_v24 }
 0x802   : > { %6295 = vst.msk [vmem:[#allocation7 + $0x11] sm:$0x1] %vm6266_vm11, %v6292_v56 }
 0x803   : > { %6289 = vst.msk [vmem:[#allocation7 + $0x9] sm:$0x1] %vm6258_vm12, %v6287_v51  ;;  %v6256_v37 = vpop.permute.xlu0 %6255  ;;  %v6307_v20 = vpop.permute.xlu1 %6306 }
 0x804   : > { %6294 = vst.msk [vmem:[#allocation7 + $0x9] sm:$0x1] %vm6264_vm13, %v6292_v56 }
 0x805   : > { %6259 = vst.msk [vmem:[#allocation7 + $0x8] sm:$0x1] %vm6258_vm12, %v6256_v37  ;;  %v8259_v37 = vld [vmem:[%s11337_s13 + $0x20] sm:$0xff]  }
 0x806   : > { %6309 = vst.msk [vmem:[#allocation7 + $0x2] sm:$0x1] %vm6250_vm9, %v6307_v20 }
 0x807   : > { %6310 = vst.msk [vmem:[#allocation7 + $0xa] sm:$0x1] %vm6252_vm10, %v6307_v20  ;;  %v6262_v49 = vpop.permute.xlu0 %6261  ;;  %v6298_v53 = vpop.permute.xlu1 %6297  ;;  %v8260_v20 = vld [vmem:[%s11337_s13 + $0x28] ss:$0 sps:$4 sm:$0x33]  }
 0x808   : > { %6265 = vst.msk [vmem:[#allocation7 + $0x8] sm:$0x1] %vm6264_vm13, %v6262_v49 }
 0x809   : > { %6267 = vst.msk [vmem:[#allocation7 + $0x10] sm:$0x1] %vm6266_vm11, %v6262_v49  ;;  %v6931_v49 = vsel %vm4493_vm3, %v8260_v20, 0  ;;  %vm6973_vm3 = vcmask 31744  }
 0x80a   : > { %6300 = vst.msk [vmem:[#allocation7 + $0x11] sm:$0x1] %vm6272_vm14, %v6298_v53 }
 0x80b   : > { %6301 = vst.msk [vmem:[#allocation7 + $0x19] sm:$0x1] %vm6274_vm15, %v6298_v53  ;;  %v6270_v48 = vpop.permute.xlu0 %6269  ;;  %v6333_v11 = vpop.permute.xlu1 %6332  ;;  %v7666_v53 = vld [vmem:[%s11336_s12] ss:$0 sm:$0xff] }
 0x80c   : > { %6273 = vst.msk [vmem:[#allocation7 + $0x10] sm:$0x1] %vm6272_vm14, %v6270_v48 }
 0x80d   : > { %6275 = vst.msk [vmem:[#allocation7 + $0x18] sm:$0x1] %vm6274_vm15, %v6270_v48 }
 0x80e   : > { %6335 = vst.msk [vmem:[#allocation7 + $0x3] sm:$0x1] %vm6250_vm9, %v6333_v11 }
 0x80f   : > { %6336 = vst.msk [vmem:[#allocation7 + $0xb] sm:$0x1] %vm6252_vm10, %v6333_v11  ;;  %v6313_v31 = vpop.permute.xlu0 %6312  ;;  %v6339_v16 = vpop.permute.xlu1 %6338 }
 0x810   : > { %6315 = vst.msk [vmem:[#allocation7 + $0xa] sm:$0x1] %vm6258_vm12, %v6313_v31  ;;  %6341 = vst.msk [vmem:[#allocation7 + $0xb] sm:$0x1] %vm6258_vm12, %v6339_v16 }
 0x813   : > { %v6318_v45 = vpop.permute.xlu0 %6317  ;;  %v6344_v15 = vpop.permute.xlu1 %6343 }
 0x814   : > { %6320 = vst.msk [vmem:[#allocation7 + $0xa] sm:$0x1] %vm6264_vm13, %v6318_v45  ;;  %6346 = vst.msk [vmem:[#allocation7 + $0xb] sm:$0x1] %vm6264_vm13, %v6344_v15 }
 0x815   : > { %6321 = vst.msk [vmem:[#allocation7 + $0x12] sm:$0x1] %vm6266_vm11, %v6318_v45  ;;  %6347 = vst.msk [vmem:[#allocation7 + $0x13] sm:$0x1] %vm6266_vm11, %v6344_v15 }
 0x817   : > { %v6324_v14 = vpop.permute.xlu0 %6323  ;;  %v6350_v38 = vpop.permute.xlu1 %6349 }
 0x818   : > { %6326 = vst.msk [vmem:[#allocation7 + $0x12] sm:$0x1] %vm6272_vm14, %v6324_v14  ;;  %6352 = vst.msk [vmem:[#allocation7 + $0x13] sm:$0x1] %vm6272_vm14, %v6350_v38 }
 0x819   : > { %6327 = vst.msk [vmem:[#allocation7 + $0x1a] sm:$0x1] %vm6274_vm15, %v6324_v14  ;;  %6353 = vst.msk [vmem:[#allocation7 + $0x1b] sm:$0x1] %vm6274_vm15, %v6350_v38 }
 0x81b   : > { %v6359_v18 = vpop.permute.xlu0 %6358  ;;  %v6385_v59 = vpop.permute.xlu1 %6384 }
 0x81c   : > { %6361 = vst.msk [vmem:[#allocation7 + $0x4] sm:$0x1] %vm6250_vm9, %v6359_v18  ;;  %6387 = vst.msk [vmem:[#allocation7 + $0x5] sm:$0x1] %vm6250_vm9, %v6385_v59 }
 0x81d   : > { %6362 = vst.msk [vmem:[#allocation7 + $0xc] sm:$0x1] %vm6252_vm10, %v6359_v18  ;;  %6388 = vst.msk [vmem:[#allocation7 + $0xd] sm:$0x1] %vm6252_vm10, %v6385_v59 }
 0x81f   : > { %v6365_v19 = vpop.permute.xlu0 %6364  ;;  %v6391_v55 = vpop.permute.xlu1 %6390 }
 0x820   : > { %6367 = vst.msk [vmem:[#allocation7 + $0xc] sm:$0x1] %vm6258_vm12, %v6365_v19  ;;  %6393 = vst.msk [vmem:[#allocation7 + $0xd] sm:$0x1] %vm6258_vm12, %v6391_v55 }
 0x823   : > { %v6370_v4 = vpop.permute.xlu0 %6369  ;;  %v6396_v8 = vpop.permute.xlu1 %6395 }
 0x824   : > { %6372 = vst.msk [vmem:[#allocation7 + $0xc] sm:$0x1] %vm6264_vm13, %v6370_v4  ;;  %6398 = vst.msk [vmem:[#allocation7 + $0xd] sm:$0x1] %vm6264_vm13, %v6396_v8 }
 0x825   : > { %6373 = vst.msk [vmem:[#allocation7 + $0x14] sm:$0x1] %vm6266_vm11, %v6370_v4  ;;  %6399 = vst.msk [vmem:[#allocation7 + $0x15] sm:$0x1] %vm6266_vm11, %v6396_v8 }
 0x827   : > { %v6411_v0 = vpop.permute.xlu0 %6410  ;;  %v6437_v6 = vpop.permute.xlu1 %6436 }
 0x828   : > { %6413 = vst.msk [vmem:[#allocation7 + $0x6] sm:$0x1] %vm6250_vm9, %v6411_v0  ;;  %6439 = vst.msk [vmem:[#allocation7 + $0x7] sm:$0x1] %vm6250_vm9, %v6437_v6 }
 0x829   : > { %6414 = vst.msk [vmem:[#allocation7 + $0xe] sm:$0x1] %vm6252_vm10, %v6411_v0  ;;  %6440 = vst.msk [vmem:[#allocation7 + $0xf] sm:$0x1] %vm6252_vm10, %v6437_v6 }
 0x82b   : > { %v6417_v47 = vpop.permute.xlu0 %6416  ;;  %v6443_v17 = vpop.permute.xlu1 %6442 }
 0x82c   : > { %6419 = vst.msk [vmem:[#allocation7 + $0xe] sm:$0x1] %vm6258_vm12, %v6417_v47  ;;  %6445 = vst.msk [vmem:[#allocation7 + $0xf] sm:$0x1] %vm6258_vm12, %v6443_v17 }
 0x82f   : > { %v6448_v5 = vpop.permute.xlu1 %6447  ;;  %v6422_v10 = vpop.permute.xlu0 %6421  ;;  %v6458_v58 = vld [vmem:[#allocation7] sm:$0xff] }
 0x830   : > { %6450 = vst.msk [vmem:[#allocation7 + $0xf] sm:$0x1] %vm6264_vm13, %v6448_v5  ;;  %6424 = vst.msk [vmem:[#allocation7 + $0xe] sm:$0x1] %vm6264_vm13, %v6422_v10  ;;  %v6462_v26 = vpack.c.bf16 %v6458_v58, %v6458_v58 }
 0x831   : > { %6451 = vst.msk [vmem:[#allocation7 + $0x17] sm:$0x1] %vm6266_vm11, %v6448_v5  ;;  %6425 = vst.msk [vmem:[#allocation7 + $0x16] sm:$0x1] %vm6266_vm11, %v6422_v10 }
 0x833   : > { %v6402_v30 = vpop.permute.xlu1 %6401  ;;  %v6376_v13 = vpop.permute.xlu0 %6375 }
 0x834   : > { %6404 = vst.msk [vmem:[#allocation7 + $0x15] sm:$0x1] %vm6272_vm14, %v6402_v30  ;;  %6378 = vst.msk [vmem:[#allocation7 + $0x14] sm:$0x1] %vm6272_vm14, %v6376_v13 }
 0x835   : > { %6405 = vst.msk [vmem:[#allocation7 + $0x1d] sm:$0x1] %vm6274_vm15, %v6402_v30  ;;  %6379 = vst.msk [vmem:[#allocation7 + $0x1c] sm:$0x1] %vm6274_vm15, %v6376_v13 }
 0x837   : > { %v6454_v62 = vpop.permute.xlu1 %6453  ;;  %v6428_v9 = vpop.permute.xlu0 %6427  ;;  %v6459_v52 = vld [vmem:[#allocation7 + $0x8] sm:$0xff] }
 0x838   : > { %6456 = vst.msk [vmem:[#allocation7 + $0x17] sm:$0x1] %vm6272_vm14, %v6454_v62  ;;  %6430 = vst.msk [vmem:[#allocation7 + $0x16] sm:$0x1] %vm6272_vm14, %v6428_v9  ;;  %v6463_v34 = vpack.c.bf16 %v6459_v52, %v6459_v52 }
 0x839   : > { %6457 = vst.msk [vmem:[#allocation7 + $0x1f] sm:$0x1] %vm6274_vm15, %v6454_v62  ;;  %6431 = vst.msk [vmem:[#allocation7 + $0x1e] sm:$0x1] %vm6274_vm15, %v6428_v9 }
 0x83a   : > { %6709 = vmatprep.mubr.bf16.mxu0 %v6463_v34 }
 0x83b   : > { %6710 = vmatmul.mubr.bf16.vlgmr.msra.gmra.mrb[12].mxu0 %v6462_v26 }
 0x83c   : > { %7726 = vmatpush3.bf16.msra.mxu0 %v8247_v39  ;;  %7741 = vmatprep.mubr.msk.bf16.mxu0 %vm8277_vm2, %v8272_v63 }
 0x83d   : > { %7727 = vmatprep.subr.bf16.mxu0 %v8272_v63 }
 0x83f   : > { %v6460_v32 = vld [vmem:[#allocation7 + $0x10] sm:$0xff] }
 0x840   : > { %v6461_v61 = vld [vmem:[#allocation7 + $0x18] sm:$0xff]  ;;  %v6464_v50 = vpack.c.bf16 %v6460_v32, %v6460_v32  ;;  %7728 = vmatpush3.bf16.msra.mxu0 %v8248_v57 }
 0x841   : > { %v6465_v1 = vpack.c.bf16 %v6461_v61, %v6461_v61  ;;  %7729 = vmatprep.subr.bf16.mxu0 %v8272_v63 }
 0x843   : > { %7665 = vmatprep.mubr.msk.bf16.mxu1 %vm6673_vm0, %v6465_v1 }
 0x844   : > { %6750 = vmatmul.mubr.bf16.vlgmr.msra.gmra.mrb[12].mxu1 %v6464_v50  ;;  %7730 = vmatpush3.bf16.msra.mxu0 %v8249_v60 }
 0x845   : > { %7731 = vmatprep.subr.bf16.mxu0 %v8272_v63  ;;  %7757 = vmatprep.mubr.msk.bf16.mxu1 %vm8277_vm2, %v8272_v63 }
 0x846   : > { %7746 = vmatpush3.bf16.msra.mxu1 %v8255_v42 }
 0x847   : > { %7747 = vmatprep.subr.bf16.mxu1 %v8272_v63 }
 0x848   : > { %7732 = vmatpush3.bf16.msra.mxu0 %v8250_v54 }
 0x849   : > { %7733 = vmatprep.subr.bf16.mxu0 %v8272_v63 }
 0x84a   : > { %7748 = vmatpush3.bf16.msra.mxu1 %v8256_v46 }
 0x84b   : > { %7749 = vmatprep.subr.bf16.mxu1 %v8272_v63 }
 0x84c   : > { %7734 = vmatpush3.bf16.msra.mxu0 %v8251_v44 }
 0x84d   : > { %7735 = vmatprep.subr.bf16.mxu0 %v8272_v63 }
 0x84e   : > { %7750 = vmatpush3.bf16.msra.mxu1 %v8257_v2 }
 0x84f   : > { %7751 = vmatprep.subr.bf16.mxu1 %v8272_v63 }
 0x850   : > { %7736 = vmatpush3.bf16.msra.mxu0 %v8252_v25 }
 0x851   : > { %7737 = vmatprep.subr.bf16.mxu0 %v8272_v63 }
 0x852   : > { %7752 = vmatpush3.bf16.msra.mxu1 %v8258_v40 }
 0x853   : > { %7753 = vmatprep.subr.bf16.mxu1 %v8272_v63 }
 0x854   : > { %7738 = vmatpush3.bf16.msra.mxu0 %v8253_v29 }
 0x855   : > { %7739 = vmatprep.subr.bf16.mxu0 %v8272_v63 }
 0x856   : > { %7754 = vmatpush3.bf16.msra.mxu1 %v8259_v37 }
 0x857   : > { %7755 = vmatprep.subr.bf16.mxu1 %v8272_v63  ;;  %v7676_v63 = vld [vmem:[%s11338_s14] ss:$0 sm:$0xff] }
 0x858   : > { %7740 = vmatpush3.bf16.msra.mxu0 %v6832_v43 }
 0x85a   : > { %7756 = vmatpush3.bf16.msra.mxu1 %v6931_v49 }
 0x90e   : > { %v7703_v41 = vpop.f32.mrb[12].mxu0 }
 0x90f   : > { %v7704_v36 = vpop.f32.mrb[13].mxu0 }
 0x910   : > { %v7705_v3 = vadd.f32 %v7704_v36, %v7703_v41  ;;  %v7706_v33 = vpop.f32.mrb[14].mxu0 }
 0x911   : > { %v7707_v27 = vpop.f32.mrb[15].mxu0 }
 0x912   : > { %v6712_v7 = vadd.f32 %v7705_v3, %v7639_v35 }
 0x917   : > { %v6751_v23 = vpop.f32.mrb[12].mxu1 }
 0x918   : > { %v6752_v12 = vadd.f32 %v6751_v23, %v6712_v7  ;;  %v6753_v21 = vpop.f32.mrb[13].mxu1 }
 0x919   : > { %v6754_v51 = vpop.f32.mrb[14].mxu1 }
 0x91a   : > { %v6757_v22 = vmax.f32 %v6752_v12, 0.0  ;;  %v6755_v24 = vpop.f32.mrb[15].mxu1 }
 0x91c   : > { %v6758_v56 = vpack.c.bf16 %v6757_v22, %v6757_v22 }
 0x91e   : > { %7742 = vmatmul.mubr.msk.bf16.vlgmr.msra.gmra.mrb[16].mxu0 %vm6826_vm5, %v6758_v56 }
 0x9f1   : > { %v6868_v48 = vpop.f32.mrb[16].mxu0 }
 0x9f2   : > { %v6869_v11 = vadd.f32 %v7666_v53, %v6868_v48  ;;  %v7743_v31 = vpop.f32.mrb[17].mxu0 }
 0x9f3   : > { %v6871_v16 = vpop.f32.mrb[18].mxu0 }
 0x9f4   : > { %v6874_v45 = vmax.f32 %v6869_v11, 0.0  ;;  %v7744_v15 = vpop.f32.mrb[19].mxu0 }
 0x9f6   : > { %v6875_v14 = vpack.c.bf16 %v6874_v45, %v6874_v45 }
 0x9f8   : > { %7758 = vmatmul.mubr.msk.bf16.vlgmr.msra.gmra.mrb[16].mxu1 %vm4294_vm4, %v6875_v14 }
 0xacb   : > { %v6967_v38 = vpop.f32.mrb[16].mxu1 }
 0xacc   : > { %v6968_v18 = vadd.f32 %v7676_v63, %v6967_v38  ;;  %v7759_v59 = vpop.f32.mrb[17].mxu1 }
 0xacd   : > { %v6970_v19 = vpop.f32.mrb[18].mxu1 }
 0xace   : > { %6974 = vst.msk [vmem:[%s497_s21] sm:$0xff] %vm6973_vm3, %v6968_v18  ;;  %v7760_v55 = vpop.f32.mrb[19].mxu1 }
 0xacf PF: > { %s25_s18 = sadd.s32 1, %s8268_s18  }
 0xad0   : > { %p22_p5 = scmp.ge.s32.totalorder %s25_s18, 4  }
 0xad2   :  { %24 = sbr.rel (!%p22_p5) target bundleno = 1 (0x1), region = 129 }

</bundles_post_ra>
